<compile_context>
chip_gen: v6e
topology: v6e:2x2x1
jax: 0.10.0
libtpu: 0.0.40
codegen_flags: <defaults>
</compile_context>

<pallas_src>
import jax
import jax.numpy as jnp
from jax.experimental import pallas as pl
from jax.experimental.pallas import tpu as pltpu

# ----------------------------- ViT-small config ------------------------------
PATCH_SIZE = 8
EMBED_DIM = 384          # n_feats for 'vit_small'
NUM_HEADS = 6
HEAD_DIM = EMBED_DIM // NUM_HEADS
MLP_RATIO = 4
HIDDEN_DIM = MLP_RATIO * EMBED_DIM
DEPTH = 12
LN_EPS = 1e-6
ATTN_SCALE = HEAD_DIM ** -0.5

VMEM_LIMIT_BYTES = 32 * 1024 * 1024


def _compiler_params():
    return pltpu.CompilerParams(dimension_semantics=("parallel",),
                                vmem_limit_bytes=VMEM_LIMIT_BYTES)


def _gelu_tanh(y):
    # TODO(synk): nn.GELU (exact erf) approximated with the tanh formulation
    # (safe Mosaic lowering; ~1e-3 abs difference).
    c = jnp.float32(0.7978845608028654)  # sqrt(2/pi)
    return 0.5 * y * (1.0 + jnp.tanh(c * (y + 0.044715 * y * y * y)))


def _layernorm_f32(x, g, b):
    mu = jnp.mean(x, axis=-1, keepdims=True)
    xc = x - mu
    var = jnp.mean(xc * xc, axis=-1, keepdims=True)
    return xc * jax.lax.rsqrt(var + LN_EPS) * g + b


# -----------------------------------------------------------------------------
# Fused [LayerNorm] -> matmul(bf16, f32 acc) -> bias -> [GELU]
# -----------------------------------------------------------------------------
def _fused_linear_kernel(has_ln, gelu):
    def kernel(*refs):
        i = 0
        x_ref = refs[i]; i += 1
        if has_ln:
            g_ref, be_ref = refs[i], refs[i + 1]; i += 2
        w_ref, b_ref = refs[i], refs[i + 1]; i += 2
        o_ref = refs[i]

        x = x_ref[...].astype(jnp.float32)
        if has_ln:
            x = _layernorm_f32(x, g_ref[...], be_ref[...])
        y = jnp.dot(x.astype(jnp.bfloat16), w_ref[...],
                    preferred_element_type=jnp.float32)
        y = y + b_ref[...]
        if gelu:
            y = _gelu_tanh(y)
        o_ref[...] = y.astype(o_ref.dtype)

    return kernel


def fused_linear(x, w, b, *, ln=None, gelu=False, out_dtype=jnp.bfloat16,
                 row_block=512):
    """x: (M, K); w: (K, N) bf16; b: (N,). Returns (M, N) out_dtype."""
    m, k = x.shape
    k2, n = w.shape
    assert k == k2
    tb = min(row_block, m)
    grid = (pl.cdiv(m, tb),)

    args = [x]
    in_specs = [pl.BlockSpec((tb, k), lambda i: (i, 0))]
    if ln is not None:
        g, be = ln
        args += [g.reshape(1, k).astype(jnp.float32),
                 be.reshape(1, k).astype(jnp.float32)]
        in_specs += [pl.BlockSpec((1, k), lambda i: (0, 0)),
                     pl.BlockSpec((1, k), lambda i: (0, 0))]
    args += [w.astype(jnp.bfloat16), b.reshape(1, n).astype(jnp.float32)]
    in_specs += [pl.BlockSpec((k, n), lambda i: (0, 0)),
                 pl.BlockSpec((1, n), lambda i: (0, 0))]

    bytes_accessed = (sum(int(a.size) * a.dtype.itemsize for a in args)
                      + m * n * jnp.dtype(out_dtype).itemsize)
    cost = pl.CostEstimate(flops=2 * m * k * n,
                           transcendentals=(m * n) if gelu else 0,
                           bytes_accessed=int(bytes_accessed))

    return pl.pallas_call(
        _fused_linear_kernel(ln is not None, gelu),
        out_shape=jax.ShapeDtypeStruct((m, n), out_dtype),
        grid=grid,
        in_specs=in_specs,
        out_specs=pl.BlockSpec((tb, n), lambda i: (i, 0)),
        compiler_params=_compiler_params(),
        cost_estimate=cost,
    )(*args)


# -----------------------------------------------------------------------------
# Fused MLP block: LN2 -> fc1 -> GELU -> fc2 -> +residual
# (the (tb, 1536) hidden activation never round-trips HBM)
# -----------------------------------------------------------------------------
def _mlp_kernel(x_ref, g_ref, be_ref, w1_ref, b1_ref, w2_ref, b2_ref, o_ref):
    x = x_ref[...].astype(jnp.float32)
    xn = _layernorm_f32(x, g_ref[...], be_ref[...])
    h = jnp.dot(xn.astype(jnp.bfloat16), w1_ref[...],
                preferred_element_type=jnp.float32)
    h = _gelu_tanh(h + b1_ref[...])
    y = jnp.dot(h.astype(jnp.bfloat16), w2_ref[...],
                preferred_element_type=jnp.float32)
    y = y + b2_ref[...] + x
    o_ref[...] = y.astype(o_ref.dtype)


def fused_mlp_block(x, g, be, w1, b1, w2, b2, *, row_block=512):
    m, d = x.shape
    hidden = w1.shape[1]
    tb = min(row_block, m)
    grid = (pl.cdiv(m, tb),)

    args = [x,
            g.reshape(1, d).astype(jnp.float32),
            be.reshape(1, d).astype(jnp.float32),
            w1.astype(jnp.bfloat16), b1.reshape(1, hidden).astype(jnp.float32),
            w2.astype(jnp.bfloat16), b2.reshape(1, d).astype(jnp.float32)]
    in_specs = [pl.BlockSpec((tb, d), lambda i: (i, 0)),
                pl.BlockSpec((1, d), lambda i: (0, 0)),
                pl.BlockSpec((1, d), lambda i: (0, 0)),
                pl.BlockSpec((d, hidden), lambda i: (0, 0)),
                pl.BlockSpec((1, hidden), lambda i: (0, 0)),
                pl.BlockSpec((hidden, d), lambda i: (0, 0)),
                pl.BlockSpec((1, d), lambda i: (0, 0))]

    bytes_accessed = (sum(int(a.size) * a.dtype.itemsize for a in args)
                      + m * d * x.dtype.itemsize)
    cost = pl.CostEstimate(flops=4 * m * d * hidden,
                           transcendentals=m * hidden,
                           bytes_accessed=int(bytes_accessed))

    return pl.pallas_call(
        _mlp_kernel,
        out_shape=jax.ShapeDtypeStruct((m, d), x.dtype),
        grid=grid,
        in_specs=in_specs,
        out_specs=pl.BlockSpec((tb, d), lambda i: (i, 0)),
        compiler_params=_compiler_params(),
        cost_estimate=cost,
    )(*args)


# -----------------------------------------------------------------------------
# Fused attention + output projection + residual, per image.
# Consumes the (B,T,3D) qkv slab directly (heads sliced along lanes), emits a
# lane-dense (B,T,384) output and only the CLS query attention row (B,H,T).
# -----------------------------------------------------------------------------
def _attn_proj_kernel(qkv_ref, wp_ref, bp_ref, xr_ref, o_ref, cls_ref):
    ctx_heads = []
    cls_rows = []
    for h in range(NUM_HEADS):          # static unroll over 6 heads
        q = qkv_ref[0, :, h * HEAD_DIM:(h + 1) * HEAD_DIM]                  # (T,hd) bf16
        k = qkv_ref[0, :, EMBED_DIM + h * HEAD_DIM:
                    EMBED_DIM + (h + 1) * HEAD_DIM]
        v = qkv_ref[0, :, 2 * EMBED_DIM + h * HEAD_DIM:
                    2 * EMBED_DIM + (h + 1) * HEAD_DIM]
        s = jax.lax.dot_general(q, k, (((1,), (1,)), ((), ())),
                                preferred_element_type=jnp.float32) * ATTN_SCALE
        s_max = jnp.max(s, axis=-1, keepdims=True)
        p = jnp.exp(s - s_max)
        attn = p * pl.reciprocal(jnp.sum(p, axis=-1, keepdims=True), approx=True)
        cls_rows.append(attn[0:1, :])                                       # (1,T)
        ctx_heads.append(jnp.dot(attn.astype(jnp.bfloat16), v,
                                 preferred_element_type=jnp.float32))       # (T,hd)
    ctx = jnp.concatenate(ctx_heads, axis=-1)                               # (T,D) f32
    y = jnp.dot(ctx.astype(jnp.bfloat16), wp_ref[...],
                preferred_element_type=jnp.float32)
    y = y + bp_ref[...] + xr_ref[0].astype(jnp.float32)
    o_ref[0] = y.astype(o_ref.dtype)
    cls_ref[0] = jnp.concatenate(cls_rows, axis=0).astype(cls_ref.dtype)    # (H,T)


def attention_proj(qkv, w_proj, b_proj, x_res):
    """qkv: (B,T,3D) bf16; x_res: (B,T,D) bf16 residual.
    Returns (B,T,D) bf16 residual output and (B,H,T) f32 CLS attention row."""
    b, t, _ = qkv.shape
    d = EMBED_DIM
    in_specs = [pl.BlockSpec((1, t, 3 * d), lambda i: (i, 0, 0)),
                pl.BlockSpec((d, d), lambda i: (0, 0)),
                pl.BlockSpec((1, d), lambda i: (0, 0)),
                pl.BlockSpec((1, t, d), lambda i: (i, 0, 0))]
    out_specs = (pl.BlockSpec((1, t, d), lambda i: (i, 0, 0)),
                 pl.BlockSpec((1, NUM_HEADS, t), lambda i: (i, 0, 0)))

    flops = b * (4 * t * t * d + 2 * t * d * d)
    in_bytes = (int(qkv.size) * qkv.dtype.itemsize + d * d * 2 + d * 4
                + int(x_res.size) * x_res.dtype.itemsize)
    out_bytes = b * t * d * 2 + b * NUM_HEADS * t * 4
    cost = pl.CostEstimate(flops=int(flops),
                           transcendentals=b * NUM_HEADS * t * t,
                           bytes_accessed=int(in_bytes + out_bytes))

    ctx, cls_attn = pl.pallas_call(
        _attn_proj_kernel,
        out_shape=(jax.ShapeDtypeStruct((b, t, d), x_res.dtype),
                   jax.ShapeDtypeStruct((b, NUM_HEADS, t), jnp.float32)),
        grid=(b,),
        in_specs=in_specs,
        out_specs=out_specs,
        compiler_params=_compiler_params(),
        cost_estimate=cost,
    )(qkv, w_proj.astype(jnp.bfloat16),
      b_proj.reshape(1, d).astype(jnp.float32), x_res)
    return ctx, cls_attn


# -----------------------------------------------------------------------------
# Standalone LayerNorm (final self.norm before taking the patch tokens)
# -----------------------------------------------------------------------------
def _ln_kernel(x_ref, g_ref, b_ref, o_ref):
    x = x_ref[...].astype(jnp.float32)
    o_ref[...] = _layernorm_f32(x, g_ref[...], b_ref[...]).astype(o_ref.dtype)


def layernorm(x, g, b, *, row_block=512, out_dtype=jnp.float32):
    m, d = x.shape
    tb = min(row_block, m)
    return pl.pallas_call(
        _ln_kernel,
        out_shape=jax.ShapeDtypeStruct((m, d), out_dtype),
        grid=(pl.cdiv(m, tb),),
        in_specs=[pl.BlockSpec((tb, d), lambda i: (i, 0)),
                  pl.BlockSpec((1, d), lambda i: (0, 0)),
                  pl.BlockSpec((1, d), lambda i: (0, 0))],
        out_specs=pl.BlockSpec((tb, d), lambda i: (i, 0)),
        compiler_params=_compiler_params(),
    )(x, g.reshape(1, d).astype(jnp.float32), b.reshape(1, d).astype(jnp.float32))


# -----------------------------------------------------------------------------
# Parameters (DINO-style init: trunc-normal 0.02 weights, zero biases, LN 1/0)
# -----------------------------------------------------------------------------
def init_params(key, num_patches):
    d = EMBED_DIM
    keys = jax.random.split(key, 8)

    def w(k, shape):
        return (0.02 * jax.random.normal(k, shape, dtype=jnp.float32)
                ).astype(jnp.bfloat16)

    params = {
        "patch_w": w(keys[0], (3 * PATCH_SIZE * PATCH_SIZE, d)),
        "patch_b": jnp.zeros((d,), jnp.float32),
        "cls_token": 0.02 * jax.random.normal(keys[1], (1, 1, d), dtype=jnp.float32),
        "pos_embed": 0.02 * jax.random.normal(keys[2], (1, num_patches + 1, d),
                                              dtype=jnp.float32),
        "norm_g": jnp.ones((d,), jnp.float32),
        "norm_b": jnp.zeros((d,), jnp.float32),
        # stacked per-block params (leading dim = DEPTH) for lax.scan
        "blocks": {
            "ln1_g": jnp.ones((DEPTH, d), jnp.float32),
            "ln1_b": jnp.zeros((DEPTH, d), jnp.float32),
            "w_qkv": w(keys[3], (DEPTH, d, 3 * d)),
            "b_qkv": jnp.zeros((DEPTH, 3 * d), jnp.float32),
            "w_proj": w(keys[4], (DEPTH, d, d)),
            "b_proj": jnp.zeros((DEPTH, d), jnp.float32),
            "ln2_g": jnp.ones((DEPTH, d), jnp.float32),
            "ln2_b": jnp.zeros((DEPTH, d), jnp.float32),
            "w_fc1": w(keys[5], (DEPTH, d, HIDDEN_DIM)),
            "b_fc1": jnp.zeros((DEPTH, HIDDEN_DIM), jnp.float32),
            "w_fc2": w(keys[6], (DEPTH, HIDDEN_DIM, d)),
            "b_fc2": jnp.zeros((DEPTH, d), jnp.float32),
        },
    }
    return params


# -----------------------------------------------------------------------------
# DinoFeaturizer.forward (feat_type='atten_feat'), inference semantics
# -----------------------------------------------------------------------------
@jax.jit
def dino_featurizer_forward(img, params):
    b, c, hh, ww = img.shape
    p = PATCH_SIZE
    assert hh % p == 0 and ww % p == 0
    fh, fw = hh // p, ww // p
    n = fh * fw
    d = EMBED_DIM
    t = n + 1

    # --- patch embed: Conv2d(3, 384, k=p, s=p) as one long-K matmul -----------
    # TODO(synk): real DINO checkpoint would need conv weight (384,3,8,8)
    # reshaped/transposed to match this (c, ph, pw) flatten order, plus
    # pos-embed interpolation for non-224 inputs.
    patches = img.astype(jnp.float32).reshape(b, c, fh, p, fw, p)
    patches = patches.transpose(0, 2, 4, 1, 3, 5).reshape(b * n, c * p * p)
    x = fused_linear(patches, params["patch_w"], params["patch_b"],
                     out_dtype=jnp.float32)                             # (B*N, D)
    x = x.reshape(b, n, d)

    # --- prepend CLS token, add positional embedding (tiny glue) --------------
    cls = jnp.broadcast_to(params["cls_token"].astype(jnp.float32), (b, 1, d))
    x = jnp.concatenate([cls, x], axis=1) + params["pos_embed"].astype(jnp.float32)
    x = x.astype(jnp.bfloat16).reshape(b * t, d)     # bf16 residual stream

    # --- 12 pre-norm transformer blocks (compiled once via scan) --------------
    def block_step(x2, blk):
        qkv = fused_linear(x2, blk["w_qkv"], blk["b_qkv"],
                           ln=(blk["ln1_g"], blk["ln1_b"]))             # (B*T,3D) bf16
        x3, cls_attn = attention_proj(qkv.reshape(b, t, 3 * d),
                                      blk["w_proj"], blk["b_proj"],
                                      x2.reshape(b, t, d))
        x3 = x3.reshape(b * t, d)
        x4 = fused_mlp_block(x3, blk["ln2_g"], blk["ln2_b"],
                             blk["w_fc1"], blk["b_fc1"],
                             blk["w_fc2"], blk["b_fc2"])
        return x4, cls_attn                                             # cls: (B,H,T)

    x, cls_attns = jax.lax.scan(block_step, x, params["blocks"])
    cls_last = cls_attns[-1]                                            # (B,H,T)

    # --- final norm, then the two 'atten_feat' outputs -------------------------
    feat = layernorm(x, params["norm_g"], params["norm_b"]).reshape(b, t, d)
    image_feat = feat[:, 1:, :].reshape(b, fh, fw, d).transpose(0, 3, 1, 2)
    attentions = cls_last[:, :, 1:].reshape(b, NUM_HEADS, n)
    return image_feat, attentions


if __name__ == "__main__":
    key = jax.random.PRNGKey(0)
    pkey, dkey = jax.random.split(key)
    B, C, H, W = 2, 3, 32, 32                 # small, divisible by patch_size=8
    n_patches = (H // PATCH_SIZE) * (W // PATCH_SIZE)
    params = init_params(pkey, n_patches)
    img = jax.random.normal(dkey, (B, C, H, W), dtype=jnp.float32)

    image_feat, attentions = dino_featurizer_forward(img, params)
    image_feat = jax.block_until_ready(image_feat)
    attentions = jax.block_until_ready(attentions)

    assert image_feat.shape == (B, EMBED_DIM, H // PATCH_SIZE, W // PATCH_SIZE), image_feat.shape
    assert attentions.shape == (B, NUM_HEADS, n_patches), attentions.shape
    assert bool(jnp.all(jnp.isfinite(image_feat)))
    assert bool(jnp.all(jnp.isfinite(attentions)))
    print("KERNEL_OK")
</pallas_src>

<mosaic_0001>
module attributes {stable_mosaic.version = 11 : i64} {
  func.func @kernel(%arg0: i32, %arg1: memref<32x192xf32, #tpu.memory_space<vmem>>, %arg2: memref<192x384xbf16, #tpu.memory_space<vmem>>, %arg3: memref<1x384xf32, #tpu.memory_space<vmem>>, %arg4: memref<32x384xf32, #tpu.memory_space<vmem>>) attributes {dimension_semantics = [#tpu.dimension_semantics<parallel>], iteration_bounds = array<i64: 1>, scalar_prefetch = 0 : i64, scratch_operands = 0 : i64, tpu.core_type = #tpu.core_type<tc>, window_params = [{transform_indices = @transform_0, window_bounds = array<i64: 32, 192>}, {pipeline_mode = #tpu.pipeline_mode<synchronous>, transform_indices = @transform_1, window_bounds = array<i64: 192, 384>}, {pipeline_mode = #tpu.pipeline_mode<synchronous>, transform_indices = @transform_2, window_bounds = array<i64: 1, 384>}, {transform_indices = @transform_3, window_bounds = array<i64: 32, 384>}]} {
    %c0 = arith.constant 0 : index
    %c0_0 = arith.constant 0 : index
    %0 = vector.load %arg1[%c0, %c0_0] : memref<32x192xf32, #tpu.memory_space<vmem>>, vector<32x192xf32>
    %1 = arith.truncf %0 : vector<32x192xf32> to vector<32x192xbf16>
    %c0_1 = arith.constant 0 : index
    %c0_2 = arith.constant 0 : index
    %2 = vector.load %arg2[%c0_1, %c0_2] : memref<192x384xbf16, #tpu.memory_space<vmem>>, vector<192x384xbf16>
    %cst = arith.constant dense<0.000000e+00> : vector<32x384xf32>
    %3 = tpu.matmul %1, %2, %cst {dimension_numbers = #tpu.dot_dimension_numbers<[1], [0], [0], [1], [0, 0, 1, 1], [], []>} : vector<32x192xbf16>, vector<192x384xbf16>, vector<32x384xf32> -> vector<32x384xf32>
    %c0_3 = arith.constant 0 : index
    %c0_4 = arith.constant 0 : index
    %4 = vector.load %arg3[%c0_3, %c0_4] : memref<1x384xf32, #tpu.memory_space<vmem>>, vector<1x384xf32>
    %5 = vector.broadcast %4 : vector<1x384xf32> to vector<32x384xf32>
    %6 = arith.addf %3, %5 : vector<32x384xf32>
    %c0_5 = arith.constant 0 : index
    %c0_6 = arith.constant 0 : index
    %7 = vector.load %arg4[%c0_5, %c0_6] : memref<32x384xf32, #tpu.memory_space<vmem>>, vector<32x384xf32>
    tpu.vector_store %arg4[%c0_5, %c0_6], %6 {strides = array<i32>} : memref<32x384xf32, #tpu.memory_space<vmem>>, vector<32x384xf32>,
    return
  }
  func.func @transform_0(%arg0: i32) -> (i32, i32) {
    %c0_i32 = arith.constant 0 : i32
    %c0_i32_0 = arith.constant 0 : i32
    return %arg0, %c0_i32 : i32, i32
  }
  func.func @transform_1(%arg0: i32) -> (i32, i32) {
    %c0_i32 = arith.constant 0 : i32
    %c0_i32_0 = arith.constant 0 : i32
    %c0_i32_1 = arith.constant 0 : i32
    return %c0_i32, %c0_i32_0 : i32, i32
  }
  func.func @transform_2(%arg0: i32) -> (i32, i32) {
    %c0_i32 = arith.constant 0 : i32
    %c0_i32_0 = arith.constant 0 : i32
    %c0_i32_1 = arith.constant 0 : i32
    return %c0_i32, %c0_i32_0 : i32, i32
  }
  func.func @transform_3(%arg0: i32) -> (i32, i32) {
    %c0_i32 = arith.constant 0 : i32
    %c0_i32_0 = arith.constant 0 : i32
    return %arg0, %c0_i32 : i32, i32
  }
}

module attributes {stable_mosaic.version = 11 : i64} {
  func.func @kernel(%arg0: i32, %arg1: memref<34x384xbf16, #tpu.memory_space<vmem>>, %arg2: memref<1x384xf32, #tpu.memory_space<vmem>>, %arg3: memref<1x384xf32, #tpu.memory_space<vmem>>, %arg4: memref<384x1152xbf16, #tpu.memory_space<vmem>>, %arg5: memref<1x1152xf32, #tpu.memory_space<vmem>>, %arg6: memref<34x1152xbf16, #tpu.memory_space<vmem>>) attributes {dimension_semantics = [#tpu.dimension_semantics<parallel>], iteration_bounds = array<i64: 1>, scalar_prefetch = 0 : i64, scratch_operands = 0 : i64, tpu.core_type = #tpu.core_type<tc>, window_params = [{transform_indices = @transform_0, window_bounds = array<i64: 34, 384>}, {pipeline_mode = #tpu.pipeline_mode<synchronous>, transform_indices = @transform_1, window_bounds = array<i64: 1, 384>}, {pipeline_mode = #tpu.pipeline_mode<synchronous>, transform_indices = @transform_2, window_bounds = array<i64: 1, 384>}, {pipeline_mode = #tpu.pipeline_mode<synchronous>, transform_indices = @transform_3, window_bounds = array<i64: 384, 1152>}, {pipeline_mode = #tpu.pipeline_mode<synchronous>, transform_indices = @transform_4, window_bounds = array<i64: 1, 1152>}, {transform_indices = @transform_5, window_bounds = array<i64: 34, 1152>}]} {
    %c0 = arith.constant 0 : index
    %c0_0 = arith.constant 0 : index
    %0 = vector.load %arg1[%c0, %c0_0] : memref<34x384xbf16, #tpu.memory_space<vmem>>, vector<34x384xbf16>
    %1 = arith.extf %0 : vector<34x384xbf16> to vector<34x384xf32>
    %c0_1 = arith.constant 0 : index
    %c0_2 = arith.constant 0 : index
    %2 = vector.load %arg2[%c0_1, %c0_2] : memref<1x384xf32, #tpu.memory_space<vmem>>, vector<1x384xf32>
    %c0_3 = arith.constant 0 : index
    %c0_4 = arith.constant 0 : index
    %3 = vector.load %arg3[%c0_3, %c0_4] : memref<1x384xf32, #tpu.memory_space<vmem>>, vector<1x384xf32>
    %cst = arith.constant dense<0.000000e+00> : vector<34xf32>
    %4 = vector.multi_reduction <add>, %1, %cst [1] : vector<34x384xf32> to vector<34xf32>
    %5 = vector.shape_cast %4 : vector<34xf32> to vector<34x1xf32>
    %cst_5 = arith.constant 3.840000e+02 : f32
    %6 = vector.broadcast %cst_5 : f32 to vector<34x1xf32>
    %7 = arith.divf %5, %6 : vector<34x1xf32>
    %8 = vector.broadcast %7 : vector<34x1xf32> to vector<34x384xf32>
    %9 = arith.subf %1, %8 : vector<34x384xf32>
    %10 = arith.mulf %9, %9 : vector<34x384xf32>
    %cst_6 = arith.constant dense<0.000000e+00> : vector<34xf32>
    %11 = vector.multi_reduction <add>, %10, %cst_6 [1] : vector<34x384xf32> to vector<34xf32>
    %12 = vector.shape_cast %11 : vector<34xf32> to vector<34x1xf32>
    %cst_7 = arith.constant 3.840000e+02 : f32
    %13 = vector.broadcast %cst_7 : f32 to vector<34x1xf32>
    %14 = arith.divf %12, %13 : vector<34x1xf32>
    %cst_8 = arith.constant 9.99999997E-7 : f32
    %15 = vector.broadcast %cst_8 : f32 to vector<34x1xf32>
    %16 = arith.addf %14, %15 : vector<34x1xf32>
    %17 = math.rsqrt %16 : vector<34x1xf32>
    %18 = vector.broadcast %17 : vector<34x1xf32> to vector<34x384xf32>
    %19 = arith.mulf %9, %18 : vector<34x384xf32>
    %20 = vector.broadcast %2 : vector<1x384xf32> to vector<34x384xf32>
    %21 = arith.mulf %19, %20 : vector<34x384xf32>
    %22 = vector.broadcast %3 : vector<1x384xf32> to vector<34x384xf32>
    %23 = arith.addf %21, %22 : vector<34x384xf32>
    %24 = arith.truncf %23 : vector<34x384xf32> to vector<34x384xbf16>
    %c0_9 = arith.constant 0 : index
    %c0_10 = arith.constant 0 : index
    %25 = vector.load %arg4[%c0_9, %c0_10] : memref<384x1152xbf16, #tpu.memory_space<vmem>>, vector<384x1152xbf16>
    %cst_11 = arith.constant dense<0.000000e+00> : vector<34x1152xf32>
    %26 = tpu.matmul %24, %25, %cst_11 {dimension_numbers = #tpu.dot_dimension_numbers<[1], [0], [0], [1], [0, 0, 1, 1], [], []>} : vector<34x384xbf16>, vector<384x1152xbf16>, vector<34x1152xf32> -> vector<34x1152xf32>
    %c0_12 = arith.constant 0 : index
    %c0_13 = arith.constant 0 : index
    %27 = vector.load %arg5[%c0_12, %c0_13] : memref<1x1152xf32, #tpu.memory_space<vmem>>, vector<1x1152xf32>
    %28 = vector.broadcast %27 : vector<1x1152xf32> to vector<34x1152xf32>
    %29 = arith.addf %26, %28 : vector<34x1152xf32>
    %30 = arith.truncf %29 : vector<34x1152xf32> to vector<34x1152xbf16>
    %c0_14 = arith.constant 0 : index
    %c0_15 = arith.constant 0 : index
    %31 = vector.load %arg6[%c0_14, %c0_15] : memref<34x1152xbf16, #tpu.memory_space<vmem>>, vector<34x1152xbf16>
    tpu.vector_store %arg6[%c0_14, %c0_15], %30 {strides = array<i32>} : memref<34x1152xbf16, #tpu.memory_space<vmem>>, vector<34x1152xbf16>,
    return
  }
  func.func @transform_0(%arg0: i32) -> (i32, i32) {
    %c0_i32 = arith.constant 0 : i32
    %c0_i32_0 = arith.constant 0 : i32
    return %arg0, %c0_i32 : i32, i32
  }
  func.func @transform_1(%arg0: i32) -> (i32, i32) {
    %c0_i32 = arith.constant 0 : i32
    %c0_i32_0 = arith.constant 0 : i32
    %c0_i32_1 = arith.constant 0 : i32
    return %c0_i32, %c0_i32_0 : i32, i32
  }
  func.func @transform_2(%arg0: i32) -> (i32, i32) {
    %c0_i32 = arith.constant 0 : i32
    %c0_i32_0 = arith.constant 0 : i32
    %c0_i32_1 = arith.constant 0 : i32
    return %c0_i32, %c0_i32_0 : i32, i32
  }
  func.func @transform_3(%arg0: i32) -> (i32, i32) {
    %c0_i32 = arith.constant 0 : i32
    %c0_i32_0 = arith.constant 0 : i32
    %c0_i32_1 = arith.constant 0 : i32
    return %c0_i32, %c0_i32_0 : i32, i32
  }
  func.func @transform_4(%arg0: i32) -> (i32, i32) {
    %c0_i32 = arith.constant 0 : i32
    %c0_i32_0 = arith.constant 0 : i32
    %c0_i32_1 = arith.constant 0 : i32
    return %c0_i32, %c0_i32_0 : i32, i32
  }
  func.func @transform_5(%arg0: i32) -> (i32, i32) {
    %c0_i32 = arith.constant 0 : i32
    %c0_i32_0 = arith.constant 0 : i32
    return %arg0, %c0_i32 : i32, i32
  }
}

module attributes {stable_mosaic.version = 11 : i64} {
  func.func @_attn_proj_kernel(%arg0: i32, %arg1: memref<1x17x1152xbf16, #tpu.memory_space<vmem>>, %arg2: memref<384x384xbf16, #tpu.memory_space<vmem>>, %arg3: memref<1x384xf32, #tpu.memory_space<vmem>>, %arg4: memref<1x17x384xbf16, #tpu.memory_space<vmem>>, %arg5: memref<1x17x384xbf16, #tpu.memory_space<vmem>>, %arg6: memref<1x6x17xf32, #tpu.memory_space<vmem>>) attributes {dimension_semantics = [#tpu.dimension_semantics<parallel>], iteration_bounds = array<i64: 2>, scalar_prefetch = 0 : i64, scratch_operands = 0 : i64, tpu.core_type = #tpu.core_type<tc>, window_params = [{transform_indices = @transform_0, window_bounds = array<i64: 1, 17, 1152>}, {pipeline_mode = #tpu.pipeline_mode<synchronous>, transform_indices = @transform_1, window_bounds = array<i64: 384, 384>}, {pipeline_mode = #tpu.pipeline_mode<synchronous>, transform_indices = @transform_2, window_bounds = array<i64: 1, 384>}, {transform_indices = @transform_3, window_bounds = array<i64: 1, 17, 384>}, {transform_indices = @transform_4, window_bounds = array<i64: 1, 17, 384>}, {transform_indices = @transform_5, window_bounds = array<i64: 1, 6, 17>}]} {
    %c0 = arith.constant 0 : index
    %c0_0 = arith.constant 0 : index
    %c0_1 = arith.constant 0 : index
    %0 = vector.load %arg1[%c0, %c0_0, %c0_1] : memref<1x17x1152xbf16, #tpu.memory_space<vmem>>, vector<1x17x64xbf16>
    %1 = vector.shape_cast %0 : vector<1x17x64xbf16> to vector<17x64xbf16>
    %c0_2 = arith.constant 0 : index
    %c0_3 = arith.constant 0 : index
    %c384 = arith.constant 384 : index
    %2 = vector.load %arg1[%c0_2, %c0_3, %c384] : memref<1x17x1152xbf16, #tpu.memory_space<vmem>>, vector<1x17x64xbf16>
    %3 = vector.shape_cast %2 : vector<1x17x64xbf16> to vector<17x64xbf16>
    %c0_4 = arith.constant 0 : index
    %c0_5 = arith.constant 0 : index
    %c768 = arith.constant 768 : index
    %4 = vector.load %arg1[%c0_4, %c0_5, %c768] : memref<1x17x1152xbf16, #tpu.memory_space<vmem>>, vector<1x17x64xbf16>
    %5 = vector.shape_cast %4 : vector<1x17x64xbf16> to vector<17x64xbf16>
    %cst = arith.constant dense<0.000000e+00> : vector<17x17xf32>
    %6 = tpu.matmul %1, %3, %cst {dimension_numbers = #tpu.dot_dimension_numbers<[1], [1], [0], [0], [0, 0, 1, 0], [], []>} : vector<17x64xbf16>, vector<17x64xbf16>, vector<17x17xf32> -> vector<17x17xf32>
    %cst_6 = arith.constant 1.250000e-01 : f32
    %7 = vector.broadcast %cst_6 : f32 to vector<17x17xf32>
    %8 = arith.mulf %6, %7 : vector<17x17xf32>
    %cst_7 = arith.constant dense<0xFF800000> : vector<17xf32>
    %9 = vector.multi_reduction <maximumf>, %8, %cst_7 [1] : vector<17x17xf32> to vector<17xf32>
    %10 = vector.shape_cast %9 : vector<17xf32> to vector<17x1xf32>
    %11 = vector.broadcast %10 : vector<17x1xf32> to vector<17x17xf32>
    %12 = arith.subf %8, %11 : vector<17x17xf32>
    %13 = math.exp %12 : vector<17x17xf32>
    %cst_8 = arith.constant dense<0.000000e+00> : vector<17xf32>
    %14 = vector.multi_reduction <add>, %13, %cst_8 [1] : vector<17x17xf32> to vector<17xf32>
    %15 = vector.shape_cast %14 : vector<17xf32> to vector<17x1xf32>
    %16 = tpu.reciprocal %15 {approx = true} : vector<17x1xf32> -> vector<17x1xf32>
    %17 = vector.broadcast %16 : vector<17x1xf32> to vector<17x17xf32>
    %18 = arith.mulf %13, %17 : vector<17x17xf32>
    %19 = vector.extract_strided_slice %18 {offsets = [0, 0], sizes = [1, 17], strides = [1, 1]} : vector<17x17xf32> to vector<1x17xf32>
    %20 = arith.truncf %18 : vector<17x17xf32> to vector<17x17xbf16>
    %cst_9 = arith.constant dense<0.000000e+00> : vector<17x64xf32>
    %21 = tpu.matmul %20, %5, %cst_9 {dimension_numbers = #tpu.dot_dimension_numbers<[1], [0], [0], [1], [0, 0, 1, 1], [], []>} : vector<17x17xbf16>, vector<17x64xbf16>, vector<17x64xf32> -> vector<17x64xf32>
    %c0_10 = arith.constant 0 : index
    %c0_11 = arith.constant 0 : index
    %c64 = arith.constant 64 : index
    %22 = vector.load %arg1[%c0_10, %c0_11, %c64] : memref<1x17x1152xbf16, #tpu.memory_space<vmem>>, vector<1x17x64xbf16>
    %23 = vector.shape_cast %22 : vector<1x17x64xbf16> to vector<17x64xbf16>
    %c0_12 = arith.constant 0 : index
    %c0_13 = arith.constant 0 : index
    %c448 = arith.constant 448 : index
    %24 = vector.load %arg1[%c0_12, %c0_13, %c448] : memref<1x17x1152xbf16, #tpu.memory_space<vmem>>, vector<1x17x64xbf16>
    %25 = vector.shape_cast %24 : vector<1x17x64xbf16> to vector<17x64xbf16>
    %c0_14 = arith.constant 0 : index
    %c0_15 = arith.constant 0 : index
    %c832 = arith.constant 832 : index
    %26 = vector.load %arg1[%c0_14, %c0_15, %c832] : memref<1x17x1152xbf16, #tpu.memory_space<vmem>>, vector<1x17x64xbf16>
    %27 = vector.shape_cast %26 : vector<1x17x64xbf16> to vector<17x64xbf16>
    %cst_16 = arith.constant dense<0.000000e+00> : vector<17x17xf32>
    %28 = tpu.matmul %23, %25, %cst_16 {dimension_numbers = #tpu.dot_dimension_numbers<[1], [1], [0], [0], [0, 0, 1, 0], [], []>} : vector<17x64xbf16>, vector<17x64xbf16>, vector<17x17xf32> -> vector<17x17xf32>
    %cst_17 = arith.constant 1.250000e-01 : f32
    %29 = vector.broadcast %cst_17 : f32 to vector<17x17xf32>
    %30 = arith.mulf %28, %29 : vector<17x17xf32>
    %cst_18 = arith.constant dense<0xFF800000> : vector<17xf32>
    %31 = vector.multi_reduction <maximumf>, %30, %cst_18 [1] : vector<17x17xf32> to vector<17xf32>
    %32 = vector.shape_cast %31 : vector<17xf32> to vector<17x1xf32>
    %33 = vector.broadcast %32 : vector<17x1xf32> to vector<17x17xf32>
    %34 = arith.subf %30, %33 : vector<17x17xf32>
    %35 = math.exp %34 : vector<17x17xf32>
    %cst_19 = arith.constant dense<0.000000e+00> : vector<17xf32>
    %36 = vector.multi_reduction <add>, %35, %cst_19 [1] : vector<17x17xf32> to vector<17xf32>
    %37 = vector.shape_cast %36 : vector<17xf32> to vector<17x1xf32>
    %38 = tpu.reciprocal %37 {approx = true} : vector<17x1xf32> -> vector<17x1xf32>
    %39 = vector.broadcast %38 : vector<17x1xf32> to vector<17x17xf32>
    %40 = arith.mulf %35, %39 : vector<17x17xf32>
    %41 = vector.extract_strided_slice %40 {offsets = [0, 0], sizes = [1, 17], strides = [1, 1]} : vector<17x17xf32> to vector<1x17xf32>
    %42 = arith.truncf %40 : vector<17x17xf32> to vector<17x17xbf16>
    %cst_20 = arith.constant dense<0.000000e+00> : vector<17x64xf32>
    %43 = tpu.matmul %42, %27, %cst_20 {dimension_numbers = #tpu.dot_dimension_numbers<[1], [0], [0], [1], [0, 0, 1, 1], [], []>} : vector<17x17xbf16>, vector<17x64xbf16>, vector<17x64xf32> -> vector<17x64xf32>
    %c0_21 = arith.constant 0 : index
    %c0_22 = arith.constant 0 : index
    %c128 = arith.constant 128 : index
    %44 = vector.load %arg1[%c0_21, %c0_22, %c128] : memref<1x17x1152xbf16, #tpu.memory_space<vmem>>, vector<1x17x64xbf16>
    %45 = vector.shape_cast %44 : vector<1x17x64xbf16> to vector<17x64xbf16>
    %c0_23 = arith.constant 0 : index
    %c0_24 = arith.constant 0 : index
    %c512 = arith.constant 512 : index
    %46 = vector.load %arg1[%c0_23, %c0_24, %c512] : memref<1x17x1152xbf16, #tpu.memory_space<vmem>>, vector<1x17x64xbf16>
    %47 = vector.shape_cast %46 : vector<1x17x64xbf16> to vector<17x64xbf16>
    %c0_25 = arith.constant 0 : index
    %c0_26 = arith.constant 0 : index
    %c896 = arith.constant 896 : index
    %48 = vector.load %arg1[%c0_25, %c0_26, %c896] : memref<1x17x1152xbf16, #tpu.memory_space<vmem>>, vector<1x17x64xbf16>
    %49 = vector.shape_cast %48 : vector<1x17x64xbf16> to vector<17x64xbf16>
    %cst_27 = arith.constant dense<0.000000e+00> : vector<17x17xf32>
    %50 = tpu.matmul %45, %47, %cst_27 {dimension_numbers = #tpu.dot_dimension_numbers<[1], [1], [0], [0], [0, 0, 1, 0], [], []>} : vector<17x64xbf16>, vector<17x64xbf16>, vector<17x17xf32> -> vector<17x17xf32>
    %cst_28 = arith.constant 1.250000e-01 : f32
    %51 = vector.broadcast %cst_28 : f32 to vector<17x17xf32>
    %52 = arith.mulf %50, %51 : vector<17x17xf32>
    %cst_29 = arith.constant dense<0xFF800000> : vector<17xf32>
    %53 = vector.multi_reduction <maximumf>, %52, %cst_29 [1] : vector<17x17xf32> to vector<17xf32>
    %54 = vector.shape_cast %53 : vector<17xf32> to vector<17x1xf32>
    %55 = vector.broadcast %54 : vector<17x1xf32> to vector<17x17xf32>
    %56 = arith.subf %52, %55 : vector<17x17xf32>
    %57 = math.exp %56 : vector<17x17xf32>
    %cst_30 = arith.constant dense<0.000000e+00> : vector<17xf32>
    %58 = vector.multi_reduction <add>, %57, %cst_30 [1] : vector<17x17xf32> to vector<17xf32>
    %59 = vector.shape_cast %58 : vector<17xf32> to vector<17x1xf32>
    %60 = tpu.reciprocal %59 {approx = true} : vector<17x1xf32> -> vector<17x1xf32>
    %61 = vector.broadcast %60 : vector<17x1xf32> to vector<17x17xf32>
    %62 = arith.mulf %57, %61 : vector<17x17xf32>
    %63 = vector.extract_strided_slice %62 {offsets = [0, 0], sizes = [1, 17], strides = [1, 1]} : vector<17x17xf32> to vector<1x17xf32>
    %64 = arith.truncf %62 : vector<17x17xf32> to vector<17x17xbf16>
    %cst_31 = arith.constant dense<0.000000e+00> : vector<17x64xf32>
    %65 = tpu.matmul %64, %49, %cst_31 {dimension_numbers = #tpu.dot_dimension_numbers<[1], [0], [0], [1], [0, 0, 1, 1], [], []>} : vector<17x17xbf16>, vector<17x64xbf16>, vector<17x64xf32> -> vector<17x64xf32>
    %c0_32 = arith.constant 0 : index
    %c0_33 = arith.constant 0 : index
    %c192 = arith.constant 192 : index
    %66 = vector.load %arg1[%c0_32, %c0_33, %c192] : memref<1x17x1152xbf16, #tpu.memory_space<vmem>>, vector<1x17x64xbf16>
    %67 = vector.shape_cast %66 : vector<1x17x64xbf16> to vector<17x64xbf16>
    %c0_34 = arith.constant 0 : index
    %c0_35 = arith.constant 0 : index
    %c576 = arith.constant 576 : index
    %68 = vector.load %arg1[%c0_34, %c0_35, %c576] : memref<1x17x1152xbf16, #tpu.memory_space<vmem>>, vector<1x17x64xbf16>
    %69 = vector.shape_cast %68 : vector<1x17x64xbf16> to vector<17x64xbf16>
    %c0_36 = arith.constant 0 : index
    %c0_37 = arith.constant 0 : index
    %c960 = arith.constant 960 : index
    %70 = vector.load %arg1[%c0_36, %c0_37, %c960] : memref<1x17x1152xbf16, #tpu.memory_space<vmem>>, vector<1x17x64xbf16>
    %71 = vector.shape_cast %70 : vector<1x17x64xbf16> to vector<17x64xbf16>
    %cst_38 = arith.constant dense<0.000000e+00> : vector<17x17xf32>
    %72 = tpu.matmul %67, %69, %cst_38 {dimension_numbers = #tpu.dot_dimension_numbers<[1], [1], [0], [0], [0, 0, 1, 0], [], []>} : vector<17x64xbf16>, vector<17x64xbf16>, vector<17x17xf32> -> vector<17x17xf32>
    %cst_39 = arith.constant 1.250000e-01 : f32
    %73 = vector.broadcast %cst_39 : f32 to vector<17x17xf32>
    %74 = arith.mulf %72, %73 : vector<17x17xf32>
    %cst_40 = arith.constant dense<0xFF800000> : vector<17xf32>
    %75 = vector.multi_reduction <maximumf>, %74, %cst_40 [1] : vector<17x17xf32> to vector<17xf32>
    %76 = vector.shape_cast %75 : vector<17xf32> to vector<17x1xf32>
    %77 = vector.broadcast %76 : vector<17x1xf32> to vector<17x17xf32>
    %78 = arith.subf %74, %77 : vector<17x17xf32>
    %79 = math.exp %78 : vector<17x17xf32>
    %cst_41 = arith.constant dense<0.000000e+00> : vector<17xf32>
    %80 = vector.multi_reduction <add>, %79, %cst_41 [1] : vector<17x17xf32> to vector<17xf32>
    %81 = vector.shape_cast %80 : vector<17xf32> to vector<17x1xf32>
    %82 = tpu.reciprocal %81 {approx = true} : vector<17x1xf32> -> vector<17x1xf32>
    %83 = vector.broadcast %82 : vector<17x1xf32> to vector<17x17xf32>
    %84 = arith.mulf %79, %83 : vector<17x17xf32>
    %85 = vector.extract_strided_slice %84 {offsets = [0, 0], sizes = [1, 17], strides = [1, 1]} : vector<17x17xf32> to vector<1x17xf32>
    %86 = arith.truncf %84 : vector<17x17xf32> to vector<17x17xbf16>
    %cst_42 = arith.constant dense<0.000000e+00> : vector<17x64xf32>
    %87 = tpu.matmul %86, %71, %cst_42 {dimension_numbers = #tpu.dot_dimension_numbers<[1], [0], [0], [1], [0, 0, 1, 1], [], []>} : vector<17x17xbf16>, vector<17x64xbf16>, vector<17x64xf32> -> vector<17x64xf32>
    %c0_43 = arith.constant 0 : index
    %c0_44 = arith.constant 0 : index
    %c256 = arith.constant 256 : index
    %88 = vector.load %arg1[%c0_43, %c0_44, %c256] : memref<1x17x1152xbf16, #tpu.memory_space<vmem>>, vector<1x17x64xbf16>
    %89 = vector.shape_cast %88 : vector<1x17x64xbf16> to vector<17x64xbf16>
    %c0_45 = arith.constant 0 : index
    %c0_46 = arith.constant 0 : index
    %c640 = arith.constant 640 : index
    %90 = vector.load %arg1[%c0_45, %c0_46, %c640] : memref<1x17x1152xbf16, #tpu.memory_space<vmem>>, vector<1x17x64xbf16>
    %91 = vector.shape_cast %90 : vector<1x17x64xbf16> to vector<17x64xbf16>
    %c0_47 = arith.constant 0 : index
    %c0_48 = arith.constant 0 : index
    %c1024 = arith.constant 1024 : index
    %92 = vector.load %arg1[%c0_47, %c0_48, %c1024] : memref<1x17x1152xbf16, #tpu.memory_space<vmem>>, vector<1x17x64xbf16>
    %93 = vector.shape_cast %92 : vector<1x17x64xbf16> to vector<17x64xbf16>
    %cst_49 = arith.constant dense<0.000000e+00> : vector<17x17xf32>
    %94 = tpu.matmul %89, %91, %cst_49 {dimension_numbers = #tpu.dot_dimension_numbers<[1], [1], [0], [0], [0, 0, 1, 0], [], []>} : vector<17x64xbf16>, vector<17x64xbf16>, vector<17x17xf32> -> vector<17x17xf32>
    %cst_50 = arith.constant 1.250000e-01 : f32
    %95 = vector.broadcast %cst_50 : f32 to vector<17x17xf32>
    %96 = arith.mulf %94, %95 : vector<17x17xf32>
    %cst_51 = arith.constant dense<0xFF800000> : vector<17xf32>
    %97 = vector.multi_reduction <maximumf>, %96, %cst_51 [1] : vector<17x17xf32> to vector<17xf32>
    %98 = vector.shape_cast %97 : vector<17xf32> to vector<17x1xf32>
    %99 = vector.broadcast %98 : vector<17x1xf32> to vector<17x17xf32>
    %100 = arith.subf %96, %99 : vector<17x17xf32>
    %101 = math.exp %100 : vector<17x17xf32>
    %cst_52 = arith.constant dense<0.000000e+00> : vector<17xf32>
    %102 = vector.multi_reduction <add>, %101, %cst_52 [1] : vector<17x17xf32> to vector<17xf32>
    %103 = vector.shape_cast %102 : vector<17xf32> to vector<17x1xf32>
    %104 = tpu.reciprocal %103 {approx = true} : vector<17x1xf32> -> vector<17x1xf32>
    %105 = vector.broadcast %104 : vector<17x1xf32> to vector<17x17xf32>
    %106 = arith.mulf %101, %105 : vector<17x17xf32>
    %107 = vector.extract_strided_slice %106 {offsets = [0, 0], sizes = [1, 17], strides = [1, 1]} : vector<17x17xf32> to vector<1x17xf32>
    %108 = arith.truncf %106 : vector<17x17xf32> to vector<17x17xbf16>
    %cst_53 = arith.constant dense<0.000000e+00> : vector<17x64xf32>
    %109 = tpu.matmul %108, %93, %cst_53 {dimension_numbers = #tpu.dot_dimension_numbers<[1], [0], [0], [1], [0, 0, 1, 1], [], []>} : vector<17x17xbf16>, vector<17x64xbf16>, vector<17x64xf32> -> vector<17x64xf32>
    %c0_54 = arith.constant 0 : index
    %c0_55 = arith.constant 0 : index
    %c320 = arith.constant 320 : index
    %110 = vector.load %arg1[%c0_54, %c0_55, %c320] : memref<1x17x1152xbf16, #tpu.memory_space<vmem>>, vector<1x17x64xbf16>
    %111 = vector.shape_cast %110 : vector<1x17x64xbf16> to vector<17x64xbf16>
    %c0_56 = arith.constant 0 : index
    %c0_57 = arith.constant 0 : index
    %c704 = arith.constant 704 : index
    %112 = vector.load %arg1[%c0_56, %c0_57, %c704] : memref<1x17x1152xbf16, #tpu.memory_space<vmem>>, vector<1x17x64xbf16>
    %113 = vector.shape_cast %112 : vector<1x17x64xbf16> to vector<17x64xbf16>
    %c0_58 = arith.constant 0 : index
    %c0_59 = arith.constant 0 : index
    %c1088 = arith.constant 1088 : index
    %114 = vector.load %arg1[%c0_58, %c0_59, %c1088] : memref<1x17x1152xbf16, #tpu.memory_space<vmem>>, vector<1x17x64xbf16>
    %115 = vector.shape_cast %114 : vector<1x17x64xbf16> to vector<17x64xbf16>
    %cst_60 = arith.constant dense<0.000000e+00> : vector<17x17xf32>
    %116 = tpu.matmul %111, %113, %cst_60 {dimension_numbers = #tpu.dot_dimension_numbers<[1], [1], [0], [0], [0, 0, 1, 0], [], []>} : vector<17x64xbf16>, vector<17x64xbf16>, vector<17x17xf32> -> vector<17x17xf32>
    %cst_61 = arith.constant 1.250000e-01 : f32
    %117 = vector.broadcast %cst_61 : f32 to vector<17x17xf32>
    %118 = arith.mulf %116, %117 : vector<17x17xf32>
    %cst_62 = arith.constant dense<0xFF800000> : vector<17xf32>
    %119 = vector.multi_reduction <maximumf>, %118, %cst_62 [1] : vector<17x17xf32> to vector<17xf32>
    %120 = vector.shape_cast %119 : vector<17xf32> to vector<17x1xf32>
    %121 = vector.broadcast %120 : vector<17x1xf32> to vector<17x17xf32>
    %122 = arith.subf %118, %121 : vector<17x17xf32>
    %123 = math.exp %122 : vector<17x17xf32>
    %cst_63 = arith.constant dense<0.000000e+00> : vector<17xf32>
    %124 = vector.multi_reduction <add>, %123, %cst_63 [1] : vector<17x17xf32> to vector<17xf32>
    %125 = vector.shape_cast %124 : vector<17xf32> to vector<17x1xf32>
    %126 = tpu.reciprocal %125 {approx = true} : vector<17x1xf32> -> vector<17x1xf32>
    %127 = vector.broadcast %126 : vector<17x1xf32> to vector<17x17xf32>
    %128 = arith.mulf %123, %127 : vector<17x17xf32>
    %129 = vector.extract_strided_slice %128 {offsets = [0, 0], sizes = [1, 17], strides = [1, 1]} : vector<17x17xf32> to vector<1x17xf32>
    %130 = arith.truncf %128 : vector<17x17xf32> to vector<17x17xbf16>
    %cst_64 = arith.constant dense<0.000000e+00> : vector<17x64xf32>
    %131 = tpu.matmul %130, %115, %cst_64 {dimension_numbers = #tpu.dot_dimension_numbers<[1], [0], [0], [1], [0, 0, 1, 1], [], []>} : vector<17x17xbf16>, vector<17x64xbf16>, vector<17x64xf32> -> vector<17x64xf32>
    %132 = tpu.concatenate %21, %43, %65, %87, %109, %131 in 1 : vector<17x64xf32>, vector<17x64xf32>, vector<17x64xf32>, vector<17x64xf32>, vector<17x64xf32>, vector<17x64xf32> -> vector<17x384xf32>
    %133 = arith.truncf %132 : vector<17x384xf32> to vector<17x384xbf16>
    %c0_65 = arith.constant 0 : index
    %c0_66 = arith.constant 0 : index
    %134 = vector.load %arg2[%c0_65, %c0_66] : memref<384x384xbf16, #tpu.memory_space<vmem>>, vector<384x384xbf16>
    %cst_67 = arith.constant dense<0.000000e+00> : vector<17x384xf32>
    %135 = tpu.matmul %133, %134, %cst_67 {dimension_numbers = #tpu.dot_dimension_numbers<[1], [0], [0], [1], [0, 0, 1, 1], [], []>} : vector<17x384xbf16>, vector<384x384xbf16>, vector<17x384xf32> -> vector<17x384xf32>
    %c0_68 = arith.constant 0 : index
    %c0_69 = arith.constant 0 : index
    %136 = vector.load %arg3[%c0_68, %c0_69] : memref<1x384xf32, #tpu.memory_space<vmem>>, vector<1x384xf32>
    %137 = vector.broadcast %136 : vector<1x384xf32> to vector<17x384xf32>
    %138 = arith.addf %135, %137 : vector<17x384xf32>
    %c0_70 = arith.constant 0 : index
    %c0_71 = arith.constant 0 : index
    %c0_72 = arith.constant 0 : index
    %139 = vector.load %arg4[%c0_70, %c0_71, %c0_72] : memref<1x17x384xbf16, #tpu.memory_space<vmem>>, vector<1x17x384xbf16>
    %140 = vector.shape_cast %139 : vector<1x17x384xbf16> to vector<17x384xbf16>
    %141 = arith.extf %140 : vector<17x384xbf16> to vector<17x384xf32>
    %142 = arith.addf %138, %141 : vector<17x384xf32>
    %143 = arith.truncf %142 : vector<17x384xf32> to vector<17x384xbf16>
    %c0_73 = arith.constant 0 : index
    %c0_74 = arith.constant 0 : index
    %c0_75 = arith.constant 0 : index
    %144 = vector.load %arg5[%c0_73, %c0_74, %c0_75] : memref<1x17x384xbf16, #tpu.memory_space<vmem>>, vector<1x17x384xbf16>
    %145 = vector.shape_cast %144 : vector<1x17x384xbf16> to vector<17x384xbf16>
    %146 = vector.shape_cast %143 : vector<17x384xbf16> to vector<1x17x384xbf16>
    tpu.vector_store %arg5[%c0_73, %c0_74, %c0_75], %146 {strides = array<i32>} : memref<1x17x384xbf16, #tpu.memory_space<vmem>>, vector<1x17x384xbf16>,
    %147 = tpu.concatenate %19, %41, %63, %85, %107, %129 in 0 : vector<1x17xf32>, vector<1x17xf32>, vector<1x17xf32>, vector<1x17xf32>, vector<1x17xf32>, vector<1x17xf32> -> vector<6x17xf32>
    %c0_76 = arith.constant 0 : index
    %c0_77 = arith.constant 0 : index
    %c0_78 = arith.constant 0 : index
    %148 = vector.load %arg6[%c0_76, %c0_77, %c0_78] : memref<1x6x17xf32, #tpu.memory_space<vmem>>, vector<1x6x17xf32>
    %149 = vector.shape_cast %148 : vector<1x6x17xf32> to vector<6x17xf32>
    %150 = vector.shape_cast %147 : vector<6x17xf32> to vector<1x6x17xf32>
    tpu.vector_store %arg6[%c0_76, %c0_77, %c0_78], %150 {strides = array<i32>} : memref<1x6x17xf32, #tpu.memory_space<vmem>>, vector<1x6x17xf32>,
    return
  }
  func.func @transform_0(%arg0: i32) -> (i32, i32, i32) {
    %c0_i32 = arith.constant 0 : i32
    %c0_i32_0 = arith.constant 0 : i32
    %c0_i32_1 = arith.constant 0 : i32
    return %arg0, %c0_i32, %c0_i32_0 : i32, i32, i32
  }
  func.func @transform_1(%arg0: i32) -> (i32, i32) {
    %c0_i32 = arith.constant 0 : i32
    %c0_i32_0 = arith.constant 0 : i32
    %c0_i32_1 = arith.constant 0 : i32
    return %c0_i32, %c0_i32_0 : i32, i32
  }
  func.func @transform_2(%arg0: i32) -> (i32, i32) {
    %c0_i32 = arith.constant 0 : i32
    %c0_i32_0 = arith.constant 0 : i32
    %c0_i32_1 = arith.constant 0 : i32
    return %c0_i32, %c0_i32_0 : i32, i32
  }
  func.func @transform_3(%arg0: i32) -> (i32, i32, i32) {
    %c0_i32 = arith.constant 0 : i32
    %c0_i32_0 = arith.constant 0 : i32
    %c0_i32_1 = arith.constant 0 : i32
    return %arg0, %c0_i32, %c0_i32_0 : i32, i32, i32
  }
  func.func @transform_4(%arg0: i32) -> (i32, i32, i32) {
    %c0_i32 = arith.constant 0 : i32
    %c0_i32_0 = arith.constant 0 : i32
    %c0_i32_1 = arith.constant 0 : i32
    return %arg0, %c0_i32, %c0_i32_0 : i32, i32, i32
  }
  func.func @transform_5(%arg0: i32) -> (i32, i32, i32) {
    %c0_i32 = arith.constant 0 : i32
    %c0_i32_0 = arith.constant 0 : i32
    %c0_i32_1 = arith.constant 0 : i32
    return %arg0, %c0_i32, %c0_i32_0 : i32, i32, i32
  }
}

module attributes {stable_mosaic.version = 11 : i64} {
  func.func @_mlp_kernel(%arg0: i32, %arg1: memref<34x384xbf16, #tpu.memory_space<vmem>>, %arg2: memref<1x384xf32, #tpu.memory_space<vmem>>, %arg3: memref<1x384xf32, #tpu.memory_space<vmem>>, %arg4: memref<384x1536xbf16, #tpu.memory_space<vmem>>, %arg5: memref<1x1536xf32, #tpu.memory_space<vmem>>, %arg6: memref<1536x384xbf16, #tpu.memory_space<vmem>>, %arg7: memref<1x384xf32, #tpu.memory_space<vmem>>, %arg8: memref<34x384xbf16, #tpu.memory_space<vmem>>) attributes {dimension_semantics = [#tpu.dimension_semantics<parallel>], iteration_bounds = array<i64: 1>, scalar_prefetch = 0 : i64, scratch_operands = 0 : i64, tpu.core_type = #tpu.core_type<tc>, window_params = [{transform_indices = @transform_0, window_bounds = array<i64: 34, 384>}, {pipeline_mode = #tpu.pipeline_mode<synchronous>, transform_indices = @transform_1, window_bounds = array<i64: 1, 384>}, {pipeline_mode = #tpu.pipeline_mode<synchronous>, transform_indices = @transform_2, window_bounds = array<i64: 1, 384>}, {pipeline_mode = #tpu.pipeline_mode<synchronous>, transform_indices = @transform_3, window_bounds = array<i64: 384, 1536>}, {pipeline_mode = #tpu.pipeline_mode<synchronous>, transform_indices = @transform_4, window_bounds = array<i64: 1, 1536>}, {pipeline_mode = #tpu.pipeline_mode<synchronous>, transform_indices = @transform_5, window_bounds = array<i64: 1536, 384>}, {pipeline_mode = #tpu.pipeline_mode<synchronous>, transform_indices = @transform_6, window_bounds = array<i64: 1, 384>}, {transform_indices = @transform_7, window_bounds = array<i64: 34, 384>}]} {
    %c0 = arith.constant 0 : index
    %c0_0 = arith.constant 0 : index
    %0 = vector.load %arg1[%c0, %c0_0] : memref<34x384xbf16, #tpu.memory_space<vmem>>, vector<34x384xbf16>
    %1 = arith.extf %0 : vector<34x384xbf16> to vector<34x384xf32>
    %c0_1 = arith.constant 0 : index
    %c0_2 = arith.constant 0 : index
    %2 = vector.load %arg2[%c0_1, %c0_2] : memref<1x384xf32, #tpu.memory_space<vmem>>, vector<1x384xf32>
    %c0_3 = arith.constant 0 : index
    %c0_4 = arith.constant 0 : index
    %3 = vector.load %arg3[%c0_3, %c0_4] : memref<1x384xf32, #tpu.memory_space<vmem>>, vector<1x384xf32>
    %cst = arith.constant dense<0.000000e+00> : vector<34xf32>
    %4 = vector.multi_reduction <add>, %1, %cst [1] : vector<34x384xf32> to vector<34xf32>
    %5 = vector.shape_cast %4 : vector<34xf32> to vector<34x1xf32>
    %cst_5 = arith.constant 3.840000e+02 : f32
    %6 = vector.broadcast %cst_5 : f32 to vector<34x1xf32>
    %7 = arith.divf %5, %6 : vector<34x1xf32>
    %8 = vector.broadcast %7 : vector<34x1xf32> to vector<34x384xf32>
    %9 = arith.subf %1, %8 : vector<34x384xf32>
    %10 = arith.mulf %9, %9 : vector<34x384xf32>
    %cst_6 = arith.constant dense<0.000000e+00> : vector<34xf32>
    %11 = vector.multi_reduction <add>, %10, %cst_6 [1] : vector<34x384xf32> to vector<34xf32>
    %12 = vector.shape_cast %11 : vector<34xf32> to vector<34x1xf32>
    %cst_7 = arith.constant 3.840000e+02 : f32
    %13 = vector.broadcast %cst_7 : f32 to vector<34x1xf32>
    %14 = arith.divf %12, %13 : vector<34x1xf32>
    %cst_8 = arith.constant 9.99999997E-7 : f32
    %15 = vector.broadcast %cst_8 : f32 to vector<34x1xf32>
    %16 = arith.addf %14, %15 : vector<34x1xf32>
    %17 = math.rsqrt %16 : vector<34x1xf32>
    %18 = vector.broadcast %17 : vector<34x1xf32> to vector<34x384xf32>
    %19 = arith.mulf %9, %18 : vector<34x384xf32>
    %20 = vector.broadcast %2 : vector<1x384xf32> to vector<34x384xf32>
    %21 = arith.mulf %19, %20 : vector<34x384xf32>
    %22 = vector.broadcast %3 : vector<1x384xf32> to vector<34x384xf32>
    %23 = arith.addf %21, %22 : vector<34x384xf32>
    %24 = arith.truncf %23 : vector<34x384xf32> to vector<34x384xbf16>
    %c0_9 = arith.constant 0 : index
    %c0_10 = arith.constant 0 : index
    %25 = vector.load %arg4[%c0_9, %c0_10] : memref<384x1536xbf16, #tpu.memory_space<vmem>>, vector<384x1536xbf16>
    %cst_11 = arith.constant dense<0.000000e+00> : vector<34x1536xf32>
    %26 = tpu.matmul %24, %25, %cst_11 {dimension_numbers = #tpu.dot_dimension_numbers<[1], [0], [0], [1], [0, 0, 1, 1], [], []>} : vector<34x384xbf16>, vector<384x1536xbf16>, vector<34x1536xf32> -> vector<34x1536xf32>
    %c0_12 = arith.constant 0 : index
    %c0_13 = arith.constant 0 : index
    %27 = vector.load %arg5[%c0_12, %c0_13] : memref<1x1536xf32, #tpu.memory_space<vmem>>, vector<1x1536xf32>
    %28 = vector.broadcast %27 : vector<1x1536xf32> to vector<34x1536xf32>
    %29 = arith.addf %26, %28 : vector<34x1536xf32>
    %cst_14 = arith.constant 5.000000e-01 : f32
    %30 = vector.broadcast %cst_14 : f32 to vector<34x1536xf32>
    %31 = arith.mulf %30, %29 : vector<34x1536xf32>
    %cst_15 = arith.constant 4.471500e-02 : f32
    %32 = vector.broadcast %cst_15 : f32 to vector<34x1536xf32>
    %33 = arith.mulf %32, %29 : vector<34x1536xf32>
    %34 = arith.mulf %33, %29 : vector<34x1536xf32>
    %35 = arith.mulf %34, %29 : vector<34x1536xf32>
    %36 = arith.addf %29, %35 : vector<34x1536xf32>
    %cst_16 = arith.constant 0.797884583 : f32
    %37 = vector.broadcast %cst_16 : f32 to vector<34x1536xf32>
    %38 = arith.mulf %37, %36 : vector<34x1536xf32>
    %39 = math.tanh %38 : vector<34x1536xf32>
    %cst_17 = arith.constant 1.000000e+00 : f32
    %40 = vector.broadcast %cst_17 : f32 to vector<34x1536xf32>
    %41 = arith.addf %40, %39 : vector<34x1536xf32>
    %42 = arith.mulf %31, %41 : vector<34x1536xf32>
    %43 = arith.truncf %42 : vector<34x1536xf32> to vector<34x1536xbf16>
    %c0_18 = arith.constant 0 : index
    %c0_19 = arith.constant 0 : index
    %44 = vector.load %arg6[%c0_18, %c0_19] : memref<1536x384xbf16, #tpu.memory_space<vmem>>, vector<1536x384xbf16>
    %cst_20 = arith.constant dense<0.000000e+00> : vector<34x384xf32>
    %45 = tpu.matmul %43, %44, %cst_20 {dimension_numbers = #tpu.dot_dimension_numbers<[1], [0], [0], [1], [0, 0, 1, 1], [], []>} : vector<34x1536xbf16>, vector<1536x384xbf16>, vector<34x384xf32> -> vector<34x384xf32>
    %c0_21 = arith.constant 0 : index
    %c0_22 = arith.constant 0 : index
    %46 = vector.load %arg7[%c0_21, %c0_22] : memref<1x384xf32, #tpu.memory_space<vmem>>, vector<1x384xf32>
    %47 = vector.broadcast %46 : vector<1x384xf32> to vector<34x384xf32>
    %48 = arith.addf %45, %47 : vector<34x384xf32>
    %49 = arith.addf %48, %1 : vector<34x384xf32>
    %50 = arith.truncf %49 : vector<34x384xf32> to vector<34x384xbf16>
    %c0_23 = arith.constant 0 : index
    %c0_24 = arith.constant 0 : index
    %51 = vector.load %arg8[%c0_23, %c0_24] : memref<34x384xbf16, #tpu.memory_space<vmem>>, vector<34x384xbf16>
    tpu.vector_store %arg8[%c0_23, %c0_24], %50 {strides = array<i32>} : memref<34x384xbf16, #tpu.memory_space<vmem>>, vector<34x384xbf16>,
    return
  }
  func.func @transform_0(%arg0: i32) -> (i32, i32) {
    %c0_i32 = arith.constant 0 : i32
    %c0_i32_0 = arith.constant 0 : i32
    return %arg0, %c0_i32 : i32, i32
  }
  func.func @transform_1(%arg0: i32) -> (i32, i32) {
    %c0_i32 = arith.constant 0 : i32
    %c0_i32_0 = arith.constant 0 : i32
    %c0_i32_1 = arith.constant 0 : i32
    return %c0_i32, %c0_i32_0 : i32, i32
  }
  func.func @transform_2(%arg0: i32) -> (i32, i32) {
    %c0_i32 = arith.constant 0 : i32
    %c0_i32_0 = arith.constant 0 : i32
    %c0_i32_1 = arith.constant 0 : i32
    return %c0_i32, %c0_i32_0 : i32, i32
  }
  func.func @transform_3(%arg0: i32) -> (i32, i32) {
    %c0_i32 = arith.constant 0 : i32
    %c0_i32_0 = arith.constant 0 : i32
    %c0_i32_1 = arith.constant 0 : i32
    return %c0_i32, %c0_i32_0 : i32, i32
  }
  func.func @transform_4(%arg0: i32) -> (i32, i32) {
    %c0_i32 = arith.constant 0 : i32
    %c0_i32_0 = arith.constant 0 : i32
    %c0_i32_1 = arith.constant 0 : i32
    return %c0_i32, %c0_i32_0 : i32, i32
  }
  func.func @transform_5(%arg0: i32) -> (i32, i32) {
    %c0_i32 = arith.constant 0 : i32
    %c0_i32_0 = arith.constant 0 : i32
    %c0_i32_1 = arith.constant 0 : i32
    return %c0_i32, %c0_i32_0 : i32, i32
  }
  func.func @transform_6(%arg0: i32) -> (i32, i32) {
    %c0_i32 = arith.constant 0 : i32
    %c0_i32_0 = arith.constant 0 : i32
    %c0_i32_1 = arith.constant 0 : i32
    return %c0_i32, %c0_i32_0 : i32, i32
  }
  func.func @transform_7(%arg0: i32) -> (i32, i32) {
    %c0_i32 = arith.constant 0 : i32
    %c0_i32_0 = arith.constant 0 : i32
    return %arg0, %c0_i32 : i32, i32
  }
}

module attributes {stable_mosaic.version = 11 : i64} {
  func.func @_ln_kernel(%arg0: i32, %arg1: memref<34x384xbf16, #tpu.memory_space<vmem>>, %arg2: memref<1x384xf32, #tpu.memory_space<vmem>>, %arg3: memref<1x384xf32, #tpu.memory_space<vmem>>, %arg4: memref<34x384xf32, #tpu.memory_space<vmem>>) attributes {dimension_semantics = [#tpu.dimension_semantics<parallel>], iteration_bounds = array<i64: 1>, scalar_prefetch = 0 : i64, scratch_operands = 0 : i64, tpu.core_type = #tpu.core_type<tc>, window_params = [{transform_indices = @transform_0, window_bounds = array<i64: 34, 384>}, {pipeline_mode = #tpu.pipeline_mode<synchronous>, transform_indices = @transform_1, window_bounds = array<i64: 1, 384>}, {pipeline_mode = #tpu.pipeline_mode<synchronous>, transform_indices = @transform_2, window_bounds = array<i64: 1, 384>}, {transform_indices = @transform_3, window_bounds = array<i64: 34, 384>}]} {
    %c0 = arith.constant 0 : index
    %c0_0 = arith.constant 0 : index
    %0 = vector.load %arg1[%c0, %c0_0] : memref<34x384xbf16, #tpu.memory_space<vmem>>, vector<34x384xbf16>
    %1 = arith.extf %0 : vector<34x384xbf16> to vector<34x384xf32>
    %c0_1 = arith.constant 0 : index
    %c0_2 = arith.constant 0 : index
    %2 = vector.load %arg2[%c0_1, %c0_2] : memref<1x384xf32, #tpu.memory_space<vmem>>, vector<1x384xf32>
    %c0_3 = arith.constant 0 : index
    %c0_4 = arith.constant 0 : index
    %3 = vector.load %arg3[%c0_3, %c0_4] : memref<1x384xf32, #tpu.memory_space<vmem>>, vector<1x384xf32>
    %cst = arith.constant dense<0.000000e+00> : vector<34xf32>
    %4 = vector.multi_reduction <add>, %1, %cst [1] : vector<34x384xf32> to vector<34xf32>
    %5 = vector.shape_cast %4 : vector<34xf32> to vector<34x1xf32>
    %cst_5 = arith.constant 3.840000e+02 : f32
    %6 = vector.broadcast %cst_5 : f32 to vector<34x1xf32>
    %7 = arith.divf %5, %6 : vector<34x1xf32>
    %8 = vector.broadcast %7 : vector<34x1xf32> to vector<34x384xf32>
    %9 = arith.subf %1, %8 : vector<34x384xf32>
    %10 = arith.mulf %9, %9 : vector<34x384xf32>
    %cst_6 = arith.constant dense<0.000000e+00> : vector<34xf32>
    %11 = vector.multi_reduction <add>, %10, %cst_6 [1] : vector<34x384xf32> to vector<34xf32>
    %12 = vector.shape_cast %11 : vector<34xf32> to vector<34x1xf32>
    %cst_7 = arith.constant 3.840000e+02 : f32
    %13 = vector.broadcast %cst_7 : f32 to vector<34x1xf32>
    %14 = arith.divf %12, %13 : vector<34x1xf32>
    %cst_8 = arith.constant 9.99999997E-7 : f32
    %15 = vector.broadcast %cst_8 : f32 to vector<34x1xf32>
    %16 = arith.addf %14, %15 : vector<34x1xf32>
    %17 = math.rsqrt %16 : vector<34x1xf32>
    %18 = vector.broadcast %17 : vector<34x1xf32> to vector<34x384xf32>
    %19 = arith.mulf %9, %18 : vector<34x384xf32>
    %20 = vector.broadcast %2 : vector<1x384xf32> to vector<34x384xf32>
    %21 = arith.mulf %19, %20 : vector<34x384xf32>
    %22 = vector.broadcast %3 : vector<1x384xf32> to vector<34x384xf32>
    %23 = arith.addf %21, %22 : vector<34x384xf32>
    %c0_9 = arith.constant 0 : index
    %c0_10 = arith.constant 0 : index
    %24 = vector.load %arg4[%c0_9, %c0_10] : memref<34x384xf32, #tpu.memory_space<vmem>>, vector<34x384xf32>
    tpu.vector_store %arg4[%c0_9, %c0_10], %23 {strides = array<i32>} : memref<34x384xf32, #tpu.memory_space<vmem>>, vector<34x384xf32>,
    return
  }
  func.func @transform_0(%arg0: i32) -> (i32, i32) {
    %c0_i32 = arith.constant 0 : i32
    %c0_i32_0 = arith.constant 0 : i32
    return %arg0, %c0_i32 : i32, i32
  }
  func.func @transform_1(%arg0: i32) -> (i32, i32) {
    %c0_i32 = arith.constant 0 : i32
    %c0_i32_0 = arith.constant 0 : i32
    %c0_i32_1 = arith.constant 0 : i32
    return %c0_i32, %c0_i32_0 : i32, i32
  }
  func.func @transform_2(%arg0: i32) -> (i32, i32) {
    %c0_i32 = arith.constant 0 : i32
    %c0_i32_0 = arith.constant 0 : i32
    %c0_i32_1 = arith.constant 0 : i32
    return %c0_i32, %c0_i32_0 : i32, i32
  }
  func.func @transform_3(%arg0: i32) -> (i32, i32) {
    %c0_i32 = arith.constant 0 : i32
    %c0_i32_0 = arith.constant 0 : i32
    return %arg0, %c0_i32 : i32, i32
  }
}

</mosaic_0001>

<bundles_post_ra>
// kernel: custom-call
= control target key start
LH: loop header
LB: loop body
LE: loop exit
PB: predicated region body
PF: predicated region fallthrough
CT: control target
= control target key end

     0   :  { %s6_s0 = inlined_call_operand.vmem [shape: f32[12,2,6,17], index: 0, kind: output, shape index: {}]  }

// kernel: dino_featurizer_forward.2
= control target key start
LH: loop header
LB: loop body
LE: loop exit
PB: predicated region body
PF: predicated region fallthrough
CT: control target
= control target key end

     0   :  { %8 = vsyncpa [#allocation3], 0  ;;  %s538_s12 = smov [#allocation2]   ;;  %s644_s0 = inlined_call_operand.vmem [shape: f32[32,192], index: 0, kind: input, shape index: {}]   ;;  %s645_s1 = inlined_call_operand.hbm [shape: bf16[192,384], index: 1, kind: input, shape index: {}]   ;;  %s646_s2 = inlined_call_operand.vmem [shape: f32[1,384], index: 2, kind: input, shape index: {}]   ;;  %s647_s3 = inlined_call_operand.vmem [shape: f32[32,384], index: 3, kind: output, shape index: {}]  }
   0x1   :  { %s16_s13 = sshll.u32 %s538_s12, 4  ;;  %s17_s13 = int_to_ptr.vmem [resolvable:$true] %s16_s13 }
   0x2   :  { %s524_s14 = scalar_lea.vmem %s17_s13, 4608  ;;  %p529_p1 = scmp.lt.s32.totalorder %s17_s13, %s17_s13 }
   0x3   :  { %p525_p0 = scmp.ne.s32.totalorder %s17_s13, %s524_s14  ;;  %p530_p2 = scmp.lt.s32.totalorder %s524_s14, %s524_s14 }
   0x5   :  { %p531_p3 = por %p530_p2, %p529_p1 }
   0x7   :  { %p532_p4 = pnand %p531_p3, %p525_p0 }
   0x9   :  { %535 = shalt.err (!%p532_p4)
}
   0xa   :  { %s539_s15 = smov 192   ;;  %s540_s16 = smov 12  }
   0xb   :  { %22 = dma.hbm_to_vmem [thread:$0]  %s645_s1, 4608, %s17_s13, [#allocation3], %s539_s15, %s539_s15, %s540_s16  }
   0xc   :  { %536 = dma.done.wait [#allocation3], 4608  }
   0xd   :  { %537 = vsyncadd [#allocation3], 4294962688  ;;  %v541_v0 = vmov 0   ;;  %v468_v1 = vld [vmem:[#allocation2 + $0xac] ss:$12 sps:$4 sm:$0xff]   ;;  %vm298_vm0 = vcmask 523264   ;;  %v91_v49 = vlaneseq }
   0xe   :  { %358 = vmatprep.subr.bf16.mxu1 %v541_v0  ;;  %v470_v2 = vld [vmem:[#allocation2 + $0xb0] ss:$12 sps:$4 sm:$0xff]   ;;  %305 = vmatprep.subr.bf16.mxu0 %v468_v1  ;;  %v471_v3 = vld [vmem:[#allocation2 + $0xa8] ss:$12 sps:$4 sm:$0xff]   ;;  %v474_v5 = vld [vmem:[#allocation2 + $0x98] ss:$12 sps:$4 sm:$0xff]  }
   0xf   :  { %359 = vmatpush1.bf16.msra.mxu1 %v470_v2  ;;  %v472_v4 = vld [vmem:[#allocation2 + $0x94] ss:$12 sps:$4 sm:$0xff]   ;;  %306 = vmatpush1.bf16.msra.mxu0 %v471_v3  ;;  %v475_v6 = vld [vmem:[#allocation2 + $0x90] ss:$12 sps:$4 sm:$0xff]   ;;  %v479_v9 = vld [vmem:[#allocation2 + $0x78] ss:$12 sps:$4 sm:$0xff]  }
  0x10   :  { %360 = vmatprep.subr.bf16.mxu1 %v541_v0  ;;  %307 = vmatprep.subr.bf16.mxu0 %v472_v4  ;;  %v476_v7 = vld [vmem:[#allocation2 + $0x7c] ss:$12 sps:$4 sm:$0xff]   ;;  %v478_v8 = vld [vmem:[#allocation2 + $0x80] ss:$12 sps:$4 sm:$0xff]   ;;  %v480_v10 = vld [vmem:[#allocation2 + $0x64] ss:$12 sps:$4 sm:$0xff]  }
  0x11   :  { %v482_v11 = vld [vmem:[#allocation2 + $0x68] ss:$12 sps:$4 sm:$0xff]   ;;  %v483_v12 = vld [vmem:[#allocation2 + $0x60] ss:$12 sps:$4 sm:$0xff]   ;;  %v486_v14 = vld [vmem:[#allocation2 + $0x50] ss:$12 sps:$4 sm:$0xff]  }
  0x12   :  { %v484_v13 = vld [vmem:[#allocation2 + $0x4c] ss:$12 sps:$4 sm:$0xff]   ;;  %v487_v15 = vld [vmem:[#allocation2 + $0x48] ss:$12 sps:$4 sm:$0xff]   ;;  %v491_v18 = vld [vmem:[#allocation2 + $0x30] ss:$12 sps:$4 sm:$0xff]  }
  0x13   :  { %361 = vmatpush1.bf16.msra.mxu1 %v474_v5  ;;  %308 = vmatpush1.bf16.msra.mxu0 %v475_v6  ;;  %v488_v16 = vld [vmem:[#allocation2 + $0x34] ss:$12 sps:$4 sm:$0xff]   ;;  %v490_v17 = vld [vmem:[#allocation2 + $0x38] ss:$12 sps:$4 sm:$0xff]   ;;  %v492_v19 = vld [vmem:[#allocation2 + $0x1c] ss:$12 sps:$4 sm:$0xff]  }
  0x14   :  { %362 = vmatprep.subr.bf16.mxu1 %v541_v0  ;;  %309 = vmatprep.subr.bf16.mxu0 %v476_v7  ;;  %v494_v20 = vld [vmem:[#allocation2 + $0x20] ss:$12 sps:$4 sm:$0xff]   ;;  %v495_v21 = vld [vmem:[#allocation2 + $0x18] ss:$12 sps:$4 sm:$0xff]   ;;  %v498_v23 = vld [vmem:[#allocation2 + $0x8] ss:$12 sps:$4 sm:$0xff]  }
  0x15   :  { %v496_v22 = vld [vmem:[#allocation2 + $0x4] ss:$12 sps:$4 sm:$0xff]   ;;  %v499_v24 = vld [vmem:[#allocation2] ss:$12 sps:$4 sm:$0xff]   ;;  %v32_v26 = vld [vmem:[%s644_s0 + $0x18] sm:$0xff]  ;;  %v92_v50 = vshrl.u32 %v91_v49, 7 }
  0x16   :  { %v30_v25 = vld [vmem:[%s644_s0 + $0x8] sm:$0xff]  ;;  %v502_v29 = vld [vmem:[#allocation2 + $0x110] ss:$12 sps:$4 sm:$0xff]   ;;  %v504_v31 = vld [vmem:[#allocation2 + $0xf4] ss:$12 sps:$4 sm:$0xff]  }
  0x17   :  { %363 = vmatpush1.bf16.msra.mxu1 %v478_v8  ;;  %310 = vmatpush1.bf16.msra.mxu0 %v479_v9  ;;  %v500_v27 = vld [vmem:[#allocation2 + $0x10c] ss:$12 sps:$4 sm:$0xff]   ;;  %v38_v28 = vpack.c.bf16 %v32_v26, %v30_v25  ;;  %v503_v30 = vld [vmem:[#allocation2 + $0x108] ss:$12 sps:$4 sm:$0xff]   ;;  %v507_v33 = vld [vmem:[#allocation2 + $0xf0] ss:$12 sps:$4 sm:$0xff]  }
  0x18   :  { %364 = vmatprep.subr.bf16.mxu1 %v541_v0  ;;  %311 = vmatprep.subr.bf16.mxu0 %v480_v10  ;;  %v506_v32 = vld [vmem:[#allocation2 + $0xf8] ss:$12 sps:$4 sm:$0xff]   ;;  %v508_v34 = vld [vmem:[#allocation2 + $0xdc] ss:$12 sps:$4 sm:$0xff]   ;;  %v510_v35 = vld [vmem:[#allocation2 + $0xe0] ss:$12 sps:$4 sm:$0xff]  }
  0x19   :  { %462 = vmatprep.mubr.msk.bf16.mxu1 %vm298_vm0, %v38_v28  ;;  %460 = vmatprep.mubr.msk.bf16.mxu0 %vm298_vm0, %v38_v28  ;;  %v511_v36 = vld [vmem:[#allocation2 + $0xd8] ss:$12 sps:$4 sm:$0xff]   ;;  %v514_v38 = vld [vmem:[#allocation2 + $0xc8] ss:$12 sps:$4 sm:$0xff]   ;;  %v515_v41 = vld [vmem:[#allocation2 + $0xc0] ss:$12 sps:$4 sm:$0xff]  }
  0x1a   :  { %v512_v37 = vld [vmem:[#allocation2 + $0xc4] ss:$12 sps:$4 sm:$0xff]   ;;  %v34_v42 = vld [vmem:[%s644_s0 + $0x28] sm:$0xff]  ;;  %v36_v43 = vld [vmem:[%s644_s0 + $0x38] sm:$0xff]  ;;  %v101_v51 = vsub.s32 2, %v92_v50  ;;  %v93_v52 = vsub.s32 0, %v92_v50 }
  0x1b   :  { %365 = vmatpush1.bf16.msra.mxu1 %v482_v11  ;;  %312 = vmatpush1.bf16.msra.mxu0 %v483_v12  ;;  %v29_v39 = vld [vmem:[%s644_s0] sm:$0xff]  ;;  %v31_v40 = vld [vmem:[%s644_s0 + $0x10] sm:$0xff]  ;;  %v40_v45 = vpack.c.bf16 %v36_v43, %v34_v42  ;;  %v97_v54 = vsub.s32 1, %v92_v50 }
  0x1c   :  { %366 = vmatprep.subr.bf16.mxu1 %v541_v0  ;;  %313 = vmatprep.subr.bf16.mxu0 %v484_v13  ;;  %v37_v44 = vpack.c.bf16 %v31_v40, %v29_v39  ;;  %v33_v46 = vld [vmem:[%s644_s0 + $0x20] sm:$0xff]  ;;  %v35_v47 = vld [vmem:[%s644_s0 + $0x30] sm:$0xff] }
  0x1d   :  { %v39_v48 = vpack.c.bf16 %v35_v47, %v33_v46  ;;  %v89_v53 = vld [vmem:[%s646_s2] sm:$0x7] }
  0x1e   :  { %v102_v55 = vrot.slane %v89_v53, %v101_v51  ;;  %v94_v56 = vrot.slane %v89_v53, %v93_v52  ;;  %v98_v58 = vrot.slane %v89_v53, %v97_v54 }
  0x1f   :  { %367 = vmatpush1.bf16.msra.mxu1 %v486_v14  ;;  %314 = vmatpush1.bf16.msra.mxu0 %v487_v15 }
  0x20   :  { %368 = vmatprep.subr.bf16.mxu1 %v541_v0  ;;  %315 = vmatprep.subr.bf16.mxu0 %v488_v16 }
  0x23   :  { %369 = vmatpush1.bf16.msra.mxu1 %v490_v17  ;;  %316 = vmatpush1.bf16.msra.mxu0 %v491_v18 }
  0x24   :  { %370 = vmatprep.subr.bf16.mxu1 %v541_v0  ;;  %317 = vmatprep.subr.bf16.mxu0 %v492_v19 }
  0x27   :  { %371 = vmatpush1.bf16.msra.mxu1 %v494_v20  ;;  %318 = vmatpush1.bf16.msra.mxu0 %v495_v21 }
  0x28   :  { %372 = vmatprep.subr.bf16.mxu1 %v541_v0  ;;  %319 = vmatprep.subr.bf16.mxu0 %v496_v22 }
  0x2b   :  { %373 = vmatpush1.bf16.msra.mxu1 %v498_v23  ;;  %320 = vmatpush1.bf16.msra.mxu0 %v499_v24 }
  0x2c   :  { %382 = vmatprep.subr.bf16.mxu1 %v541_v0  ;;  %329 = vmatprep.subr.bf16.mxu0 %v500_v27 }
  0x2f   :  { %383 = vmatpush2.bf16.msra.mxu1 %v502_v29  ;;  %330 = vmatpush2.bf16.msra.mxu0 %v503_v30 }
  0x30   :  { %384 = vmatprep.subr.bf16.mxu1 %v541_v0  ;;  %331 = vmatprep.subr.bf16.mxu0 %v504_v31 }
  0x33   :  { %385 = vmatpush2.bf16.msra.mxu1 %v506_v32  ;;  %332 = vmatpush2.bf16.msra.mxu0 %v507_v33 }
  0x34   :  { %386 = vmatprep.subr.bf16.mxu1 %v541_v0  ;;  %333 = vmatprep.subr.bf16.mxu0 %v508_v34 }
  0x37   :  { %387 = vmatpush2.bf16.msra.mxu1 %v510_v35  ;;  %334 = vmatpush2.bf16.msra.mxu0 %v511_v36 }
  0x38   :  { %388 = vmatprep.subr.bf16.mxu1 %v541_v0  ;;  %335 = vmatprep.subr.bf16.mxu0 %v512_v37 }
  0x3b   :  { %389 = vmatpush2.bf16.msra.mxu1 %v514_v38  ;;  %336 = vmatpush2.bf16.msra.mxu0 %v515_v41 }
  0x3e   :  { %391 = vmatmul.mubr.bf16.vlgmr.msra.gmra.mxu1 %v37_v44  ;;  %338 = vmatmul.mubr.bf16.vlgmr.msra.gmra.mxu0 %v37_v44 }
  0x3f   :  { %463 = vmatprep.mubr.msk.bf16.mxu1 %vm298_vm0, %v40_v45  ;;  %461 = vmatprep.mubr.msk.bf16.mxu0 %vm298_vm0, %v40_v45 }
  0x46   :  { %399 = vmatmul.mubr.bf16.gmra.mxu1 %v39_v48  ;;  %348 = vmatmul.mubr.bf16.gmra.mxu0 %v39_v48 }
  0xfe   :  { %v392_v57 = vpop.f32.mrf.mxu1  ;;  %v339_v60 = vpop.f32.mrf.mxu0 }
  0xff   :  { %v393_v59 = vadd.f32 %v392_v57, %v102_v55  ;;  %v340_v61 = vadd.f32 %v339_v60, %v94_v56 }
 0x100   :  { %v394_v62 = vpop.f32.mrf.mxu1  ;;  %v341_v63 = vpop.f32.mrf.mxu0 }
 0x101   :  { %409 = vst [vmem:[%s647_s3 + $0x10] sm:$0xff] %v393_v59  ;;  %407 = vst [vmem:[%s647_s3] sm:$0xff] %v340_v61  ;;  %v342_v0 = vadd.f32 %v341_v63, %v98_v58 }
 0x102   :  { %v395_v1 = vpop.f32.mrf.mxu1  ;;  %v343_v3 = vpop.f32.mrf.mxu0 }
 0x103   :  { %v396_v2 = vadd.f32 %v395_v1, %v102_v55  ;;  %408 = vst [vmem:[%s647_s3 + $0x8] sm:$0xff] %v342_v0  ;;  %v344_v4 = vadd.f32 %v343_v3, %v94_v56 }
 0x104   :  { %v397_v5 = vpop.f32.mrf.mxu1  ;;  %v345_v6 = vpop.f32.mrf.mxu0 }
 0x105   :  { %412 = vst [vmem:[%s647_s3 + $0x28] sm:$0xff] %v396_v2  ;;  %410 = vst [vmem:[%s647_s3 + $0x18] sm:$0xff] %v344_v4  ;;  %v346_v7 = vadd.f32 %v345_v6, %v98_v58 }
 0x106   :  { %v400_v8 = vpop.f32.mrf.mxu1  ;;  %v349_v10 = vpop.f32.mrf.mxu0 }
 0x107   :  { %v401_v9 = vadd.f32 %v400_v8, %v102_v55  ;;  %411 = vst [vmem:[%s647_s3 + $0x20] sm:$0xff] %v346_v7  ;;  %v350_v11 = vadd.f32 %v349_v10, %v94_v56 }
 0x108   :  { %v402_v12 = vpop.f32.mrf.mxu1  ;;  %v351_v13 = vpop.f32.mrf.mxu0 }
 0x109   :  { %415 = vst [vmem:[%s647_s3 + $0x40] sm:$0xff] %v401_v9  ;;  %413 = vst [vmem:[%s647_s3 + $0x30] sm:$0xff] %v350_v11  ;;  %v352_v14 = vadd.f32 %v351_v13, %v98_v58 }
 0x10a   :  { %v403_v15 = vpop.f32.mrf.mxu1  ;;  %v353_v17 = vpop.f32.mrf.mxu0 }
 0x10b   :  { %v404_v16 = vadd.f32 %v403_v15, %v102_v55  ;;  %414 = vst [vmem:[%s647_s3 + $0x38] sm:$0xff] %v352_v14  ;;  %v354_v18 = vadd.f32 %v353_v17, %v94_v56 }
 0x10c   :  { %v405_v19 = vpop.f32.mrf.mxu1  ;;  %v355_v20 = vpop.f32.mrf.mxu0 }
 0x10d   :  { %418 = vst [vmem:[%s647_s3 + $0x58] sm:$0xff] %v404_v16  ;;  %416 = vst [vmem:[%s647_s3 + $0x48] sm:$0xff] %v354_v18  ;;  %v356_v21 = vadd.f32 %v355_v20, %v98_v58 }
 0x10f   :  { %417 = vst [vmem:[%s647_s3 + $0x50] sm:$0xff] %v356_v21 }
 0x110   :  { %423 = vsyncpa [#allocation3], 1 }

// kernel: closed_call.14
= control target key start
LH: loop header
LB: loop body
LE: loop exit
PB: predicated region body
PF: predicated region fallthrough
CT: control target
= control target key end

     0   :  { %vm64_vm0 = vcmask 1041408   ;;  %vm3070_vm1 = vmmov 0   ;;  %s4191_s0 = inlined_call_operand.vmem [shape: bf16[34,384], index: 0, kind: input, shape index: {}]   ;;  %s4192_s3 = inlined_call_operand.vmem [shape: bf16[384,1152], index: 3, kind: input, shape index: {}]   ;;  %s4193_s1 = inlined_call_operand.vmem [shape: f32[1,384], index: 1, kind: input, shape index: {}]   ;;  %s4194_s2 = inlined_call_operand.vmem [shape: f32[1,384], index: 2, kind: input, shape index: {}]   ;;  %s4195_s4 = inlined_call_operand.vmem [shape: f32[1,1152], index: 4, kind: input, shape index: {}]   ;;  %s4196_s5 = inlined_call_operand.vmem [shape: bf16[34,1152], index: 5, kind: output, shape index: {}]  }
   0x1   :  { %v3104_v0 = vld [vmem:[%s4191_s0] sm:$0xff]  ;;  %v3114_v2 = vld [vmem:[%s4191_s0 + $0x18] sm:$0xff]  ;;  %v3123_v7 = vld [vmem:[%s4191_s0 + $0xc] sm:$0xff] }
   0x2   :  { %v3109_v1 = vld [vmem:[%s4191_s0 + $0x8] ss:$24 sps:$4 sm:$0xff]   ;;  %v31_v3 = vunpack.c.l.bf16 %v3104_v0  ;;  %v32_v4 = vunpack.c.h.bf16 %v3104_v0  ;;  %v37_v6 = vunpack.c.l.bf16 %v3114_v2  ;;  %v3128_v8 = vld [vmem:[%s4191_s0 + $0x14] ss:$24 sps:$4 sm:$0xff]   ;;  %v38_v10 = vunpack.c.h.bf16 %v3114_v2  ;;  %v3147_v15 = vld [vmem:[%s4191_s0 + $0x38] sm:$0x1] }
   0x3   :  { %v33_v5 = vunpack.c.l.bf16 %v3109_v1  ;;  %v3133_v9 = vld [vmem:[%s4191_s0 + $0x24] sm:$0xff]  ;;  %v39_v11 = vunpack.c.h.bf16 %v3109_v1  ;;  %v34_v12 = vunpack.c.l.bf16 %v3123_v7  ;;  %v35_v13 = vunpack.c.h.bf16 %v3123_v7  ;;  %v3142_v14 = vld [vmem:[%s4191_s0 + $0x30] sm:$0x11]  ;;  %v2746_v36 = vld [vmem:[%s4192_s3 + $0x1fc] ss:$36 sps:$4 sm:$0xff]  }
   0x4   :  { %v48_v16 = vadd.f32 %v32_v4, %v31_v3  ;;  %v36_v17 = vunpack.c.l.bf16 %v3128_v8  ;;  %v40_v18 = vunpack.c.l.bf16 %v3133_v9  ;;  %v41_v19 = vunpack.c.h.bf16 %v3133_v9  ;;  %v2748_v37 = vld [vmem:[%s4192_s3 + $0x1f8] ss:$36 sps:$4 sm:$0xff]   ;;  %1625 = vmatprep.subr.bf16.mxu0 %v2746_v36  ;;  %v2751_v39 = vld [vmem:[%s4192_s3 + $0x1b0] ss:$36 sps:$4 sm:$0xff]   ;;  %v2754_v41 = vld [vmem:[%s4192_s3 + $0x168] ss:$36 sps:$4 sm:$0xff]  }
   0x5   :  { %v56_v20 = vadd.f32 %v38_v10, %v37_v6  ;;  %v52_v21 = vadd.f32 %v35_v13, %v34_v12  ;;  %v42_v22 = vunpack.c.h.bf16 %v3128_v8  ;;  %v43_v23 = vunpack.c.l.bf16 %v3142_v14  ;;  %v2749_v38 = vld [vmem:[%s4192_s3 + $0x1b4] ss:$36 sps:$4 sm:$0xff]   ;;  %1626 = vmatpush1.bf16.msra.mxu0 %v2748_v37  ;;  %v2752_v40 = vld [vmem:[%s4192_s3 + $0x16c] ss:$36 sps:$4 sm:$0xff]   ;;  %v2755_v42 = vld [vmem:[%s4192_s3 + $0x124] ss:$36 sps:$4 sm:$0xff]  }
   0x6   :  { %v49_v24 = vadd.f32 %v48_v16, %v33_v5  ;;  %v60_v25 = vadd.f32 %v41_v19, %v40_v18  ;;  %v44_v26 = vunpack.c.h.bf16 %v3142_v14  ;;  %v45_v27 = vunpack.c.l.bf16 %v3147_v15  ;;  %1627 = vmatprep.subr.bf16.mxu0 %v2749_v38  ;;  %v2757_v43 = vld [vmem:[%s4192_s3 + $0x120] ss:$36 sps:$4 sm:$0xff]   ;;  %v2774_v46 = vld [vmem:[%s4192_s3 + $0x678] ss:$36 sps:$4 sm:$0xff]   ;;  %v2763_v49 = vld [vmem:[%s4192_s3 + $0x90] ss:$36 sps:$4 sm:$0xff]  }
   0x7   :  { %v57_v28 = vadd.f32 %v56_v20, %v39_v11  ;;  %v65_v29 = vsel %vm64_vm0, %v43_v23, 0.0  ;;  %v53_v30 = vadd.f32 %v52_v21, %v36_v17  ;;  %v2770_v44 = vld [vmem:[%s4192_s3 + $0x67c] ss:$36 sps:$4 sm:$0xff]   ;;  %v2761_v48 = vld [vmem:[%s4192_s3 + $0x94] ss:$36 sps:$4 sm:$0xff]  }
   0x8   :  { %50 = vadd.xlane.f32.xlu0 %v49_v24  ;;  %v66_v31 = vsel %vm64_vm0, %v44_v26, 0.0  ;;  %v61_v32 = vadd.f32 %v60_v25, %v42_v22  ;;  %v68_v34 = vsel %vm64_vm0, %v45_v27, 0.0  ;;  %v2758_v45 = vld [vmem:[%s4192_s3 + $0xdc] ss:$36 sps:$4 sm:$0xff]   ;;  %1686 = vmatprep.subr.bf16.mxu1 %v2770_v44  ;;  %v2764_v50 = vld [vmem:[%s4192_s3 + $0x4c] ss:$36 sps:$4 sm:$0xff]  }
   0x9   :  { %58 = vadd.xlane.f32.xlu1 %v57_v28  ;;  %v67_v33 = vadd.f32 %v66_v31, %v65_v29  ;;  %1628 = vmatpush1.bf16.msra.mxu0 %v2751_v39  ;;  %v2760_v47 = vld [vmem:[%s4192_s3 + $0xd8] ss:$36 sps:$4 sm:$0xff]   ;;  %v2766_v51 = vld [vmem:[%s4192_s3 + $0x48] ss:$36 sps:$4 sm:$0xff]   ;;  %v2769_v53 = vld [vmem:[%s4192_s3] ss:$36 sps:$4 sm:$0xff]  }
   0xa   :  { %1629 = vmatprep.subr.bf16.mxu0 %v2752_v40  ;;  %1687 = vmatpush1.bf16.msra.mxu1 %v2774_v46  ;;  %v2767_v52 = vld [vmem:[%s4192_s3 + $0x4] ss:$36 sps:$4 sm:$0xff]   ;;  %v2772_v54 = vld [vmem:[%s4192_s3 + $0x43c] ss:$36 sps:$4 sm:$0xff]   ;;  %v2778_v46 = vld [vmem:[%s4192_s3 + $0x3f4] ss:$36 sps:$4 sm:$0xff]  }
   0xb   :  { %v69_v35 = vadd.f32 %v68_v34, %v67_v33  ;;  %v2775_v55 = vld [vmem:[%s4192_s3 + $0x438] ss:$36 sps:$4 sm:$0xff]  }
   0xc   :  { %54 = vadd.xlane.f32.xlu0 %v53_v30 }
   0xd   :  { %62 = vadd.xlane.f32.xlu1 %v61_v32  ;;  %1630 = vmatpush1.bf16.msra.mxu0 %v2754_v41 }
   0xe   :  { %1631 = vmatprep.subr.bf16.mxu0 %v2755_v42 }
  0x10   :  { %70 = vadd.xlane.f32.xlu0 %v69_v35 }
  0x11   :  { %1632 = vmatpush1.bf16.msra.mxu0 %v2757_v43 }
  0x12   :  { %1633 = vmatprep.subr.bf16.mxu0 %v2758_v45  ;;  %v2776_v45 = vld [vmem:[%s4192_s3 + $0x634] ss:$36 sps:$4 sm:$0xff]  }
  0x13   :  { %1688 = vmatprep.subr.bf16.mxu1 %v2776_v45 }
  0x15   :  { %1634 = vmatpush1.bf16.msra.mxu0 %v2760_v47  ;;  %v2780_v47 = vld [vmem:[%s4192_s3 + $0x630] ss:$36 sps:$4 sm:$0xff]  }
  0x16   :  { %1635 = vmatprep.subr.bf16.mxu0 %v2761_v48  ;;  %v2781_v48 = vld [vmem:[%s4192_s3 + $0x3f0] ss:$36 sps:$4 sm:$0xff]   ;;  %1689 = vmatpush1.bf16.msra.mxu1 %v2780_v47 }
  0x19   :  { %1636 = vmatpush1.bf16.msra.mxu0 %v2763_v49  ;;  %v2782_v49 = vld [vmem:[%s4192_s3 + $0x5ec] ss:$36 sps:$4 sm:$0xff]  }
  0x1a   :  { %1637 = vmatprep.subr.bf16.mxu0 %v2764_v50  ;;  %v2784_v50 = vld [vmem:[%s4192_s3 + $0x3ac] ss:$36 sps:$4 sm:$0xff]   ;;  %1690 = vmatprep.subr.bf16.mxu1 %v2782_v49 }
  0x1d   :  { %1638 = vmatpush1.bf16.msra.mxu0 %v2766_v51  ;;  %v2786_v51 = vld [vmem:[%s4192_s3 + $0x5e8] ss:$36 sps:$4 sm:$0xff]  }
  0x1e   :  { %1639 = vmatprep.subr.bf16.mxu0 %v2767_v52  ;;  %v2787_v52 = vld [vmem:[%s4192_s3 + $0x3a8] ss:$36 sps:$4 sm:$0xff]   ;;  %1691 = vmatpush1.bf16.msra.mxu1 %v2786_v51  ;;  %v47_v51 = vld [vmem:[%s4194_s2] sm:$0x7] }
  0x21   :  { %1640 = vmatpush1.bf16.msra.mxu0 %v2769_v53  ;;  %v2788_v53 = vld [vmem:[%s4192_s3 + $0x5a4] ss:$36 sps:$4 sm:$0xff]  }
  0x22   :  { %1641 = vmatprep.subr.bf16.mxu0 %v2772_v54  ;;  %v2790_v54 = vld [vmem:[%s4192_s3 + $0x364] ss:$36 sps:$4 sm:$0xff]   ;;  %1692 = vmatprep.subr.bf16.mxu1 %v2788_v53 }
  0x25   :  { %1642 = vmatpush2.bf16.msra.mxu0 %v2775_v55  ;;  %v2792_v55 = vld [vmem:[%s4192_s3 + $0x5a0] ss:$36 sps:$4 sm:$0xff]  }
  0x26   :  { %1643 = vmatprep.subr.bf16.mxu0 %v2778_v46  ;;  %1693 = vmatpush1.bf16.msra.mxu1 %v2792_v55  ;;  %v46_v46 = vld [vmem:[%s4193_s1] sm:$0x7] }
  0x29   :  { %1644 = vmatpush2.bf16.msra.mxu0 %v2781_v48 }
  0x2a   :  { %1645 = vmatprep.subr.bf16.mxu0 %v2784_v50 }
  0x2d   :  { %1646 = vmatpush2.bf16.msra.mxu0 %v2787_v52 }
  0x2e   :  { %1647 = vmatprep.subr.bf16.mxu0 %v2790_v54 }
  0x91   :  { %v51_v56 = vpop.xlane.xlu0 %50 }
  0x92   :  { %v73_v57 = vmul.f32 0.0026041667, %v51_v56  ;;  %v59_v58 = vpop.xlane.xlu1 %58  ;;  %v2793_v56 = vld [vmem:[%s4192_s3 + $0x360] ss:$36 sps:$4 sm:$0xff]  }
  0x93   :  { %v75_v59 = vmul.f32 0.0026041667, %v59_v58  ;;  %1648 = vmatpush2.bf16.msra.mxu0 %v2793_v56  ;;  %v2796_v58 = vld [vmem:[%s4192_s3 + $0x31c] ss:$36 sps:$4 sm:$0xff]  }
  0x94   :  { %v3251_v60 = vsub.f32 %v31_v3, %v73_v57  ;;  %v3255_v61 = vsub.f32 %v32_v4, %v73_v57  ;;  %v3259_v62 = vsub.f32 %v33_v5, %v73_v57  ;;  %v2794_v57 = vld [vmem:[%s4192_s3 + $0x55c] ss:$36 sps:$4 sm:$0xff]   ;;  %1649 = vmatprep.subr.bf16.mxu0 %v2796_v58 }
  0x95   :  { %v3263_v63 = vsub.f32 %v37_v6, %v75_v59  ;;  %v3267_v16 = vsub.f32 %v38_v10, %v75_v59  ;;  %v3271_v3 = vsub.f32 %v39_v11, %v75_v59  ;;  %v55_v20 = vpop.xlane.xlu0 %54  ;;  %v2798_v59 = vld [vmem:[%s4192_s3 + $0x558] ss:$36 sps:$4 sm:$0xff]   ;;  %1694 = vmatprep.subr.bf16.mxu1 %v2794_v57 }
  0x96   :  { %v74_v0 = vmul.f32 0.0026041667, %v55_v20  ;;  %v63_v4 = vpop.xlane.xlu1 %62  ;;  %v93_v21 = vmul.f32 %v3251_v60, %v3251_v60  ;;  %v94_v5 = vmul.f32 %v3255_v61, %v3255_v61  ;;  %v95_v6 = vmul.f32 %v3259_v62, %v3259_v62  ;;  %v2799_v20 = vld [vmem:[%s4192_s3 + $0x318] ss:$36 sps:$4 sm:$0xff]   ;;  %1695 = vmatpush1.bf16.msra.mxu1 %v2798_v59 }
  0x97   :  { %v76_v24 = vmul.f32 0.0026041667, %v63_v4  ;;  %v99_v2 = vmul.f32 %v3263_v63, %v3263_v63  ;;  %v100_v1 = vmul.f32 %v3267_v16, %v3267_v16  ;;  %v101_v10 = vmul.f32 %v3271_v3, %v3271_v3  ;;  %v2802_v4 = vld [vmem:[%s4192_s3 + $0x2d4] ss:$36 sps:$4 sm:$0xff]   ;;  %1650 = vmatpush2.bf16.msra.mxu0 %v2799_v20 }
  0x98   :  { %v3287_v11 = vsub.f32 %v34_v12, %v74_v0  ;;  %v3291_v25 = vsub.f32 %v35_v13, %v74_v0  ;;  %v3295_v28 = vsub.f32 %v36_v17, %v74_v0  ;;  %v108_v29 = vadd.f32 %v94_v5, %v93_v21  ;;  %v2800_v0 = vld [vmem:[%s4192_s3 + $0x514] ss:$36 sps:$4 sm:$0xff]   ;;  %1651 = vmatprep.subr.bf16.mxu0 %v2802_v4 }
  0x99   :  { %v3299_v30 = vsub.f32 %v40_v18, %v76_v24  ;;  %v3303_v31 = vsub.f32 %v41_v19, %v76_v24  ;;  %v3307_v12 = vsub.f32 %v42_v22, %v76_v24  ;;  %v71_v7 = vpop.xlane.xlu0 %70  ;;  %v116_v13 = vadd.f32 %v100_v1, %v99_v2  ;;  %v2804_v21 = vld [vmem:[%s4192_s3 + $0x510] ss:$36 sps:$4 sm:$0xff]   ;;  %1696 = vmatprep.subr.bf16.mxu1 %v2800_v0  ;;  %v2810_v2 = vld [vmem:[%s4192_s3 + $0x4c8] ss:$36 sps:$4 sm:$0xff]  }
  0x9a   :  { %v77_v32 = vmul.f32 0.0026041667, %v71_v7  ;;  %v109_v33 = vadd.f32 %v108_v29, %v95_v6  ;;  %v96_v17 = vmul.f32 %v3287_v11, %v3287_v11  ;;  %v97_v34 = vmul.f32 %v3291_v25, %v3291_v25  ;;  %v2805_v5 = vld [vmem:[%s4192_s3 + $0x2d0] ss:$36 sps:$4 sm:$0xff]   ;;  %1697 = vmatpush1.bf16.msra.mxu1 %v2804_v21  ;;  %v2812_v29 = vld [vmem:[%s4192_s3 + $0x484] ss:$36 sps:$4 sm:$0xff]  }
  0x9b   :  { %v117_v18 = vadd.f32 %v116_v13, %v101_v10  ;;  %v98_v9 = vmul.f32 %v3295_v28, %v3295_v28  ;;  %v102_v19 = vmul.f32 %v3299_v30, %v3299_v30  ;;  %v103_v8 = vmul.f32 %v3303_v31, %v3303_v31  ;;  %v2806_v6 = vld [vmem:[%s4192_s3 + $0x4cc] ss:$36 sps:$4 sm:$0xff]   ;;  %1652 = vmatpush2.bf16.msra.mxu0 %v2805_v5  ;;  %v2814_v7 = vld [vmem:[%s4192_s3 + $0x244] ss:$36 sps:$4 sm:$0xff]  }
  0x9c   :  { %v3321_v22 = vsub.f32 %v43_v23, %v77_v32  ;;  %v3325_v35 = vsub.f32 %v44_v26, %v77_v32  ;;  %v3329_v36 = vsub.f32 %v45_v27, %v77_v32  ;;  %110 = vadd.xlane.f32.xlu1 %v109_v33  ;;  %v112_v37 = vadd.f32 %v97_v34, %v96_v17  ;;  %v2808_v24 = vld [vmem:[%s4192_s3 + $0x28c] ss:$36 sps:$4 sm:$0xff]   ;;  %v2816_v13 = vld [vmem:[%s4192_s3 + $0x480] ss:$36 sps:$4 sm:$0xff]  }
  0x9d   :  { %v104_v38 = vmul.f32 %v3307_v12, %v3307_v12  ;;  %v120_v39 = vadd.f32 %v103_v8, %v102_v19  ;;  %v3068_v1 = vmov 0   ;;  %1698 = vmatprep.subr.bf16.mxu1 %v2806_v6  ;;  %v2811_v10 = vld [vmem:[%s4192_s3 + $0x288] ss:$36 sps:$4 sm:$0xff]   ;;  %1653 = vmatprep.subr.bf16.mxu0 %v2808_v24  ;;  %v2817_v32 = vld [vmem:[%s4192_s3 + $0x240] ss:$36 sps:$4 sm:$0xff]  }
  0x9e   :  { %v113_v40 = vadd.f32 %v112_v37, %v98_v9  ;;  %v105_v41 = vmul.f32 %v3321_v22, %v3321_v22  ;;  %v106_v23 = vmul.f32 %v3325_v35, %v3325_v35  ;;  %v107_v14 = vmul.f32 %v3329_v36, %v3329_v36  ;;  %1718 = vmatprep.mubr.bf16.mxu1 %v3068_v1  ;;  %v2820_v33 = vld [vmem:[%s4192_s3 + $0x204] ss:$36 sps:$4 sm:$0xff]  }
  0x9f   :  { %v121_v15 = vadd.f32 %v120_v39, %v104_v38  ;;  %1699 = vmatpush1.bf16.msra.mxu1 %v2810_v2  ;;  %1654 = vmatpush2.bf16.msra.mxu0 %v2811_v10  ;;  %v2823_v17 = vld [vmem:[%s4192_s3 + $0x684] ss:$36 sps:$4 sm:$0xff]   ;;  %v162_v39 = vlaneseq }
  0xa0   :  { %118 = vadd.xlane.f32.xlu1 %v117_v18  ;;  %114 = vadd.xlane.f32.xlu0 %v113_v40  ;;  %v124_v26 = vsel %vm64_vm0, %v105_v41, 0.0  ;;  %v125_v27 = vsel %vm64_vm0, %v106_v23, 0.0  ;;  %v127_v42 = vsel %vm64_vm0, %v107_v14, 0.0 }
  0xa1   :  { %v126_v43 = vadd.f32 %v125_v27, %v124_v26  ;;  %1700 = vmatprep.subr.bf16.mxu1 %v2812_v29  ;;  %1655 = vmatprep.subr.bf16.mxu0 %v2814_v7  ;;  %v3433_v26 = vshrl.u32 %v162_v39, 7 }
  0xa3   :  { %v128_v44 = vadd.f32 %v127_v42, %v126_v43  ;;  %1701 = vmatpush1.bf16.msra.mxu1 %v2816_v13  ;;  %1656 = vmatpush2.bf16.msra.mxu0 %v2817_v32  ;;  %v3439_v45 = vsub.s32 2, %v3433_v26  ;;  %v3445_v47 = vsub.s32 0, %v3433_v26 }
  0xa4   :  { %122 = vadd.xlane.f32.xlu0 %v121_v15  ;;  %1747 = vmatprep.subr.bf16.mxu1 %v2820_v33 }
  0xa5   :  { %129 = vadd.xlane.f32.xlu1 %v128_v44  ;;  %1808 = vmatprep.subr.bf16.mxu0 %v2823_v17  ;;  %v3436_v44 = vsub.s32 1, %v3433_v26  ;;  %v3449_v49 = vrot.slane %v46_v46, %v3439_v45  ;;  %v3455_v52 = vrot.slane %v46_v46, %v3445_v47  ;;  %v3465_v59 = vrot.slane %v47_v51, %v3439_v45 }
  0xa6   :  { %v3469_v4 = vrot.slane %v47_v51, %v3445_v47 }
  0xa7   :  { %v169_v48 = vrot.slane %v46_v46, %v3436_v44  ;;  %v3461_v57 = vrot.slane %v47_v51, %v3436_v44  ;;  %v2832_v46 = vld [vmem:[%s4192_s3 + $0x174] ss:$36 sps:$4 sm:$0xff]  }
  0xa8   :  { %v2835_v51 = vld [vmem:[%s4192_s3 + $0x5f4] ss:$36 sps:$4 sm:$0xff]  }
 0x125   :  { %v111_v34 = vpop.xlane.xlu1 %110 }
 0x126   :  { %v131_v18 = vmul.f32 0.0026041667, %v111_v34 }
 0x128   :  { %v136_v9 = vadd.f32 1e-06, %v131_v18 }
 0x129   :  { %v119_v19 = vpop.xlane.xlu1 %118  ;;  %v115_v8 = vpop.xlane.xlu0 %114 }
 0x12a   :  { %3058 = vrsqrt.f32 %v136_v9  ;;  %v133_v37 = vmul.f32 0.0026041667, %v119_v19  ;;  %v132_v38 = vmul.f32 0.0026041667, %v115_v8  ;;  %v2818_v9 = vld [vmem:[%s4192_s3 + $0x200] ss:$36 sps:$4 sm:$0xff]  }
 0x12c   :  { %v138_v40 = vadd.f32 1e-06, %v133_v37  ;;  %v137_v41 = vadd.f32 1e-06, %v132_v38  ;;  %v2821_v37 = vld [vmem:[%s4192_s3 + $0x680] ss:$36 sps:$4 sm:$0xff]  }
 0x12d   :  { %v123_v23 = vpop.xlane.xlu0 %122 }
 0x12e   :  { %3060 = vrsqrt.f32 %v138_v40  ;;  %v134_v14 = vmul.f32 0.0026041667, %v123_v23  ;;  %v130_v15 = vpop.xlane.xlu1 %129 }
 0x12f   :  { %3062 = vrsqrt.f32 %v137_v41  ;;  %v135_v27 = vmul.f32 0.0026041667, %v130_v15  ;;  %v2829_v41 = vld [vmem:[%s4192_s3 + $0x63c] ss:$36 sps:$4 sm:$0xff]  }
 0x130   :  { %v139_v42 = vadd.f32 1e-06, %v134_v14 }
 0x131   :  { %v140_v43 = vadd.f32 1e-06, %v135_v27 }
 0x132   :  { %3064 = vrsqrt.f32 %v139_v42 }
 0x133   :  { %3066 = vrsqrt.f32 %v140_v43  ;;  %v2827_v43 = vld [vmem:[%s4192_s3 + $0x638] ss:$36 sps:$4 sm:$0xff]  }
 0x137   :  { %v3059_v50 = vpop.eup %3058 }
 0x138   :  { %v147_v53 = vmul.f32 %v3059_v50, %v3255_v61  ;;  %v148_v54 = vmul.f32 %v3059_v50, %v3259_v62  ;;  %v146_v55 = vmul.f32 %v3059_v50, %v3251_v60 }
 0x13a   :  { %v178_v56 = vmul.f32 %v169_v48, %v147_v53  ;;  %v179_v58 = vmul.f32 %v3449_v49, %v148_v54  ;;  %v177_v0 = vmul.f32 %v3455_v52, %v146_v55 }
 0x13b   :  { %v3061_v20 = vpop.eup %3060 }
 0x13c   :  { %v3063_v61 = vpop.eup %3062  ;;  %v153_v62 = vmul.f32 %v3061_v20, %v3267_v16  ;;  %v209_v6 = vadd.f32 %v3461_v57, %v178_v56  ;;  %v210_v24 = vadd.f32 %v3465_v59, %v179_v58  ;;  %v208_v13 = vadd.f32 %v3469_v4, %v177_v0 }
 0x13d   :  { %v150_v60 = vmul.f32 %v3063_v61, %v3291_v25  ;;  %v151_v21 = vmul.f32 %v3063_v61, %v3295_v28  ;;  %v149_v5 = vmul.f32 %v3063_v61, %v3287_v11  ;;  %v154_v18 = vmul.f32 %v3061_v20, %v3271_v3  ;;  %v2826_v3 = vld [vmem:[%s4192_s3 + $0x1bc] ss:$36 sps:$4 sm:$0xff]  }
 0x13e   :  { %v184_v25 = vmul.f32 %v169_v48, %v153_v62  ;;  %v152_v8 = vmul.f32 %v3061_v20, %v3263_v63  ;;  %v2841_v62 = vld [vmem:[%s4192_s3 + $0x5ac] ss:$36 sps:$4 sm:$0xff]  }
 0x13f   :  { %v3065_v2 = vpop.eup %3064  ;;  %v181_v10 = vmul.f32 %v169_v48, %v150_v60  ;;  %v182_v29 = vmul.f32 %v3449_v49, %v151_v21  ;;  %v180_v7 = vmul.f32 %v3455_v52, %v149_v5  ;;  %v185_v14 = vmul.f32 %v3449_v49, %v154_v18  ;;  %v2839_v5 = vld [vmem:[%s4192_s3 + $0x5a8] ss:$36 sps:$4 sm:$0xff]  }
 0x140   :  { %v3067_v32 = vpop.eup %3066  ;;  %v156_v16 = vmul.f32 %v3065_v2, %v3303_v31  ;;  %v157_v28 = vmul.f32 %v3065_v2, %v3307_v12  ;;  %v155_v11 = vmul.f32 %v3065_v2, %v3299_v30  ;;  %v215_v40 = vadd.f32 %v3461_v57, %v184_v25  ;;  %v2856_v25 = vld [vmem:[%s4192_s3 + $0x54] ss:$36 sps:$4 sm:$0xff]   ;;  %v2860_v18 = vld [vmem:[%s4192_s3 + $0x8] ss:$36 sps:$4 sm:$0xff]  }
 0x141   :  { %v212_v33 = vadd.f32 %v3461_v57, %v181_v10  ;;  %v213_v17 = vadd.f32 %v3465_v59, %v182_v29  ;;  %v211_v34 = vadd.f32 %v3469_v4, %v180_v7  ;;  %v159_v39 = vmul.f32 %v3067_v32, %v3325_v35  ;;  %v2824_v35 = vld [vmem:[%s4192_s3 + $0x1b8] ss:$36 sps:$4 sm:$0xff]   ;;  %v2842_v10 = vld [vmem:[%s4192_s3 + $0xe0] ss:$36 sps:$4 sm:$0xff]  }
 0x142   :  { %v187_v19 = vmul.f32 %v169_v48, %v156_v16  ;;  %v188_v31 = vmul.f32 %v3449_v49, %v157_v28  ;;  %v186_v23 = vmul.f32 %v3455_v52, %v155_v11  ;;  %v183_v42 = vmul.f32 %v3455_v52, %v152_v8  ;;  %v2851_v16 = vld [vmem:[%s4192_s3 + $0x518] ss:$36 sps:$4 sm:$0xff]   ;;  %v2854_v11 = vld [vmem:[%s4192_s3 + $0x50] ss:$36 sps:$4 sm:$0xff]   ;;  %v2866_v8 = vld [vmem:[%s4192_s3 + $0x440] ss:$36 sps:$4 sm:$0xff]  }
 0x143   :  { %v3492_v12 = vpack.c.bf16 %v212_v33, %v209_v6  ;;  %v3494_v30 = vpack.c.bf16 %v213_v17, %v210_v24  ;;  %v3499_v38 = vpack.c.bf16 %v211_v34, %v208_v13  ;;  %v190_v15 = vmul.f32 %v169_v48, %v159_v39  ;;  %v2847_v24 = vld [vmem:[%s4192_s3 + $0x564] ss:$36 sps:$4 sm:$0xff]   ;;  %v2853_v13 = vld [vmem:[%s4192_s3 + $0x51c] ss:$36 sps:$4 sm:$0xff]   ;;  %v2859_v28 = vld [vmem:[%s4192_s3 + $0x4d4] ss:$36 sps:$4 sm:$0xff]  }
 0x144   :  { %v218_v63 = vadd.f32 %v3461_v57, %v187_v19  ;;  %v219_v48 = vadd.f32 %v3465_v59, %v188_v31  ;;  %v160_v50 = vmul.f32 %v3067_v32, %v3329_v36  ;;  %v217_v53 = vadd.f32 %v3469_v4, %v186_v23  ;;  %v2830_v36 = vld [vmem:[%s4192_s3 + $0x170] ss:$36 sps:$4 sm:$0xff]   ;;  %v2868_v19 = vld [vmem:[%s4192_s3 + $0x444] ss:$36 sps:$4 sm:$0xff]   ;;  %v2883_v23 = vld [vmem:[%s4192_s3 + $0x17c] ss:$36 sps:$4 sm:$0xff]  }
 0x145   :  { %1657 = vmatprep.mubr.bf16.mxu0 %v3492_v12  ;;  %1719 = vmatmul.mubr.bf16.vlgmr.msra.gmra.mxu1 %v3494_v30  ;;  %v158_v54 = vmul.f32 %v3067_v32, %v3321_v22  ;;  %v216_v55 = vadd.f32 %v3465_v59, %v185_v14  ;;  %v221_v56 = vadd.f32 %v3461_v57, %v190_v15  ;;  %v2833_v22 = vld [vmem:[%s4192_s3 + $0x5f0] ss:$36 sps:$4 sm:$0xff]   ;;  %v2848_v32 = vld [vmem:[%s4192_s3 + $0x98] ss:$36 sps:$4 sm:$0xff]   ;;  %v2877_v39 = vld [vmem:[%s4192_s3 + $0x1c4] ss:$36 sps:$4 sm:$0xff]  }
 0x146   :  { %1748 = vmatpush1.bf16.msra.mxu1 %v2818_v9  ;;  %1658 = vmatmul.mubr.bf16.vlgmr.msra.gmra.mxu0 %v3499_v38  ;;  %v3518_v27 = vpack.c.bf16 %v218_v63, %v215_v40  ;;  %v214_v58 = vadd.f32 %v3469_v4, %v183_v42  ;;  %v191_v0 = vmul.f32 %v3449_v49, %v160_v50  ;;  %v2838_v57 = vld [vmem:[%s4192_s3 + $0x12c] ss:$36 sps:$4 sm:$0xff]   ;;  %v2872_v40 = vld [vmem:[%s4192_s3 + $0x3f8] ss:$36 sps:$4 sm:$0xff]   ;;  %v2875_v63 = vld [vmem:[%s4192_s3 + $0x1c0] ss:$36 sps:$4 sm:$0xff]  }
 0x147   :  { %1809 = vmatpush1.bf16.msra.mxu0 %v2821_v37  ;;  %1749 = vmatprep.subr.bf16.mxu1 %v2826_v3  ;;  %v3542_v20 = vpack.c.bf16 %v219_v48, %v216_v55  ;;  %v189_v60 = vmul.f32 %v3455_v52, %v158_v54  ;;  %v3558_v21 = vpack.c.bf16 %v221_v56, %v221_v56  ;;  %v2836_v49 = vld [vmem:[%s4192_s3 + $0x128] ss:$36 sps:$4 sm:$0xff]   ;;  %v2857_v33 = vld [vmem:[%s4192_s3 + $0x4d0] ss:$36 sps:$4 sm:$0xff]   ;;  %v2874_v3 = vld [vmem:[%s4192_s3 + $0x3fc] ss:$36 sps:$4 sm:$0xff]  }
 0x148   :  { %1667 = vmatprep.mubr.bf16.mxu0 %v3518_v27  ;;  %1810 = vmatprep.subr.bf16.mxu0 %v2829_v41  ;;  %v3548_v61 = vpack.c.bf16 %v217_v53, %v214_v58  ;;  %v2844_v52 = vld [vmem:[%s4192_s3 + $0xe4] ss:$36 sps:$4 sm:$0xff]   ;;  %v222_v6 = vadd.f32 %v3465_v59, %v191_v0  ;;  %v2862_v17 = vld [vmem:[%s4192_s3 + $0xc] ss:$36 sps:$4 sm:$0xff]   ;;  %v2880_v41 = vld [vmem:[%s4192_s3 + $0x3b4] ss:$36 sps:$4 sm:$0xff]  }
 0x149   :  { %1728 = vmatprep.mubr.bf16.mxu1 %v3068_v1  ;;  %v220_v2 = vadd.f32 %v3469_v4, %v189_v60  ;;  %v2845_v59 = vld [vmem:[%s4192_s3 + $0x560] ss:$36 sps:$4 sm:$0xff]   ;;  %v2865_v34 = vld [vmem:[%s4192_s3 + $0x48c] ss:$36 sps:$4 sm:$0xff]   ;;  %v2881_v15 = vld [vmem:[%s4192_s3 + $0x178] ss:$36 sps:$4 sm:$0xff]  }
 0x14a   :  { %1750 = vmatpush1.bf16.msra.mxu1 %v2824_v35  ;;  %v3580_v29 = vpack.c.bf16 %v222_v6, %v222_v6  ;;  %v2850_v4 = vld [vmem:[%s4192_s3 + $0x9c] ss:$36 sps:$4 sm:$0xff]   ;;  %v2863_v9 = vld [vmem:[%s4192_s3 + $0x488] ss:$36 sps:$4 sm:$0xff]   ;;  %v2878_v14 = vld [vmem:[%s4192_s3 + $0x3b0] ss:$36 sps:$4 sm:$0xff]  }
 0x14b   :  { %1811 = vmatpush1.bf16.msra.mxu0 %v2827_v43  ;;  %1751 = vmatprep.subr.bf16.mxu1 %v2832_v46  ;;  %v3585_v7 = vpack.c.bf16 %v220_v2, %v220_v2  ;;  %v2871_v31 = vld [vmem:[%s4192_s3 + $0x20c] ss:$36 sps:$4 sm:$0xff]   ;;  %v2889_v42 = vld [vmem:[%s4192_s3 + $0x134] ss:$36 sps:$4 sm:$0xff]   ;;  %v2892_v48 = vld [vmem:[%s4192_s3 + $0x324] ss:$36 sps:$4 sm:$0xff]  }
 0x14c   :  { %1812 = vmatprep.subr.bf16.mxu0 %v2835_v51  ;;  %v2869_v37 = vld [vmem:[%s4192_s3 + $0x208] ss:$36 sps:$4 sm:$0xff]   ;;  %v2887_v46 = vld [vmem:[%s4192_s3 + $0x130] ss:$36 sps:$4 sm:$0xff]   ;;  %v2890_v51 = vld [vmem:[%s4192_s3 + $0x320] ss:$36 sps:$4 sm:$0xff]  }
 0x14d   :  { %1729 = vmatmul.mubr.bf16.gmra.mxu1 %v3542_v20  ;;  %v2886_v35 = vld [vmem:[%s4192_s3 + $0x36c] ss:$36 sps:$4 sm:$0xff]   ;;  %v2898_v54 = vld [vmem:[%s4192_s3 + $0x2dc] ss:$36 sps:$4 sm:$0xff]   ;;  %v2901_v55 = vld [vmem:[%s4192_s3 + $0xa4] ss:$36 sps:$4 sm:$0xff]  }
 0x14e   :  { %1752 = vmatpush1.bf16.msra.mxu1 %v2830_v36  ;;  %1668 = vmatmul.mubr.bf16.gmra.mxu0 %v3548_v61  ;;  %v2884_v43 = vld [vmem:[%s4192_s3 + $0x368] ss:$36 sps:$4 sm:$0xff]   ;;  %v2896_v56 = vld [vmem:[%s4192_s3 + $0x2d8] ss:$36 sps:$4 sm:$0xff]   ;;  %v2899_v36 = vld [vmem:[%s4192_s3 + $0xa0] ss:$36 sps:$4 sm:$0xff]  }
 0x14f   :  { %1813 = vmatpush1.bf16.msra.mxu0 %v2833_v22  ;;  %1677 = vmatprep.mubr.bf16.mxu0 %v3558_v21  ;;  %v2895_v50 = vld [vmem:[%s4192_s3 + $0xec] ss:$36 sps:$4 sm:$0xff]   ;;  %v2904_v58 = vld [vmem:[%s4192_s3 + $0x294] ss:$36 sps:$4 sm:$0xff]   ;;  %v2907_v22 = vld [vmem:[%s4192_s3 + $0x5c] ss:$36 sps:$4 sm:$0xff]  }
 0x150   :  { %1753 = vmatprep.subr.bf16.mxu1 %v2838_v57  ;;  %1814 = vmatprep.subr.bf16.mxu0 %v2841_v62  ;;  %v2893_v53 = vld [vmem:[%s4192_s3 + $0xe8] ss:$36 sps:$4 sm:$0xff]   ;;  %v2902_v0 = vld [vmem:[%s4192_s3 + $0x290] ss:$36 sps:$4 sm:$0xff]   ;;  %v2905_v57 = vld [vmem:[%s4192_s3 + $0x58] ss:$36 sps:$4 sm:$0xff]  }
 0x151   :  { %1738 = vmatprep.mubr.bf16.mxu1 %v3068_v1  ;;  %v2910_v62 = vld [vmem:[%s4192_s3 + $0x24c] ss:$36 sps:$4 sm:$0xff]   ;;  %v2913_v60 = vld [vmem:[%s4192_s3 + $0x14] ss:$36 sps:$4 sm:$0xff]  }
 0x152   :  { %1754 = vmatpush1.bf16.msra.mxu1 %v2836_v49  ;;  %v2908_v49 = vld [vmem:[%s4192_s3 + $0x248] ss:$36 sps:$4 sm:$0xff]  }
 0x153   :  { %1815 = vmatpush1.bf16.msra.mxu0 %v2839_v5  ;;  %1755 = vmatprep.subr.bf16.mxu1 %v2844_v52  ;;  %v2911_v5 = vld [vmem:[%s4192_s3 + $0x10] ss:$36 sps:$4 sm:$0xff]   ;;  %v2917_v2 = vld [vmem:[%s4192_s3 + $0x448] ss:$36 sps:$4 sm:$0xff]  }
 0x154   :  { %1816 = vmatprep.subr.bf16.mxu0 %v2847_v24  ;;  %v2916_v52 = vld [vmem:[%s4192_s3 + $0x68c] ss:$36 sps:$4 sm:$0xff]  }
 0x155   :  { %1739 = vmatmul.mubr.bf16.gmra.mxu1 %v3580_v29  ;;  %v2919_v6 = vld [vmem:[%s4192_s3 + $0x44c] ss:$36 sps:$4 sm:$0xff]  }
 0x156   :  { %1756 = vmatpush1.bf16.msra.mxu1 %v2842_v10  ;;  %1678 = vmatmul.mubr.bf16.gmra.mxu0 %v3585_v7  ;;  %v2914_v24 = vld [vmem:[%s4192_s3 + $0x688] ss:$36 sps:$4 sm:$0xff]  }
 0x157   :  { %1779 = vmatprep.mubr.bf16.mxu1 %v3492_v12  ;;  %1817 = vmatpush1.bf16.msra.mxu0 %v2845_v59  ;;  %v2922_v10 = vld [vmem:[%s4192_s3 + $0x644] ss:$36 sps:$4 sm:$0xff]  }
 0x158   :  { %1757 = vmatprep.subr.bf16.mxu1 %v2850_v4  ;;  %1818 = vmatprep.subr.bf16.mxu0 %v2853_v13  ;;  %v2925_v59 = vld [vmem:[%s4192_s3 + $0x404] ss:$36 sps:$4 sm:$0xff]  }
 0x159   :  { %1840 = vmatprep.mubr.bf16.mxu0 %v3068_v1  ;;  %v2920_v4 = vld [vmem:[%s4192_s3 + $0x640] ss:$36 sps:$4 sm:$0xff]  }
 0x15a   :  { %1758 = vmatpush1.bf16.msra.mxu1 %v2848_v32  ;;  %v2923_v13 = vld [vmem:[%s4192_s3 + $0x400] ss:$36 sps:$4 sm:$0xff]  }
 0x15b   :  { %1819 = vmatpush1.bf16.msra.mxu0 %v2851_v16  ;;  %1759 = vmatprep.subr.bf16.mxu1 %v2856_v25  ;;  %v2928_v32 = vld [vmem:[%s4192_s3 + $0x5fc] ss:$36 sps:$4 sm:$0xff]  }
 0x15c   :  { %1820 = vmatprep.subr.bf16.mxu0 %v2859_v28  ;;  %v2931_v16 = vld [vmem:[%s4192_s3 + $0x3bc] ss:$36 sps:$4 sm:$0xff]  }
 0x15d   :  { %v2926_v25 = vld [vmem:[%s4192_s3 + $0x5f8] ss:$36 sps:$4 sm:$0xff]  }
 0x15e   :  { %1760 = vmatpush1.bf16.msra.mxu1 %v2854_v11  ;;  %v2929_v28 = vld [vmem:[%s4192_s3 + $0x3b8] ss:$36 sps:$4 sm:$0xff]  }
 0x15f   :  { %1821 = vmatpush1.bf16.msra.mxu0 %v2857_v33  ;;  %1761 = vmatprep.subr.bf16.mxu1 %v2862_v17  ;;  %v2934_v11 = vld [vmem:[%s4192_s3 + $0x5b4] ss:$36 sps:$4 sm:$0xff]  }
 0x160   :  { %1822 = vmatprep.subr.bf16.mxu0 %v2865_v34  ;;  %v2937_v33 = vld [vmem:[%s4192_s3 + $0x374] ss:$36 sps:$4 sm:$0xff]  }
 0x161   :  { %v2932_v17 = vld [vmem:[%s4192_s3 + $0x5b0] ss:$36 sps:$4 sm:$0xff]  }
 0x162   :  { %1762 = vmatpush1.bf16.msra.mxu1 %v2860_v18  ;;  %v2935_v34 = vld [vmem:[%s4192_s3 + $0x370] ss:$36 sps:$4 sm:$0xff]  }
 0x163   :  { %1823 = vmatpush1.bf16.msra.mxu0 %v2863_v9  ;;  %1763 = vmatprep.subr.bf16.mxu1 %v2868_v19  ;;  %v2940_v18 = vld [vmem:[%s4192_s3 + $0x56c] ss:$36 sps:$4 sm:$0xff]  }
 0x164   :  { %1869 = vmatprep.subr.bf16.mxu0 %v2871_v31  ;;  %v2943_v9 = vld [vmem:[%s4192_s3 + $0x32c] ss:$36 sps:$4 sm:$0xff]  }
 0x165   :  { %v2938_v19 = vld [vmem:[%s4192_s3 + $0x568] ss:$36 sps:$4 sm:$0xff]  }
 0x166   :  { %1764 = vmatpush2.bf16.msra.mxu1 %v2866_v8  ;;  %1841 = vmatmul.mubr.bf16.vlgmr.msra.gmra.mxu0 %v3494_v30  ;;  %v2941_v31 = vld [vmem:[%s4192_s3 + $0x328] ss:$36 sps:$4 sm:$0xff]  }
 0x167   :  { %1870 = vmatpush1.bf16.msra.mxu0 %v2869_v37  ;;  %1765 = vmatprep.subr.bf16.mxu1 %v2874_v3  ;;  %v2946_v8 = vld [vmem:[%s4192_s3 + $0x524] ss:$36 sps:$4 sm:$0xff]  }
 0x168   :  { %1871 = vmatprep.subr.bf16.mxu0 %v2877_v39  ;;  %1850 = vmatprep.mubr.bf16.mxu0 %v3068_v1  ;;  %v2949_v37 = vld [vmem:[%s4192_s3 + $0x2e4] ss:$36 sps:$4 sm:$0xff]  }
 0x169   :  { %v2944_v3 = vld [vmem:[%s4192_s3 + $0x520] ss:$36 sps:$4 sm:$0xff]  }
 0x16a   :  { %1766 = vmatpush2.bf16.msra.mxu1 %v2872_v40  ;;  %v2947_v39 = vld [vmem:[%s4192_s3 + $0x2e0] ss:$36 sps:$4 sm:$0xff]  }
 0x16b   :  { %1872 = vmatpush1.bf16.msra.mxu0 %v2875_v63  ;;  %1767 = vmatprep.subr.bf16.mxu1 %v2880_v41  ;;  %v2952_v40 = vld [vmem:[%s4192_s3 + $0x4dc] ss:$36 sps:$4 sm:$0xff]  }
 0x16c   :  { %1873 = vmatprep.subr.bf16.mxu0 %v2883_v23  ;;  %v2955_v63 = vld [vmem:[%s4192_s3 + $0x29c] ss:$36 sps:$4 sm:$0xff]  }
 0x16d   :  { %v2950_v41 = vld [vmem:[%s4192_s3 + $0x4d8] ss:$36 sps:$4 sm:$0xff]  }
 0x16e   :  { %1768 = vmatpush2.bf16.msra.mxu1 %v2878_v14  ;;  %1851 = vmatmul.mubr.bf16.gmra.mxu0 %v3542_v20  ;;  %v2953_v23 = vld [vmem:[%s4192_s3 + $0x298] ss:$36 sps:$4 sm:$0xff]  }
 0x16f   :  { %1874 = vmatpush1.bf16.msra.mxu0 %v2881_v15  ;;  %1769 = vmatprep.subr.bf16.mxu1 %v2886_v35  ;;  %v2958_v14 = vld [vmem:[%s4192_s3 + $0x494] ss:$36 sps:$4 sm:$0xff]  }
 0x170   :  { %1875 = vmatprep.subr.bf16.mxu0 %v2889_v42  ;;  %1860 = vmatprep.mubr.bf16.mxu0 %v3068_v1  ;;  %v2961_v15 = vld [vmem:[%s4192_s3 + $0x254] ss:$36 sps:$4 sm:$0xff]  }
 0x171   :  { %v2956_v35 = vld [vmem:[%s4192_s3 + $0x490] ss:$36 sps:$4 sm:$0xff]  }
 0x172   :  { %1770 = vmatpush2.bf16.msra.mxu1 %v2884_v43  ;;  %v2959_v42 = vld [vmem:[%s4192_s3 + $0x250] ss:$36 sps:$4 sm:$0xff]  }
 0x173   :  { %1876 = vmatpush1.bf16.msra.mxu0 %v2887_v46  ;;  %1771 = vmatprep.subr.bf16.mxu1 %v2892_v48  ;;  %v2964_v43 = vld [vmem:[%s4192_s3 + $0x214] ss:$36 sps:$4 sm:$0xff]  }
 0x174   :  { %1877 = vmatprep.subr.bf16.mxu0 %v2895_v50  ;;  %v2967_v46 = vld [vmem:[%s4192_s3 + $0x694] ss:$36 sps:$4 sm:$0xff]  }
 0x175   :  { %v2962_v48 = vld [vmem:[%s4192_s3 + $0x210] ss:$36 sps:$4 sm:$0xff]  }
 0x176   :  { %1772 = vmatpush2.bf16.msra.mxu1 %v2890_v51  ;;  %1861 = vmatmul.mubr.bf16.gmra.mxu0 %v3580_v29  ;;  %v2965_v50 = vld [vmem:[%s4192_s3 + $0x690] ss:$36 sps:$4 sm:$0xff]  }
 0x177   :  { %1878 = vmatpush1.bf16.msra.mxu0 %v2893_v53  ;;  %1901 = vmatprep.mubr.bf16.mxu0 %v3492_v12  ;;  %v2970_v51 = vld [vmem:[%s4192_s3 + $0x1cc] ss:$36 sps:$4 sm:$0xff]  }
 0x178   :  { %1773 = vmatprep.subr.bf16.mxu1 %v2898_v54  ;;  %1879 = vmatprep.subr.bf16.mxu0 %v2901_v55  ;;  %v2973_v53 = vld [vmem:[%s4192_s3 + $0x64c] ss:$36 sps:$4 sm:$0xff]  }
 0x179   :  { %v2968_v54 = vld [vmem:[%s4192_s3 + $0x1c8] ss:$36 sps:$4 sm:$0xff]  }
 0x17a   :  { %1774 = vmatpush2.bf16.msra.mxu1 %v2896_v56  ;;  %v2971_v55 = vld [vmem:[%s4192_s3 + $0x648] ss:$36 sps:$4 sm:$0xff]  }
 0x17b   :  { %1880 = vmatpush1.bf16.msra.mxu0 %v2899_v36  ;;  %1775 = vmatprep.subr.bf16.mxu1 %v2904_v58  ;;  %v2976_v56 = vld [vmem:[%s4192_s3 + $0x184] ss:$36 sps:$4 sm:$0xff]  }
 0x17c   :  { %1881 = vmatprep.subr.bf16.mxu0 %v2907_v22  ;;  %v2979_v36 = vld [vmem:[%s4192_s3 + $0x604] ss:$36 sps:$4 sm:$0xff]  }
 0x17d   :  { %v2974_v58 = vld [vmem:[%s4192_s3 + $0x180] ss:$36 sps:$4 sm:$0xff]  }
 0x17e   :  { %1776 = vmatpush2.bf16.msra.mxu1 %v2902_v0  ;;  %v2977_v22 = vld [vmem:[%s4192_s3 + $0x600] ss:$36 sps:$4 sm:$0xff]  }
 0x17f   :  { %1882 = vmatpush1.bf16.msra.mxu0 %v2905_v57  ;;  %1777 = vmatprep.subr.bf16.mxu1 %v2910_v62  ;;  %v2982_v0 = vld [vmem:[%s4192_s3 + $0x13c] ss:$36 sps:$4 sm:$0xff]  }
 0x180   :  { %1883 = vmatprep.subr.bf16.mxu0 %v2913_v60  ;;  %v2985_v57 = vld [vmem:[%s4192_s3 + $0x5bc] ss:$36 sps:$4 sm:$0xff]  }
 0x181   :  { %v2980_v62 = vld [vmem:[%s4192_s3 + $0x138] ss:$36 sps:$4 sm:$0xff]  }
 0x182   :  { %1778 = vmatpush2.bf16.msra.mxu1 %v2908_v49  ;;  %v2983_v60 = vld [vmem:[%s4192_s3 + $0x5b8] ss:$36 sps:$4 sm:$0xff]  }
 0x183   :  { %1884 = vmatpush1.bf16.msra.mxu0 %v2911_v5  ;;  %1930 = vmatprep.subr.bf16.mxu1 %v2916_v52  ;;  %v2988_v49 = vld [vmem:[%s4192_s3 + $0xf4] ss:$36 sps:$4 sm:$0xff]  }
 0x184   :  { %1885 = vmatprep.subr.bf16.mxu0 %v2919_v6  ;;  %v2991_v5 = vld [vmem:[%s4192_s3 + $0x574] ss:$36 sps:$4 sm:$0xff]  }
 0x185   :  { %1780 = vmatmul.mubr.bf16.vlgmr.msra.gmra.mxu1 %v3499_v38  ;;  %v2986_v52 = vld [vmem:[%s4192_s3 + $0xf0] ss:$36 sps:$4 sm:$0xff]  }
 0x186   :  { %1789 = vmatprep.mubr.bf16.mxu1 %v3518_v27  ;;  %1931 = vmatpush1.bf16.msra.mxu1 %v2914_v24  ;;  %v2989_v6 = vld [vmem:[%s4192_s3 + $0x570] ss:$36 sps:$4 sm:$0xff]  }
 0x187   :  { %1886 = vmatpush2.bf16.msra.mxu0 %v2917_v2  ;;  %1932 = vmatprep.subr.bf16.mxu1 %v2922_v10  ;;  %v2994_v24 = vld [vmem:[%s4192_s3 + $0xac] ss:$36 sps:$4 sm:$0xff]  }
 0x188   :  { %1887 = vmatprep.subr.bf16.mxu0 %v2925_v59  ;;  %v2997_v2 = vld [vmem:[%s4192_s3 + $0x52c] ss:$36 sps:$4 sm:$0xff]  }
 0x189   :  { %v2992_v10 = vld [vmem:[%s4192_s3 + $0xa8] ss:$36 sps:$4 sm:$0xff]  }
 0x18a   :  { %1933 = vmatpush1.bf16.msra.mxu1 %v2920_v4  ;;  %v2995_v59 = vld [vmem:[%s4192_s3 + $0x528] ss:$36 sps:$4 sm:$0xff]  }
 0x18b   :  { %1888 = vmatpush2.bf16.msra.mxu0 %v2923_v13  ;;  %1934 = vmatprep.subr.bf16.mxu1 %v2928_v32  ;;  %v3000_v4 = vld [vmem:[%s4192_s3 + $0x64] ss:$36 sps:$4 sm:$0xff]  }
 0x18c   :  { %1889 = vmatprep.subr.bf16.mxu0 %v2931_v16  ;;  %v3003_v13 = vld [vmem:[%s4192_s3 + $0x4e4] ss:$36 sps:$4 sm:$0xff]  }
 0x18d   :  { %1790 = vmatmul.mubr.bf16.gmra.mxu1 %v3548_v61  ;;  %v2998_v32 = vld [vmem:[%s4192_s3 + $0x60] ss:$36 sps:$4 sm:$0xff]  }
 0x18e   :  { %1799 = vmatprep.mubr.bf16.mxu1 %v3558_v21  ;;  %1935 = vmatpush1.bf16.msra.mxu1 %v2926_v25  ;;  %v3001_v16 = vld [vmem:[%s4192_s3 + $0x4e0] ss:$36 sps:$4 sm:$0xff]  }
 0x18f   :  { %1890 = vmatpush2.bf16.msra.mxu0 %v2929_v28  ;;  %1936 = vmatprep.subr.bf16.mxu1 %v2934_v11  ;;  %v3006_v25 = vld [vmem:[%s4192_s3 + $0x1c] ss:$36 sps:$4 sm:$0xff]  }
 0x190   :  { %1891 = vmatprep.subr.bf16.mxu0 %v2937_v33  ;;  %v3009_v28 = vld [vmem:[%s4192_s3 + $0x49c] ss:$36 sps:$4 sm:$0xff]  }
 0x191   :  { %v3004_v11 = vld [vmem:[%s4192_s3 + $0x18] ss:$36 sps:$4 sm:$0xff]  }
 0x192   :  { %1937 = vmatpush1.bf16.msra.mxu1 %v2932_v17  ;;  %v3007_v33 = vld [vmem:[%s4192_s3 + $0x498] ss:$36 sps:$4 sm:$0xff]  }
 0x193   :  { %1892 = vmatpush2.bf16.msra.mxu0 %v2935_v34  ;;  %1938 = vmatprep.subr.bf16.mxu1 %v2940_v18  ;;  %v3012_v17 = vld [vmem:[%s4192_s3 + $0x454] ss:$36 sps:$4 sm:$0xff]  }
 0x194   :  { %1893 = vmatprep.subr.bf16.mxu0 %v2943_v9  ;;  %v3013_v34 = vld [vmem:[%s4192_s3 + $0x458] ss:$36 sps:$4 sm:$0xff]   ;;  %v3010_v18 = vld [vmem:[%s4192_s3 + $0x450] ss:$36 sps:$4 sm:$0xff]  }
 0x195   :  { %1800 = vmatmul.mubr.bf16.gmra.mxu1 %v3585_v7  ;;  %v3014_v9 = vld [vmem:[%s4192_s3 + $0x218] ss:$36 sps:$4 sm:$0xff]  }
 0x196   :  { %1939 = vmatpush1.bf16.msra.mxu1 %v2938_v19  ;;  %1962 = vmatprep.mubr.bf16.mxu1 %v3068_v1  ;;  %v3017_v19 = vld [vmem:[%s4192_s3 + $0x40c] ss:$36 sps:$4 sm:$0xff]  }
 0x197   :  { %1894 = vmatpush2.bf16.msra.mxu0 %v2941_v31  ;;  %1940 = vmatprep.subr.bf16.mxu1 %v2946_v8  ;;  %v3018_v31 = vld [vmem:[%s4192_s3 + $0x410] ss:$36 sps:$4 sm:$0xff]   ;;  %v3015_v8 = vld [vmem:[%s4192_s3 + $0x408] ss:$36 sps:$4 sm:$0xff]  }
 0x198   :  { %1895 = vmatprep.subr.bf16.mxu0 %v2949_v37  ;;  %v3019_v37 = vld [vmem:[%s4192_s3 + $0x1d0] ss:$36 sps:$4 sm:$0xff]  }
 0x19a   :  { %1941 = vmatpush1.bf16.msra.mxu1 %v2944_v3  ;;  %v3022_v3 = vld [vmem:[%s4192_s3 + $0x3c4] ss:$36 sps:$4 sm:$0xff]  }
 0x19b   :  { %1896 = vmatpush2.bf16.msra.mxu0 %v2947_v39  ;;  %1942 = vmatprep.subr.bf16.mxu1 %v2952_v40  ;;  %v3023_v39 = vld [vmem:[%s4192_s3 + $0x3c8] ss:$36 sps:$4 sm:$0xff]   ;;  %v3020_v40 = vld [vmem:[%s4192_s3 + $0x3c0] ss:$36 sps:$4 sm:$0xff]  }
 0x19c   :  { %1897 = vmatprep.subr.bf16.mxu0 %v2955_v63  ;;  %v3024_v63 = vld [vmem:[%s4192_s3 + $0x188] ss:$36 sps:$4 sm:$0xff]  }
 0x19e   :  { %1943 = vmatpush1.bf16.msra.mxu1 %v2950_v41  ;;  %v3027_v41 = vld [vmem:[%s4192_s3 + $0x37c] ss:$36 sps:$4 sm:$0xff]  }
 0x19f   :  { %1898 = vmatpush2.bf16.msra.mxu0 %v2953_v23  ;;  %1944 = vmatprep.subr.bf16.mxu1 %v2958_v14  ;;  %v3028_v23 = vld [vmem:[%s4192_s3 + $0x380] ss:$36 sps:$4 sm:$0xff]   ;;  %v3025_v14 = vld [vmem:[%s4192_s3 + $0x378] ss:$36 sps:$4 sm:$0xff]  }
 0x1a0   :  { %1899 = vmatprep.subr.bf16.mxu0 %v2961_v15  ;;  %v3029_v15 = vld [vmem:[%s4192_s3 + $0x140] ss:$36 sps:$4 sm:$0xff]  }
 0x1a2   :  { %1945 = vmatpush1.bf16.msra.mxu1 %v2956_v35  ;;  %v3032_v35 = vld [vmem:[%s4192_s3 + $0x334] ss:$36 sps:$4 sm:$0xff]  }
 0x1a3   :  { %1900 = vmatpush2.bf16.msra.mxu0 %v2959_v42  ;;  %1991 = vmatprep.subr.bf16.mxu1 %v2964_v43  ;;  %v3033_v42 = vld [vmem:[%s4192_s3 + $0x338] ss:$36 sps:$4 sm:$0xff]   ;;  %v3030_v43 = vld [vmem:[%s4192_s3 + $0x330] ss:$36 sps:$4 sm:$0xff]  }
 0x1a4   :  { %2052 = vmatprep.subr.bf16.mxu0 %v2967_v46  ;;  %v3034_v46 = vld [vmem:[%s4192_s3 + $0xf8] ss:$36 sps:$4 sm:$0xff]  }
 0x1a5   :  { %1963 = vmatmul.mubr.bf16.vlgmr.msra.gmra.mxu1 %v3494_v30 }
 0x1a6   :  { %1902 = vmatmul.mubr.bf16.vlgmr.msra.gmra.mxu0 %v3499_v38  ;;  %1992 = vmatpush1.bf16.msra.mxu1 %v2962_v48  ;;  %v3038_v48 = vld [vmem:[%s4192_s3 + $0x2f0] ss:$36 sps:$4 sm:$0xff]  }
 0x1a7   :  { %1911 = vmatprep.mubr.bf16.mxu0 %v3518_v27  ;;  %2053 = vmatpush1.bf16.msra.mxu0 %v2965_v50  ;;  %v3035_v50 = vld [vmem:[%s4192_s3 + $0x2e8] ss:$36 sps:$4 sm:$0xff]  }
 0x1a8   :  { %1993 = vmatprep.subr.bf16.mxu1 %v2970_v51  ;;  %2054 = vmatprep.subr.bf16.mxu0 %v2973_v53  ;;  %v3039_v51 = vld [vmem:[%s4192_s3 + $0xb0] ss:$36 sps:$4 sm:$0xff]   ;;  %v3042_v53 = vld [vmem:[%s4192_s3 + $0x2a4] ss:$36 sps:$4 sm:$0xff]  }
 0x1a9   :  { %1972 = vmatprep.mubr.bf16.mxu1 %v3068_v1 }
 0x1aa   :  { %1994 = vmatpush1.bf16.msra.mxu1 %v2968_v54  ;;  %v3043_v54 = vld [vmem:[%s4192_s3 + $0x2a8] ss:$36 sps:$4 sm:$0xff]  }
 0x1ab   :  { %2055 = vmatpush1.bf16.msra.mxu0 %v2971_v55  ;;  %1995 = vmatprep.subr.bf16.mxu1 %v2976_v56  ;;  %v3040_v55 = vld [vmem:[%s4192_s3 + $0x2a0] ss:$36 sps:$4 sm:$0xff]  }
 0x1ac   :  { %2056 = vmatprep.subr.bf16.mxu0 %v2979_v36  ;;  %v3047_v56 = vld [vmem:[%s4192_s3 + $0x25c] ss:$36 sps:$4 sm:$0xff]  }
 0x1ad   :  { %1973 = vmatmul.mubr.bf16.gmra.mxu1 %v3542_v20  ;;  %v3048_v36 = vld [vmem:[%s4192_s3 + $0x260] ss:$36 sps:$4 sm:$0xff]  }
 0x1ae   :  { %1912 = vmatmul.mubr.bf16.gmra.mxu0 %v3548_v61  ;;  %1996 = vmatpush1.bf16.msra.mxu1 %v2974_v58  ;;  %v3045_v58 = vld [vmem:[%s4192_s3 + $0x258] ss:$36 sps:$4 sm:$0xff]  }
 0x1af   :  { %1921 = vmatprep.mubr.bf16.mxu0 %v3558_v21  ;;  %2057 = vmatpush1.bf16.msra.mxu0 %v2977_v22  ;;  %v3049_v22 = vld [vmem:[%s4192_s3 + $0x20] ss:$36 sps:$4 sm:$0xff]  }
 0x1b0   :  { %1997 = vmatprep.subr.bf16.mxu1 %v2982_v0  ;;  %2058 = vmatprep.subr.bf16.mxu0 %v2985_v57  ;;  %v3069_v0 = vmov 0.0   ;;  %v3050_v57 = vld [vmem:[%s4192_s3 + $0x698] ss:$36 sps:$4 sm:$0xff]  }
 0x1b1   :  { %1982 = vmatprep.mubr.bf16.mxu1 %v3068_v1 }
 0x1b2   :  { %1998 = vmatpush1.bf16.msra.mxu1 %v2980_v62  ;;  %v3051_v62 = vld [vmem:[%s4192_s3 + $0x650] ss:$36 sps:$4 sm:$0xff]  }
 0x1b3   :  { %2059 = vmatpush1.bf16.msra.mxu0 %v2983_v60  ;;  %1999 = vmatprep.subr.bf16.mxu1 %v2988_v49  ;;  %v3052_v60 = vld [vmem:[%s4192_s3 + $0x608] ss:$36 sps:$4 sm:$0xff]   ;;  %v4088_v49 = vld [vmem:[%s4195_s4] sm:$0xff] }
 0x1b4   :  { %2060 = vmatprep.subr.bf16.mxu0 %v2991_v5  ;;  %v479_v5 = vrot.slane %v4088_v49, %v3445_v47 }
 0x1b5   :  { %1983 = vmatmul.mubr.bf16.gmra.mxu1 %v3580_v29 }
 0x1b6   :  { %1922 = vmatmul.mubr.bf16.gmra.mxu0 %v3585_v7  ;;  %2000 = vmatpush1.bf16.msra.mxu1 %v2986_v52 }
 0x1b7   :  { %2023 = vmatprep.mubr.bf16.mxu1 %v3492_v12  ;;  %2061 = vmatpush1.bf16.msra.mxu0 %v2989_v6  ;;  %v483_v6 = vrot.slane %v4088_v49, %v3436_v44 }
 0x1b8   :  { %2001 = vmatprep.subr.bf16.mxu1 %v2994_v24  ;;  %2062 = vmatprep.subr.bf16.mxu0 %v2997_v2 }
 0x1b9   :  { %2084 = vmatprep.mubr.bf16.mxu0 %v3068_v1 }
 0x1ba   :  { %2002 = vmatpush1.bf16.msra.mxu1 %v2992_v10 }
 0x1bb   :  { %2063 = vmatpush1.bf16.msra.mxu0 %v2995_v59  ;;  %2003 = vmatprep.subr.bf16.mxu1 %v3000_v4 }
 0x1bc   :  { %2064 = vmatprep.subr.bf16.mxu0 %v3003_v13 }
 0x1be   :  { %2004 = vmatpush1.bf16.msra.mxu1 %v2998_v32 }
 0x1bf   :  { %2065 = vmatpush1.bf16.msra.mxu0 %v3001_v16  ;;  %2005 = vmatprep.subr.bf16.mxu1 %v3006_v25 }
 0x1c0   :  { %2066 = vmatprep.subr.bf16.mxu0 %v3009_v28 }
 0x1c2   :  { %2006 = vmatpush1.bf16.msra.mxu1 %v3004_v11 }
 0x1c3   :  { %2067 = vmatpush1.bf16.msra.mxu0 %v3007_v33  ;;  %2007 = vmatprep.subr.bf16.mxu1 %v3012_v17 }
 0x1c4   :  { %2670 = vmatprep.subr.bf16.mxu0 %v3013_v34 }
 0x1c6   :  { %2008 = vmatpush2.bf16.msra.mxu1 %v3010_v18  ;;  %2085 = vmatmul.mubr.bf16.vlgmr.msra.gmra.mxu0 %v3494_v30 }
 0x1c7   :  { %2671 = vmatpush3.bf16.msra.mxu0 %v3014_v9  ;;  %2009 = vmatprep.subr.bf16.mxu1 %v3017_v19 }
 0x1c8   :  { %2672 = vmatprep.subr.bf16.mxu0 %v3018_v31  ;;  %2094 = vmatprep.mubr.bf16.mxu0 %v3068_v1 }
 0x1ca   :  { %2010 = vmatpush2.bf16.msra.mxu1 %v3015_v8 }
 0x1cb   :  { %2673 = vmatpush3.bf16.msra.mxu0 %v3019_v37  ;;  %2011 = vmatprep.subr.bf16.mxu1 %v3022_v3 }
 0x1cc   :  { %2674 = vmatprep.subr.bf16.mxu0 %v3023_v39 }
 0x1ce   :  { %2012 = vmatpush2.bf16.msra.mxu1 %v3020_v40  ;;  %2095 = vmatmul.mubr.bf16.gmra.mxu0 %v3542_v20 }
 0x1cf   :  { %2675 = vmatpush3.bf16.msra.mxu0 %v3024_v63  ;;  %2013 = vmatprep.subr.bf16.mxu1 %v3027_v41 }
 0x1d0   :  { %2676 = vmatprep.subr.bf16.mxu0 %v3028_v23  ;;  %2104 = vmatprep.mubr.bf16.mxu0 %v3068_v1  ;;  %v3037_v1 = vld [vmem:[%s4192_s3 + $0x2ec] ss:$36 sps:$4 sm:$0xff]  }
 0x1d2   :  { %2014 = vmatpush2.bf16.msra.mxu1 %v3025_v14 }
 0x1d3   :  { %2677 = vmatpush3.bf16.msra.mxu0 %v3029_v15  ;;  %2015 = vmatprep.subr.bf16.mxu1 %v3032_v35 }
 0x1d4   :  { %2678 = vmatprep.subr.bf16.mxu0 %v3033_v42 }
 0x1d6   :  { %2016 = vmatpush2.bf16.msra.mxu1 %v3030_v43  ;;  %2105 = vmatmul.mubr.bf16.gmra.mxu0 %v3580_v29 }
 0x1d7   :  { %2679 = vmatpush3.bf16.msra.mxu0 %v3034_v46  ;;  %2145 = vmatprep.mubr.bf16.mxu0 %v3492_v12  ;;  %v3044_v12 = vld [vmem:[%s4192_s3 + $0x68] ss:$36 sps:$4 sm:$0xff]  }
 0x1d8   :  { %2017 = vmatprep.subr.bf16.mxu1 %v3037_v1  ;;  %2680 = vmatprep.subr.bf16.mxu0 %v3038_v48 }
 0x1da   :  { %2018 = vmatpush2.bf16.msra.mxu1 %v3035_v50 }
 0x1db   :  { %2681 = vmatpush3.bf16.msra.mxu0 %v3039_v51  ;;  %2019 = vmatprep.subr.bf16.mxu1 %v3042_v53 }
 0x1dc   :  { %2682 = vmatprep.subr.bf16.mxu0 %v3043_v54 }
 0x1de   :  { %2020 = vmatpush2.bf16.msra.mxu1 %v3040_v55 }
 0x1df   :  { %2683 = vmatpush3.bf16.msra.mxu0 %v3044_v12  ;;  %2021 = vmatprep.subr.bf16.mxu1 %v3047_v56 }
 0x1e0   :  { %2684 = vmatprep.subr.bf16.mxu0 %v3048_v36 }
 0x1e2   :  { %2022 = vmatpush2.bf16.msra.mxu1 %v3045_v58 }
 0x1e3   :  { %2685 = vmatpush3.bf16.msra.mxu0 %v3049_v22  ;;  %2715 = vmatprep.subr.bf16.mxu1 %v3069_v0 }
 0x1e5   :  { %2024 = vmatmul.mubr.bf16.vlgmr.msra.gmra.mxu1 %v3499_v38 }
 0x1e6   :  { %2033 = vmatprep.mubr.bf16.mxu1 %v3518_v27  ;;  %2146 = vmatmul.mubr.bf16.vlgmr.msra.gmra.mxu0 %v3499_v38  ;;  %v3053_v38 = vld [vmem:[%s4192_s3 + $0x5c0] ss:$36 sps:$4 sm:$0xff]  }
 0x1e7   :  { %2716 = vmatpush3.bf16.msra.mxu1 %v3050_v57  ;;  %2153 = vmatprep.mubr.bf16.mxu0 %v3518_v27  ;;  %v3054_v27 = vld [vmem:[%s4192_s3 + $0x578] ss:$36 sps:$4 sm:$0xff]  }
 0x1e8   :  { %2717 = vmatprep.subr.bf16.mxu1 %v3069_v0 }
 0x1eb   :  { %2718 = vmatpush3.bf16.msra.mxu1 %v3051_v62 }
 0x1ec   :  { %2719 = vmatprep.subr.bf16.mxu1 %v3069_v0 }
 0x1ed   :  { %2034 = vmatmul.mubr.bf16.gmra.mxu1 %v3548_v61 }
 0x1ee   :  { %2043 = vmatprep.mubr.bf16.mxu1 %v3558_v21  ;;  %2154 = vmatmul.mubr.bf16.gmra.mxu0 %v3548_v61  ;;  %v3055_v61 = vld [vmem:[%s4192_s3 + $0x530] ss:$36 sps:$4 sm:$0xff]  }
 0x1ef   :  { %2720 = vmatpush3.bf16.msra.mxu1 %v3052_v60  ;;  %2161 = vmatprep.mubr.bf16.mxu0 %v3558_v21  ;;  %v3056_v21 = vld [vmem:[%s4192_s3 + $0x4e8] ss:$36 sps:$4 sm:$0xff]  }
 0x1f0   :  { %2721 = vmatprep.subr.bf16.mxu1 %v3069_v0 }
 0x1f3   :  { %2722 = vmatpush3.bf16.msra.mxu1 %v3053_v38 }
 0x1f4   :  { %2723 = vmatprep.subr.bf16.mxu1 %v3069_v0 }
 0x1f5   :  { %2044 = vmatmul.mubr.bf16.gmra.mxu1 %v3585_v7 }
 0x1f6   :  { %2162 = vmatmul.mubr.bf16.gmra.mxu0 %v3585_v7  ;;  %2731 = vmatprep.mubr.msk.bf16.mxu1 %vm3070_vm1, %v3069_v0  ;;  %v3057_v7 = vld [vmem:[%s4192_s3 + $0x4a0] ss:$36 sps:$4 sm:$0xff]  }
 0x1f7   :  { %2724 = vmatpush3.bf16.msra.mxu1 %v3054_v27 }
 0x1f8   :  { %2725 = vmatprep.subr.bf16.mxu1 %v3069_v0 }
 0x1fb   :  { %2726 = vmatpush3.bf16.msra.mxu1 %v3055_v61 }
 0x1fc   :  { %2727 = vmatprep.subr.bf16.mxu1 %v3069_v0 }
 0x1ff   :  { %2728 = vmatpush3.bf16.msra.mxu1 %v3056_v21 }
 0x200   :  { %2729 = vmatprep.subr.bf16.mxu1 %v3069_v0 }
 0x203   :  { %2730 = vmatpush3.bf16.msra.mxu1 %v3057_v7 }
 0x205   :  { %v1720_v52 = vpop.f32.mrf.mxu1 }
 0x206   :  { %2732 = vmatmul.mubr.bf16.vlgmr.msra.gmra.mxu1 %v3494_v30  ;;  %v1659_v24 = vpop.f32.mrf.mxu0 }
 0x207   :  { %v1660_v2 = vadd.f32 %v1659_v24, %v479_v5  ;;  %v1722_v10 = vpop.f32.mrf.mxu1  ;;  %2735 = vmatprep.mubr.msk.bf16.mxu1 %vm3070_vm1, %v3069_v0  ;;  %v487_v24 = vrot.slane %v4088_v49, %v3439_v45 }
 0x208   :  { %v1661_v59 = vpop.f32.mrf.mxu0 }
 0x209   :  { %v1662_v4 = vadd.f32 %v1661_v59, %v483_v6  ;;  %v1724_v13 = vpop.f32.mrf.mxu1  ;;  %v1721_v16 = vadd.f32 %v1720_v52, %v1660_v2 }
 0x20a   :  { %v1663_v32 = vpop.f32.mrf.mxu0 }
 0x20b   :  { %v1723_v25 = vadd.f32 %v1722_v10, %v1662_v4  ;;  %v1664_v28 = vadd.f32 %v1663_v32, %v479_v5  ;;  %v1726_v47 = vpop.f32.mrf.mxu1 }
 0x20c   :  { %v1665_v11 = vpop.f32.mrf.mxu0 }
 0x20d   :  { %v2645_v33 = vpack.c.bf16 %v1723_v25, %v1721_v16  ;;  %v1666_v17 = vadd.f32 %v1665_v11, %v483_v6  ;;  %v1730_v44 = vpop.f32.mrf.mxu1  ;;  %v1725_v34 = vadd.f32 %v1724_v13, %v1664_v28 }
 0x20e   :  { %2736 = vmatmul.mubr.bf16.gmra.mxu1 %v3542_v20  ;;  %v1669_v30 = vpop.f32.mrf.mxu0 }
 0x20f   :  { %2374 = vst [vmem:[%s4196_s5] sm:$0xff] %v2645_v33  ;;  %v1727_v18 = vadd.f32 %v1726_v47, %v1666_v17  ;;  %v1670_v9 = vadd.f32 %v1669_v30, %v479_v5  ;;  %v1732_v19 = vpop.f32.mrf.mxu1  ;;  %2739 = vmatprep.mubr.msk.bf16.mxu1 %vm3070_vm1, %v3069_v0 }
 0x210   :  { %v1671_v31 = vpop.f32.mrf.mxu0 }
 0x211   :  { %v2650_v8 = vpack.c.bf16 %v1727_v18, %v1725_v34  ;;  %v1672_v37 = vadd.f32 %v1671_v31, %v483_v6  ;;  %v1734_v3 = vpop.f32.mrf.mxu1  ;;  %v1731_v20 = vadd.f32 %v1730_v44, %v1670_v9 }
 0x212   :  { %v1673_v39 = vpop.f32.mrf.mxu0 }
 0x213   :  { %2379 = vst [vmem:[%s4196_s5 + $0x24] sm:$0xff] %v2650_v8  ;;  %v1733_v40 = vadd.f32 %v1732_v19, %v1672_v37  ;;  %v1674_v63 = vadd.f32 %v1673_v39, %v479_v5  ;;  %v1736_v41 = vpop.f32.mrf.mxu1 }
 0x214   :  { %v1675_v23 = vpop.f32.mrf.mxu0 }
 0x215   :  { %v2655_v14 = vpack.c.bf16 %v1733_v40, %v1731_v20  ;;  %v1676_v15 = vadd.f32 %v1675_v23, %v483_v6  ;;  %v1740_v35 = vpop.f32.mrf.mxu1  ;;  %v1735_v43 = vadd.f32 %v1734_v3, %v1674_v63 }
 0x216   :  { %2740 = vmatmul.mubr.bf16.gmra.mxu1 %v3580_v29  ;;  %v1679_v42 = vpop.f32.mrf.mxu0 }
 0x217   :  { %2384 = vst [vmem:[%s4196_s5 + $0x48] sm:$0xff] %v2655_v14  ;;  %v1737_v46 = vadd.f32 %v1736_v41, %v1676_v15  ;;  %v1680_v1 = vadd.f32 %v1679_v42, %v479_v5  ;;  %v1742_v48 = vpop.f32.mrf.mxu1 }
 0x218   :  { %v1681_v50 = vpop.f32.mrf.mxu0 }
 0x219   :  { %v2660_v51 = vpack.c.bf16 %v1737_v46, %v1735_v43  ;;  %v1682_v53 = vadd.f32 %v1681_v50, %v483_v6  ;;  %v1744_v54 = vpop.f32.mrf.mxu1  ;;  %v1741_v12 = vadd.f32 %v1740_v35, %v1680_v1  ;;  %v490_v6 = vsub.s32 3, %v3433_v26 }
 0x21a   :  { %v1683_v55 = vpop.f32.mrf.mxu0  ;;  %v494_v50 = vsub.s32 4, %v3433_v26 }
 0x21b   :  { %2389 = vst [vmem:[%s4196_s5 + $0x6c] sm:$0xff] %v2660_v51  ;;  %v1743_v29 = vadd.f32 %v1742_v48, %v1682_v53  ;;  %v1745_v56 = vpop.f32.mrf.mxu1  ;;  %v491_v2 = vrot.slane %v4088_v49, %v490_v6  ;;  %v498_v51 = vsub.s32 5, %v3433_v26 }
 0x21c   :  { %v1684_v36 = vpop.f32.mrf.mxu0  ;;  %v495_v53 = vrot.slane %v4088_v49, %v494_v50 }
 0x21d   :  { %v2665_v58 = vpack.c.bf16 %v1743_v29, %v1741_v12  ;;  %v499_v55 = vrot.slane %v4088_v49, %v498_v51 }
 0x21f   :  { %2394 = vst [vmem:[%s4196_s5 + $0x90] sm:$0x11] %v2665_v58 }
 0x226   :  { %v1842_v22 = vpop.f32.mrf.mxu0 }
 0x228   :  { %v1844_v0 = vpop.f32.mrf.mxu0 }
 0x22a   :  { %v1846_v57 = vpop.f32.mrf.mxu0 }
 0x22c   :  { %v1848_v62 = vpop.f32.mrf.mxu0 }
 0x22e   :  { %v1852_v60 = vpop.f32.mrf.mxu0 }
 0x230   :  { %v1854_v38 = vpop.f32.mrf.mxu0 }
 0x232   :  { %v1856_v27 = vpop.f32.mrf.mxu0 }
 0x234   :  { %v1858_v61 = vpop.f32.mrf.mxu0 }
 0x236   :  { %v1862_v21 = vpop.f32.mrf.mxu0 }
 0x238   :  { %v1864_v7 = vpop.f32.mrf.mxu0 }
 0x23a   :  { %v1866_v5 = vpop.f32.mrf.mxu0 }
 0x23c   :  { %v1867_v52 = vpop.f32.mrf.mxu0 }
 0x245   :  { %v1781_v10 = vpop.f32.mrf.mxu1 }
 0x246   :  { %v1782_v59 = vadd.f32 %v1781_v10, %v487_v24 }
 0x247   :  { %v1783_v4 = vpop.f32.mrf.mxu1 }
 0x248   :  { %v1784_v13 = vadd.f32 %v1783_v4, %v491_v2  ;;  %v1843_v16 = vadd.f32 %v1842_v22, %v1782_v59 }
 0x249   :  { %v1785_v32 = vpop.f32.mrf.mxu1 }
 0x24a   :  { %v1845_v25 = vadd.f32 %v1844_v0, %v1784_v13  ;;  %v1786_v28 = vadd.f32 %v1785_v32, %v487_v24 }
 0x24b   :  { %v1787_v47 = vpop.f32.mrf.mxu1 }
 0x24c   :  { %v2646_v11 = vpack.c.bf16 %v1845_v25, %v1843_v16  ;;  %v1788_v33 = vadd.f32 %v1787_v47, %v491_v2  ;;  %v1847_v44 = vadd.f32 %v1846_v57, %v1786_v28 }
 0x24d   :  { %v1791_v17 = vpop.f32.mrf.mxu1 }
 0x24e   :  { %2375 = vst [vmem:[%s4196_s5 + $0x8] sm:$0xff] %v2646_v11  ;;  %v1849_v45 = vadd.f32 %v1848_v62, %v1788_v33  ;;  %v1792_v30 = vadd.f32 %v1791_v17, %v487_v24 }
 0x24f   :  { %v1793_v34 = vpop.f32.mrf.mxu1 }
 0x250   :  { %v2651_v18 = vpack.c.bf16 %v1849_v45, %v1847_v44  ;;  %v1794_v9 = vadd.f32 %v1793_v34, %v491_v2  ;;  %v1853_v31 = vadd.f32 %v1852_v60, %v1792_v30 }
 0x251   :  { %v1795_v19 = vpop.f32.mrf.mxu1 }
 0x252   :  { %2380 = vst [vmem:[%s4196_s5 + $0x2c] sm:$0xff] %v2651_v18  ;;  %v1855_v8 = vadd.f32 %v1854_v38, %v1794_v9  ;;  %v1796_v37 = vadd.f32 %v1795_v19, %v487_v24 }
 0x253   :  { %v1797_v3 = vpop.f32.mrf.mxu1 }
 0x254   :  { %v2656_v39 = vpack.c.bf16 %v1855_v8, %v1853_v31  ;;  %v1798_v20 = vadd.f32 %v1797_v3, %v491_v2  ;;  %v1857_v63 = vadd.f32 %v1856_v27, %v1796_v37 }
 0x255   :  { %v1801_v40 = vpop.f32.mrf.mxu1 }
 0x256   :  { %2385 = vst [vmem:[%s4196_s5 + $0x50] sm:$0xff] %v2656_v39  ;;  %v1859_v41 = vadd.f32 %v1858_v61, %v1798_v20  ;;  %v1802_v23 = vadd.f32 %v1801_v40, %v487_v24 }
 0x257   :  { %v1803_v14 = vpop.f32.mrf.mxu1 }
 0x258   :  { %v2661_v15 = vpack.c.bf16 %v1859_v41, %v1857_v63  ;;  %v1804_v35 = vadd.f32 %v1803_v14, %v491_v2  ;;  %v1863_v43 = vadd.f32 %v1862_v21, %v1802_v23 }
 0x259   :  { %v1805_v42 = vpop.f32.mrf.mxu1 }
 0x25a   :  { %2390 = vst [vmem:[%s4196_s5 + $0x74] sm:$0xff] %v2661_v15  ;;  %v1865_v46 = vadd.f32 %v1864_v7, %v1804_v35 }
 0x25b   :  { %v1806_v1 = vpop.f32.mrf.mxu1 }
 0x25c   :  { %v2666_v48 = vpack.c.bf16 %v1865_v46, %v1863_v43 }
 0x25e   :  { %2395 = vst [vmem:[%s4196_s5 + $0x98] sm:$0x11] %v2666_v48 }
 0x265   :  { %v1964_v54 = vpop.f32.mrf.mxu1 }
 0x266   :  { %v1903_v12 = vpop.f32.mrf.mxu0 }
 0x267   :  { %v1904_v29 = vadd.f32 %v1903_v12, %v495_v53  ;;  %v1966_v56 = vpop.f32.mrf.mxu1 }
 0x268   :  { %v1905_v36 = vpop.f32.mrf.mxu0 }
 0x269   :  { %v1906_v58 = vadd.f32 %v1905_v36, %v499_v55  ;;  %v1968_v22 = vpop.f32.mrf.mxu1  ;;  %v1965_v57 = vadd.f32 %v1964_v54, %v1904_v29  ;;  %v502_v54 = vsub.s32 6, %v3433_v26 }
 0x26a   :  { %v1907_v0 = vpop.f32.mrf.mxu0 }
 0x26b   :  { %v1967_v62 = vadd.f32 %v1966_v56, %v1906_v58  ;;  %v1908_v60 = vadd.f32 %v1907_v0, %v495_v53  ;;  %v1970_v38 = vpop.f32.mrf.mxu1  ;;  %v503_v12 = vrot.slane %v4088_v49, %v502_v54 }
 0x26c   :  { %v1909_v27 = vpop.f32.mrf.mxu0 }
 0x26d   :  { %v2647_v61 = vpack.c.bf16 %v1967_v62, %v1965_v57  ;;  %v1910_v21 = vadd.f32 %v1909_v27, %v499_v55  ;;  %v1974_v7 = vpop.f32.mrf.mxu1  ;;  %v1969_v52 = vadd.f32 %v1968_v22, %v1908_v60 }
 0x26e   :  { %v1913_v5 = vpop.f32.mrf.mxu0 }
 0x26f   :  { %2376 = vst [vmem:[%s4196_s5 + $0x10] sm:$0xff] %v2647_v61  ;;  %v1971_v6 = vadd.f32 %v1970_v38, %v1910_v21  ;;  %v1914_v24 = vadd.f32 %v1913_v5, %v495_v53  ;;  %v1976_v2 = vpop.f32.mrf.mxu1 }
 0x270   :  { %v1915_v10 = vpop.f32.mrf.mxu0 }
 0x271   :  { %v2652_v59 = vpack.c.bf16 %v1971_v6, %v1969_v52  ;;  %v1916_v4 = vadd.f32 %v1915_v10, %v499_v55  ;;  %v1978_v13 = vpop.f32.mrf.mxu1  ;;  %v1975_v16 = vadd.f32 %v1974_v7, %v1914_v24 }
 0x272   :  { %v1917_v32 = vpop.f32.mrf.mxu0 }
 0x273   :  { %2381 = vst [vmem:[%s4196_s5 + $0x34] sm:$0xff] %v2652_v59  ;;  %v1977_v25 = vadd.f32 %v1976_v2, %v1916_v4  ;;  %v1918_v28 = vadd.f32 %v1917_v32, %v495_v53  ;;  %v1980_v47 = vpop.f32.mrf.mxu1 }
 0x274   :  { %v1919_v11 = vpop.f32.mrf.mxu0 }
 0x275   :  { %v2657_v33 = vpack.c.bf16 %v1977_v25, %v1975_v16  ;;  %v1920_v17 = vadd.f32 %v1919_v11, %v499_v55  ;;  %v1984_v44 = vpop.f32.mrf.mxu1  ;;  %v1979_v30 = vadd.f32 %v1978_v13, %v1918_v28 }
 0x276   :  { %v1923_v45 = vpop.f32.mrf.mxu0 }
 0x277   :  { %2386 = vst [vmem:[%s4196_s5 + $0x58] sm:$0xff] %v2657_v33  ;;  %v1981_v34 = vadd.f32 %v1980_v47, %v1920_v17  ;;  %v1924_v18 = vadd.f32 %v1923_v45, %v495_v53  ;;  %v1986_v9 = vpop.f32.mrf.mxu1 }
 0x278   :  { %v1925_v19 = vpop.f32.mrf.mxu0 }
 0x279   :  { %v2662_v31 = vpack.c.bf16 %v1981_v34, %v1979_v30  ;;  %v1926_v8 = vadd.f32 %v1925_v19, %v499_v55  ;;  %v1988_v37 = vpop.f32.mrf.mxu1  ;;  %v1985_v39 = vadd.f32 %v1984_v44, %v1924_v18  ;;  %v506_v55 = vsub.s32 7, %v3433_v26 }
 0x27a   :  { %v1927_v3 = vpop.f32.mrf.mxu0 }
 0x27b   :  { %2391 = vst [vmem:[%s4196_s5 + $0x7c] sm:$0xff] %v2662_v31  ;;  %v1987_v20 = vadd.f32 %v1986_v9, %v1926_v8  ;;  %v1989_v40 = vpop.f32.mrf.mxu1  ;;  %v507_v29 = vrot.slane %v4088_v49, %v506_v55 }
 0x27c   :  { %v1928_v63 = vpop.f32.mrf.mxu0 }
 0x27d   :  { %v2667_v41 = vpack.c.bf16 %v1987_v20, %v1985_v39 }
 0x27f   :  { %2396 = vst [vmem:[%s4196_s5 + $0xa0] sm:$0x11] %v2667_v41 }
 0x286   :  { %v2086_v23 = vpop.f32.mrf.mxu0 }
 0x288   :  { %v2088_v14 = vpop.f32.mrf.mxu0 }
 0x28a   :  { %v2090_v15 = vpop.f32.mrf.mxu0 }
 0x28c   :  { %v2092_v35 = vpop.f32.mrf.mxu0 }
 0x28e   :  { %v2096_v42 = vpop.f32.mrf.mxu0 }
 0x290   :  { %v2098_v43 = vpop.f32.mrf.mxu0 }
 0x292   :  { %v2100_v46 = vpop.f32.mrf.mxu0 }
 0x294   :  { %v2102_v1 = vpop.f32.mrf.mxu0 }
 0x296   :  { %v2106_v48 = vpop.f32.mrf.mxu0 }
 0x298   :  { %v2108_v50 = vpop.f32.mrf.mxu0 }
 0x29a   :  { %v2110_v51 = vpop.f32.mrf.mxu0 }
 0x29c   :  { %v2111_v53 = vpop.f32.mrf.mxu0 }
 0x2a5   :  { %v2025_v56 = vpop.f32.mrf.mxu1 }
 0x2a6   :  { %v2026_v36 = vadd.f32 %v2025_v56, %v503_v12  ;;  %v2686_v58 = vpop.f32.mrf.mxu0 }
 0x2a7   :  { %v2027_v22 = vpop.f32.mrf.mxu1 }
 0x2a8   :  { %v2028_v0 = vadd.f32 %v2027_v22, %v507_v29  ;;  %v2687_v57 = vpop.f32.mrf.mxu0  ;;  %v2087_v60 = vadd.f32 %v2086_v23, %v2026_v36 }
 0x2a9   :  { %v2029_v62 = vpop.f32.mrf.mxu1 }
 0x2aa   :  { %v2089_v38 = vadd.f32 %v2088_v14, %v2028_v0  ;;  %v2030_v27 = vadd.f32 %v2029_v62, %v503_v12  ;;  %v2689_v61 = vpop.f32.mrf.mxu0  ;;  %v2688_v14 = vadd.f32 %v2687_v57, %v2686_v58 }
 0x2ab   :  { %v2031_v21 = vpop.f32.mrf.mxu1 }
 0x2ac   :  { %v2648_v7 = vpack.c.bf16 %v2089_v38, %v2087_v60  ;;  %v2032_v5 = vadd.f32 %v2031_v21, %v507_v29  ;;  %v2690_v52 = vpop.f32.mrf.mxu0  ;;  %v2091_v49 = vadd.f32 %v2090_v15, %v2030_v27  ;;  %v2403_v15 = vld [vmem:[%s4195_s4 + $0x8] ss:$0 sm:$0xff] }
 0x2ad   :  { %v2035_v26 = vpop.f32.mrf.mxu1 }
 0x2ae   :  { %2377 = vst [vmem:[%s4196_s5 + $0x18] sm:$0xff] %v2648_v7  ;;  %v2093_v6 = vadd.f32 %v2092_v35, %v2032_v5  ;;  %v2036_v24 = vadd.f32 %v2035_v26, %v503_v12  ;;  %v2692_v2 = vpop.f32.mrf.mxu0  ;;  %v2691_v35 = vadd.f32 %v2690_v52, %v2689_v61 }
 0x2af   :  { %v2037_v10 = vpop.f32.mrf.mxu1 }
 0x2b0   :  { %v2653_v59 = vpack.c.bf16 %v2093_v6, %v2091_v49  ;;  %v2038_v4 = vadd.f32 %v2037_v10, %v507_v29  ;;  %v2693_v13 = vpop.f32.mrf.mxu0  ;;  %v2097_v16 = vadd.f32 %v2096_v42, %v2036_v24  ;;  %v2148_v42 = vadd.f32 %v2688_v14, %v2403_v15 }
 0x2b1   :  { %v2039_v32 = vpop.f32.mrf.mxu1  ;;  %v2151_v51 = vadd.f32 %v2691_v35, %v2403_v15 }
 0x2b2   :  { %2382 = vst [vmem:[%s4196_s5 + $0x3c] sm:$0xff] %v2653_v59  ;;  %v2099_v25 = vadd.f32 %v2098_v43, %v2038_v4  ;;  %v2040_v28 = vadd.f32 %v2039_v32, %v503_v12  ;;  %v2695_v47 = vpop.f32.mrf.mxu0 }
 0x2b3   :  { %v2041_v11 = vpop.f32.mrf.mxu1 }
 0x2b4   :  { %v2658_v33 = vpack.c.bf16 %v2099_v25, %v2097_v16  ;;  %v2042_v17 = vadd.f32 %v2041_v11, %v507_v29  ;;  %v2696_v44 = vpop.f32.mrf.mxu0  ;;  %v2101_v30 = vadd.f32 %v2100_v46, %v2040_v28 }
 0x2b5   :  { %v2045_v45 = vpop.f32.mrf.mxu1 }
 0x2b6   :  { %2387 = vst [vmem:[%s4196_s5 + $0x60] sm:$0xff] %v2658_v33  ;;  %v2103_v34 = vadd.f32 %v2102_v1, %v2042_v17  ;;  %v2046_v18 = vadd.f32 %v2045_v45, %v503_v12  ;;  %v2698_v9 = vpop.f32.mrf.mxu0  ;;  %v2697_v12 = vadd.f32 %v2696_v44, %v2695_v47 }
 0x2b7   :  { %v2047_v19 = vpop.f32.mrf.mxu1 }
 0x2b8   :  { %v2663_v31 = vpack.c.bf16 %v2103_v34, %v2101_v30  ;;  %v2048_v8 = vadd.f32 %v2047_v19, %v507_v29  ;;  %v2699_v37 = vpop.f32.mrf.mxu0  ;;  %v2107_v39 = vadd.f32 %v2106_v48, %v2046_v18  ;;  %v2694_v48 = vadd.f32 %v2693_v13, %v2692_v2 }
 0x2b9   :  { %v2049_v3 = vpop.f32.mrf.mxu1  ;;  %v2700_v0 = vadd.f32 %v2699_v37, %v2698_v9  ;;  %v2159_v62 = vadd.f32 %v2697_v12, %v2403_v15 }
 0x2ba   :  { %2392 = vst [vmem:[%s4196_s5 + $0x84] sm:$0xff] %v2663_v31  ;;  %v2109_v20 = vadd.f32 %v2108_v50, %v2048_v8  ;;  %v2701_v40 = vpop.f32.mrf.mxu0  ;;  %v2156_v56 = vadd.f32 %v2694_v48, %v2403_v15 }
 0x2bb   :  { %v2050_v63 = vpop.f32.mrf.mxu1  ;;  %v2164_v21 = vadd.f32 %v2700_v0, %v2403_v15 }
 0x2bc   :  { %v2668_v41 = vpack.c.bf16 %v2109_v20, %v2107_v39  ;;  %v2702_v23 = vpop.f32.mrf.mxu0 }
 0x2be   :  { %2397 = vst [vmem:[%s4196_s5 + $0xa8] sm:$0x11] %v2668_v41 }
 0x2c6   :  { %v2203_v43 = vpop.f32.mrf.mxu1 }
 0x2c7   :  { %v2204_v46 = vadd.f32 %v2203_v43, %v2148_v42 }
 0x2c8   :  { %v2733_v1 = vpop.f32.mrf.mxu1 }
 0x2c9   :  { %v2649_v50 = vpack.c.bf16 %v2204_v46, %v2204_v46 }
 0x2ca   :  { %v2206_v53 = vpop.f32.mrf.mxu1 }
 0x2cb   :  { %2378 = vst [vmem:[%s4196_s5 + $0x20] sm:$0xf] %v2649_v50  ;;  %v2207_v54 = vadd.f32 %v2206_v53, %v2151_v51 }
 0x2cc   :  { %v2734_v55 = vpop.f32.mrf.mxu1 }
 0x2cd   :  { %v2654_v29 = vpack.c.bf16 %v2207_v54, %v2207_v54 }
 0x2ce   :  { %v2211_v36 = vpop.f32.mrf.mxu1 }
 0x2cf   :  { %2383 = vst [vmem:[%s4196_s5 + $0x44] sm:$0xf] %v2654_v29  ;;  %v2212_v58 = vadd.f32 %v2211_v36, %v2156_v56 }
 0x2d0   :  { %v2737_v22 = vpop.f32.mrf.mxu1 }
 0x2d1   :  { %v2659_v57 = vpack.c.bf16 %v2212_v58, %v2212_v58 }
 0x2d2   :  { %v2214_v60 = vpop.f32.mrf.mxu1 }
 0x2d3   :  { %2388 = vst [vmem:[%s4196_s5 + $0x68] sm:$0xf] %v2659_v57  ;;  %v2215_v38 = vadd.f32 %v2214_v60, %v2159_v62 }
 0x2d4   :  { %v2738_v27 = vpop.f32.mrf.mxu1 }
 0x2d5   :  { %v2664_v61 = vpack.c.bf16 %v2215_v38, %v2215_v38 }
 0x2d6   :  { %v2219_v7 = vpop.f32.mrf.mxu1 }
 0x2d7   :  { %2393 = vst [vmem:[%s4196_s5 + $0x8c] sm:$0xf] %v2664_v61  ;;  %v2220_v5 = vadd.f32 %v2219_v7, %v2164_v21 }
 0x2d8   :  { %v2741_v52 = vpop.f32.mrf.mxu1 }
 0x2d9   :  { %v2669_v26 = vpack.c.bf16 %v2220_v5, %v2220_v5 }
 0x2da   :  { %v2222_v49 = vpop.f32.mrf.mxu1 }
 0x2db   :  { %2398 = vst [vmem:[%s4196_s5 + $0xb0] sm:$0x1] %v2669_v26 }
 0x2dc   :  { %v2742_v6 = vpop.f32.mrf.mxu1 }

// kernel: closed_call.15
= control target key start
LH: loop header
LB: loop body
LE: loop exit
PB: predicated region body
PF: predicated region fallthrough
CT: control target
= control target key end

     0   :  { %s2887_s18 = smov 0   ;;  %s3428_s0 = inlined_call_operand.vmem [shape: bf16[2,17,1152], index: 0, kind: input, shape index: {}]   ;;  %s3429_s1 = inlined_call_operand.vmem [shape: bf16[384,384], index: 1, kind: input, shape index: {}]   ;;  %s3430_s2 = inlined_call_operand.vmem [shape: f32[1,384], index: 2, kind: input, shape index: {}]   ;;  %s3431_s3 = inlined_call_operand.vmem [shape: bf16[2,17,384], index: 3, kind: input, shape index: {}]   ;;  %s3432_s4 = inlined_call_operand.vmem [shape: bf16[2,17,384], index: 4, kind: output, shape index: {0}]   ;;  %s3433_s5 = inlined_call_operand.vmem [shape: f32[2,6,17], index: 5, kind: output, shape index: {1}]  }
   0x1 LB: > { %s2278_s19 = sadd.s32 4294967295, %s2853_s18   ;;  %p2282_p0 = scmp.ge.s32.totalorder %s2853_s18, 1  ;;  %s2853_s18 = sphi %s2887_s18, %s16_s18  }
   0x2   : > { %p200_p1 = scmp.lt.s32.totalorder %s2853_s18, 3 }
   0x4   : > { %p201_p2 = pnand %p2282_p0, %p200_p1 }
   0x5   : > { %p237_p3 = scmp.lt.s32.totalorder (!%p201_p2), %s2278_s19, 1  ;;  %s2856_s24 = smov (!%p201_p2), 64  }
   0x6   : > { %204 = sbr.rel (%p201_p2) target bundleno = 3786 (0xeca), region = 36 }
   0xb   : > { %s3437_s19 = smov (!%p237_p3, %s2278_s19), 1  ;;  %vm282_vm0 = vcmask 523264   ;;  %vm353_vm1 = vcmask 131072   ;;  %vm346_vm2 = vcmask 138240   ;;  %vm398_vm3 = vcmask 1040384  }
   0xc   : > { %s2629_s20 = smul.u32 108, %s3437_s19  ;;  %v2855_v32 = vmov 0   ;;  %vm2170_vm4 = vcmask 1041408   ;;  %vm2172_vm5 = vcmask 1042432   ;;  %vm2174_vm6 = vcmask 1043456   ;;  %s2286_s25 = sshll.u32 %s3437_s19, 3 }
   0xd   : > { %v2924_v33 = vsel %vm398_vm3, 65535, %v2855_v32  ;;  %vm2176_vm7 = vcmask 1044480   ;;  %s255_s28 = scalar_lea.vmem %s3433_s5, %s2286_s25  ;;  %vm2178_vm8 = vcmask 136192   ;;  %s2630_s14 = smul.u32 36, %s3437_s19  ;;  %vm2142_vm9 = vsmask.f32 256 }
   0xe   : > { %s2901_s23 = scalar_lea.vmem %s3428_s0, %s2629_s20  ;;  %vm2144_vm10 = vcmask 1044484   ;;  %vm2145_vm11 = vsmask.f32 4352  ;;  %vm3406_vm12 = vmand %vm398_vm3, %vm2142_vm9 }
   0xf   : > { %v2661_v0 = vld [vmem:[%s2901_s23 + $0x54] ss:$0 sps:$4 sm:$0x11]   ;;  %v2662_v1 = vld [vmem:[%s2901_s23 + $0xc] ss:$36 sps:$4 sm:$0xff]   ;;  %s3390_s20 = scalar_lea.vmem %s3431_s3, %s2630_s14  ;;  %vm2146_vm13 = vmand %vm2144_vm10, %vm2145_vm11 }
  0x10   : > { %2617 = vmatprep.subr.msk.bf16.mxu1 %vm282_vm0, %v2661_v0  ;;  %v293_v2 = vsel %vm282_vm0, %v2661_v0, 0  ;;  %v2663_v3 = vld [vmem:[%s2901_s23] ss:$36 sps:$4 sm:$0xff]   ;;  %v290_v4 = vsel %vm282_vm0, %v2662_v1, 0  ;;  %v2929_v35 = vld [vmem:[%s2901_s23 + $0x18] ss:$36 sps:$4 sm:$0xff]   ;;  %vm2147_vm14 = vmor %vm2146_vm13, %vm3406_vm12 }
  0x11   : > { %2502 = vmatpush3.bf16.xpose.msra.mxu1 %v293_v2  ;;  %2505 = vmatprep.mubr.msk.bf16.mxu1 %vm282_vm0, %v2663_v3  ;;  %v2664_v5 = vld [vmem:[%s2901_s23 + $0x48] ss:$0 sps:$4 sm:$0x11]   ;;  %v2920_v31 = vld [vmem:[%s2901_s23 + $0x60] ss:$0 sps:$4 sm:$0x11]  }
  0x12   : > { %2618 = vmatprep.subr.msk.bf16.mxu1 %vm282_vm0, %v2662_v1  ;;  %v402_v34 = vand.u32 %v2920_v31, %v2924_v33 }
  0x19   : > { %2504 = vmatpush3.bf16.xpose.msra.mxu1 %v290_v4 }
  0x1a   : > { %2509 = vmatprep.subr.bf16.mxu1 %v402_v34 }
  0x20   : > { %2506 = vmatmul.mubr.msk.bf16.vlgmr.msra.gmra.mxu1 %vm282_vm0, %v2664_v5 }
  0x21   : > { %2510 = vmatpush3.bf16.msra.mxu1 %v402_v34 }
  0x22   : > { %2511 = vmatprep.subr.bf16.mxu1 %v2929_v35 }
  0x25   : > { %2512 = vmatpush3.bf16.msra.mxu1 %v2929_v35 }
  0xe0   : > { %v2507_v6 = vpop.f32.mrf.mxu1 }
  0xe1   : > { %v345_v7 = vmul.f32 0.125, %v2507_v6 }
  0xe2   : > { %v329_v8 = vpop.f32.mrf.mxu1 }
  0xe3   : > { %v343_v9 = vmul.f32 0.125, %v329_v8  ;;  %v354_v10 = vsel %vm353_vm1, %v345_v7, -inf }
  0xe4   : > { %355 = vmax.xlane.f32.xlu1 %v354_v10  ;;  %v2508_v11 = vpop.f32.mrf.mxu1 }
  0xe5   : > { %v347_v12 = vsel %vm346_vm2, %v343_v9, -inf }
  0xe6   : > { %348 = vmax.xlane.f32.xlu0 %v347_v12  ;;  %v332_v13 = vpop.f32.mrf.mxu1 }
  0xe7   : > { %v344_v14 = vmul.f32 0.125, %v332_v13 }
  0xe9   : > { %v350_v15 = vsel %vm346_vm2, %v344_v14, -inf }
  0xea   : > { %351 = vmax.xlane.f32.xlu0 %v350_v15 }
 0x16d   : > { %v356_v16 = vpop.xlane.xlu1 %355 }
 0x16e   : > { %v359_v17 = vsub.f32 %v345_v7, %v356_v16 }
 0x16f   : > { %v349_v18 = vpop.xlane.xlu0 %348 }
 0x170   : > { %v357_v19 = vsub.f32 %v343_v9, %v349_v18  ;;  %v364_v20 = vmul.f32 1.442695, %v359_v17 }
 0x172   : > { %v360_v21 = vmul.f32 1.442695, %v357_v19 }
 0x173   : > { %v352_v22 = vpop.xlane.xlu0 %351 }
 0x174   : > { %2775 = vpow2.f32 %v360_v21  ;;  %v358_v23 = vsub.f32 %v344_v14, %v352_v22 }
 0x175   : > { %2777 = vpow2.f32 %v364_v20 }
 0x176   : > { %v362_v24 = vmul.f32 1.442695, %v358_v23 }
 0x178   : > { %2779 = vpow2.f32 %v362_v24  ;;  %v2966_v24 = vld [vmem:[%s2901_s23 + $0x58] ss:$0 sps:$4 sm:$0x11]  }
 0x181   : > { %v2776_v25 = vpop.eup %2775 }
 0x182   : > { %v366_v26 = vsel %vm346_vm2, %v2776_v25, 0.0  ;;  %v2778_v27 = vpop.eup %2777 }
 0x183   : > { %367 = vadd.xlane.f32.xlu1 %v366_v26  ;;  %v372_v29 = vsel %vm353_vm1, %v2778_v27, 0.0 }
 0x185   : > { %v2780_v28 = vpop.eup %2779 }
 0x186   : > { %v369_v30 = vsel %vm346_vm2, %v2780_v28, 0.0 }
 0x187   : > { %373 = vadd.xlane.f32.xlu1 %v372_v29  ;;  %370 = vadd.xlane.f32.xlu0 %v369_v30 }
 0x198   : > { %456 = vrot.lane.b32.xlu1 %v2662_v1, %s2856_s24 }
 0x19c   : > { %452 = vrot.lane.b32.xlu1 %v2663_v3, %s2856_s24 }
 0x19d   : > { %458 = vrot.lane.b32.xlu0 %v2661_v0, %s2856_s24 }
 0x1a0   : > { %454 = vrot.lane.b32.xlu1 %v2664_v5, %s2856_s24 }
 0x20c   : > { %v368_v36 = vpop.xlane.xlu1 %367 }
 0x20d   : > { %2781 = vrcp.f32 %v368_v36  ;;  %v655_v36 = vsel %vm282_vm0, %v2966_v24, 0 }
 0x210   : > { %v374_v37 = vpop.xlane.xlu1 %373  ;;  %v371_v38 = vpop.xlane.xlu0 %370 }
 0x211   : > { %2783 = vrcp.f32 %v374_v37  ;;  %v2668_v37 = vld [vmem:[%s2901_s23 + $0x10] ss:$36 sps:$4 sm:$0xff]  }
 0x212   : > { %2785 = vrcp.f32 %v371_v38  ;;  %v652_v38 = vsel %vm282_vm0, %v2668_v37, 0 }
 0x214   : > { %v459_v39 = vpop.permute.xlu0 %458  ;;  %v457_v41 = vpop.permute.xlu1 %456 }
 0x215   : > { %2619 = vmatprep.subr.msk.bf16.mxu1 %vm282_vm0, %v459_v39  ;;  %v470_v49 = vsel %vm282_vm0, %v459_v39, 0  ;;  %v467_v51 = vsel %vm282_vm0, %v457_v41, 0  ;;  %v2670_v39 = vld [vmem:[%s2901_s23 + $0x4c] ss:$0 sps:$4 sm:$0x11]  }
 0x218   : > { %v453_v50 = vpop.permute.xlu1 %452 }
 0x21a   : > { %v2782_v40 = vpop.eup %2781 }
 0x21b   : > { %v2938_v45 = vmul.f32 %v2782_v40, %v2776_v25 }
 0x21c   : > { %v455_v52 = vpop.permute.xlu1 %454 }
 0x21e   : > { %v2784_v42 = vpop.eup %2783 }
 0x21f   : > { %v2786_v43 = vpop.eup %2785  ;;  %v380_v44 = vmul.f32 %v2784_v42, %v2778_v27 }
 0x220   : > { %v379_v46 = vmul.f32 %v2786_v43, %v2780_v28 }
 0x221   : > { %v382_v47 = vpack.c.bf16 %v380_v44, %v380_v44 }
 0x222   : > { %v381_v48 = vpack.c.bf16 %v379_v46, %v2938_v45 }
 0x224   : > { %2513 = vmatprep.mubr.msk.bf16.mxu1 %vm346_vm2, %v381_v48 }
 0x225   : > { %2514 = vmatmul.mubr.msk.bf16.vlgmr.msra.gmra.mxu1 %vm346_vm2, %v382_v47 }
 0x226   : > { %2518 = vmatpush3.bf16.xpose.msra.mxu1 %v470_v49  ;;  %2521 = vmatprep.mubr.msk.bf16.mxu1 %vm282_vm0, %v453_v50 }
 0x227   : > { %2620 = vmatprep.subr.msk.bf16.mxu1 %vm282_vm0, %v457_v41 }
 0x22e   : > { %2520 = vmatpush3.bf16.xpose.msra.mxu1 %v467_v51 }
 0x235   : > { %2522 = vmatmul.mubr.msk.bf16.vlgmr.msra.gmra.mxu1 %vm282_vm0, %v455_v52 }
 0x2e5   : > { %v2948_v53 = vpop.f32.mrf.mxu1 }
 0x2e7   : > { %v2950_v54 = vpop.f32.mrf.mxu1 }
 0x2e9   : > { %v2516_v55 = vpop.f32.mrf.mxu1 }
 0x2eb   : > { %v2952_v56 = vpop.f32.mrf.mxu1 }
 0x2f5   : > { %v2523_v57 = vpop.f32.mrf.mxu1 }
 0x2f6   : > { %v522_v61 = vmul.f32 0.125, %v2523_v57 }
 0x2f7   : > { %v506_v58 = vpop.f32.mrf.mxu1 }
 0x2f8   : > { %v520_v59 = vmul.f32 0.125, %v506_v58  ;;  %v529_v1 = vsel %vm353_vm1, %v522_v61, -inf }
 0x2f9   : > { %v2524_v60 = vpop.f32.mrf.mxu1 }
 0x2fa   : > { %v523_v62 = vsel %vm346_vm2, %v520_v59, -inf }
 0x2fb   : > { %524 = vmax.xlane.f32.xlu0 %v523_v62  ;;  %v509_v63 = vpop.f32.mrf.mxu1 }
 0x2fc   : > { %v521_v0 = vmul.f32 0.125, %v509_v63 }
 0x2fe   : > { %v526_v2 = vsel %vm346_vm2, %v521_v0, -inf }
 0x2ff   : > { %530 = vmax.xlane.f32.xlu0 %v529_v1  ;;  %527 = vmax.xlane.f32.xlu1 %v526_v2 }
 0x384   : > { %v525_v3 = vpop.xlane.xlu0 %524 }
 0x385   : > { %v532_v4 = vsub.f32 %v520_v59, %v525_v3 }
 0x387   : > { %v535_v5 = vmul.f32 1.442695, %v532_v4 }
 0x388   : > { %v531_v6 = vpop.xlane.xlu0 %530  ;;  %v528_v7 = vpop.xlane.xlu1 %527 }
 0x389   : > { %2787 = vpow2.f32 %v535_v5  ;;  %v534_v8 = vsub.f32 %v522_v61, %v531_v6  ;;  %v533_v9 = vsub.f32 %v521_v0, %v528_v7 }
 0x38b   : > { %v539_v10 = vmul.f32 1.442695, %v534_v8  ;;  %v537_v11 = vmul.f32 1.442695, %v533_v9 }
 0x38d   : > { %2789 = vpow2.f32 %v539_v10  ;;  %v2999_v10 = vld [vmem:[%s2901_s23 + $0x64] ss:$0 sps:$4 sm:$0x11]  }
 0x38e   : > { %2791 = vpow2.f32 %v537_v11  ;;  %v759_v11 = vand.u32 %v2999_v10, %v2924_v33 }
 0x390   : > { %2541 = vmatprep.subr.bf16.mxu1 %v759_v11 }
 0x391   : > { %2542 = vmatpush3.bf16.msra.mxu1 %v759_v11 }
 0x396   : > { %v2788_v12 = vpop.eup %2787 }
 0x397   : > { %v541_v13 = vsel %vm346_vm2, %v2788_v12, 0.0 }
 0x398   : > { %542 = vadd.xlane.f32.xlu0 %v541_v13 }
 0x39a   : > { %v2790_v14 = vpop.eup %2789 }
 0x39b   : > { %v2792_v15 = vpop.eup %2791  ;;  %v547_v16 = vsel %vm353_vm1, %v2790_v14, 0.0 }
 0x39c   : > { %548 = vadd.xlane.f32.xlu1 %v547_v16  ;;  %v544_v17 = vsel %vm346_vm2, %v2792_v15, 0.0 }
 0x39d   : > { %545 = vadd.xlane.f32.xlu0 %v544_v17 }
 0x3ad   : > { %558 = vrot.lane.b32.xlu1 %v2929_v35, %s2856_s24  ;;  %v2669_v35 = vld [vmem:[%s2901_s23 + $0x4] ss:$36 sps:$4 sm:$0xff]  }
 0x3b3   : > { %560 = vrot.lane.b32.xlu0 %v2920_v31, %s2856_s24 }
 0x421   : > { %v543_v18 = vpop.xlane.xlu0 %542 }
 0x422   : > { %2793 = vrcp.f32 %v543_v18 }
 0x425   : > { %v549_v19 = vpop.xlane.xlu1 %548 }
 0x426   : > { %v546_v20 = vpop.xlane.xlu0 %545  ;;  %2795 = vrcp.f32 %v549_v19 }
 0x427   : > { %2797 = vrcp.f32 %v546_v20 }
 0x429   : > { %v559_v23 = vpop.permute.xlu1 %558 }
 0x42a   : > { %v561_v21 = vpop.permute.xlu0 %560 }
 0x42b   : > { %v570_v22 = vand.u32 %v561_v21, %v2924_v33 }
 0x42d   : > { %2525 = vmatprep.subr.bf16.mxu0 %v570_v22 }
 0x42e   : > { %2526 = vmatpush3.bf16.msra.mxu0 %v570_v22 }
 0x42f   : > { %2527 = vmatprep.subr.bf16.mxu0 %v559_v23  ;;  %v2794_v25 = vpop.eup %2793 }
 0x430   : > { %v2970_v29 = vmul.f32 %v2794_v25, %v2788_v12  ;;  %v3004_v12 = vld [vmem:[%s2901_s23 + $0x1c] ss:$36 sps:$4 sm:$0xff]  }
 0x431   : > { %2543 = vmatprep.subr.bf16.mxu1 %v3004_v12 }
 0x432   : > { %2528 = vmatpush3.bf16.msra.mxu0 %v559_v23  ;;  %2544 = vmatpush3.bf16.msra.mxu1 %v3004_v12  ;;  %v2155_v18 = vrot.slane %v2970_v29, 7 }
 0x433   : > { %v2796_v26 = vpop.eup %2795  ;;  %2621 = vmatprep.subr.msk.bf16.mxu0 %vm282_vm0, %v2966_v24 }
 0x434   : > { %v2798_v27 = vpop.eup %2797  ;;  %v555_v28 = vmul.f32 %v2796_v26, %v2790_v14  ;;  %v2169_v22 = vsel %vm398_vm3, %v2938_v45, %v2155_v18 }
 0x435   : > { %v554_v30 = vmul.f32 %v2798_v27, %v2792_v15 }
 0x436   : > { %v557_v31 = vpack.c.bf16 %v555_v28, %v555_v28 }
 0x437   : > { %v556_v34 = vpack.c.bf16 %v554_v30, %v2970_v29 }
 0x439   : > { %2529 = vmatprep.mubr.msk.bf16.mxu0 %vm346_vm2, %v556_v34 }
 0x43a   : > { %2530 = vmatmul.mubr.msk.bf16.vlgmr.msra.gmra.mxu0 %vm346_vm2, %v557_v31 }
 0x43b   : > { %2534 = vmatpush3.bf16.xpose.msra.mxu0 %v655_v36  ;;  %2537 = vmatprep.mubr.msk.bf16.mxu0 %vm282_vm0, %v2669_v35 }
 0x43c   : > { %2622 = vmatprep.subr.msk.bf16.mxu0 %vm282_vm0, %v2668_v37 }
 0x443   : > { %2536 = vmatpush3.bf16.xpose.msra.mxu0 %v652_v38 }
 0x44a   : > { %2538 = vmatmul.mubr.msk.bf16.vlgmr.msra.gmra.mxu0 %vm282_vm0, %v2670_v39 }
 0x4fa   : > { %v2984_v40 = vpop.f32.mrf.mxu0 }
 0x4fc   : > { %v2986_v41 = vpop.f32.mrf.mxu0 }
 0x4fe   : > { %v2532_v42 = vpop.f32.mrf.mxu0 }
 0x500   : > { %v2988_v43 = vpop.f32.mrf.mxu0 }
 0x501   : > { %v2651_v44 = vpack.i.bf16 %v2988_v43, %v2986_v41 }
 0x50a   : > { %v2539_v46 = vpop.f32.mrf.mxu0 }
 0x50b   : > { %v707_v55 = vmul.f32 0.125, %v2539_v46 }
 0x50c   : > { %v691_v47 = vpop.f32.mrf.mxu0 }
 0x50d   : > { %v705_v48 = vmul.f32 0.125, %v691_v47  ;;  %v714_v58 = vsel %vm353_vm1, %v707_v55, -inf }
 0x50e   : > { %v2540_v49 = vpop.f32.mrf.mxu0 }
 0x50f   : > { %v708_v50 = vsel %vm346_vm2, %v705_v48, -inf }
 0x510   : > { %709 = vmax.xlane.f32.xlu1 %v708_v50  ;;  %v694_v51 = vpop.f32.mrf.mxu0 }
 0x511   : > { %v706_v52 = vmul.f32 0.125, %v694_v51 }
 0x513   : > { %v711_v57 = vsel %vm346_vm2, %v706_v52, -inf }
 0x514   : > { %712 = vmax.xlane.f32.xlu0 %v711_v57 }
 0x518   : > { %715 = vmax.xlane.f32.xlu0 %v714_v58 }
 0x599   : > { %v710_v59 = vpop.xlane.xlu1 %709 }
 0x59a   : > { %v717_v60 = vsub.f32 %v705_v48, %v710_v59 }
 0x59c   : > { %v720_v61 = vmul.f32 1.442695, %v717_v60 }
 0x59d   : > { %v713_v62 = vpop.xlane.xlu0 %712 }
 0x59e   : > { %2799 = vpow2.f32 %v720_v61  ;;  %v718_v63 = vsub.f32 %v706_v52, %v713_v62 }
 0x5a0   : > { %v722_v0 = vmul.f32 1.442695, %v718_v63 }
 0x5a1   : > { %v716_v1 = vpop.xlane.xlu0 %715 }
 0x5a2   : > { %2801 = vpow2.f32 %v722_v0  ;;  %v719_v2 = vsub.f32 %v707_v55, %v716_v1 }
 0x5a4   : > { %v724_v3 = vmul.f32 1.442695, %v719_v2 }
 0x5a6   : > { %2803 = vpow2.f32 %v724_v3 }
 0x5ab   : > { %v2800_v4 = vpop.eup %2799 }
 0x5ac   : > { %v726_v5 = vsel %vm346_vm2, %v2800_v4, 0.0 }
 0x5ad   : > { %727 = vadd.xlane.f32.xlu1 %v726_v5 }
 0x5af   : > { %v2802_v6 = vpop.eup %2801 }
 0x5b0   : > { %v729_v7 = vsel %vm346_vm2, %v2802_v6, 0.0 }
 0x5b1   : > { %730 = vadd.xlane.f32.xlu0 %v729_v7 }
 0x5b3   : > { %v2804_v8 = vpop.eup %2803 }
 0x5b4   : > { %v732_v9 = vsel %vm353_vm1, %v2804_v8, 0.0 }
 0x5b5   : > { %733 = vadd.xlane.f32.xlu1 %v732_v9 }
 0x5c6   : > { %813 = vrot.lane.b32.xlu1 %v2668_v37, %s2856_s24 }
 0x5c7   : > { %815 = vrot.lane.b32.xlu0 %v2966_v24, %s2856_s24 }
 0x5ca   : > { %809 = vrot.lane.b32.xlu1 %v2669_v35, %s2856_s24 }
 0x5ce   : > { %811 = vrot.lane.b32.xlu1 %v2670_v39, %s2856_s24 }
 0x636   : > { %v728_v13 = vpop.xlane.xlu1 %727 }
 0x637   : > { %2805 = vrcp.f32 %v728_v13 }
 0x63a   : > { %v731_v14 = vpop.xlane.xlu0 %730 }
 0x63b   : > { %2807 = vrcp.f32 %v731_v14 }
 0x63e   : > { %v734_v15 = vpop.xlane.xlu1 %733  ;;  %v816_v16 = vpop.permute.xlu0 %815 }
 0x63f   : > { %2809 = vrcp.f32 %v734_v15  ;;  %2623 = vmatprep.subr.msk.bf16.mxu1 %vm282_vm0, %v816_v16  ;;  %v827_v30 = vsel %vm282_vm0, %v816_v16, 0 }
 0x642   : > { %v814_v25 = vpop.permute.xlu1 %813 }
 0x643   : > { %v824_v45 = vsel %vm282_vm0, %v814_v25, 0 }
 0x644   : > { %v2806_v17 = vpop.eup %2805 }
 0x645   : > { %v738_v19 = vmul.f32 %v2806_v17, %v2800_v4 }
 0x646   : > { %v810_v29 = vpop.permute.xlu1 %809 }
 0x647   : > { %v2158_v20 = vrot.slane %v738_v19, 6 }
 0x648   : > { %v2808_v21 = vpop.eup %2807 }
 0x649   : > { %v739_v23 = vmul.f32 %v2808_v21, %v2802_v6  ;;  %v3017_v24 = vsel %vm2170_vm4, %v2169_v22, %v2158_v20 }
 0x64a   : > { %v812_v34 = vpop.permute.xlu1 %811 }
 0x64b   : > { %v741_v26 = vpack.c.bf16 %v739_v23, %v738_v19 }
 0x64c   : > { %v2810_v27 = vpop.eup %2809 }
 0x64d   : > { %2545 = vmatprep.mubr.msk.bf16.mxu1 %vm346_vm2, %v741_v26  ;;  %v740_v28 = vmul.f32 %v2810_v27, %v2804_v8  ;;  %v2675_v26 = vld [vmem:[%s2901_s23 + $0x8] ss:$36 sps:$4 sm:$0xff]  }
 0x64f   : > { %v742_v31 = vpack.c.bf16 %v740_v28, %v740_v28  ;;  %v2674_v28 = vld [vmem:[%s2901_s23 + $0x14] ss:$36 sps:$4 sm:$0xff]  }
 0x651   : > { %2546 = vmatmul.mubr.msk.bf16.vlgmr.msra.gmra.mxu1 %vm346_vm2, %v742_v31 }
 0x652   : > { %2550 = vmatpush3.bf16.xpose.msra.mxu1 %v827_v30  ;;  %2553 = vmatprep.mubr.msk.bf16.mxu1 %vm282_vm0, %v810_v29  ;;  %v2676_v30 = vld [vmem:[%s2901_s23 + $0x50] ss:$0 sps:$4 sm:$0x11]  }
 0x653   : > { %2624 = vmatprep.subr.msk.bf16.mxu1 %vm282_vm0, %v814_v25 }
 0x65a   : > { %2552 = vmatpush3.bf16.xpose.msra.mxu1 %v824_v45 }
 0x661   : > { %2554 = vmatmul.mubr.msk.bf16.vlgmr.msra.gmra.mxu1 %vm282_vm0, %v812_v34 }
 0x711   : > { %v3026_v35 = vpop.f32.mrf.mxu1 }
 0x713   : > { %v3028_v36 = vpop.f32.mrf.mxu1 }
 0x715   : > { %v2548_v37 = vpop.f32.mrf.mxu1 }
 0x717   : > { %v3030_v38 = vpop.f32.mrf.mxu1 }
 0x721   : > { %v2555_v39 = vpop.f32.mrf.mxu1 }
 0x722   : > { %v879_v48 = vmul.f32 0.125, %v2555_v39 }
 0x723   : > { %v863_v42 = vpop.f32.mrf.mxu1 }
 0x724   : > { %v877_v46 = vmul.f32 0.125, %v863_v42  ;;  %v886_v52 = vsel %vm353_vm1, %v879_v48, -inf }
 0x725   : > { %v2556_v47 = vpop.f32.mrf.mxu1 }
 0x726   : > { %v880_v49 = vsel %vm346_vm2, %v877_v46, -inf }
 0x727   : > { %881 = vmax.xlane.f32.xlu0 %v880_v49  ;;  %v866_v50 = vpop.f32.mrf.mxu1 }
 0x728   : > { %v878_v51 = vmul.f32 0.125, %v866_v50 }
 0x72a   : > { %v883_v55 = vsel %vm346_vm2, %v878_v51, -inf }
 0x72b   : > { %887 = vmax.xlane.f32.xlu0 %v886_v52  ;;  %884 = vmax.xlane.f32.xlu1 %v883_v55 }
 0x7b0   : > { %v882_v57 = vpop.xlane.xlu0 %881 }
 0x7b1   : > { %v889_v58 = vsub.f32 %v877_v46, %v882_v57 }
 0x7b3   : > { %v892_v59 = vmul.f32 1.442695, %v889_v58 }
 0x7b4   : > { %v888_v60 = vpop.xlane.xlu0 %887  ;;  %v885_v61 = vpop.xlane.xlu1 %884 }
 0x7b5   : > { %2811 = vpow2.f32 %v892_v59  ;;  %v891_v62 = vsub.f32 %v879_v48, %v888_v60  ;;  %v890_v63 = vsub.f32 %v878_v51, %v885_v61 }
 0x7b7   : > { %v896_v0 = vmul.f32 1.442695, %v891_v62  ;;  %v894_v1 = vmul.f32 1.442695, %v890_v63 }
 0x7b9   : > { %2813 = vpow2.f32 %v896_v0 }
 0x7ba   : > { %2815 = vpow2.f32 %v894_v1 }
 0x7c2   : > { %v2812_v2 = vpop.eup %2811 }
 0x7c3   : > { %v898_v3 = vsel %vm346_vm2, %v2812_v2, 0.0 }
 0x7c4   : > { %899 = vadd.xlane.f32.xlu0 %v898_v3 }
 0x7c6   : > { %v2814_v4 = vpop.eup %2813 }
 0x7c7   : > { %v2816_v5 = vpop.eup %2815  ;;  %v904_v6 = vsel %vm353_vm1, %v2814_v4, 0.0 }
 0x7c8   : > { %905 = vadd.xlane.f32.xlu1 %v904_v6  ;;  %v901_v7 = vsel %vm346_vm2, %v2816_v5, 0.0 }
 0x7c9   : > { %902 = vadd.xlane.f32.xlu0 %v901_v7 }
 0x7d9   : > { %915 = vrot.lane.b32.xlu1 %v3004_v12, %s2856_s24  ;;  %v3044_v12 = vld [vmem:[%s2901_s23 + $0x5c] ss:$0 sps:$4 sm:$0x11]  }
 0x7da   : > { %v1012_v27 = vsel %vm282_vm0, %v3044_v12, 0 }
 0x7df   : > { %917 = vrot.lane.b32.xlu0 %v2999_v10, %s2856_s24 }
 0x84d   : > { %v900_v8 = vpop.xlane.xlu0 %899 }
 0x84e   : > { %2817 = vrcp.f32 %v900_v8  ;;  %v3077_v8 = vld [vmem:[%s2901_s23 + $0x68] ss:$0 sps:$4 sm:$0x11]  }
 0x851   : > { %v906_v9 = vpop.xlane.xlu1 %905 }
 0x852   : > { %v903_v11 = vpop.xlane.xlu0 %902  ;;  %2819 = vrcp.f32 %v906_v9  ;;  %v1116_v9 = vand.u32 %v3077_v8, %v2924_v33 }
 0x853   : > { %2821 = vrcp.f32 %v903_v11  ;;  %v3082_v11 = vld [vmem:[%s2901_s23 + $0x20] ss:$36 sps:$4 sm:$0xff]   ;;  %s3402_s23 = scalar_lea.vmem %s3432_s4, %s2630_s14 }
 0x854   : > { %2573 = vmatprep.subr.bf16.mxu1 %v1116_v9 }
 0x855   : > { %v916_v15 = vpop.permute.xlu1 %915  ;;  %2574 = vmatpush3.bf16.msra.mxu1 %v1116_v9 }
 0x856   : > { %v918_v13 = vpop.permute.xlu0 %917  ;;  %2575 = vmatprep.subr.bf16.mxu1 %v3082_v11 }
 0x857   : > { %v927_v14 = vand.u32 %v918_v13, %v2924_v33 }
 0x859   : > { %2557 = vmatprep.subr.bf16.mxu0 %v927_v14  ;;  %2576 = vmatpush3.bf16.msra.mxu1 %v3082_v11 }
 0x85a   : > { %2558 = vmatpush3.bf16.msra.mxu0 %v927_v14 }
 0x85b   : > { %v2818_v16 = vpop.eup %2817  ;;  %2559 = vmatprep.subr.bf16.mxu0 %v916_v15 }
 0x85c   : > { %v910_v17 = vmul.f32 %v2818_v16, %v2812_v2 }
 0x85e   : > { %2560 = vmatpush3.bf16.msra.mxu0 %v916_v15  ;;  %v2161_v10 = vrot.slane %v910_v17, 5 }
 0x85f   : > { %v2820_v18 = vpop.eup %2819  ;;  %2625 = vmatprep.subr.msk.bf16.mxu0 %vm282_vm0, %v3044_v12 }
 0x860   : > { %v2822_v19 = vpop.eup %2821  ;;  %v3049_v20 = vsel %vm2172_vm5, %v3017_v24, %v2161_v10  ;;  %v912_v21 = vmul.f32 %v2820_v18, %v2814_v4  ;;  %v1009_v24 = vsel %vm282_vm0, %v2674_v28, 0 }
 0x861   : > { %v911_v22 = vmul.f32 %v2822_v19, %v2816_v5 }
 0x862   : > { %v914_v23 = vpack.c.bf16 %v912_v21, %v912_v21 }
 0x863   : > { %v913_v25 = vpack.c.bf16 %v911_v22, %v910_v17 }
 0x865   : > { %2561 = vmatprep.mubr.msk.bf16.mxu0 %vm346_vm2, %v913_v25 }
 0x866   : > { %2562 = vmatmul.mubr.msk.bf16.vlgmr.msra.gmra.mxu0 %vm346_vm2, %v914_v23 }
 0x867   : > { %2566 = vmatpush3.bf16.xpose.msra.mxu0 %v1012_v27  ;;  %2569 = vmatprep.mubr.msk.bf16.mxu0 %vm282_vm0, %v2675_v26 }
 0x868   : > { %2626 = vmatprep.subr.msk.bf16.mxu0 %vm282_vm0, %v2674_v28 }
 0x86f   : > { %2568 = vmatpush3.bf16.xpose.msra.mxu0 %v1009_v24 }
 0x876   : > { %2570 = vmatmul.mubr.msk.bf16.vlgmr.msra.gmra.mxu0 %vm282_vm0, %v2676_v30 }
 0x926   : > { %v3062_v31 = vpop.f32.mrf.mxu0 }
 0x928   : > { %v3064_v29 = vpop.f32.mrf.mxu0 }
 0x92a   : > { %v2564_v45 = vpop.f32.mrf.mxu0 }
 0x92c   : > { %v3066_v34 = vpop.f32.mrf.mxu0 }
 0x92d   : > { %v2646_v37 = vpack.i.bf16 %v3066_v34, %v3064_v29  ;;  %v2752_v29 = vld [vmem:[%s3429_s1 + $0xb0] ss:$12 sps:$4 sm:$0xff]  }
 0x936   : > { %v2571_v39 = vpop.f32.mrf.mxu0 }
 0x937   : > { %v1064_v51 = vmul.f32 0.125, %v2571_v39 }
 0x938   : > { %v1048_v42 = vpop.f32.mrf.mxu0 }
 0x939   : > { %v1062_v46 = vmul.f32 0.125, %v1048_v42  ;;  %v1071_v55 = vsel %vm353_vm1, %v1064_v51, -inf }
 0x93a   : > { %v2572_v47 = vpop.f32.mrf.mxu0 }
 0x93b   : > { %v1065_v48 = vsel %vm346_vm2, %v1062_v46, -inf }
 0x93c   : > { %1066 = vmax.xlane.f32.xlu1 %v1065_v48  ;;  %v1051_v49 = vpop.f32.mrf.mxu0 }
 0x93d   : > { %v1063_v50 = vmul.f32 0.125, %v1051_v49 }
 0x93f   : > { %v1068_v52 = vsel %vm346_vm2, %v1063_v50, -inf }
 0x940   : > { %1069 = vmax.xlane.f32.xlu0 %v1068_v52 }
 0x944   : > { %1072 = vmax.xlane.f32.xlu0 %v1071_v55 }
 0x9c5   : > { %v1067_v57 = vpop.xlane.xlu1 %1066 }
 0x9c6   : > { %v1074_v58 = vsub.f32 %v1062_v46, %v1067_v57 }
 0x9c8   : > { %v1077_v59 = vmul.f32 1.442695, %v1074_v58 }
 0x9c9   : > { %v1070_v60 = vpop.xlane.xlu0 %1069 }
 0x9ca   : > { %2823 = vpow2.f32 %v1077_v59  ;;  %v1075_v61 = vsub.f32 %v1063_v50, %v1070_v60 }
 0x9cc   : > { %v1079_v62 = vmul.f32 1.442695, %v1075_v61 }
 0x9cd   : > { %v1073_v63 = vpop.xlane.xlu0 %1072 }
 0x9ce   : > { %2825 = vpow2.f32 %v1079_v62  ;;  %v1076_v0 = vsub.f32 %v1064_v51, %v1073_v63 }
 0x9d0   : > { %v1081_v1 = vmul.f32 1.442695, %v1076_v0 }
 0x9d2   : > { %2827 = vpow2.f32 %v1081_v1 }
 0x9d7   : > { %v2824_v2 = vpop.eup %2823 }
 0x9d8   : > { %v1083_v3 = vsel %vm346_vm2, %v2824_v2, 0.0 }
 0x9d9   : > { %1084 = vadd.xlane.f32.xlu1 %v1083_v3 }
 0x9db   : > { %v2826_v4 = vpop.eup %2825 }
 0x9dc   : > { %v1086_v5 = vsel %vm346_vm2, %v2826_v4, 0.0 }
 0x9dd   : > { %1087 = vadd.xlane.f32.xlu0 %v1086_v5 }
 0x9df   : > { %v2828_v6 = vpop.eup %2827 }
 0x9e0   : > { %v1089_v7 = vsel %vm353_vm1, %v2828_v6, 0.0 }
 0x9e1   : > { %1090 = vadd.xlane.f32.xlu1 %v1089_v7 }
 0x9f2   : > { %1170 = vrot.lane.b32.xlu1 %v2674_v28, %s2856_s24 }
 0x9f3   : > { %1172 = vrot.lane.b32.xlu0 %v3044_v12, %s2856_s24 }
 0x9f6   : > { %1166 = vrot.lane.b32.xlu1 %v2675_v26, %s2856_s24 }
 0x9fa   : > { %1168 = vrot.lane.b32.xlu1 %v2676_v30, %s2856_s24 }
 0xa62   : > { %v1085_v13 = vpop.xlane.xlu1 %1084 }
 0xa63   : > { %2829 = vrcp.f32 %v1085_v13 }
 0xa66   : > { %v1088_v14 = vpop.xlane.xlu0 %1087 }
 0xa67   : > { %2831 = vrcp.f32 %v1088_v14 }
 0xa6a   : > { %v1091_v15 = vpop.xlane.xlu1 %1090  ;;  %v1173_v16 = vpop.permute.xlu0 %1172 }
 0xa6b   : > { %2833 = vrcp.f32 %v1091_v15  ;;  %2627 = vmatprep.subr.msk.bf16.mxu1 %vm282_vm0, %v1173_v16  ;;  %v1184_v27 = vsel %vm282_vm0, %v1173_v16, 0  ;;  %v2656_v15 = vpack.i.bf16 %v2984_v40, %v3062_v31 }
 0xa6e   : > { %v1171_v22 = vpop.permute.xlu1 %1170 }
 0xa70   : > { %v2830_v17 = vpop.eup %2829 }
 0xa71   : > { %v1095_v10 = vmul.f32 %v2830_v17, %v2824_v2 }
 0xa72   : > { %v1167_v24 = vpop.permute.xlu1 %1166 }
 0xa73   : > { %v2164_v18 = vrot.slane %v1095_v10, 4 }
 0xa74   : > { %v2832_v12 = vpop.eup %2831 }
 0xa75   : > { %v1096_v19 = vmul.f32 %v2832_v12, %v2826_v4  ;;  %v3093_v21 = vsel %vm2174_vm6, %v3049_v20, %v2164_v18  ;;  %v1181_v20 = vsel %vm282_vm0, %v1171_v22, 0 }
 0xa76   : > { %v1169_v30 = vpop.permute.xlu1 %1168 }
 0xa77   : > { %v1098_v23 = vpack.c.bf16 %v1096_v19, %v1095_v10 }
 0xa78   : > { %v2834_v25 = vpop.eup %2833 }
 0xa79   : > { %2577 = vmatprep.mubr.msk.bf16.mxu1 %vm346_vm2, %v1098_v23  ;;  %v1097_v26 = vmul.f32 %v2834_v25, %v2828_v6  ;;  %v2679_v25 = vld [vmem:[%s3429_s1 + $0xa8] ss:$12 sps:$4 sm:$0xff]  }
 0xa7b   : > { %v1099_v28 = vpack.c.bf16 %v1097_v26, %v1097_v26  ;;  %v2681_v26 = vld [vmem:[%s3429_s1 + $0xac] ss:$12 sps:$4 sm:$0xff]  }
 0xa7d   : > { %2578 = vmatmul.mubr.msk.bf16.vlgmr.msra.gmra.mxu1 %vm346_vm2, %v1099_v28  ;;  %v2687_v28 = vld [vmem:[%s3429_s1 + $0x7c] ss:$12 sps:$4 sm:$0xff]  }
 0xa7e   : > { %2582 = vmatpush3.bf16.xpose.msra.mxu1 %v1184_v27  ;;  %2585 = vmatprep.mubr.msk.bf16.mxu1 %vm282_vm0, %v1167_v24  ;;  %v2682_v27 = vld [vmem:[%s3429_s1 + $0x90] ss:$12 sps:$4 sm:$0xff]   ;;  %v2700_v24 = vld [vmem:[%s3429_s1 + $0x228] ss:$12 sps:$4 sm:$0xff]  }
 0xa7f   : > { %2628 = vmatprep.subr.msk.bf16.mxu1 %vm282_vm0, %v1171_v22 }
 0xa86   : > { %2584 = vmatpush3.bf16.xpose.msra.mxu1 %v1181_v20  ;;  %v2702_v20 = vld [vmem:[%s3429_s1 + $0x22c] ss:$12 sps:$4 sm:$0xff]  }
 0xa87   : > { %1933 = vmatprep.subr.bf16.mxu1 %v2702_v20 }
 0xa8d   : > { %2586 = vmatmul.mubr.msk.bf16.vlgmr.msra.gmra.mxu1 %vm282_vm0, %v1169_v30  ;;  %v2708_v30 = vld [vmem:[%s3429_s1 + $0x214] ss:$12 sps:$4 sm:$0xff]  }
 0xa8e   : > { %1965 = vmatprep.mubr.bf16.mxu1 %v2855_v32  ;;  %1934 = vmatpush1.bf16.msra.mxu1 %v2700_v24 }
 0xa8f   : > { %1935 = vmatprep.subr.bf16.mxu1 %v2708_v30 }
 0xb3d   : > { %v3103_v45 = vpop.f32.mrf.mxu1 }
 0xb3f   : > { %v3105_v39 = vpop.f32.mrf.mxu1 }
 0xb41   : > { %v2580_v42 = vpop.f32.mrf.mxu1 }
 0xb42   : > { %v2685_v42 = vld [vmem:[%s3429_s1 + $0x78] ss:$12 sps:$4 sm:$0xff]  }
 0xb43   : > { %v3107_v46 = vpop.f32.mrf.mxu1 }
 0xb4d   : > { %v2587_v47 = vpop.f32.mrf.mxu1 }
 0xb4e   : > { %v1236_v51 = vmul.f32 0.125, %v2587_v47  ;;  %v2690_v47 = vld [vmem:[%s3429_s1 + $0x64] ss:$12 sps:$4 sm:$0xff]  }
 0xb4f   : > { %v1220_v48 = vpop.f32.mrf.mxu1 }
 0xb50   : > { %v1234_v49 = vmul.f32 0.125, %v1220_v48  ;;  %v1243_v58 = vsel %vm353_vm1, %v1236_v51, -inf  ;;  %v2706_v48 = vld [vmem:[%s3429_s1 + $0x210] ss:$12 sps:$4 sm:$0xff]  }
 0xb51   : > { %v2588_v50 = vpop.f32.mrf.mxu1  ;;  %1936 = vmatpush1.bf16.msra.mxu1 %v2706_v48 }
 0xb52   : > { %v1237_v52 = vsel %vm346_vm2, %v1234_v49, -inf  ;;  %v2688_v50 = vld [vmem:[%s3429_s1 + $0x60] ss:$12 sps:$4 sm:$0xff]  }
 0xb53   : > { %1238 = vmax.xlane.f32.xlu0 %v1237_v52  ;;  %v1223_v55 = vpop.f32.mrf.mxu1  ;;  %v2712_v52 = vld [vmem:[%s3429_s1 + $0x1f8] ss:$12 sps:$4 sm:$0xff]  }
 0xb54   : > { %v1235_v57 = vmul.f32 0.125, %v1223_v55  ;;  %v2720_v55 = vld [vmem:[%s3429_s1 + $0x1e4] ss:$12 sps:$4 sm:$0xff]  }
 0xb56   : > { %v1240_v59 = vsel %vm346_vm2, %v1235_v57, -inf }
 0xb57   : > { %1244 = vmax.xlane.f32.xlu0 %v1243_v58  ;;  %1241 = vmax.xlane.f32.xlu1 %v1240_v59  ;;  %v2696_v58 = vld [vmem:[%s3429_s1 + $0x34] ss:$12 sps:$4 sm:$0xff]  }
 0xb58   : > { %v2718_v59 = vld [vmem:[%s3429_s1 + $0x1e0] ss:$12 sps:$4 sm:$0xff]  }
 0xbdc   : > { %v1239_v60 = vpop.xlane.xlu0 %1238 }
 0xbdd   : > { %v1246_v61 = vsub.f32 %v1234_v49, %v1239_v60  ;;  %v2714_v49 = vld [vmem:[%s3429_s1 + $0x1fc] ss:$12 sps:$4 sm:$0xff]   ;;  %v2726_v60 = vld [vmem:[%s3429_s1 + $0x1cc] ss:$12 sps:$4 sm:$0xff]  }
 0xbde   : > { %1937 = vmatprep.subr.bf16.mxu1 %v2714_v49 }
 0xbdf   : > { %v1249_v62 = vmul.f32 1.442695, %v1246_v61  ;;  %1938 = vmatpush1.bf16.msra.mxu1 %v2712_v52  ;;  %v2694_v61 = vld [vmem:[%s3429_s1 + $0x30] ss:$12 sps:$4 sm:$0xff]   ;;  %v2753_v52 = vld [vmem:[%s3429_s1 + $0x158] ss:$12 sps:$4 sm:$0xff]  }
 0xbe0   : > { %v1245_v63 = vpop.xlane.xlu0 %1244  ;;  %v1242_v0 = vpop.xlane.xlu1 %1241  ;;  %1939 = vmatprep.subr.bf16.mxu1 %v2720_v55 }
 0xbe1   : > { %2835 = vpow2.f32 %v1249_v62  ;;  %v1248_v1 = vsub.f32 %v1236_v51, %v1245_v63  ;;  %v1247_v2 = vsub.f32 %v1235_v57, %v1242_v0  ;;  %v2693_v51 = vld [vmem:[%s3429_s1 + $0x4c] ss:$12 sps:$4 sm:$0xff]   ;;  %v2691_v57 = vld [vmem:[%s3429_s1 + $0x48] ss:$12 sps:$4 sm:$0xff]  }
 0xbe2   : > { %v2699_v62 = vld [vmem:[%s3429_s1 + $0x1c] ss:$12 sps:$4 sm:$0xff]   ;;  %v2732_v0 = vld [vmem:[%s3429_s1 + $0x1b4] ss:$12 sps:$4 sm:$0xff]  }
 0xbe3   : > { %v1253_v3 = vmul.f32 1.442695, %v1248_v1  ;;  %v1251_v4 = vmul.f32 1.442695, %v1247_v2  ;;  %1940 = vmatpush1.bf16.msra.mxu1 %v2718_v59  ;;  %v2724_v63 = vld [vmem:[%s3429_s1 + $0x1c8] ss:$12 sps:$4 sm:$0xff]  }
 0xbe4   : > { %1941 = vmatprep.subr.bf16.mxu1 %v2726_v60  ;;  %v2697_v1 = vld [vmem:[%s3429_s1 + $0x18] ss:$12 sps:$4 sm:$0xff]  }
 0xbe5   : > { %2837 = vpow2.f32 %v1253_v3  ;;  %v2705_v2 = vld [vmem:[%s3429_s1 + $0x4] ss:$12 sps:$4 sm:$0xff]  }
 0xbe6   : > { %2839 = vpow2.f32 %v1251_v4  ;;  %v2730_v3 = vld [vmem:[%s3429_s1 + $0x1b0] ss:$12 sps:$4 sm:$0xff]   ;;  %v2754_v60 = vld [vmem:[%s3429_s1 + $0x98] ss:$12 sps:$4 sm:$0xff]  }
 0xbe7   : > { %1942 = vmatpush1.bf16.msra.mxu1 %v2724_v63  ;;  %v2738_v4 = vld [vmem:[%s3429_s1 + $0x19c] ss:$12 sps:$4 sm:$0xff]  }
 0xbe8   : > { %1943 = vmatprep.subr.bf16.mxu1 %v2732_v0 }
 0xbeb   : > { %1944 = vmatpush1.bf16.msra.mxu1 %v2730_v3 }
 0xbec   : > { %1945 = vmatprep.subr.bf16.mxu1 %v2738_v4  ;;  %v2760_v4 = vld [vmem:[%s3429_s1 + $0x68] ss:$12 sps:$4 sm:$0xff]  }
 0xbee   : > { %v2836_v5 = vpop.eup %2835 }
 0xbef   : > { %v1255_v6 = vsel %vm346_vm2, %v2836_v5, 0.0 }
 0xbf0   : > { %1256 = vadd.xlane.f32.xlu0 %v1255_v6  ;;  %v2711_v6 = vld [vmem:[%s3429_s1 + $0x16c] ss:$12 sps:$4 sm:$0xff]  }
 0xbf2   : > { %v2838_v7 = vpop.eup %2837 }
 0xbf3   : > { %v2840_v9 = vpop.eup %2839  ;;  %v1261_v13 = vsel %vm353_vm1, %v2838_v7, 0.0 }
 0xbf4   : > { %1262 = vadd.xlane.f32.xlu1 %v1261_v13  ;;  %v1258_v14 = vsel %vm346_vm2, %v2840_v9, 0.0  ;;  %v2717_v13 = vld [vmem:[%s3429_s1 + $0x154] ss:$12 sps:$4 sm:$0xff]  }
 0xbf5   : > { %1259 = vadd.xlane.f32.xlu0 %v1258_v14  ;;  %v2715_v14 = vld [vmem:[%s3429_s1 + $0x150] ss:$12 sps:$4 sm:$0xff]  }
 0xc05   : > { %1272 = vrot.lane.b32.xlu1 %v3082_v11, %s2856_s24 }
 0xc0b   : > { %1274 = vrot.lane.b32.xlu0 %v3077_v8, %s2856_s24 }
 0xc0f   : > { %2652 = vrot.lane.b32.xlu0 %v2651_v44, %s2856_s24 }
 0xc13   : > { %2657 = vrot.lane.b32.xlu0 %v2656_v15, %s2856_s24  ;;  %v2723_v15 = vld [vmem:[%s3429_s1 + $0x13c] ss:$12 sps:$4 sm:$0xff]  }
 0xc79   : > { %v1257_v16 = vpop.xlane.xlu0 %1256 }
 0xc7a   : > { %2841 = vrcp.f32 %v1257_v16  ;;  %v2721_v16 = vld [vmem:[%s3429_s1 + $0x138] ss:$12 sps:$4 sm:$0xff]  }
 0xc7d   : > { %v1263_v17 = vpop.xlane.xlu1 %1262 }
 0xc7e   : > { %v1260_v10 = vpop.xlane.xlu0 %1259  ;;  %2843 = vrcp.f32 %v1263_v17  ;;  %v2729_v17 = vld [vmem:[%s3429_s1 + $0x124] ss:$12 sps:$4 sm:$0xff]  }
 0xc7f   : > { %2845 = vrcp.f32 %v1260_v10  ;;  %v2727_v10 = vld [vmem:[%s3429_s1 + $0x120] ss:$12 sps:$4 sm:$0xff]  }
 0xc81   : > { %v1273_v18 = vpop.permute.xlu1 %1272 }
 0xc82   : > { %v1275_v11 = vpop.permute.xlu0 %1274 }
 0xc83   : > { %v1284_v8 = vand.u32 %v1275_v11, %v2924_v33  ;;  %v2735_v11 = vld [vmem:[%s3429_s1 + $0x10c] ss:$12 sps:$4 sm:$0xff]  }
 0xc85   : > { %2589 = vmatprep.subr.bf16.mxu0 %v1284_v8 }
 0xc86   : > { %2590 = vmatpush3.bf16.msra.mxu0 %v1284_v8  ;;  %v2733_v8 = vld [vmem:[%s3429_s1 + $0x108] ss:$12 sps:$4 sm:$0xff]  }
 0xc87   : > { %v2842_v41 = vpop.eup %2841  ;;  %2591 = vmatprep.subr.bf16.mxu0 %v1273_v18 }
 0xc88   : > { %v1267_v43 = vmul.f32 %v2842_v41, %v2836_v5  ;;  %v2703_v5 = vld [vmem:[%s3429_s1] ss:$12 sps:$4 sm:$0xff]   ;;  %v2739_v41 = vld [vmem:[%s3429_s1 + $0xf0] ss:$12 sps:$4 sm:$0xff]  }
 0xc8a   : > { %2592 = vmatpush3.bf16.msra.mxu0 %v1273_v18  ;;  %v2167_v40 = vrot.slane %v1267_v43, 3  ;;  %v2741_v18 = vld [vmem:[%s3429_s1 + $0xf4] ss:$12 sps:$4 sm:$0xff]  }
 0xc8b   : > { %v2844_v44 = vpop.eup %2843  ;;  %1882 = vmatprep.subr.bf16.mxu0 %v2681_v26  ;;  %v2755_v26 = vld [vmem:[%s3429_s1 + $0x230] ss:$12 sps:$4 sm:$0xff]  }
 0xc8c   : > { %v2846_v31 = vpop.eup %2845  ;;  %v2177_v12 = vsel %vm2176_vm7, %v3093_v21, %v2167_v40  ;;  %v1269_v33 = vmul.f32 %v2844_v44, %v2838_v7  ;;  %v2684_v21 = vld [vmem:[%s3429_s1 + $0x94] ss:$12 sps:$4 sm:$0xff]   ;;  %v2736_v7 = vld [vmem:[%s3429_s1 + $0x198] ss:$12 sps:$4 sm:$0xff]   ;;  %v2747_v44 = vld [vmem:[%s3429_s1 + $0xdc] ss:$12 sps:$4 sm:$0xff]  }
 0xc8d   : > { %v1268_v19 = vmul.f32 %v2846_v31, %v2840_v9  ;;  %2179 = vst.msk [vmem:[%s255_s28] sm:$0x3f] %vm2178_vm8, %v2177_v12  ;;  %v2709_v9 = vld [vmem:[%s3429_s1 + $0x168] ss:$12 sps:$4 sm:$0xff]   ;;  %1946 = vmatpush1.bf16.msra.mxu1 %v2736_v7  ;;  %v2742_v40 = vld [vmem:[%s3429_s1 + $0x180] ss:$12 sps:$4 sm:$0xff]  }
 0xc8e   : > { %v1271_v22 = vpack.c.bf16 %v1269_v33, %v1269_v33  ;;  %v2745_v31 = vld [vmem:[%s3429_s1 + $0xd8] ss:$12 sps:$4 sm:$0xff]   ;;  %v2748_v12 = vld [vmem:[%s3429_s1 + $0x170] ss:$12 sps:$4 sm:$0xff]   ;;  %v2764_v7 = vld [vmem:[%s3429_s1 + $0x1e8] ss:$12 sps:$4 sm:$0xff]  }
 0xc8f   : > { %v1270_v23 = vpack.c.bf16 %v1268_v19, %v1267_v43  ;;  %v2744_v43 = vld [vmem:[%s3429_s1 + $0x184] ss:$12 sps:$4 sm:$0xff]  }
 0xc90   : > { %1947 = vmatprep.subr.bf16.mxu1 %v2744_v43  ;;  %v2751_v33 = vld [vmem:[%s3429_s1 + $0xc4] ss:$12 sps:$4 sm:$0xff]  }
 0xc91   : > { %2593 = vmatprep.mubr.msk.bf16.mxu0 %vm346_vm2, %v1270_v23  ;;  %1948 = vmatpush1.bf16.msra.mxu1 %v2742_v40 }
 0xc92   : > { %2594 = vmatmul.mubr.msk.bf16.vlgmr.msra.gmra.mxu0 %vm346_vm2, %v1271_v22  ;;  %2463 = vmatprep.subr.bf16.mxu1 %v2748_v12  ;;  %v2749_v22 = vld [vmem:[%s3429_s1 + $0xc0] ss:$12 sps:$4 sm:$0xff]  }
 0xc93   : > { %1883 = vmatpush1.bf16.msra.mxu0 %v2679_v25 }
 0xc94   : > { %1884 = vmatprep.subr.bf16.mxu0 %v2684_v21 }
 0xc97   : > { %1885 = vmatpush1.bf16.msra.mxu0 %v2682_v27 }
 0xc98   : > { %1886 = vmatprep.subr.bf16.mxu0 %v2687_v28  ;;  %v2653_v28 = vpop.permute.xlu0 %2652 }
 0xc99   : > { %v2654_v48 = vunpack.i.l.bf16 %v2653_v28 }
 0xc9b   : > { %1887 = vmatpush1.bf16.msra.mxu0 %v2685_v42 }
 0xc9c   : > { %1888 = vmatprep.subr.bf16.mxu0 %v2690_v47  ;;  %v2658_v24 = vpop.permute.xlu0 %2657  ;;  %v2655_v47 = vunpack.i.h.bf16 %v2653_v28 }
 0xc9d   : > { %v2659_v49 = vunpack.i.l.bf16 %v2658_v24  ;;  %v2660_v0 = vunpack.i.h.bf16 %v2658_v24 }
 0xc9f   : > { %1889 = vmatpush1.bf16.msra.mxu0 %v2688_v50  ;;  %v1372_v3 = vsel %vm282_vm0, %v2948_v53, %v2660_v0  ;;  %v2763_v53 = vld [vmem:[%s3429_s1 + $0x50] ss:$12 sps:$4 sm:$0xff]  }
 0xca0   : > { %1890 = vmatprep.subr.bf16.mxu0 %v2693_v51 }
 0xca3   : > { %1891 = vmatpush1.bf16.msra.mxu0 %v2691_v57 }
 0xca4   : > { %1892 = vmatprep.subr.bf16.mxu0 %v2696_v58  ;;  %v1371_v58 = vsel %vm282_vm0, %v2952_v56, %v2655_v47 }
 0xca7   : > { %1893 = vmatpush1.bf16.msra.mxu0 %v2694_v61  ;;  %v1375_v61 = vsel %vm282_vm0, %v3026_v35, %v2659_v49 }
 0xca8   : > { %1894 = vmatprep.subr.bf16.mxu0 %v2699_v62  ;;  %v1383_v35 = vpack.c.bf16 %v1375_v61, %v1375_v61 }
 0xcab   : > { %1895 = vmatpush1.bf16.msra.mxu0 %v2697_v1 }
 0xcac   : > { %1896 = vmatprep.subr.bf16.mxu0 %v2705_v2  ;;  %v2761_v2 = vld [vmem:[%s3429_s1 + $0x200] ss:$12 sps:$4 sm:$0xff]  }
 0xcaf   : > { %1897 = vmatpush1.bf16.msra.mxu0 %v2703_v5  ;;  %v1382_v5 = vpack.c.bf16 %v1372_v3, %v1372_v3 }
 0xcb0   : > { %1898 = vmatprep.subr.bf16.mxu0 %v2711_v6  ;;  %v2762_v6 = vld [vmem:[%s3429_s1 + $0x110] ss:$12 sps:$4 sm:$0xff]  }
 0xcb3   : > { %1899 = vmatpush2.bf16.msra.mxu0 %v2709_v9  ;;  %v2765_v9 = vld [vmem:[%s3429_s1 + $0xf8] ss:$12 sps:$4 sm:$0xff]  }
 0xcb4   : > { %1900 = vmatprep.subr.bf16.mxu0 %v2717_v13  ;;  %v2767_v13 = vld [vmem:[%s3429_s1 + $0x1d0] ss:$12 sps:$4 sm:$0xff]  }
 0xcb7   : > { %1901 = vmatpush2.bf16.msra.mxu0 %v2715_v14  ;;  %v2766_v14 = vld [vmem:[%s3429_s1 + $0x38] ss:$12 sps:$4 sm:$0xff]  }
 0xcb8   : > { %1902 = vmatprep.subr.bf16.mxu0 %v2723_v15  ;;  %v2768_v15 = vld [vmem:[%s3429_s1 + $0xe0] ss:$12 sps:$4 sm:$0xff]  }
 0xcbb   : > { %1903 = vmatpush2.bf16.msra.mxu0 %v2721_v16  ;;  %v2770_v16 = vld [vmem:[%s3429_s1 + $0x1b8] ss:$12 sps:$4 sm:$0xff]  }
 0xcbc   : > { %1904 = vmatprep.subr.bf16.mxu0 %v2729_v17  ;;  %v2769_v17 = vld [vmem:[%s3429_s1 + $0x20] ss:$12 sps:$4 sm:$0xff]  }
 0xcbf   : > { %1905 = vmatpush2.bf16.msra.mxu0 %v2727_v10  ;;  %v2771_v10 = vld [vmem:[%s3429_s1 + $0xc8] ss:$12 sps:$4 sm:$0xff]  }
 0xcc0   : > { %1906 = vmatprep.subr.bf16.mxu0 %v2735_v11  ;;  %v2773_v11 = vld [vmem:[%s3429_s1 + $0x1a0] ss:$12 sps:$4 sm:$0xff]  }
 0xcc3   : > { %1907 = vmatpush2.bf16.msra.mxu0 %v2733_v8  ;;  %v2772_v8 = vld [vmem:[%s3429_s1 + $0x8] ss:$12 sps:$4 sm:$0xff]  }
 0xcc4   : > { %1908 = vmatprep.subr.bf16.mxu0 %v2741_v18  ;;  %v2774_v18 = vld [vmem:[%s3429_s1 + $0x188] ss:$12 sps:$4 sm:$0xff]  }
 0xcc7   : > { %1909 = vmatpush2.bf16.msra.mxu0 %v2739_v41  ;;  %v1483_v41 = vlaneseq }
 0xcc8   : > { %1910 = vmatprep.subr.bf16.mxu0 %v2747_v44  ;;  %v3382_v44 = vld [vmem:[%s3430_s2] sm:$0x7] }
 0xcc9   : > { %v3375_v43 = vshrl.u32 %v1483_v41, 7 }
 0xccb   : > { %1911 = vmatpush2.bf16.msra.mxu0 %v2745_v31  ;;  %v1485_v40 = vsub.s32 0, %v3375_v43  ;;  %v1489_v12 = vsub.s32 1, %v3375_v43 }
 0xccc   : > { %1912 = vmatprep.subr.bf16.mxu0 %v2751_v33 }
 0xccf   : > { %1913 = vmatpush2.bf16.msra.mxu0 %v2749_v22 }
 0xcd0   : > { %2597 = vmatprep.subr.bf16.mxu0 %v2755_v26 }
 0xd52   : > { %v2595_v19 = vpop.f32.mrf.mxu0 }
 0xd54   : > { %v1320_v23 = vpop.f32.mrf.mxu0 }
 0xd56   : > { %v2596_v25 = vpop.f32.mrf.mxu0 }
 0xd58   : > { %v1323_v21 = vpop.f32.mrf.mxu0 }
 0xd59   : > { %v2641_v27 = vpack.i.bf16 %v1323_v21, %v1320_v23  ;;  %v1490_v23 = vrot.slane %v3382_v44, %v1489_v12 }
 0xd5b   : > { %2642 = vrot.lane.b32.xlu1 %v2641_v27, %s2856_s24 }
 0xd5f   : > { %2647 = vrot.lane.b32.xlu1 %v2646_v37, %s2856_s24 }
 0xd63   : > { %1365 = vrot.lane.b32.xlu1 %v2595_v19, %s2856_s24  ;;  %v1486_v19 = vrot.slane %v3382_v44, %v1485_v40 }
 0xdcd   : > { %v2643_v20 = vpop.permute.xlu1 %2642 }
 0xdce   : > { %v2645_v30 = vunpack.i.h.bf16 %v2643_v20  ;;  %v2644_v42 = vunpack.i.l.bf16 %v2643_v20 }
 0xdd0   : > { %v1377_v50 = vsel %vm282_vm0, %v3107_v46, %v2645_v30  ;;  %v1376_v51 = vsel %vm282_vm0, %v3105_v39, %v2644_v42  ;;  %v1370_v46 = vsel %vm282_vm0, %v2950_v54, %v2654_v48  ;;  %v2082_v48 = vld [vmem:[%s3390_s20 + $0xc] sm:$0xff] }
 0xdd1   : > { %v1381_v34 = vpack.c.bf16 %v1377_v50, %v1376_v51  ;;  %v2648_v37 = vpop.permute.xlu1 %2647  ;;  %v1379_v62 = vpack.c.bf16 %v1371_v58, %v1370_v46 }
 0xdd2   : > { %v2650_v55 = vunpack.i.h.bf16 %v2648_v37  ;;  %v2649_v57 = vunpack.i.l.bf16 %v2648_v37 }
 0xdd3   : > { %1966 = vmatmul.mubr.bf16.vlgmr.msra.gmra.mxu1 %v1381_v34 }
 0xdd4   : > { %2464 = vmatpush3.bf16.msra.mxu1 %v2752_v29  ;;  %v1373_v39 = vsel %vm282_vm0, %v3028_v36, %v2649_v57  ;;  %v1374_v59 = vsel %vm282_vm0, %v3030_v38, %v2650_v55  ;;  %1975 = vmatprep.mubr.bf16.mxu1 %v2855_v32  ;;  %v2756_v36 = vld [vmem:[%s3429_s1 + $0x140] ss:$12 sps:$4 sm:$0xff]   ;;  %v2758_v38 = vld [vmem:[%s3429_s1 + $0x218] ss:$12 sps:$4 sm:$0xff]  }
 0xdd5   : > { %v1366_v56 = vpop.permute.xlu1 %1365  ;;  %2465 = vmatprep.subr.bf16.mxu1 %v2753_v52  ;;  %v1380_v54 = vpack.c.bf16 %v1374_v59, %v1373_v39  ;;  %v2757_v32 = vld [vmem:[%s3429_s1 + $0x80] ss:$12 sps:$4 sm:$0xff]   ;;  %v2090_v52 = vunpack.c.h.bf16 %v2082_v48  ;;  %v2084_v59 = vld [vmem:[%s3390_s20 + $0x18] sm:$0x11] }
 0xdd6   : > { %v1378_v63 = vsel %vm282_vm0, %v3103_v45, %v1366_v56  ;;  %v2759_v45 = vld [vmem:[%s3429_s1 + $0x128] ss:$12 sps:$4 sm:$0xff]  }
 0xdd7   : > { %1914 = vmatprep.mubr.bf16.mxu0 %v1380_v54  ;;  %v1384_v1 = vpack.c.bf16 %v1378_v63, %v1378_v63  ;;  %v2092_v63 = vunpack.c.l.bf16 %v2084_v59 }
 0xdd8   : > { %2466 = vmatpush3.bf16.msra.mxu1 %v2754_v60  ;;  %1915 = vmatmul.mubr.bf16.vlgmr.msra.gmra.mxu0 %v1379_v62 }
 0xdd9   : > { %2598 = vmatpush3.bf16.msra.mxu0 %v2755_v26  ;;  %1924 = vmatprep.mubr.bf16.mxu0 %v1383_v35  ;;  %v2080_v26 = vld [vmem:[%s3390_s20] sm:$0xff] }
 0xdda   : > { %2467 = vmatprep.subr.bf16.mxu1 %v2756_v36  ;;  %2599 = vmatprep.subr.bf16.mxu0 %v2758_v38  ;;  %v2086_v20 = vunpack.c.l.bf16 %v2080_v26  ;;  %v2087_v42 = vunpack.c.h.bf16 %v2080_v26 }
 0xddb   : > { %1976 = vmatmul.mubr.bf16.gmra.mxu1 %v1384_v1 }
 0xddc   : > { %2468 = vmatpush3.bf16.msra.mxu1 %v2757_v32  ;;  %2016 = vmatprep.mubr.bf16.mxu1 %v1380_v54 }
 0xddd   : > { %2600 = vmatpush3.bf16.msra.mxu0 %v2758_v38  ;;  %2469 = vmatprep.subr.bf16.mxu1 %v2759_v45  ;;  %v2093_v38 = vunpack.c.h.bf16 %v2084_v59 }
 0xdde   : > { %2601 = vmatprep.subr.bf16.mxu0 %v2761_v2 }
 0xde0   : > { %2470 = vmatpush3.bf16.msra.mxu1 %v2760_v4  ;;  %1925 = vmatmul.mubr.bf16.gmra.mxu0 %v1382_v5 }
 0xde1   : > { %2602 = vmatpush3.bf16.msra.mxu0 %v2761_v2  ;;  %2613 = vmatprep.mubr.bf16.mxu0 %v1381_v34  ;;  %v2089_v34 = vunpack.c.l.bf16 %v2082_v48 }
 0xde2   : > { %2471 = vmatprep.subr.bf16.mxu1 %v2762_v6  ;;  %2603 = vmatprep.subr.bf16.mxu0 %v2764_v7 }
 0xde4   : > { %2472 = vmatpush3.bf16.msra.mxu1 %v2763_v53  ;;  %v2148_v53 = vld [vmem:[%s3402_s23 + $0x18] sm:$0x11] }
 0xde5   : > { %2604 = vmatpush3.bf16.msra.mxu0 %v2764_v7  ;;  %2473 = vmatprep.subr.bf16.mxu1 %v2765_v9 }
 0xde6   : > { %2605 = vmatprep.subr.bf16.mxu0 %v2767_v13 }
 0xde8   : > { %2474 = vmatpush3.bf16.msra.mxu1 %v2766_v14  ;;  %v1493_v14 = vsub.s32 2, %v3375_v43 }
 0xde9   : > { %2606 = vmatpush3.bf16.msra.mxu0 %v2767_v13  ;;  %2475 = vmatprep.subr.bf16.mxu1 %v2768_v15 }
 0xdea   : > { %2607 = vmatprep.subr.bf16.mxu0 %v2770_v16 }
 0xdec   : > { %2476 = vmatpush3.bf16.msra.mxu1 %v2769_v17 }
 0xded   : > { %2608 = vmatpush3.bf16.msra.mxu0 %v2770_v16  ;;  %2477 = vmatprep.subr.bf16.mxu1 %v2771_v10  ;;  %v1494_v16 = vrot.slane %v3382_v44, %v1493_v14  ;;  %v2085_v44 = vld [vmem:[%s3390_s20 + $0x20] sm:$0x1] }
 0xdee   : > { %2609 = vmatprep.subr.bf16.mxu0 %v2773_v11 }
 0xdf0   : > { %2478 = vmatpush3.bf16.msra.mxu1 %v2772_v8 }
 0xdf1   : > { %2610 = vmatpush3.bf16.msra.mxu0 %v2773_v11  ;;  %v2081_v11 = vld [vmem:[%s3390_s20 + $0x8] ss:$12 sps:$4 sm:$0xff]  }
 0xdf2   : > { %2611 = vmatprep.subr.bf16.mxu0 %v2774_v18 }
 0xdf3   : > { %2017 = vmatmul.mubr.bf16.vlgmr.msra.gmra.mxu1 %v1379_v62 }
 0xdf4   : > { %2024 = vmatprep.mubr.bf16.mxu1 %v1383_v35 }
 0xdf5   : > { %2612 = vmatpush3.bf16.msra.mxu0 %v2774_v18 }
 0xdf8   : > { %2614 = vmatmul.mubr.bf16.vlgmr.msra.gmra.mxu0 %v1384_v1 }
 0xdfb   : > { %2025 = vmatmul.mubr.bf16.gmra.mxu1 %v1382_v5 }
 0xe93   : > { %v1967_v31 = vpop.f32.mrf.mxu1 }
 0xe95   : > { %v1969_v33 = vpop.f32.mrf.mxu1 }
 0xe97   : > { %v1971_v22 = vpop.f32.mrf.mxu1 }
 0xe98   : > { %v1916_v25 = vpop.f32.mrf.mxu0 }
 0xe99   : > { %v1917_v21 = vadd.f32 %v1916_v25, %v1486_v19  ;;  %v1973_v27 = vpop.f32.mrf.mxu1 }
 0xe9a   : > { %v1918_v28 = vpop.f32.mrf.mxu0 }
 0xe9b   : > { %v1968_v24 = vadd.f32 %v1967_v31, %v1917_v21  ;;  %v1919_v30 = vadd.f32 %v1918_v28, %v1490_v23  ;;  %v1977_v47 = vpop.f32.mrf.mxu1  ;;  %v2088_v31 = vunpack.c.l.bf16 %v2081_v11  ;;  %v2091_v21 = vunpack.c.h.bf16 %v2081_v11 }
 0xe9c   : > { %v1920_v49 = vpop.f32.mrf.mxu0 }
 0xe9d   : > { %v1970_v50 = vadd.f32 %v1969_v33, %v1919_v30  ;;  %v1921_v51 = vadd.f32 %v1920_v49, %v1486_v19  ;;  %v1979_v29 = vpop.f32.mrf.mxu1  ;;  %v2095_v55 = vadd.f32 %v2086_v20, %v1968_v24 }
 0xe9e   : > { %v1922_v37 = vpop.f32.mrf.mxu0 }
 0xe9f   : > { %v2096_v57 = vadd.f32 %v2087_v42, %v1970_v50  ;;  %v1972_v58 = vadd.f32 %v1971_v22, %v1921_v51  ;;  %v1923_v46 = vadd.f32 %v1922_v37, %v1490_v23  ;;  %v1981_v39 = vpop.f32.mrf.mxu1 }
 0xea0   : > { %v1926_v60 = vpop.f32.mrf.mxu0 }
 0xea1   : > { %v2409_v61 = vpack.c.bf16 %v2096_v57, %v2095_v55  ;;  %v1974_v56 = vadd.f32 %v1973_v27, %v1923_v46  ;;  %v1927_v54 = vadd.f32 %v1926_v60, %v1486_v19  ;;  %v1982_v62 = vpop.f32.mrf.mxu1  ;;  %v2098_v0 = vadd.f32 %v2089_v34, %v1972_v58  ;;  %v2151_v34 = vld [vmem:[%s3402_s23 + $0x20] sm:$0x1] }
 0xea2   : > { %v1928_v36 = vpop.f32.mrf.mxu0 }
 0xea3   : > { %2137 = vst [vmem:[%s3402_s23] sm:$0xff] %v2409_v61  ;;  %v2099_v35 = vadd.f32 %v2090_v52, %v1974_v56  ;;  %v1978_v32 = vadd.f32 %v1977_v47, %v1927_v54  ;;  %v1929_v1 = vadd.f32 %v1928_v36, %v1490_v23  ;;  %v2094_v47 = vunpack.c.l.bf16 %v2085_v44 }
 0xea4   : > { %v1930_v2 = vpop.f32.mrf.mxu0 }
 0xea5   : > { %v2411_v3 = vpack.c.bf16 %v2099_v35, %v2098_v0  ;;  %v1980_v4 = vadd.f32 %v1979_v29, %v1929_v1  ;;  %v2101_v6 = vadd.f32 %v2092_v63, %v1978_v32 }
 0xea6   : > { %v1931_v5 = vpop.f32.mrf.mxu0 }
 0xea7   : > { %2139 = vst [vmem:[%s3402_s23 + $0xc] sm:$0xff] %v2411_v3  ;;  %v2102_v7 = vadd.f32 %v2093_v38, %v1980_v4 }
 0xea9   : > { %v2413_v9 = vpack.c.bf16 %v2102_v7, %v2101_v6 }
 0xeab   : > { %v2149_v13 = vsel %vm2147_vm14, %v2413_v9, %v2148_v53 }
 0xeac   : > { %2150 = vst [vmem:[%s3402_s23 + $0x18] sm:$0x11] %v2149_v13 }
 0xeb3   : > { %v2479_v15 = vpop.f32.mrf.mxu1 }
 0xeb5   : > { %v2480_v17 = vpop.f32.mrf.mxu1 }
 0xeb6   : > { %v2481_v10 = vadd.f32 %v2480_v17, %v2479_v15 }
 0xeb7   : > { %v2482_v8 = vpop.f32.mrf.mxu1 }
 0xeb8   : > { %v2615_v18 = vpop.f32.mrf.mxu0  ;;  %v2019_v41 = vadd.f32 %v2481_v10, %v1494_v16 }
 0xeb9   : > { %v2483_v40 = vpop.f32.mrf.mxu1 }
 0xeba   : > { %v2484_v12 = vadd.f32 %v2483_v40, %v2482_v8  ;;  %v2066_v33 = vpop.f32.mrf.mxu0 }
 0xebb   : > { %v2067_v19 = vadd.f32 %v2066_v33, %v2019_v41  ;;  %v2485_v22 = vpop.f32.mrf.mxu1 }
 0xebc   : > { %v2616_v23 = vpop.f32.mrf.mxu0  ;;  %v2022_v25 = vadd.f32 %v2484_v12, %v1494_v16 }
 0xebd   : > { %v2097_v43 = vadd.f32 %v2088_v31, %v2067_v19  ;;  %v2486_v26 = vpop.f32.mrf.mxu1 }
 0xebe   : > { %v2487_v27 = vadd.f32 %v2486_v26, %v2485_v22  ;;  %v2069_v28 = vpop.f32.mrf.mxu0 }
 0xebf   : > { %v2410_v24 = vpack.c.bf16 %v2097_v43, %v2097_v43  ;;  %v2070_v20 = vadd.f32 %v2069_v28, %v2022_v25  ;;  %v2488_v30 = vpop.f32.mrf.mxu1 }
 0xec0   : > { %v2027_v42 = vadd.f32 %v2487_v27, %v1494_v16 }
 0xec1   : > { %2138 = vst [vmem:[%s3402_s23 + $0x8] sm:$0xf] %v2410_v24  ;;  %v2100_v48 = vadd.f32 %v2091_v21, %v2070_v20  ;;  %v2489_v49 = vpop.f32.mrf.mxu1 }
 0xec2   : > { %v2075_v50 = vadd.f32 %v2615_v18, %v2027_v42 }
 0xec3   : > { %v2412_v51 = vpack.c.bf16 %v2100_v48, %v2100_v48 }
 0xec4   : > { %v2103_v29 = vadd.f32 %v2094_v47, %v2075_v50 }
 0xec5   : > { %2140 = vst [vmem:[%s3402_s23 + $0x14] sm:$0xf] %v2412_v51 }
 0xec6   : > { %v2414_v37 = vpack.c.bf16 %v2103_v29, %v2103_v29 }
 0xec8   : > { %v2152_v52 = vsel %vm3406_vm12, %v2414_v37, %v2151_v34 }
 0xec9   : > { %2153 = vst [vmem:[%s3402_s23 + $0x20] sm:$0x1] %v2152_v52 }
 0xeca PF: > { %s16_s18 = sadd.s32 1, %s2853_s18  }
 0xecb   : > { %p13_p4 = scmp.ge.s32.totalorder %s16_s18, 4  }
 0xecd   :  { %15 = sbr.rel (!%p13_p4) target bundleno = 1 (0x1), region = 81 }

// kernel: dino_featurizer_forward.3
= control target key start
LH: loop header
LB: loop body
LE: loop exit
PB: predicated region body
PF: predicated region fallthrough
CT: control target
= control target key end

     0   :  { %vm57_vm0 = vcmask 1041408   ;;  %s429_s0 = inlined_call_operand.vmem [shape: bf16[34,384], index: 0, kind: input, shape index: {}]   ;;  %s430_s1 = inlined_call_operand.vmem [shape: f32[1,384], index: 1, kind: input, shape index: {}]   ;;  %s431_s2 = inlined_call_operand.vmem [shape: f32[1,384], index: 2, kind: input, shape index: {}]   ;;  %s432_s3 = inlined_call_operand.vmem [shape: f32[34,384], index: 3, kind: output, shape index: {}]  }
   0x1   :  { %v16_v0 = vld [vmem:[%s429_s0 + $0xc] sm:$0xff]  ;;  %v17_v1 = vld [vmem:[%s429_s0 + $0x8] ss:$12 sps:$4 sm:$0xff]   ;;  %v14_v2 = vld [vmem:[%s429_s0] sm:$0xff] }
   0x2   :  { %v27_v3 = vunpack.c.l.bf16 %v16_v0  ;;  %v28_v4 = vunpack.c.h.bf16 %v16_v0  ;;  %v29_v5 = vunpack.c.h.bf16 %v17_v1  ;;  %v24_v6 = vunpack.c.l.bf16 %v14_v2  ;;  %v18_v7 = vld [vmem:[%s429_s0 + $0x18] sm:$0xff]  ;;  %v280_v8 = vld [vmem:[%s429_s0 + $0x20] ss:$12 sps:$4 sm:$0xff]   ;;  %v22_v9 = vld [vmem:[%s429_s0 + $0x30] sm:$0x11] }
   0x3   :  { %v25_v10 = vunpack.c.h.bf16 %v14_v2  ;;  %v26_v11 = vunpack.c.l.bf16 %v17_v1  ;;  %v30_v12 = vunpack.c.l.bf16 %v18_v7  ;;  %v31_v13 = vunpack.c.h.bf16 %v18_v7  ;;  %v23_v14 = vld [vmem:[%s429_s0 + $0x38] sm:$0x1]  ;;  %v291_v15 = vld [vmem:[%s429_s0 + $0x24] sm:$0xff] }
   0x4   :  { %v45_v16 = vadd.f32 %v28_v4, %v27_v3  ;;  %v32_v17 = vunpack.c.l.bf16 %v280_v8  ;;  %v36_v18 = vunpack.c.l.bf16 %v22_v9  ;;  %v37_v19 = vunpack.c.h.bf16 %v22_v9 }
   0x5   :  { %v41_v20 = vadd.f32 %v25_v10, %v24_v6  ;;  %v49_v21 = vadd.f32 %v31_v13, %v30_v12  ;;  %v38_v22 = vunpack.c.l.bf16 %v23_v14  ;;  %v33_v23 = vunpack.c.l.bf16 %v291_v15 }
   0x6   :  { %v46_v24 = vadd.f32 %v45_v16, %v29_v5  ;;  %v58_v25 = vsel %vm57_vm0, %v36_v18, 0.0  ;;  %v59_v26 = vsel %vm57_vm0, %v37_v19, 0.0  ;;  %v34_v27 = vunpack.c.h.bf16 %v291_v15 }
   0x7   :  { %v42_v28 = vadd.f32 %v41_v20, %v26_v11  ;;  %v60_v29 = vadd.f32 %v59_v26, %v58_v25  ;;  %v61_v30 = vsel %vm57_vm0, %v38_v22, 0.0  ;;  %v50_v31 = vadd.f32 %v49_v21, %v32_v17 }
   0x8   :  { %47 = vadd.xlane.f32.xlu1 %v46_v24  ;;  %v35_v33 = vunpack.c.h.bf16 %v280_v8  ;;  %v53_v34 = vadd.f32 %v34_v27, %v33_v23 }
   0x9   :  { %43 = vadd.xlane.f32.xlu0 %v42_v28  ;;  %v62_v32 = vadd.f32 %v61_v30, %v60_v29 }
   0xa   :  { %v54_v35 = vadd.f32 %v53_v34, %v35_v33 }
   0xc   :  { %51 = vadd.xlane.f32.xlu1 %v50_v31  ;;  %v155_v31 = vlaneseq }
   0xd   :  { %63 = vadd.xlane.f32.xlu0 %v62_v32 }
  0x11   :  { %55 = vadd.xlane.f32.xlu0 %v54_v35  ;;  %v156_v35 = vshrl.u32 %v155_v31, 7 }
  0x91   :  { %v48_v36 = vpop.xlane.xlu1 %47 }
  0x92   :  { %v67_v37 = vmul.f32 0.0026041667, %v48_v36  ;;  %v44_v38 = vpop.xlane.xlu0 %43 }
  0x93   :  { %v66_v39 = vmul.f32 0.0026041667, %v44_v38 }
  0x94   :  { %v300_v40 = vsub.f32 %v27_v3, %v67_v37  ;;  %v302_v41 = vsub.f32 %v28_v4, %v67_v37  ;;  %v304_v42 = vsub.f32 %v29_v5, %v67_v37 }
  0x95   :  { %v306_v43 = vsub.f32 %v24_v6, %v66_v39  ;;  %v308_v44 = vsub.f32 %v25_v10, %v66_v39  ;;  %v310_v45 = vsub.f32 %v26_v11, %v66_v39  ;;  %v52_v46 = vpop.xlane.xlu1 %51 }
  0x96   :  { %v68_v47 = vmul.f32 0.0026041667, %v52_v46  ;;  %v64_v48 = vpop.xlane.xlu0 %63  ;;  %v89_v49 = vmul.f32 %v300_v40, %v300_v40  ;;  %v90_v50 = vmul.f32 %v302_v41, %v302_v41  ;;  %v91_v52 = vmul.f32 %v304_v42, %v304_v42 }
  0x97   :  { %v70_v51 = vmul.f32 0.0026041667, %v64_v48  ;;  %v86_v53 = vmul.f32 %v306_v43, %v306_v43  ;;  %v87_v54 = vmul.f32 %v308_v44, %v308_v44  ;;  %v88_v61 = vmul.f32 %v310_v45, %v310_v45 }
  0x98   :  { %v322_v55 = vsub.f32 %v30_v12, %v68_v47  ;;  %v324_v56 = vsub.f32 %v31_v13, %v68_v47  ;;  %v326_v57 = vsub.f32 %v32_v17, %v68_v47  ;;  %v105_v58 = vadd.f32 %v90_v50, %v89_v49 }
  0x99   :  { %v328_v59 = vsub.f32 %v36_v18, %v70_v51  ;;  %v330_v60 = vsub.f32 %v37_v19, %v70_v51  ;;  %v101_v62 = vadd.f32 %v87_v54, %v86_v53  ;;  %v334_v63 = vsub.f32 %v38_v22, %v70_v51  ;;  %v39_v51 = vld [vmem:[%s430_s1] sm:$0x7] }
  0x9a   :  { %v56_v0 = vpop.xlane.xlu0 %55  ;;  %v106_v1 = vadd.f32 %v105_v58, %v91_v52  ;;  %v92_v2 = vmul.f32 %v322_v55, %v322_v55  ;;  %v93_v3 = vmul.f32 %v324_v56, %v324_v56  ;;  %v94_v8 = vmul.f32 %v326_v57, %v326_v57  ;;  %v40_v52 = vld [vmem:[%s431_s2] sm:$0x7] }
  0x9b   :  { %v69_v4 = vmul.f32 0.0026041667, %v56_v0  ;;  %v102_v5 = vadd.f32 %v101_v62, %v88_v61  ;;  %v98_v6 = vmul.f32 %v328_v59, %v328_v59  ;;  %v99_v7 = vmul.f32 %v330_v60, %v330_v60 }
  0x9c   :  { %107 = vadd.xlane.f32.xlu0 %v106_v1  ;;  %v109_v9 = vadd.f32 %v93_v3, %v92_v2  ;;  %v100_v15 = vmul.f32 %v334_v63, %v334_v63  ;;  %v157_v48 = vsub.s32 0, %v156_v35  ;;  %v161_v49 = vsub.s32 1, %v156_v35 }
  0x9d   :  { %v346_v10 = vsub.f32 %v33_v23, %v69_v4  ;;  %v348_v11 = vsub.f32 %v34_v27, %v69_v4  ;;  %v350_v12 = vsub.f32 %v35_v33, %v69_v4  ;;  %103 = vadd.xlane.f32.xlu1 %v102_v5  ;;  %v117_v13 = vsel %vm57_vm0, %v98_v6, 0.0 }
  0x9e   :  { %v110_v14 = vadd.f32 %v109_v9, %v94_v8  ;;  %v118_v16 = vsel %vm57_vm0, %v99_v7, 0.0  ;;  %v120_v22 = vsel %vm57_vm0, %v100_v15, 0.0  ;;  %v165_v50 = vsub.s32 2, %v156_v35 }
  0x9f   :  { %v119_v17 = vadd.f32 %v118_v16, %v117_v13  ;;  %v95_v18 = vmul.f32 %v346_v10, %v346_v10  ;;  %v96_v19 = vmul.f32 %v348_v11, %v348_v11  ;;  %v97_v20 = vmul.f32 %v350_v12, %v350_v12 }
  0xa0   :  { %v158_v53 = vrot.slane %v39_v51, %v157_v48  ;;  %v162_v54 = vrot.slane %v39_v51, %v161_v49  ;;  %v166_v58 = vrot.slane %v39_v51, %v165_v50  ;;  %v189_v62 = vrot.slane %v40_v52, %v157_v48 }
  0xa1   :  { %111 = vadd.xlane.f32.xlu1 %v110_v14  ;;  %v113_v21 = vadd.f32 %v96_v19, %v95_v18  ;;  %v121_v23 = vadd.f32 %v120_v22, %v119_v17  ;;  %v193_v0 = vrot.slane %v40_v52, %v161_v49  ;;  %v197_v2 = vrot.slane %v40_v52, %v165_v50 }
  0xa3   :  { %v114_v24 = vadd.f32 %v113_v21, %v97_v20 }
  0xa5   :  { %122 = vadd.xlane.f32.xlu1 %v121_v23  ;;  %115 = vadd.xlane.f32.xlu0 %v114_v24 }
 0x125   :  { %v108_v25 = vpop.xlane.xlu0 %107 }
 0x126   :  { %v104_v26 = vpop.xlane.xlu1 %103  ;;  %v125_v27 = vmul.f32 0.0026041667, %v108_v25 }
 0x127   :  { %v124_v28 = vmul.f32 0.0026041667, %v104_v26 }
 0x128   :  { %v130_v29 = vadd.f32 1e-06, %v125_v27 }
 0x129   :  { %v129_v30 = vadd.f32 1e-06, %v124_v28 }
 0x12a   :  { %235 = vrsqrt.f32 %v130_v29  ;;  %v112_v32 = vpop.xlane.xlu1 %111 }
 0x12b   :  { %237 = vrsqrt.f32 %v129_v30  ;;  %v126_v33 = vmul.f32 0.0026041667, %v112_v32 }
 0x12d   :  { %v131_v34 = vadd.f32 1e-06, %v126_v33 }
 0x12e   :  { %v123_v36 = vpop.xlane.xlu1 %122  ;;  %v116_v37 = vpop.xlane.xlu0 %115 }
 0x12f   :  { %239 = vrsqrt.f32 %v131_v34  ;;  %v128_v38 = vmul.f32 0.0026041667, %v123_v36  ;;  %v127_v39 = vmul.f32 0.0026041667, %v116_v37 }
 0x131   :  { %v133_v46 = vadd.f32 1e-06, %v128_v38  ;;  %v132_v47 = vadd.f32 1e-06, %v127_v39 }
 0x133   :  { %241 = vrsqrt.f32 %v133_v46 }
 0x134   :  { %243 = vrsqrt.f32 %v132_v47 }
 0x137   :  { %v236_v61 = vpop.eup %235 }
 0x138   :  { %v238_v1 = vpop.eup %237  ;;  %v142_v3 = vmul.f32 %v236_v61, %v300_v40  ;;  %v143_v4 = vmul.f32 %v236_v61, %v302_v41  ;;  %v144_v5 = vmul.f32 %v236_v61, %v304_v42 }
 0x139   :  { %v139_v6 = vmul.f32 %v238_v1, %v306_v43  ;;  %v140_v7 = vmul.f32 %v238_v1, %v308_v44  ;;  %v141_v8 = vmul.f32 %v238_v1, %v310_v45 }
 0x13a   :  { %v173_v9 = vmul.f32 %v158_v53, %v142_v3  ;;  %v174_v13 = vmul.f32 %v162_v54, %v143_v4  ;;  %v175_v14 = vmul.f32 %v166_v58, %v144_v5 }
 0x13b   :  { %v170_v15 = vmul.f32 %v158_v53, %v139_v6  ;;  %v171_v16 = vmul.f32 %v162_v54, %v140_v7  ;;  %v172_v17 = vmul.f32 %v166_v58, %v141_v8 }
 0x13c   :  { %v240_v18 = vpop.eup %239  ;;  %v204_v19 = vadd.f32 %v189_v62, %v173_v9  ;;  %v205_v20 = vadd.f32 %v193_v0, %v174_v13  ;;  %v206_v40 = vadd.f32 %v197_v2, %v175_v14 }
 0x13d   :  { %v201_v21 = vadd.f32 %v189_v62, %v170_v15  ;;  %v202_v41 = vadd.f32 %v193_v0, %v171_v16  ;;  %v203_v22 = vadd.f32 %v197_v2, %v172_v17  ;;  %v145_v42 = vmul.f32 %v240_v18, %v322_v55 }
 0x13e   :  { %219 = vst [vmem:[%s432_s3 + $0x18] sm:$0xff] %v204_v19  ;;  %220 = vst [vmem:[%s432_s3 + $0x20] sm:$0xff] %v205_v20  ;;  %v146_v43 = vmul.f32 %v240_v18, %v324_v56  ;;  %v147_v44 = vmul.f32 %v240_v18, %v326_v57 }
 0x13f   :  { %221 = vst [vmem:[%s432_s3 + $0x28] sm:$0xff] %v206_v40  ;;  %216 = vst [vmem:[%s432_s3] sm:$0xff] %v201_v21  ;;  %v176_v45 = vmul.f32 %v158_v53, %v145_v42 }
 0x140   :  { %217 = vst [vmem:[%s432_s3 + $0x8] sm:$0xff] %v202_v41  ;;  %218 = vst [vmem:[%s432_s3 + $0x10] sm:$0xff] %v203_v22  ;;  %v242_v55 = vpop.eup %241  ;;  %v177_v23 = vmul.f32 %v162_v54, %v146_v43  ;;  %v178_v24 = vmul.f32 %v166_v58, %v147_v44 }
 0x141   :  { %v244_v25 = vpop.eup %243  ;;  %v207_v56 = vadd.f32 %v189_v62, %v176_v45  ;;  %v151_v57 = vmul.f32 %v242_v55, %v328_v59  ;;  %v152_v26 = vmul.f32 %v242_v55, %v330_v60  ;;  %v153_v27 = vmul.f32 %v242_v55, %v334_v63 }
 0x142   :  { %v208_v28 = vadd.f32 %v193_v0, %v177_v23  ;;  %v209_v29 = vadd.f32 %v197_v2, %v178_v24  ;;  %v148_v30 = vmul.f32 %v244_v25, %v346_v10  ;;  %v149_v31 = vmul.f32 %v244_v25, %v348_v11 }
 0x143   :  { %222 = vst [vmem:[%s432_s3 + $0x30] sm:$0xff] %v207_v56  ;;  %v182_v32 = vmul.f32 %v158_v53, %v151_v57  ;;  %v183_v33 = vmul.f32 %v162_v54, %v152_v26  ;;  %v184_v34 = vmul.f32 %v166_v58, %v153_v27  ;;  %v150_v35 = vmul.f32 %v244_v25, %v350_v12 }
 0x144   :  { %223 = vst [vmem:[%s432_s3 + $0x38] sm:$0xff] %v208_v28  ;;  %224 = vst [vmem:[%s432_s3 + $0x40] sm:$0xff] %v209_v29  ;;  %v179_v59 = vmul.f32 %v158_v53, %v148_v30  ;;  %v180_v60 = vmul.f32 %v162_v54, %v149_v31 }
 0x145   :  { %v213_v63 = vadd.f32 %v189_v62, %v182_v32  ;;  %v214_v10 = vadd.f32 %v193_v0, %v183_v33  ;;  %v215_v11 = vadd.f32 %v197_v2, %v184_v34  ;;  %v181_v36 = vmul.f32 %v166_v58, %v150_v35 }
 0x146   :  { %v210_v37 = vadd.f32 %v189_v62, %v179_v59  ;;  %v211_v38 = vadd.f32 %v193_v0, %v180_v60 }
 0x147   :  { %228 = vst [vmem:[%s432_s3 + $0x60] sm:$0x3] %v213_v63  ;;  %229 = vst [vmem:[%s432_s3 + $0x68] sm:$0x3] %v214_v10  ;;  %v212_v12 = vadd.f32 %v197_v2, %v181_v36 }
 0x148   :  { %230 = vst [vmem:[%s432_s3 + $0x70] sm:$0x3] %v215_v11  ;;  %225 = vst [vmem:[%s432_s3 + $0x48] sm:$0xff] %v210_v37 }
 0x149   :  { %226 = vst [vmem:[%s432_s3 + $0x50] sm:$0xff] %v211_v38  ;;  %227 = vst [vmem:[%s432_s3 + $0x58] sm:$0xff] %v212_v12 }

// kernel: closed_call.16
= control target key start
LH: loop header
LB: loop body
LE: loop exit
PB: predicated region body
PF: predicated region fallthrough
CT: control target
= control target key end

     0   :  { %vm70_vm0 = vcmask 1041408   ;;  %s10941_s0 = inlined_call_operand.vmem [shape: bf16[34,384], index: 0, kind: input, shape index: {}]   ;;  %s10942_s3 = inlined_call_operand.vmem [shape: bf16[384,1536], index: 3, kind: input, shape index: {}]   ;;  %s10943_s1 = inlined_call_operand.vmem [shape: f32[1,384], index: 1, kind: input, shape index: {}]   ;;  %s10944_s2 = inlined_call_operand.vmem [shape: f32[1,384], index: 2, kind: input, shape index: {}]   ;;  %s10945_s5 = inlined_call_operand.vmem [shape: bf16[1536,384], index: 5, kind: input, shape index: {}]   ;;  %s10946_s4 = inlined_call_operand.vmem [shape: f32[1,1536], index: 4, kind: input, shape index: {}]   ;;  %s10947_s6 = inlined_call_operand.vmem [shape: f32[1,384], index: 6, kind: input, shape index: {}]   ;;  %s10948_s7 = inlined_call_operand.vmem [shape: bf16[34,384], index: 7, kind: output, shape index: {}]  }
   0x1   :  { %v27_v0 = vld [vmem:[%s10941_s0] sm:$0xff]  ;;  %v31_v2 = vld [vmem:[%s10941_s0 + $0x18] sm:$0xff]  ;;  %v29_v7 = vld [vmem:[%s10941_s0 + $0xc] sm:$0xff] }
   0x2   :  { %v28_v1 = vld [vmem:[%s10941_s0 + $0x8] ss:$24 sps:$4 sm:$0xff]   ;;  %v7857_v3 = vunpack.c.l.bf16 %v27_v0  ;;  %v7859_v4 = vunpack.c.h.bf16 %v27_v0  ;;  %v7863_v6 = vunpack.c.l.bf16 %v31_v2  ;;  %v30_v8 = vld [vmem:[%s10941_s0 + $0x14] ss:$24 sps:$4 sm:$0xff]   ;;  %v7874_v10 = vunpack.c.h.bf16 %v31_v2  ;;  %v36_v15 = vld [vmem:[%s10941_s0 + $0x38] sm:$0x1] }
   0x3   :  { %v7861_v5 = vunpack.c.l.bf16 %v28_v1  ;;  %v33_v9 = vld [vmem:[%s10941_s0 + $0x24] sm:$0xff]  ;;  %v7876_v11 = vunpack.c.h.bf16 %v28_v1  ;;  %v7878_v12 = vunpack.c.l.bf16 %v29_v7  ;;  %v7880_v13 = vunpack.c.h.bf16 %v29_v7  ;;  %v35_v14 = vld [vmem:[%s10941_s0 + $0x30] sm:$0x11] }
   0x4   :  { %10968 = vst [vmem:[#allocation2_spill] sm:$0xff] %v7857_v3  ;;  %10969 = vst [vmem:[#allocation3_spill] sm:$0xff] %v7859_v4  ;;  %v54_v16 = vadd.f32 %v7859_v4, %v7857_v3  ;;  %v7890_v17 = vunpack.c.l.bf16 %v30_v8  ;;  %v7892_v18 = vunpack.c.l.bf16 %v33_v9  ;;  %v7894_v19 = vunpack.c.h.bf16 %v33_v9  ;;  %v6860_v36 = vld [vmem:[%s10942_s3 + $0x2a4] ss:$48 sps:$4 sm:$0xff]   ;;  %v6862_v37 = vld [vmem:[%s10942_s3 + $0x2a0] ss:$48 sps:$4 sm:$0xff]  }
   0x5   :  { %10970 = vst [vmem:[#allocation4_spill] sm:$0xff] %v7861_v5  ;;  %10971 = vst [vmem:[#allocation5_spill] sm:$0xff] %v7863_v6  ;;  %v62_v20 = vadd.f32 %v7874_v10, %v7863_v6  ;;  %v58_v21 = vadd.f32 %v7880_v13, %v7878_v12  ;;  %v7900_v22 = vunpack.c.h.bf16 %v30_v8  ;;  %v7902_v23 = vunpack.c.l.bf16 %v35_v14  ;;  %2030 = vmatprep.subr.bf16.mxu0 %v6860_v36  ;;  %v6863_v38 = vld [vmem:[%s10942_s3 + $0x244] ss:$48 sps:$4 sm:$0xff]   ;;  %v6865_v39 = vld [vmem:[%s10942_s3 + $0x240] ss:$48 sps:$4 sm:$0xff]  }
   0x6   :  { %10972 = vst [vmem:[#allocation6_spill] sm:$0xff] %v7874_v10  ;;  %10973 = vst [vmem:[#allocation7_spill] sm:$0xff] %v7876_v11  ;;  %v55_v24 = vadd.f32 %v54_v16, %v7861_v5  ;;  %v66_v25 = vadd.f32 %v7894_v19, %v7892_v18  ;;  %v7907_v26 = vunpack.c.h.bf16 %v35_v14  ;;  %v7909_v27 = vunpack.c.l.bf16 %v36_v15  ;;  %2031 = vmatpush1.bf16.msra.mxu0 %v6862_v37  ;;  %v6866_v40 = vld [vmem:[%s10942_s3 + $0x1e4] ss:$48 sps:$4 sm:$0xff]   ;;  %v6868_v41 = vld [vmem:[%s10942_s3 + $0x1e0] ss:$48 sps:$4 sm:$0xff]  }
   0x7   :  { %10974 = vst [vmem:[#allocation8_spill] sm:$0xff] %v7878_v12  ;;  %10975 = vst [vmem:[#allocation9_spill] sm:$0xff] %v7880_v13  ;;  %v63_v28 = vadd.f32 %v62_v20, %v7876_v11  ;;  %v71_v29 = vsel %vm70_vm0, %v7902_v23, 0.0  ;;  %v59_v30 = vadd.f32 %v58_v21, %v7890_v17  ;;  %2032 = vmatprep.subr.bf16.mxu0 %v6863_v38  ;;  %v6869_v42 = vld [vmem:[%s10942_s3 + $0x184] ss:$48 sps:$4 sm:$0xff]  }
   0x8   :  { %10976 = vst [vmem:[#allocation10_spill] sm:$0xff] %v7890_v17  ;;  %10977 = vst [vmem:[#allocation11_spill] sm:$0xff] %v7892_v18  ;;  %56 = vadd.xlane.f32.xlu0 %v55_v24  ;;  %v72_v31 = vsel %vm70_vm0, %v7907_v26, 0.0  ;;  %v67_v32 = vadd.f32 %v66_v25, %v7900_v22  ;;  %v74_v34 = vsel %vm70_vm0, %v7909_v27, 0.0  ;;  %v6871_v43 = vld [vmem:[%s10942_s3 + $0x180] ss:$48 sps:$4 sm:$0xff]  }
   0x9   :  { %10978 = vst [vmem:[#allocation12_spill] sm:$0xff] %v7894_v19  ;;  %10979 = vst [vmem:[#allocation13_spill] sm:$0xff] %v7900_v22  ;;  %64 = vadd.xlane.f32.xlu1 %v63_v28  ;;  %v73_v33 = vadd.f32 %v72_v31, %v71_v29  ;;  %v6884_v44 = vld [vmem:[%s10942_s3 + $0x8a4] ss:$48 sps:$4 sm:$0xff]   ;;  %v6888_v46 = vld [vmem:[%s10942_s3 + $0x8a0] ss:$48 sps:$4 sm:$0xff]  }
   0xa   :  { %10980 = vst [vmem:[#allocation14_spill] sm:$0xff] %v7902_v23  ;;  %10981 = vst [vmem:[#allocation15_spill] sm:$0xff] %v7907_v26  ;;  %2033 = vmatpush1.bf16.msra.mxu0 %v6865_v39  ;;  %v6872_v45 = vld [vmem:[%s10942_s3 + $0x124] ss:$48 sps:$4 sm:$0xff]   ;;  %v6874_v47 = vld [vmem:[%s10942_s3 + $0x120] ss:$48 sps:$4 sm:$0xff]   ;;  %2091 = vmatprep.subr.bf16.mxu1 %v6884_v44 }
   0xb   :  { %10982 = vst [vmem:[#allocation16_spill] sm:$0xff] %v7909_v27  ;;  %v75_v35 = vadd.f32 %v74_v34, %v73_v33  ;;  %2034 = vmatprep.subr.bf16.mxu0 %v6866_v40  ;;  %v6875_v48 = vld [vmem:[%s10942_s3 + $0xc4] ss:$48 sps:$4 sm:$0xff]   ;;  %2092 = vmatpush1.bf16.msra.mxu1 %v6888_v46  ;;  %v6877_v49 = vld [vmem:[%s10942_s3 + $0xc0] ss:$48 sps:$4 sm:$0xff]  }
   0xc   :  { %60 = vadd.xlane.f32.xlu0 %v59_v30  ;;  %v6878_v50 = vld [vmem:[%s10942_s3 + $0x64] ss:$48 sps:$4 sm:$0xff]   ;;  %v6880_v51 = vld [vmem:[%s10942_s3 + $0x60] ss:$48 sps:$4 sm:$0xff]  }
   0xd   :  { %68 = vadd.xlane.f32.xlu1 %v67_v32  ;;  %v6881_v52 = vld [vmem:[%s10942_s3 + $0x4] ss:$48 sps:$4 sm:$0xff]   ;;  %v6883_v53 = vld [vmem:[%s10942_s3] ss:$48 sps:$4 sm:$0xff]  }
   0xe   :  { %2035 = vmatpush1.bf16.msra.mxu0 %v6868_v41  ;;  %v6886_v54 = vld [vmem:[%s10942_s3 + $0x5a4] ss:$48 sps:$4 sm:$0xff]   ;;  %v6889_v55 = vld [vmem:[%s10942_s3 + $0x5a0] ss:$48 sps:$4 sm:$0xff]  }
   0xf   :  { %2036 = vmatprep.subr.bf16.mxu0 %v6869_v42 }
  0x10   :  { %76 = vadd.xlane.f32.xlu0 %v75_v35 }
  0x12   :  { %2037 = vmatpush1.bf16.msra.mxu0 %v6871_v43 }
  0x13   :  { %2038 = vmatprep.subr.bf16.mxu0 %v6872_v45 }
  0x16   :  { %2039 = vmatpush1.bf16.msra.mxu0 %v6874_v47 }
  0x17   :  { %2040 = vmatprep.subr.bf16.mxu0 %v6875_v48 }
  0x1a   :  { %2041 = vmatpush1.bf16.msra.mxu0 %v6877_v49 }
  0x1b   :  { %2042 = vmatprep.subr.bf16.mxu0 %v6878_v50 }
  0x1e   :  { %2043 = vmatpush1.bf16.msra.mxu0 %v6880_v51 }
  0x1f   :  { %2044 = vmatprep.subr.bf16.mxu0 %v6881_v52 }
  0x22   :  { %2045 = vmatpush1.bf16.msra.mxu0 %v6883_v53 }
  0x23   :  { %2046 = vmatprep.subr.bf16.mxu0 %v6886_v54 }
  0x26   :  { %2047 = vmatpush2.bf16.msra.mxu0 %v6889_v55 }
  0x91   :  { %v57_v56 = vpop.xlane.xlu0 %56 }
  0x92   :  { %v79_v57 = vmul.f32 0.0026041667, %v57_v56  ;;  %v65_v58 = vpop.xlane.xlu1 %64 }
  0x93   :  { %v81_v59 = vmul.f32 0.0026041667, %v65_v58 }
  0x94   :  { %v7981_v60 = vsub.f32 %v7857_v3, %v79_v57  ;;  %v7984_v61 = vsub.f32 %v7859_v4, %v79_v57  ;;  %v7987_v62 = vsub.f32 %v7861_v5, %v79_v57 }
  0x95   :  { %v7990_v63 = vsub.f32 %v7863_v6, %v81_v59  ;;  %v7993_v0 = vsub.f32 %v7874_v10, %v81_v59  ;;  %v7996_v1 = vsub.f32 %v7876_v11, %v81_v59  ;;  %v61_v2 = vpop.xlane.xlu0 %60 }
  0x96   :  { %v80_v7 = vmul.f32 0.0026041667, %v61_v2  ;;  %v69_v8 = vpop.xlane.xlu1 %68  ;;  %v99_v9 = vmul.f32 %v7981_v60, %v7981_v60  ;;  %v100_v14 = vmul.f32 %v7984_v61, %v7984_v61  ;;  %v101_v15 = vmul.f32 %v7987_v62, %v7987_v62  ;;  %v6890_v2 = vld [vmem:[%s10942_s3 + $0x844] ss:$48 sps:$4 sm:$0xff]  }
  0x97   :  { %v82_v16 = vmul.f32 0.0026041667, %v69_v8  ;;  %v105_v20 = vmul.f32 %v7990_v63, %v7990_v63  ;;  %v106_v21 = vmul.f32 %v7993_v0, %v7993_v0  ;;  %v107_v24 = vmul.f32 %v7996_v1, %v7996_v1  ;;  %v6894_v8 = vld [vmem:[%s10942_s3 + $0x840] ss:$48 sps:$4 sm:$0xff]   ;;  %2093 = vmatprep.subr.bf16.mxu1 %v6890_v2 }
  0x98   :  { %v8011_v25 = vsub.f32 %v7878_v12, %v80_v7  ;;  %v8014_v28 = vsub.f32 %v7880_v13, %v80_v7  ;;  %v8017_v29 = vsub.f32 %v7890_v17, %v80_v7  ;;  %v114_v30 = vadd.f32 %v100_v14, %v99_v9  ;;  %v6892_v7 = vld [vmem:[%s10942_s3 + $0x544] ss:$48 sps:$4 sm:$0xff]   ;;  %v6895_v9 = vld [vmem:[%s10942_s3 + $0x540] ss:$48 sps:$4 sm:$0xff]   ;;  %2094 = vmatpush1.bf16.msra.mxu1 %v6894_v8 }
  0x99   :  { %v8020_v31 = vsub.f32 %v7892_v18, %v82_v16  ;;  %v8023_v32 = vsub.f32 %v7894_v19, %v82_v16  ;;  %v8026_v33 = vsub.f32 %v7900_v22, %v82_v16  ;;  %v77_v34 = vpop.xlane.xlu0 %76  ;;  %v122_v35 = vadd.f32 %v106_v21, %v105_v20  ;;  %2048 = vmatprep.subr.bf16.mxu0 %v6892_v7  ;;  %v6896_v14 = vld [vmem:[%s10942_s3 + $0x7e4] ss:$48 sps:$4 sm:$0xff]   ;;  %v6900_v16 = vld [vmem:[%s10942_s3 + $0x7e0] ss:$48 sps:$4 sm:$0xff]  }
  0x9a   :  { %v83_v36 = vmul.f32 0.0026041667, %v77_v34  ;;  %v115_v37 = vadd.f32 %v114_v30, %v101_v15  ;;  %v102_v38 = vmul.f32 %v8011_v25, %v8011_v25  ;;  %v103_v39 = vmul.f32 %v8014_v28, %v8014_v28  ;;  %2049 = vmatpush2.bf16.msra.mxu0 %v6895_v9  ;;  %v6898_v15 = vld [vmem:[%s10942_s3 + $0x4e4] ss:$48 sps:$4 sm:$0xff]   ;;  %2095 = vmatprep.subr.bf16.mxu1 %v6896_v14  ;;  %v6901_v20 = vld [vmem:[%s10942_s3 + $0x4e0] ss:$48 sps:$4 sm:$0xff]  }
  0x9b   :  { %v123_v40 = vadd.f32 %v122_v35, %v107_v24  ;;  %v104_v41 = vmul.f32 %v8017_v29, %v8017_v29  ;;  %v108_v42 = vmul.f32 %v8020_v31, %v8020_v31  ;;  %v109_v43 = vmul.f32 %v8023_v32, %v8023_v32  ;;  %2050 = vmatprep.subr.bf16.mxu0 %v6898_v15  ;;  %v6902_v21 = vld [vmem:[%s10942_s3 + $0x784] ss:$48 sps:$4 sm:$0xff]   ;;  %v6906_v30 = vld [vmem:[%s10942_s3 + $0x780] ss:$48 sps:$4 sm:$0xff]  }
  0x9c   :  { %v8039_v44 = vsub.f32 %v7902_v23, %v83_v36  ;;  %v8042_v45 = vsub.f32 %v7907_v26, %v83_v36  ;;  %v8045_v46 = vsub.f32 %v7909_v27, %v83_v36  ;;  %116 = vadd.xlane.f32.xlu1 %v115_v37  ;;  %v118_v47 = vadd.f32 %v103_v39, %v102_v38  ;;  %v6904_v24 = vld [vmem:[%s10942_s3 + $0x484] ss:$48 sps:$4 sm:$0xff]   ;;  %v6907_v34 = vld [vmem:[%s10942_s3 + $0x480] ss:$48 sps:$4 sm:$0xff]  }
  0x9d   :  { %v110_v48 = vmul.f32 %v8026_v33, %v8026_v33  ;;  %v126_v49 = vadd.f32 %v109_v43, %v108_v42  ;;  %2096 = vmatpush1.bf16.msra.mxu1 %v6900_v16  ;;  %v6908_v35 = vld [vmem:[%s10942_s3 + $0x724] ss:$48 sps:$4 sm:$0xff]   ;;  %v6912_v37 = vld [vmem:[%s10942_s3 + $0x720] ss:$48 sps:$4 sm:$0xff]   ;;  %v168_v14 = vlaneseq }
  0x9e   :  { %v119_v50 = vadd.f32 %v118_v47, %v104_v41  ;;  %v111_v51 = vmul.f32 %v8039_v44, %v8039_v44  ;;  %v112_v52 = vmul.f32 %v8042_v45, %v8042_v45  ;;  %v113_v53 = vmul.f32 %v8045_v46, %v8045_v46  ;;  %2051 = vmatpush2.bf16.msra.mxu0 %v6901_v20  ;;  %v6910_v36 = vld [vmem:[%s10942_s3 + $0x424] ss:$48 sps:$4 sm:$0xff]   ;;  %v6913_v38 = vld [vmem:[%s10942_s3 + $0x420] ss:$48 sps:$4 sm:$0xff]  }
  0x9f   :  { %v127_v54 = vadd.f32 %v126_v49, %v110_v48  ;;  %2097 = vmatprep.subr.bf16.mxu1 %v6902_v21  ;;  %2052 = vmatprep.subr.bf16.mxu0 %v6904_v24  ;;  %v6914_v39 = vld [vmem:[%s10942_s3 + $0x6c4] ss:$48 sps:$4 sm:$0xff]   ;;  %v6918_v41 = vld [vmem:[%s10942_s3 + $0x6c0] ss:$48 sps:$4 sm:$0xff]   ;;  %v10949_v49 = vmov 0  }
  0xa0   :  { %124 = vadd.xlane.f32.xlu1 %v123_v40  ;;  %120 = vadd.xlane.f32.xlu0 %v119_v50  ;;  %v130_v55 = vsel %vm70_vm0, %v111_v51, 0.0  ;;  %v131_v56 = vsel %vm70_vm0, %v112_v52, 0.0  ;;  %v133_v57 = vsel %vm70_vm0, %v113_v53, 0.0  ;;  %v6916_v40 = vld [vmem:[%s10942_s3 + $0x3c4] ss:$48 sps:$4 sm:$0xff]  }
  0xa1   :  { %v132_v58 = vadd.f32 %v131_v56, %v130_v55  ;;  %2098 = vmatpush1.bf16.msra.mxu1 %v6906_v30  ;;  %v6919_v42 = vld [vmem:[%s10942_s3 + $0x3c0] ss:$48 sps:$4 sm:$0xff]   ;;  %v6920_v43 = vld [vmem:[%s10942_s3 + $0x664] ss:$48 sps:$4 sm:$0xff]   ;;  %2123 = vmatprep.mubr.bf16.mxu1 %v10949_v49  ;;  %v6934_v55 = vld [vmem:[%s10942_s3 + $0x2ac] ss:$48 sps:$4 sm:$0xff]  }
  0xa2   :  { %2053 = vmatpush2.bf16.msra.mxu0 %v6907_v34  ;;  %2099 = vmatprep.subr.bf16.mxu1 %v6908_v35  ;;  %v6922_v47 = vld [vmem:[%s10942_s3 + $0x364] ss:$48 sps:$4 sm:$0xff]   ;;  %v6924_v48 = vld [vmem:[%s10942_s3 + $0x660] ss:$48 sps:$4 sm:$0xff]   ;;  %v6937_v56 = vld [vmem:[%s10942_s3 + $0x8ac] ss:$48 sps:$4 sm:$0xff]  }
  0xa3   :  { %v134_v59 = vadd.f32 %v133_v57, %v132_v58  ;;  %2054 = vmatprep.subr.bf16.mxu0 %v6910_v36  ;;  %v6925_v50 = vld [vmem:[%s10942_s3 + $0x360] ss:$48 sps:$4 sm:$0xff]   ;;  %v6926_v51 = vld [vmem:[%s10942_s3 + $0x604] ss:$48 sps:$4 sm:$0xff]   ;;  %v8149_v30 = vshrl.u32 %v168_v14, 7 }
  0xa4   :  { %128 = vadd.xlane.f32.xlu0 %v127_v54  ;;  %v6928_v52 = vld [vmem:[%s10942_s3 + $0x304] ss:$48 sps:$4 sm:$0xff]   ;;  %v6930_v53 = vld [vmem:[%s10942_s3 + $0x600] ss:$48 sps:$4 sm:$0xff]  }
  0xa5   :  { %135 = vadd.xlane.f32.xlu1 %v134_v59  ;;  %2100 = vmatpush1.bf16.msra.mxu1 %v6912_v37  ;;  %v6931_v54 = vld [vmem:[%s10942_s3 + $0x300] ss:$48 sps:$4 sm:$0xff]   ;;  %v8152_v37 = vsub.s32 1, %v8149_v30 }
  0xa6   :  { %2055 = vmatpush2.bf16.msra.mxu0 %v6913_v38  ;;  %2101 = vmatprep.subr.bf16.mxu1 %v6914_v39  ;;  %v8155_v38 = vsub.s32 2, %v8149_v30  ;;  %v52_v39 = vld [vmem:[%s10943_s1] sm:$0x7] }
  0xa7   :  { %2056 = vmatprep.subr.bf16.mxu0 %v6916_v40  ;;  %v8161_v40 = vsub.s32 0, %v8149_v30 }
  0xa9   :  { %2102 = vmatpush1.bf16.msra.mxu1 %v6918_v41  ;;  %v175_v41 = vrot.slane %v52_v39, %v8152_v37 }
  0xaa   :  { %2057 = vmatpush2.bf16.msra.mxu0 %v6919_v42  ;;  %2103 = vmatprep.subr.bf16.mxu1 %v6920_v43  ;;  %v8165_v42 = vrot.slane %v52_v39, %v8155_v38 }
  0xab   :  { %2058 = vmatprep.subr.bf16.mxu0 %v6922_v47  ;;  %v53_v47 = vld [vmem:[%s10944_s2] sm:$0x7] }
  0xad   :  { %2104 = vmatpush1.bf16.msra.mxu1 %v6924_v48  ;;  %v8171_v48 = vrot.slane %v52_v39, %v8161_v40 }
  0xae   :  { %2059 = vmatpush2.bf16.msra.mxu0 %v6925_v50  ;;  %2105 = vmatprep.subr.bf16.mxu1 %v6926_v51 }
  0xaf   :  { %2060 = vmatprep.subr.bf16.mxu0 %v6928_v52 }
  0xb1   :  { %2106 = vmatpush1.bf16.msra.mxu1 %v6930_v53 }
  0xb2   :  { %2061 = vmatpush2.bf16.msra.mxu0 %v6931_v54  ;;  %2152 = vmatprep.subr.bf16.mxu1 %v6934_v55  ;;  %v8177_v54 = vrot.slane %v53_v47, %v8152_v37 }
  0xb3   :  { %2213 = vmatprep.subr.bf16.mxu0 %v6937_v56  ;;  %v8181_v56 = vrot.slane %v53_v47, %v8155_v38 }
 0x125   :  { %v117_v57 = vpop.xlane.xlu1 %116 }
 0x126   :  { %v137_v58 = vmul.f32 0.0026041667, %v117_v57 }
 0x128   :  { %v142_v59 = vadd.f32 1e-06, %v137_v58 }
 0x129   :  { %v125_v2 = vpop.xlane.xlu1 %124  ;;  %v121_v7 = vpop.xlane.xlu0 %120 }
 0x12a   :  { %7676 = vrsqrt.f32 %v142_v59  ;;  %v139_v8 = vmul.f32 0.0026041667, %v125_v2  ;;  %v138_v9 = vmul.f32 0.0026041667, %v121_v7  ;;  %v8185_v59 = vrot.slane %v53_v47, %v8161_v40 }
 0x12c   :  { %v144_v15 = vadd.f32 1e-06, %v139_v8  ;;  %v143_v16 = vadd.f32 1e-06, %v138_v9 }
 0x12d   :  { %v129_v20 = vpop.xlane.xlu0 %128 }
 0x12e   :  { %7678 = vrsqrt.f32 %v144_v15  ;;  %v140_v21 = vmul.f32 0.0026041667, %v129_v20  ;;  %v136_v24 = vpop.xlane.xlu1 %135 }
 0x12f   :  { %7680 = vrsqrt.f32 %v143_v16  ;;  %v141_v34 = vmul.f32 0.0026041667, %v136_v24 }
 0x130   :  { %v145_v35 = vadd.f32 1e-06, %v140_v21 }
 0x131   :  { %v146_v36 = vadd.f32 1e-06, %v141_v34 }
 0x132   :  { %7682 = vrsqrt.f32 %v145_v35 }
 0x133   :  { %7684 = vrsqrt.f32 %v146_v36 }
 0x137   :  { %v7677_v43 = vpop.eup %7676 }
 0x138   :  { %v153_v50 = vmul.f32 %v7677_v43, %v7984_v61  ;;  %v154_v51 = vmul.f32 %v7677_v43, %v7987_v62  ;;  %v152_v52 = vmul.f32 %v7677_v43, %v7981_v60  ;;  %v6932_v43 = vld [vmem:[%s10942_s3 + $0x2a8] ss:$48 sps:$4 sm:$0xff]  }
 0x13a   :  { %v184_v53 = vmul.f32 %v175_v41, %v153_v50  ;;  %v185_v55 = vmul.f32 %v8165_v42, %v154_v51  ;;  %v183_v58 = vmul.f32 %v8171_v48, %v152_v52  ;;  %v6935_v51 = vld [vmem:[%s10942_s3 + $0x8a8] ss:$48 sps:$4 sm:$0xff]  }
 0x13b   :  { %v7679_v57 = vpop.eup %7678 }
 0x13c   :  { %v7681_v61 = vpop.eup %7680  ;;  %v159_v62 = vmul.f32 %v7679_v57, %v7993_v0  ;;  %v215_v8 = vadd.f32 %v8177_v54, %v184_v53  ;;  %v216_v9 = vadd.f32 %v8181_v56, %v185_v55  ;;  %v214_v21 = vadd.f32 %v8185_v59, %v183_v58 }
 0x13d   :  { %v156_v60 = vmul.f32 %v7681_v61, %v8014_v28  ;;  %v157_v2 = vmul.f32 %v7681_v61, %v8017_v29  ;;  %v155_v7 = vmul.f32 %v7681_v61, %v8011_v25  ;;  %v160_v39 = vmul.f32 %v7679_v57, %v7996_v1  ;;  %v6940_v1 = vld [vmem:[%s10942_s3 + $0x24c] ss:$48 sps:$4 sm:$0xff]  }
 0x13e   :  { %v190_v28 = vmul.f32 %v175_v41, %v159_v62  ;;  %v158_v50 = vmul.f32 %v7679_v57, %v7990_v63  ;;  %v6943_v57 = vld [vmem:[%s10942_s3 + $0x84c] ss:$48 sps:$4 sm:$0xff]  }
 0x13f   :  { %v7683_v14 = vpop.eup %7682  ;;  %v187_v15 = vmul.f32 %v175_v41, %v156_v60  ;;  %v188_v16 = vmul.f32 %v8165_v42, %v157_v2  ;;  %v186_v20 = vmul.f32 %v8171_v48, %v155_v7  ;;  %v191_v61 = vmul.f32 %v8165_v42, %v160_v39  ;;  %v6941_v7 = vld [vmem:[%s10942_s3 + $0x848] ss:$48 sps:$4 sm:$0xff]  }
 0x140   :  { %v7685_v24 = vpop.eup %7684  ;;  %v162_v0 = vmul.f32 %v7683_v14, %v8023_v32  ;;  %v163_v29 = vmul.f32 %v7683_v14, %v8026_v33  ;;  %v161_v25 = vmul.f32 %v7683_v14, %v8020_v31  ;;  %v221_v55 = vadd.f32 %v8177_v54, %v190_v28  ;;  %v6949_v14 = vld [vmem:[%s10942_s3 + $0x7ec] ss:$48 sps:$4 sm:$0xff]  }
 0x141   :  { %v218_v34 = vadd.f32 %v8177_v54, %v187_v15  ;;  %v219_v35 = vadd.f32 %v8181_v56, %v188_v16  ;;  %v217_v36 = vadd.f32 %v8185_v59, %v186_v20  ;;  %v165_v53 = vmul.f32 %v7685_v24, %v8042_v45  ;;  %v6938_v45 = vld [vmem:[%s10942_s3 + $0x248] ss:$48 sps:$4 sm:$0xff]  }
 0x142   :  { %v193_v47 = vmul.f32 %v175_v41, %v162_v0  ;;  %v194_v32 = vmul.f32 %v8165_v42, %v163_v29  ;;  %v192_v58 = vmul.f32 %v8171_v48, %v161_v25  ;;  %v189_v2 = vmul.f32 %v8171_v48, %v158_v50  ;;  %v6955_v25 = vld [vmem:[%s10942_s3 + $0x78c] ss:$48 sps:$4 sm:$0xff]  }
 0x143   :  { %v8208_v33 = vpack.c.bf16 %v218_v34, %v215_v8  ;;  %v8210_v31 = vpack.c.bf16 %v219_v35, %v216_v9  ;;  %v8215_v52 = vpack.c.bf16 %v217_v36, %v214_v21  ;;  %v196_v62 = vmul.f32 %v175_v41, %v165_v53  ;;  %v6946_v41 = vld [vmem:[%s10942_s3 + $0x1ec] ss:$48 sps:$4 sm:$0xff]   ;;  %v6953_v36 = vld [vmem:[%s10942_s3 + $0x788] ss:$48 sps:$4 sm:$0xff]  }
 0x144   :  { %v224_v63 = vadd.f32 %v8177_v54, %v193_v47  ;;  %v225_v8 = vadd.f32 %v8181_v56, %v194_v32  ;;  %v166_v9 = vmul.f32 %v7685_v24, %v8045_v46  ;;  %v223_v15 = vadd.f32 %v8185_v59, %v192_v58  ;;  %v6944_v46 = vld [vmem:[%s10942_s3 + $0x1e8] ss:$48 sps:$4 sm:$0xff]  }
 0x145   :  { %2062 = vmatprep.mubr.bf16.mxu0 %v8208_v33  ;;  %2124 = vmatmul.mubr.bf16.vlgmr.msra.gmra.mxu1 %v8210_v31  ;;  %v164_v16 = vmul.f32 %v7685_v24, %v8039_v44  ;;  %v222_v20 = vadd.f32 %v8181_v56, %v191_v61  ;;  %v227_v21 = vadd.f32 %v8177_v54, %v196_v62  ;;  %v6947_v44 = vld [vmem:[%s10942_s3 + $0x7e8] ss:$48 sps:$4 sm:$0xff]   ;;  %v6952_v54 = vld [vmem:[%s10942_s3 + $0x18c] ss:$48 sps:$4 sm:$0xff]  }
 0x146   :  { %2153 = vmatpush1.bf16.msra.mxu1 %v6932_v43  ;;  %2063 = vmatmul.mubr.bf16.vlgmr.msra.gmra.mxu0 %v8215_v52  ;;  %v8234_v60 = vpack.c.bf16 %v224_v63, %v221_v55  ;;  %v220_v0 = vadd.f32 %v8185_v59, %v189_v2  ;;  %v197_v24 = vmul.f32 %v8165_v42, %v166_v9  ;;  %v6950_v42 = vld [vmem:[%s10942_s3 + $0x188] ss:$48 sps:$4 sm:$0xff]   ;;  %v6961_v43 = vld [vmem:[%s10942_s3 + $0x72c] ss:$48 sps:$4 sm:$0xff]  }
 0x147   :  { %2214 = vmatpush1.bf16.msra.mxu0 %v6935_v51  ;;  %2154 = vmatprep.subr.bf16.mxu1 %v6940_v1  ;;  %v8258_v28 = vpack.c.bf16 %v225_v8, %v222_v20  ;;  %v195_v34 = vmul.f32 %v8171_v48, %v164_v16  ;;  %v8274_v35 = vpack.c.bf16 %v227_v21, %v227_v21  ;;  %v6958_v48 = vld [vmem:[%s10942_s3 + $0x12c] ss:$48 sps:$4 sm:$0xff]   ;;  %v6956_v32 = vld [vmem:[%s10942_s3 + $0x128] ss:$48 sps:$4 sm:$0xff]   ;;  %v6985_v8 = vld [vmem:[%s10942_s3 + $0x2b4] ss:$48 sps:$4 sm:$0xff]  }
 0x148   :  { %2072 = vmatprep.mubr.bf16.mxu0 %v8234_v60  ;;  %2215 = vmatprep.subr.bf16.mxu0 %v6943_v57  ;;  %v8264_v29 = vpack.c.bf16 %v223_v15, %v220_v0  ;;  %v228_v39 = vadd.f32 %v8181_v56, %v197_v24  ;;  %v6959_v56 = vld [vmem:[%s10942_s3 + $0x728] ss:$48 sps:$4 sm:$0xff]   ;;  %v6967_v1 = vld [vmem:[%s10942_s3 + $0x6cc] ss:$48 sps:$4 sm:$0xff]   ;;  %v6991_v16 = vld [vmem:[%s10942_s3 + $0x254] ss:$48 sps:$4 sm:$0xff]  }
 0x149   :  { %2133 = vmatprep.mubr.bf16.mxu1 %v10949_v49  ;;  %v226_v47 = vadd.f32 %v8185_v59, %v195_v34  ;;  %v6964_v59 = vld [vmem:[%s10942_s3 + $0xcc] ss:$48 sps:$4 sm:$0xff]   ;;  %v6962_v53 = vld [vmem:[%s10942_s3 + $0xc8] ss:$48 sps:$4 sm:$0xff]   ;;  %v6989_v21 = vld [vmem:[%s10942_s3 + $0x250] ss:$48 sps:$4 sm:$0xff]  }
 0x14a   :  { %2155 = vmatpush1.bf16.msra.mxu1 %v6938_v45  ;;  %v8296_v50 = vpack.c.bf16 %v228_v39, %v228_v39  ;;  %v6965_v55 = vld [vmem:[%s10942_s3 + $0x6c8] ss:$48 sps:$4 sm:$0xff]   ;;  %v6970_v63 = vld [vmem:[%s10942_s3 + $0x6c] ss:$48 sps:$4 sm:$0xff]   ;;  %v6997_v0 = vld [vmem:[%s10942_s3 + $0x1f4] ss:$48 sps:$4 sm:$0xff]  }
 0x14b   :  { %2216 = vmatpush1.bf16.msra.mxu0 %v6941_v7  ;;  %2156 = vmatprep.subr.bf16.mxu1 %v6946_v41  ;;  %v8301_v51 = vpack.c.bf16 %v226_v47, %v226_v47  ;;  %v6973_v57 = vld [vmem:[%s10942_s3 + $0x66c] ss:$48 sps:$4 sm:$0xff]   ;;  %v6968_v58 = vld [vmem:[%s10942_s3 + $0x68] ss:$48 sps:$4 sm:$0xff]   ;;  %v6995_v24 = vld [vmem:[%s10942_s3 + $0x1f0] ss:$48 sps:$4 sm:$0xff]  }
 0x14c   :  { %2217 = vmatprep.subr.bf16.mxu0 %v6949_v14  ;;  %v6971_v61 = vld [vmem:[%s10942_s3 + $0x668] ss:$48 sps:$4 sm:$0xff]   ;;  %v6976_v62 = vld [vmem:[%s10942_s3 + $0xc] ss:$48 sps:$4 sm:$0xff]   ;;  %v6983_v14 = vld [vmem:[%s10942_s3 + $0x2b0] ss:$48 sps:$4 sm:$0xff]  }
 0x14d   :  { %2134 = vmatmul.mubr.bf16.gmra.mxu1 %v8258_v28  ;;  %v6979_v45 = vld [vmem:[%s10942_s3 + $0x60c] ss:$48 sps:$4 sm:$0xff]   ;;  %v6974_v2 = vld [vmem:[%s10942_s3 + $0x8] ss:$48 sps:$4 sm:$0xff]  }
 0x14e   :  { %2157 = vmatpush1.bf16.msra.mxu1 %v6944_v46  ;;  %2073 = vmatmul.mubr.bf16.gmra.mxu0 %v8264_v29  ;;  %v6977_v7 = vld [vmem:[%s10942_s3 + $0x608] ss:$48 sps:$4 sm:$0xff]   ;;  %v6982_v41 = vld [vmem:[%s10942_s3 + $0x5ac] ss:$48 sps:$4 sm:$0xff]  }
 0x14f   :  { %2218 = vmatpush1.bf16.msra.mxu0 %v6947_v44  ;;  %2082 = vmatprep.mubr.bf16.mxu0 %v8274_v35  ;;  %v6980_v9 = vld [vmem:[%s10942_s3 + $0x5a8] ss:$48 sps:$4 sm:$0xff]   ;;  %v6988_v15 = vld [vmem:[%s10942_s3 + $0x54c] ss:$48 sps:$4 sm:$0xff]  }
 0x150   :  { %2158 = vmatprep.subr.bf16.mxu1 %v6952_v54  ;;  %2219 = vmatprep.subr.bf16.mxu0 %v6955_v25  ;;  %v6986_v20 = vld [vmem:[%s10942_s3 + $0x548] ss:$48 sps:$4 sm:$0xff]   ;;  %v6994_v46 = vld [vmem:[%s10942_s3 + $0x4ec] ss:$48 sps:$4 sm:$0xff]   ;;  %v7003_v25 = vld [vmem:[%s10942_s3 + $0x194] ss:$48 sps:$4 sm:$0xff]  }
 0x151   :  { %2143 = vmatprep.mubr.bf16.mxu1 %v10949_v49  ;;  %v6992_v44 = vld [vmem:[%s10942_s3 + $0x4e8] ss:$48 sps:$4 sm:$0xff]   ;;  %v7000_v54 = vld [vmem:[%s10942_s3 + $0x48c] ss:$48 sps:$4 sm:$0xff]  }
 0x152   :  { %2159 = vmatpush1.bf16.msra.mxu1 %v6950_v42  ;;  %v6998_v34 = vld [vmem:[%s10942_s3 + $0x488] ss:$48 sps:$4 sm:$0xff]   ;;  %v7001_v42 = vld [vmem:[%s10942_s3 + $0x190] ss:$48 sps:$4 sm:$0xff]   ;;  %v7012_v47 = vld [vmem:[%s10942_s3 + $0x3cc] ss:$48 sps:$4 sm:$0xff]  }
 0x153   :  { %2220 = vmatpush1.bf16.msra.mxu0 %v6953_v36  ;;  %2160 = vmatprep.subr.bf16.mxu1 %v6958_v48  ;;  %v7006_v36 = vld [vmem:[%s10942_s3 + $0x42c] ss:$48 sps:$4 sm:$0xff]   ;;  %v7009_v48 = vld [vmem:[%s10942_s3 + $0x134] ss:$48 sps:$4 sm:$0xff]   ;;  %v7004_v39 = vld [vmem:[%s10942_s3 + $0x428] ss:$48 sps:$4 sm:$0xff]  }
 0x154   :  { %2221 = vmatprep.subr.bf16.mxu0 %v6961_v43  ;;  %v7007_v43 = vld [vmem:[%s10942_s3 + $0x130] ss:$48 sps:$4 sm:$0xff]  }
 0x155   :  { %2144 = vmatmul.mubr.bf16.gmra.mxu1 %v8296_v50 }
 0x156   :  { %2161 = vmatpush1.bf16.msra.mxu1 %v6956_v32  ;;  %2083 = vmatmul.mubr.bf16.gmra.mxu0 %v8301_v51  ;;  %v7015_v32 = vld [vmem:[%s10942_s3 + $0xd4] ss:$48 sps:$4 sm:$0xff]  }
 0x157   :  { %2184 = vmatprep.mubr.bf16.mxu1 %v8208_v33  ;;  %2222 = vmatpush1.bf16.msra.mxu0 %v6959_v56  ;;  %v7010_v56 = vld [vmem:[%s10942_s3 + $0x3c8] ss:$48 sps:$4 sm:$0xff]  }
 0x158   :  { %2162 = vmatprep.subr.bf16.mxu1 %v6964_v59  ;;  %2223 = vmatprep.subr.bf16.mxu0 %v6967_v1  ;;  %v7013_v59 = vld [vmem:[%s10942_s3 + $0xd0] ss:$48 sps:$4 sm:$0xff]   ;;  %v7018_v1 = vld [vmem:[%s10942_s3 + $0x36c] ss:$48 sps:$4 sm:$0xff]  }
 0x159   :  { %2245 = vmatprep.mubr.bf16.mxu0 %v10949_v49 }
 0x15a   :  { %2163 = vmatpush1.bf16.msra.mxu1 %v6962_v53  ;;  %v7021_v53 = vld [vmem:[%s10942_s3 + $0x74] ss:$48 sps:$4 sm:$0xff]  }
 0x15b   :  { %2224 = vmatpush1.bf16.msra.mxu0 %v6965_v55  ;;  %2164 = vmatprep.subr.bf16.mxu1 %v6970_v63  ;;  %v7016_v55 = vld [vmem:[%s10942_s3 + $0x368] ss:$48 sps:$4 sm:$0xff]   ;;  %v7019_v63 = vld [vmem:[%s10942_s3 + $0x70] ss:$48 sps:$4 sm:$0xff]  }
 0x15c   :  { %2225 = vmatprep.subr.bf16.mxu0 %v6973_v57  ;;  %v7024_v57 = vld [vmem:[%s10942_s3 + $0x30c] ss:$48 sps:$4 sm:$0xff]  }
 0x15e   :  { %2165 = vmatpush1.bf16.msra.mxu1 %v6968_v58  ;;  %v7027_v58 = vld [vmem:[%s10942_s3 + $0x14] ss:$48 sps:$4 sm:$0xff]  }
 0x15f   :  { %2226 = vmatpush1.bf16.msra.mxu0 %v6971_v61  ;;  %2166 = vmatprep.subr.bf16.mxu1 %v6976_v62  ;;  %v7022_v61 = vld [vmem:[%s10942_s3 + $0x308] ss:$48 sps:$4 sm:$0xff]   ;;  %v7025_v62 = vld [vmem:[%s10942_s3 + $0x10] ss:$48 sps:$4 sm:$0xff]  }
 0x160   :  { %2227 = vmatprep.subr.bf16.mxu0 %v6979_v45  ;;  %v7030_v45 = vld [vmem:[%s10942_s3 + $0x8b4] ss:$48 sps:$4 sm:$0xff]  }
 0x162   :  { %2167 = vmatpush1.bf16.msra.mxu1 %v6974_v2  ;;  %v7033_v2 = vld [vmem:[%s10942_s3 + $0x5b4] ss:$48 sps:$4 sm:$0xff]  }
 0x163   :  { %2228 = vmatpush1.bf16.msra.mxu0 %v6977_v7  ;;  %2168 = vmatprep.subr.bf16.mxu1 %v6982_v41  ;;  %v7028_v7 = vld [vmem:[%s10942_s3 + $0x8b0] ss:$48 sps:$4 sm:$0xff]  }
 0x164   :  { %2274 = vmatprep.subr.bf16.mxu0 %v6985_v8  ;;  %v7031_v41 = vld [vmem:[%s10942_s3 + $0x5b0] ss:$48 sps:$4 sm:$0xff]   ;;  %v7036_v8 = vld [vmem:[%s10942_s3 + $0x854] ss:$48 sps:$4 sm:$0xff]  }
 0x166   :  { %2169 = vmatpush2.bf16.msra.mxu1 %v6980_v9  ;;  %2246 = vmatmul.mubr.bf16.vlgmr.msra.gmra.mxu0 %v8210_v31  ;;  %v7039_v9 = vld [vmem:[%s10942_s3 + $0x554] ss:$48 sps:$4 sm:$0xff]  }
 0x167   :  { %2275 = vmatpush1.bf16.msra.mxu0 %v6983_v14  ;;  %2170 = vmatprep.subr.bf16.mxu1 %v6988_v15  ;;  %v7034_v14 = vld [vmem:[%s10942_s3 + $0x850] ss:$48 sps:$4 sm:$0xff]  }
 0x168   :  { %2276 = vmatprep.subr.bf16.mxu0 %v6991_v16  ;;  %2255 = vmatprep.mubr.bf16.mxu0 %v10949_v49  ;;  %v7037_v15 = vld [vmem:[%s10942_s3 + $0x550] ss:$48 sps:$4 sm:$0xff]   ;;  %v7042_v16 = vld [vmem:[%s10942_s3 + $0x7f4] ss:$48 sps:$4 sm:$0xff]  }
 0x16a   :  { %2171 = vmatpush2.bf16.msra.mxu1 %v6986_v20  ;;  %v7045_v20 = vld [vmem:[%s10942_s3 + $0x4f4] ss:$48 sps:$4 sm:$0xff]  }
 0x16b   :  { %2277 = vmatpush1.bf16.msra.mxu0 %v6989_v21  ;;  %2172 = vmatprep.subr.bf16.mxu1 %v6994_v46  ;;  %v7040_v21 = vld [vmem:[%s10942_s3 + $0x7f0] ss:$48 sps:$4 sm:$0xff]  }
 0x16c   :  { %2278 = vmatprep.subr.bf16.mxu0 %v6997_v0  ;;  %v7043_v46 = vld [vmem:[%s10942_s3 + $0x4f0] ss:$48 sps:$4 sm:$0xff]   ;;  %v7048_v0 = vld [vmem:[%s10942_s3 + $0x794] ss:$48 sps:$4 sm:$0xff]  }
 0x16e   :  { %2173 = vmatpush2.bf16.msra.mxu1 %v6992_v44  ;;  %2256 = vmatmul.mubr.bf16.gmra.mxu0 %v8258_v28  ;;  %v7051_v44 = vld [vmem:[%s10942_s3 + $0x494] ss:$48 sps:$4 sm:$0xff]  }
 0x16f   :  { %2279 = vmatpush1.bf16.msra.mxu0 %v6995_v24  ;;  %2174 = vmatprep.subr.bf16.mxu1 %v7000_v54  ;;  %v7046_v24 = vld [vmem:[%s10942_s3 + $0x790] ss:$48 sps:$4 sm:$0xff]  }
 0x170   :  { %2280 = vmatprep.subr.bf16.mxu0 %v7003_v25  ;;  %2265 = vmatprep.mubr.bf16.mxu0 %v10949_v49  ;;  %v7049_v54 = vld [vmem:[%s10942_s3 + $0x490] ss:$48 sps:$4 sm:$0xff]   ;;  %v7054_v25 = vld [vmem:[%s10942_s3 + $0x734] ss:$48 sps:$4 sm:$0xff]  }
 0x172   :  { %2175 = vmatpush2.bf16.msra.mxu1 %v6998_v34  ;;  %v7057_v34 = vld [vmem:[%s10942_s3 + $0x434] ss:$48 sps:$4 sm:$0xff]  }
 0x173   :  { %2281 = vmatpush1.bf16.msra.mxu0 %v7001_v42  ;;  %2176 = vmatprep.subr.bf16.mxu1 %v7006_v36  ;;  %v7052_v42 = vld [vmem:[%s10942_s3 + $0x730] ss:$48 sps:$4 sm:$0xff]  }
 0x174   :  { %2282 = vmatprep.subr.bf16.mxu0 %v7009_v48  ;;  %v7055_v36 = vld [vmem:[%s10942_s3 + $0x430] ss:$48 sps:$4 sm:$0xff]   ;;  %v7060_v48 = vld [vmem:[%s10942_s3 + $0x6d4] ss:$48 sps:$4 sm:$0xff]  }
 0x176   :  { %2177 = vmatpush2.bf16.msra.mxu1 %v7004_v39  ;;  %2266 = vmatmul.mubr.bf16.gmra.mxu0 %v8296_v50  ;;  %v7063_v39 = vld [vmem:[%s10942_s3 + $0x3d4] ss:$48 sps:$4 sm:$0xff]  }
 0x177   :  { %2283 = vmatpush1.bf16.msra.mxu0 %v7007_v43  ;;  %2306 = vmatprep.mubr.bf16.mxu0 %v8208_v33  ;;  %v7058_v43 = vld [vmem:[%s10942_s3 + $0x6d0] ss:$48 sps:$4 sm:$0xff]  }
 0x178   :  { %2178 = vmatprep.subr.bf16.mxu1 %v7012_v47  ;;  %2284 = vmatprep.subr.bf16.mxu0 %v7015_v32  ;;  %v7061_v47 = vld [vmem:[%s10942_s3 + $0x3d0] ss:$48 sps:$4 sm:$0xff]   ;;  %v7066_v32 = vld [vmem:[%s10942_s3 + $0x674] ss:$48 sps:$4 sm:$0xff]  }
 0x17a   :  { %2179 = vmatpush2.bf16.msra.mxu1 %v7010_v56  ;;  %v7069_v56 = vld [vmem:[%s10942_s3 + $0x374] ss:$48 sps:$4 sm:$0xff]  }
 0x17b   :  { %2285 = vmatpush1.bf16.msra.mxu0 %v7013_v59  ;;  %2180 = vmatprep.subr.bf16.mxu1 %v7018_v1  ;;  %v7064_v59 = vld [vmem:[%s10942_s3 + $0x670] ss:$48 sps:$4 sm:$0xff]  }
 0x17c   :  { %2286 = vmatprep.subr.bf16.mxu0 %v7021_v53  ;;  %v7067_v1 = vld [vmem:[%s10942_s3 + $0x370] ss:$48 sps:$4 sm:$0xff]   ;;  %v7072_v53 = vld [vmem:[%s10942_s3 + $0x614] ss:$48 sps:$4 sm:$0xff]  }
 0x17e   :  { %2181 = vmatpush2.bf16.msra.mxu1 %v7016_v55  ;;  %v7075_v55 = vld [vmem:[%s10942_s3 + $0x314] ss:$48 sps:$4 sm:$0xff]  }
 0x17f   :  { %2287 = vmatpush1.bf16.msra.mxu0 %v7019_v63  ;;  %2182 = vmatprep.subr.bf16.mxu1 %v7024_v57  ;;  %v7070_v63 = vld [vmem:[%s10942_s3 + $0x610] ss:$48 sps:$4 sm:$0xff]  }
 0x180   :  { %2288 = vmatprep.subr.bf16.mxu0 %v7027_v58  ;;  %v7073_v57 = vld [vmem:[%s10942_s3 + $0x310] ss:$48 sps:$4 sm:$0xff]   ;;  %v7078_v58 = vld [vmem:[%s10942_s3 + $0x2bc] ss:$48 sps:$4 sm:$0xff]  }
 0x182   :  { %2183 = vmatpush2.bf16.msra.mxu1 %v7022_v61  ;;  %v7081_v61 = vld [vmem:[%s10942_s3 + $0x8bc] ss:$48 sps:$4 sm:$0xff]  }
 0x183   :  { %2289 = vmatpush1.bf16.msra.mxu0 %v7025_v62  ;;  %2335 = vmatprep.subr.bf16.mxu1 %v7030_v45  ;;  %v7076_v62 = vld [vmem:[%s10942_s3 + $0x2b8] ss:$48 sps:$4 sm:$0xff]  }
 0x184   :  { %2290 = vmatprep.subr.bf16.mxu0 %v7033_v2  ;;  %v7079_v45 = vld [vmem:[%s10942_s3 + $0x8b8] ss:$48 sps:$4 sm:$0xff]   ;;  %v7084_v2 = vld [vmem:[%s10942_s3 + $0x25c] ss:$48 sps:$4 sm:$0xff]  }
 0x185   :  { %2185 = vmatmul.mubr.bf16.vlgmr.msra.gmra.mxu1 %v8215_v52 }
 0x186   :  { %2194 = vmatprep.mubr.bf16.mxu1 %v8234_v60  ;;  %2336 = vmatpush1.bf16.msra.mxu1 %v7028_v7  ;;  %v7087_v7 = vld [vmem:[%s10942_s3 + $0x85c] ss:$48 sps:$4 sm:$0xff]  }
 0x187   :  { %2291 = vmatpush2.bf16.msra.mxu0 %v7031_v41  ;;  %2337 = vmatprep.subr.bf16.mxu1 %v7036_v8  ;;  %v7082_v41 = vld [vmem:[%s10942_s3 + $0x258] ss:$48 sps:$4 sm:$0xff]  }
 0x188   :  { %2292 = vmatprep.subr.bf16.mxu0 %v7039_v9  ;;  %v7085_v8 = vld [vmem:[%s10942_s3 + $0x858] ss:$48 sps:$4 sm:$0xff]   ;;  %v7090_v9 = vld [vmem:[%s10942_s3 + $0x1fc] ss:$48 sps:$4 sm:$0xff]  }
 0x18a   :  { %2338 = vmatpush1.bf16.msra.mxu1 %v7034_v14  ;;  %v7093_v14 = vld [vmem:[%s10942_s3 + $0x7fc] ss:$48 sps:$4 sm:$0xff]  }
 0x18b   :  { %2293 = vmatpush2.bf16.msra.mxu0 %v7037_v15  ;;  %2339 = vmatprep.subr.bf16.mxu1 %v7042_v16  ;;  %v7088_v15 = vld [vmem:[%s10942_s3 + $0x1f8] ss:$48 sps:$4 sm:$0xff]  }
 0x18c   :  { %2294 = vmatprep.subr.bf16.mxu0 %v7045_v20  ;;  %v7091_v16 = vld [vmem:[%s10942_s3 + $0x7f8] ss:$48 sps:$4 sm:$0xff]  }
 0x18d   :  { %2195 = vmatmul.mubr.bf16.gmra.mxu1 %v8264_v29  ;;  %v7094_v20 = vld [vmem:[%s10942_s3 + $0x198] ss:$48 sps:$4 sm:$0xff]  }
 0x18e   :  { %2204 = vmatprep.mubr.bf16.mxu1 %v8274_v35  ;;  %2340 = vmatpush1.bf16.msra.mxu1 %v7040_v21  ;;  %v7096_v21 = vld [vmem:[%s10942_s3 + $0x19c] ss:$48 sps:$4 sm:$0xff]  }
 0x18f   :  { %2295 = vmatpush2.bf16.msra.mxu0 %v7043_v46  ;;  %2341 = vmatprep.subr.bf16.mxu1 %v7048_v0  ;;  %v7099_v46 = vld [vmem:[%s10942_s3 + $0x79c] ss:$48 sps:$4 sm:$0xff]   ;;  %v7097_v0 = vld [vmem:[%s10942_s3 + $0x798] ss:$48 sps:$4 sm:$0xff]  }
 0x190   :  { %2296 = vmatprep.subr.bf16.mxu0 %v7051_v44  ;;  %v7102_v44 = vld [vmem:[%s10942_s3 + $0x13c] ss:$48 sps:$4 sm:$0xff]  }
 0x192   :  { %2342 = vmatpush1.bf16.msra.mxu1 %v7046_v24  ;;  %v7105_v24 = vld [vmem:[%s10942_s3 + $0x73c] ss:$48 sps:$4 sm:$0xff]  }
 0x193   :  { %2297 = vmatpush2.bf16.msra.mxu0 %v7049_v54  ;;  %2343 = vmatprep.subr.bf16.mxu1 %v7054_v25  ;;  %v7100_v54 = vld [vmem:[%s10942_s3 + $0x138] ss:$48 sps:$4 sm:$0xff]  }
 0x194   :  { %2298 = vmatprep.subr.bf16.mxu0 %v7057_v34  ;;  %v7103_v25 = vld [vmem:[%s10942_s3 + $0x738] ss:$48 sps:$4 sm:$0xff]  }
 0x195   :  { %2205 = vmatmul.mubr.bf16.gmra.mxu1 %v8301_v51  ;;  %v7106_v34 = vld [vmem:[%s10942_s3 + $0xd8] ss:$48 sps:$4 sm:$0xff]  }
 0x196   :  { %2344 = vmatpush1.bf16.msra.mxu1 %v7052_v42  ;;  %2367 = vmatprep.mubr.bf16.mxu1 %v10949_v49  ;;  %v7108_v42 = vld [vmem:[%s10942_s3 + $0xdc] ss:$48 sps:$4 sm:$0xff]  }
 0x197   :  { %2299 = vmatpush2.bf16.msra.mxu0 %v7055_v36  ;;  %2345 = vmatprep.subr.bf16.mxu1 %v7060_v48  ;;  %v7111_v36 = vld [vmem:[%s10942_s3 + $0x6dc] ss:$48 sps:$4 sm:$0xff]   ;;  %v7109_v48 = vld [vmem:[%s10942_s3 + $0x6d8] ss:$48 sps:$4 sm:$0xff]  }
 0x198   :  { %2300 = vmatprep.subr.bf16.mxu0 %v7063_v39  ;;  %v7114_v39 = vld [vmem:[%s10942_s3 + $0x7c] ss:$48 sps:$4 sm:$0xff]  }
 0x19a   :  { %2346 = vmatpush1.bf16.msra.mxu1 %v7058_v43  ;;  %v7112_v43 = vld [vmem:[%s10942_s3 + $0x78] ss:$48 sps:$4 sm:$0xff]  }
 0x19b   :  { %2301 = vmatpush2.bf16.msra.mxu0 %v7061_v47  ;;  %2347 = vmatprep.subr.bf16.mxu1 %v7066_v32  ;;  %v7117_v47 = vld [vmem:[%s10942_s3 + $0x67c] ss:$48 sps:$4 sm:$0xff]   ;;  %v7115_v32 = vld [vmem:[%s10942_s3 + $0x678] ss:$48 sps:$4 sm:$0xff]  }
 0x19c   :  { %2302 = vmatprep.subr.bf16.mxu0 %v7069_v56  ;;  %v7120_v56 = vld [vmem:[%s10942_s3 + $0x1c] ss:$48 sps:$4 sm:$0xff]  }
 0x19e   :  { %2348 = vmatpush1.bf16.msra.mxu1 %v7064_v59  ;;  %v7123_v59 = vld [vmem:[%s10942_s3 + $0x61c] ss:$48 sps:$4 sm:$0xff]  }
 0x19f   :  { %2303 = vmatpush2.bf16.msra.mxu0 %v7067_v1  ;;  %2349 = vmatprep.subr.bf16.mxu1 %v7072_v53  ;;  %v7118_v1 = vld [vmem:[%s10942_s3 + $0x18] ss:$48 sps:$4 sm:$0xff]  }
 0x1a0   :  { %2304 = vmatprep.subr.bf16.mxu0 %v7075_v55  ;;  %v7121_v53 = vld [vmem:[%s10942_s3 + $0x618] ss:$48 sps:$4 sm:$0xff]   ;;  %v7126_v55 = vld [vmem:[%s10942_s3 + $0x5bc] ss:$48 sps:$4 sm:$0xff]  }
 0x1a2   :  { %2350 = vmatpush1.bf16.msra.mxu1 %v7070_v63  ;;  %v7129_v63 = vld [vmem:[%s10942_s3 + $0x2c4] ss:$48 sps:$4 sm:$0xff]  }
 0x1a3   :  { %2305 = vmatpush2.bf16.msra.mxu0 %v7073_v57  ;;  %2396 = vmatprep.subr.bf16.mxu1 %v7078_v58  ;;  %v7124_v57 = vld [vmem:[%s10942_s3 + $0x5b8] ss:$48 sps:$4 sm:$0xff]   ;;  %v7127_v58 = vld [vmem:[%s10942_s3 + $0x2c0] ss:$48 sps:$4 sm:$0xff]  }
 0x1a4   :  { %2457 = vmatprep.subr.bf16.mxu0 %v7081_v61  ;;  %v7132_v61 = vld [vmem:[%s10942_s3 + $0x55c] ss:$48 sps:$4 sm:$0xff]  }
 0x1a5   :  { %2368 = vmatmul.mubr.bf16.vlgmr.msra.gmra.mxu1 %v8210_v31 }
 0x1a6   :  { %2307 = vmatmul.mubr.bf16.vlgmr.msra.gmra.mxu0 %v8215_v52  ;;  %2397 = vmatpush1.bf16.msra.mxu1 %v7076_v62  ;;  %v7135_v62 = vld [vmem:[%s10942_s3 + $0x264] ss:$48 sps:$4 sm:$0xff]  }
 0x1a7   :  { %2316 = vmatprep.mubr.bf16.mxu0 %v8234_v60  ;;  %2458 = vmatpush1.bf16.msra.mxu0 %v7079_v45  ;;  %v7130_v45 = vld [vmem:[%s10942_s3 + $0x558] ss:$48 sps:$4 sm:$0xff]  }
 0x1a8   :  { %2398 = vmatprep.subr.bf16.mxu1 %v7084_v2  ;;  %2459 = vmatprep.subr.bf16.mxu0 %v7087_v7  ;;  %v7133_v2 = vld [vmem:[%s10942_s3 + $0x260] ss:$48 sps:$4 sm:$0xff]   ;;  %v7138_v7 = vld [vmem:[%s10942_s3 + $0x4fc] ss:$48 sps:$4 sm:$0xff]  }
 0x1a9   :  { %2377 = vmatprep.mubr.bf16.mxu1 %v10949_v49 }
 0x1aa   :  { %2399 = vmatpush1.bf16.msra.mxu1 %v7082_v41  ;;  %v7141_v41 = vld [vmem:[%s10942_s3 + $0x204] ss:$48 sps:$4 sm:$0xff]  }
 0x1ab   :  { %2460 = vmatpush1.bf16.msra.mxu0 %v7085_v8  ;;  %2400 = vmatprep.subr.bf16.mxu1 %v7090_v9  ;;  %v7136_v8 = vld [vmem:[%s10942_s3 + $0x4f8] ss:$48 sps:$4 sm:$0xff]   ;;  %v7139_v9 = vld [vmem:[%s10942_s3 + $0x200] ss:$48 sps:$4 sm:$0xff]  }
 0x1ac   :  { %2461 = vmatprep.subr.bf16.mxu0 %v7093_v14  ;;  %v7144_v14 = vld [vmem:[%s10942_s3 + $0x49c] ss:$48 sps:$4 sm:$0xff]  }
 0x1ad   :  { %2378 = vmatmul.mubr.bf16.gmra.mxu1 %v8258_v28 }
 0x1ae   :  { %2317 = vmatmul.mubr.bf16.gmra.mxu0 %v8264_v29  ;;  %2401 = vmatpush1.bf16.msra.mxu1 %v7088_v15  ;;  %v7147_v15 = vld [vmem:[%s10942_s3 + $0x1a4] ss:$48 sps:$4 sm:$0xff]  }
 0x1af   :  { %2326 = vmatprep.mubr.bf16.mxu0 %v8274_v35  ;;  %2462 = vmatpush1.bf16.msra.mxu0 %v7091_v16  ;;  %v7142_v16 = vld [vmem:[%s10942_s3 + $0x498] ss:$48 sps:$4 sm:$0xff]  }
 0x1b0   :  { %2402 = vmatprep.subr.bf16.mxu1 %v7096_v21  ;;  %2463 = vmatprep.subr.bf16.mxu0 %v7099_v46  ;;  %v7150_v21 = vld [vmem:[%s10942_s3 + $0x43c] ss:$48 sps:$4 sm:$0xff]   ;;  %v7153_v46 = vld [vmem:[%s10942_s3 + $0x144] ss:$48 sps:$4 sm:$0xff]  }
 0x1b1   :  { %2387 = vmatprep.mubr.bf16.mxu1 %v10949_v49 }
 0x1b2   :  { %2403 = vmatpush1.bf16.msra.mxu1 %v7094_v20  ;;  %v7145_v20 = vld [vmem:[%s10942_s3 + $0x1a0] ss:$48 sps:$4 sm:$0xff]  }
 0x1b3   :  { %2464 = vmatpush1.bf16.msra.mxu0 %v7097_v0  ;;  %2404 = vmatprep.subr.bf16.mxu1 %v7102_v44  ;;  %v7148_v0 = vld [vmem:[%s10942_s3 + $0x438] ss:$48 sps:$4 sm:$0xff]   ;;  %v7151_v44 = vld [vmem:[%s10942_s3 + $0x140] ss:$48 sps:$4 sm:$0xff]  }
 0x1b4   :  { %2465 = vmatprep.subr.bf16.mxu0 %v7105_v24  ;;  %v7156_v24 = vld [vmem:[%s10942_s3 + $0x3dc] ss:$48 sps:$4 sm:$0xff]  }
 0x1b5   :  { %2388 = vmatmul.mubr.bf16.gmra.mxu1 %v8296_v50 }
 0x1b6   :  { %2327 = vmatmul.mubr.bf16.gmra.mxu0 %v8301_v51  ;;  %2405 = vmatpush1.bf16.msra.mxu1 %v7100_v54  ;;  %v7159_v54 = vld [vmem:[%s10942_s3 + $0xe4] ss:$48 sps:$4 sm:$0xff]  }
 0x1b7   :  { %2428 = vmatprep.mubr.bf16.mxu1 %v8208_v33  ;;  %2466 = vmatpush1.bf16.msra.mxu0 %v7103_v25  ;;  %v7154_v25 = vld [vmem:[%s10942_s3 + $0x3d8] ss:$48 sps:$4 sm:$0xff]  }
 0x1b8   :  { %2406 = vmatprep.subr.bf16.mxu1 %v7108_v42  ;;  %2467 = vmatprep.subr.bf16.mxu0 %v7111_v36  ;;  %v7162_v42 = vld [vmem:[%s10942_s3 + $0x37c] ss:$48 sps:$4 sm:$0xff]   ;;  %v7165_v36 = vld [vmem:[%s10942_s3 + $0x84] ss:$48 sps:$4 sm:$0xff]  }
 0x1b9   :  { %2489 = vmatprep.mubr.bf16.mxu0 %v10949_v49 }
 0x1ba   :  { %2407 = vmatpush1.bf16.msra.mxu1 %v7106_v34  ;;  %v7157_v34 = vld [vmem:[%s10942_s3 + $0xe0] ss:$48 sps:$4 sm:$0xff]  }
 0x1bb   :  { %2468 = vmatpush1.bf16.msra.mxu0 %v7109_v48  ;;  %2408 = vmatprep.subr.bf16.mxu1 %v7114_v39  ;;  %v7160_v48 = vld [vmem:[%s10942_s3 + $0x378] ss:$48 sps:$4 sm:$0xff]   ;;  %v7163_v39 = vld [vmem:[%s10942_s3 + $0x80] ss:$48 sps:$4 sm:$0xff]  }
 0x1bc   :  { %2469 = vmatprep.subr.bf16.mxu0 %v7117_v47  ;;  %v7171_v47 = vld [vmem:[%s10942_s3 + $0x24] ss:$48 sps:$4 sm:$0xff]  }
 0x1be   :  { %2409 = vmatpush1.bf16.msra.mxu1 %v7112_v43  ;;  %v7168_v43 = vld [vmem:[%s10942_s3 + $0x31c] ss:$48 sps:$4 sm:$0xff]  }
 0x1bf   :  { %2470 = vmatpush1.bf16.msra.mxu0 %v7115_v32  ;;  %2410 = vmatprep.subr.bf16.mxu1 %v7120_v56  ;;  %v7166_v32 = vld [vmem:[%s10942_s3 + $0x318] ss:$48 sps:$4 sm:$0xff]   ;;  %v7169_v56 = vld [vmem:[%s10942_s3 + $0x20] ss:$48 sps:$4 sm:$0xff]  }
 0x1c0   :  { %2471 = vmatprep.subr.bf16.mxu0 %v7123_v59  ;;  %v7174_v59 = vld [vmem:[%s10942_s3 + $0x8c4] ss:$48 sps:$4 sm:$0xff]  }
 0x1c2   :  { %2411 = vmatpush1.bf16.msra.mxu1 %v7118_v1  ;;  %v7172_v1 = vld [vmem:[%s10942_s3 + $0x8c0] ss:$48 sps:$4 sm:$0xff]  }
 0x1c3   :  { %2472 = vmatpush1.bf16.msra.mxu0 %v7121_v53  ;;  %2412 = vmatprep.subr.bf16.mxu1 %v7126_v55  ;;  %v7177_v53 = vld [vmem:[%s10942_s3 + $0x5c4] ss:$48 sps:$4 sm:$0xff]   ;;  %v7175_v55 = vld [vmem:[%s10942_s3 + $0x5c0] ss:$48 sps:$4 sm:$0xff]  }
 0x1c4   :  { %2518 = vmatprep.subr.bf16.mxu0 %v7129_v63  ;;  %v7180_v63 = vld [vmem:[%s10942_s3 + $0x864] ss:$48 sps:$4 sm:$0xff]  }
 0x1c6   :  { %2413 = vmatpush2.bf16.msra.mxu1 %v7124_v57  ;;  %2490 = vmatmul.mubr.bf16.vlgmr.msra.gmra.mxu0 %v8210_v31  ;;  %v7183_v57 = vld [vmem:[%s10942_s3 + $0x564] ss:$48 sps:$4 sm:$0xff]  }
 0x1c7   :  { %2519 = vmatpush1.bf16.msra.mxu0 %v7127_v58  ;;  %2414 = vmatprep.subr.bf16.mxu1 %v7132_v61  ;;  %v7178_v58 = vld [vmem:[%s10942_s3 + $0x860] ss:$48 sps:$4 sm:$0xff]  }
 0x1c8   :  { %2520 = vmatprep.subr.bf16.mxu0 %v7135_v62  ;;  %2499 = vmatprep.mubr.bf16.mxu0 %v10949_v49  ;;  %v7181_v61 = vld [vmem:[%s10942_s3 + $0x560] ss:$48 sps:$4 sm:$0xff]   ;;  %v7186_v62 = vld [vmem:[%s10942_s3 + $0x804] ss:$48 sps:$4 sm:$0xff]  }
 0x1ca   :  { %2415 = vmatpush2.bf16.msra.mxu1 %v7130_v45  ;;  %v7189_v45 = vld [vmem:[%s10942_s3 + $0x504] ss:$48 sps:$4 sm:$0xff]  }
 0x1cb   :  { %2521 = vmatpush1.bf16.msra.mxu0 %v7133_v2  ;;  %2416 = vmatprep.subr.bf16.mxu1 %v7138_v7  ;;  %v7184_v2 = vld [vmem:[%s10942_s3 + $0x800] ss:$48 sps:$4 sm:$0xff]  }
 0x1cc   :  { %2522 = vmatprep.subr.bf16.mxu0 %v7141_v41  ;;  %v7187_v7 = vld [vmem:[%s10942_s3 + $0x500] ss:$48 sps:$4 sm:$0xff]   ;;  %v7192_v41 = vld [vmem:[%s10942_s3 + $0x7a4] ss:$48 sps:$4 sm:$0xff]  }
 0x1ce   :  { %2417 = vmatpush2.bf16.msra.mxu1 %v7136_v8  ;;  %2500 = vmatmul.mubr.bf16.gmra.mxu0 %v8258_v28  ;;  %v7195_v8 = vld [vmem:[%s10942_s3 + $0x4a4] ss:$48 sps:$4 sm:$0xff]  }
 0x1cf   :  { %2523 = vmatpush1.bf16.msra.mxu0 %v7139_v9  ;;  %2418 = vmatprep.subr.bf16.mxu1 %v7144_v14  ;;  %v7190_v9 = vld [vmem:[%s10942_s3 + $0x7a0] ss:$48 sps:$4 sm:$0xff]  }
 0x1d0   :  { %2524 = vmatprep.subr.bf16.mxu0 %v7147_v15  ;;  %2509 = vmatprep.mubr.bf16.mxu0 %v10949_v49  ;;  %v7193_v14 = vld [vmem:[%s10942_s3 + $0x4a0] ss:$48 sps:$4 sm:$0xff]   ;;  %v7198_v15 = vld [vmem:[%s10942_s3 + $0x744] ss:$48 sps:$4 sm:$0xff]  }
 0x1d2   :  { %2419 = vmatpush2.bf16.msra.mxu1 %v7142_v16  ;;  %v7201_v16 = vld [vmem:[%s10942_s3 + $0x444] ss:$48 sps:$4 sm:$0xff]  }
 0x1d3   :  { %2525 = vmatpush1.bf16.msra.mxu0 %v7145_v20  ;;  %2420 = vmatprep.subr.bf16.mxu1 %v7150_v21  ;;  %v7196_v20 = vld [vmem:[%s10942_s3 + $0x740] ss:$48 sps:$4 sm:$0xff]  }
 0x1d4   :  { %2526 = vmatprep.subr.bf16.mxu0 %v7153_v46  ;;  %v7199_v21 = vld [vmem:[%s10942_s3 + $0x440] ss:$48 sps:$4 sm:$0xff]   ;;  %v7204_v46 = vld [vmem:[%s10942_s3 + $0x6e4] ss:$48 sps:$4 sm:$0xff]  }
 0x1d6   :  { %2421 = vmatpush2.bf16.msra.mxu1 %v7148_v0  ;;  %2510 = vmatmul.mubr.bf16.gmra.mxu0 %v8296_v50  ;;  %v7207_v0 = vld [vmem:[%s10942_s3 + $0x3e4] ss:$48 sps:$4 sm:$0xff]  }
 0x1d7   :  { %2527 = vmatpush1.bf16.msra.mxu0 %v7151_v44  ;;  %2550 = vmatprep.mubr.bf16.mxu0 %v8208_v33  ;;  %v7202_v44 = vld [vmem:[%s10942_s3 + $0x6e0] ss:$48 sps:$4 sm:$0xff]  }
 0x1d8   :  { %2422 = vmatprep.subr.bf16.mxu1 %v7156_v24  ;;  %2528 = vmatprep.subr.bf16.mxu0 %v7159_v54  ;;  %v7205_v24 = vld [vmem:[%s10942_s3 + $0x3e0] ss:$48 sps:$4 sm:$0xff]   ;;  %v7210_v54 = vld [vmem:[%s10942_s3 + $0x684] ss:$48 sps:$4 sm:$0xff]  }
 0x1da   :  { %2423 = vmatpush2.bf16.msra.mxu1 %v7154_v25  ;;  %v7213_v25 = vld [vmem:[%s10942_s3 + $0x384] ss:$48 sps:$4 sm:$0xff]  }
 0x1db   :  { %2529 = vmatpush1.bf16.msra.mxu0 %v7157_v34  ;;  %2424 = vmatprep.subr.bf16.mxu1 %v7162_v42  ;;  %v7208_v34 = vld [vmem:[%s10942_s3 + $0x680] ss:$48 sps:$4 sm:$0xff]  }
 0x1dc   :  { %2530 = vmatprep.subr.bf16.mxu0 %v7165_v36  ;;  %v7211_v42 = vld [vmem:[%s10942_s3 + $0x380] ss:$48 sps:$4 sm:$0xff]   ;;  %v7216_v36 = vld [vmem:[%s10942_s3 + $0x624] ss:$48 sps:$4 sm:$0xff]  }
 0x1de   :  { %2425 = vmatpush2.bf16.msra.mxu1 %v7160_v48  ;;  %v7219_v48 = vld [vmem:[%s10942_s3 + $0x324] ss:$48 sps:$4 sm:$0xff]  }
 0x1df   :  { %2531 = vmatpush1.bf16.msra.mxu0 %v7163_v39  ;;  %2426 = vmatprep.subr.bf16.mxu1 %v7168_v43  ;;  %v7214_v39 = vld [vmem:[%s10942_s3 + $0x620] ss:$48 sps:$4 sm:$0xff]  }
 0x1e0   :  { %2532 = vmatprep.subr.bf16.mxu0 %v7171_v47  ;;  %v7217_v43 = vld [vmem:[%s10942_s3 + $0x320] ss:$48 sps:$4 sm:$0xff]   ;;  %v7222_v47 = vld [vmem:[%s10942_s3 + $0x2cc] ss:$48 sps:$4 sm:$0xff]  }
 0x1e2   :  { %2427 = vmatpush2.bf16.msra.mxu1 %v7166_v32  ;;  %v7225_v32 = vld [vmem:[%s10942_s3 + $0x8cc] ss:$48 sps:$4 sm:$0xff]  }
 0x1e3   :  { %2533 = vmatpush1.bf16.msra.mxu0 %v7169_v56  ;;  %2579 = vmatprep.subr.bf16.mxu1 %v7174_v59  ;;  %v7220_v56 = vld [vmem:[%s10942_s3 + $0x2c8] ss:$48 sps:$4 sm:$0xff]  }
 0x1e4   :  { %2534 = vmatprep.subr.bf16.mxu0 %v7177_v53  ;;  %v7223_v59 = vld [vmem:[%s10942_s3 + $0x8c8] ss:$48 sps:$4 sm:$0xff]   ;;  %v7228_v53 = vld [vmem:[%s10942_s3 + $0x26c] ss:$48 sps:$4 sm:$0xff]  }
 0x1e5   :  { %2429 = vmatmul.mubr.bf16.vlgmr.msra.gmra.mxu1 %v8215_v52 }
 0x1e6   :  { %2438 = vmatprep.mubr.bf16.mxu1 %v8234_v60  ;;  %2580 = vmatpush1.bf16.msra.mxu1 %v7172_v1  ;;  %v8874_v1 = vld [vmem:[%s10946_s4] sm:$0xff] }
 0x1e7   :  { %2535 = vmatpush2.bf16.msra.mxu0 %v7175_v55  ;;  %2581 = vmatprep.subr.bf16.mxu1 %v7180_v63  ;;  %v7231_v55 = vld [vmem:[%s10942_s3 + $0x86c] ss:$48 sps:$4 sm:$0xff]   ;;  %v7226_v63 = vld [vmem:[%s10942_s3 + $0x268] ss:$48 sps:$4 sm:$0xff]  }
 0x1e8   :  { %2536 = vmatprep.subr.bf16.mxu0 %v7183_v57 }
 0x1ea   :  { %2582 = vmatpush1.bf16.msra.mxu1 %v7178_v58  ;;  %v8890_v58 = vrot.slane %v8874_v1, %v8152_v37 }
 0x1eb   :  { %2537 = vmatpush2.bf16.msra.mxu0 %v7181_v61  ;;  %2583 = vmatprep.subr.bf16.mxu1 %v7186_v62  ;;  %v7229_v61 = vld [vmem:[%s10942_s3 + $0x868] ss:$48 sps:$4 sm:$0xff]  }
 0x1ec   :  { %2538 = vmatprep.subr.bf16.mxu0 %v7189_v45  ;;  %v7234_v45 = vld [vmem:[%s10942_s3 + $0x20c] ss:$48 sps:$4 sm:$0xff]  }
 0x1ed   :  { %2439 = vmatmul.mubr.bf16.gmra.mxu1 %v8264_v29 }
 0x1ee   :  { %2448 = vmatprep.mubr.bf16.mxu1 %v8274_v35  ;;  %2584 = vmatpush1.bf16.msra.mxu1 %v7184_v2  ;;  %v7237_v2 = vld [vmem:[%s10942_s3 + $0x80c] ss:$48 sps:$4 sm:$0xff]  }
 0x1ef   :  { %2539 = vmatpush2.bf16.msra.mxu0 %v7187_v7  ;;  %2585 = vmatprep.subr.bf16.mxu1 %v7192_v41 }
 0x1f0   :  { %2540 = vmatprep.subr.bf16.mxu0 %v7195_v8  ;;  %v7232_v8 = vld [vmem:[%s10942_s3 + $0x208] ss:$48 sps:$4 sm:$0xff]  }
 0x1f2   :  { %2586 = vmatpush1.bf16.msra.mxu1 %v7190_v9 }
 0x1f3   :  { %2541 = vmatpush2.bf16.msra.mxu0 %v7193_v14  ;;  %2587 = vmatprep.subr.bf16.mxu1 %v7198_v15 }
 0x1f4   :  { %2542 = vmatprep.subr.bf16.mxu0 %v7201_v16  ;;  %v7235_v16 = vld [vmem:[%s10942_s3 + $0x808] ss:$48 sps:$4 sm:$0xff]  }
 0x1f5   :  { %2449 = vmatmul.mubr.bf16.gmra.mxu1 %v8301_v51 }
 0x1f6   :  { %2588 = vmatpush1.bf16.msra.mxu1 %v7196_v20  ;;  %2611 = vmatprep.mubr.bf16.mxu1 %v10949_v49  ;;  %v7240_v20 = vld [vmem:[%s10942_s3 + $0x1ac] ss:$48 sps:$4 sm:$0xff]  }
 0x1f7   :  { %2543 = vmatpush2.bf16.msra.mxu0 %v7199_v21  ;;  %2589 = vmatprep.subr.bf16.mxu1 %v7204_v46 }
 0x1f8   :  { %2544 = vmatprep.subr.bf16.mxu0 %v7207_v0  ;;  %v7243_v0 = vld [vmem:[%s10942_s3 + $0x7ac] ss:$48 sps:$4 sm:$0xff]  }
 0x1fa   :  { %2590 = vmatpush1.bf16.msra.mxu1 %v7202_v44 }
 0x1fb   :  { %2545 = vmatpush2.bf16.msra.mxu0 %v7205_v24  ;;  %2591 = vmatprep.subr.bf16.mxu1 %v7210_v54  ;;  %v7238_v24 = vld [vmem:[%s10942_s3 + $0x1a8] ss:$48 sps:$4 sm:$0xff]  }
 0x1fc   :  { %2546 = vmatprep.subr.bf16.mxu0 %v7213_v25 }
 0x1fe   :  { %2592 = vmatpush1.bf16.msra.mxu1 %v7208_v34 }
 0x1ff   :  { %2547 = vmatpush2.bf16.msra.mxu0 %v7211_v42  ;;  %2593 = vmatprep.subr.bf16.mxu1 %v7216_v36  ;;  %v7241_v36 = vld [vmem:[%s10942_s3 + $0x7a8] ss:$48 sps:$4 sm:$0xff]  }
 0x200   :  { %2548 = vmatprep.subr.bf16.mxu0 %v7219_v48  ;;  %v7246_v48 = vld [vmem:[%s10942_s3 + $0x14c] ss:$48 sps:$4 sm:$0xff]  }
 0x202   :  { %2594 = vmatpush1.bf16.msra.mxu1 %v7214_v39 }
 0x203   :  { %2549 = vmatpush2.bf16.msra.mxu0 %v7217_v43  ;;  %2640 = vmatprep.subr.bf16.mxu1 %v7222_v47  ;;  %v7249_v47 = vld [vmem:[%s10942_s3 + $0x74c] ss:$48 sps:$4 sm:$0xff]  }
 0x204   :  { %2701 = vmatprep.subr.bf16.mxu0 %v7225_v32 }
 0x205   :  { %2612 = vmatmul.mubr.bf16.vlgmr.msra.gmra.mxu1 %v8210_v31  ;;  %v8886_v57 = vpop.f32.mrf.mxu1 }
 0x206   :  { %2551 = vmatmul.mubr.bf16.vlgmr.msra.gmra.mxu0 %v8215_v52  ;;  %2641 = vmatpush1.bf16.msra.mxu1 %v7220_v56  ;;  %v8896_v62 = vpop.f32.mrf.mxu0 }
 0x207   :  { %2560 = vmatprep.mubr.bf16.mxu0 %v8234_v60  ;;  %2702 = vmatpush1.bf16.msra.mxu0 %v7223_v59  ;;  %v2127_v7 = vpop.f32.mrf.mxu1  ;;  %v7244_v59 = vld [vmem:[%s10942_s3 + $0x148] ss:$48 sps:$4 sm:$0xff]  }
 0x208   :  { %v2066_v41 = vpop.f32.mrf.mxu0  ;;  %2642 = vmatprep.subr.bf16.mxu1 %v7228_v53  ;;  %2703 = vmatprep.subr.bf16.mxu0 %v7231_v55 }
 0x209   :  { %v2067_v9 = vadd.f32 %v2066_v41, %v8890_v58  ;;  %v8909_v14 = vpop.f32.mrf.mxu1  ;;  %2621 = vmatprep.mubr.bf16.mxu1 %v10949_v49 }
 0x20a   :  { %2643 = vmatpush1.bf16.msra.mxu1 %v7226_v63  ;;  %v8912_v15 = vpop.f32.mrf.mxu0 }
 0x20b   :  { %v8920_v21 = vadd.f32 %v2127_v7, %v2067_v9  ;;  %2704 = vmatpush1.bf16.msra.mxu0 %v7229_v61  ;;  %v2131_v46 = vpop.f32.mrf.mxu1  ;;  %2644 = vmatprep.subr.bf16.mxu1 %v7234_v45  ;;  %v7247_v45 = vld [vmem:[%s10942_s3 + $0x748] ss:$48 sps:$4 sm:$0xff]   ;;  %v7255_v9 = vld [vmem:[%s10942_s3 + $0x6ec] ss:$48 sps:$4 sm:$0xff]  }
 0x20c   :  { %v2070_v44 = vpop.f32.mrf.mxu0  ;;  %2705 = vmatprep.subr.bf16.mxu0 %v7237_v2 }
 0x20d   :  { %v2823_v54 = vmul.f32 0.044715, %v8920_v21  ;;  %v2071_v25 = vadd.f32 %v2070_v44, %v8890_v58  ;;  %2622 = vmatmul.mubr.bf16.gmra.mxu1 %v8258_v28  ;;  %v8931_v34 = vpop.f32.mrf.mxu1 }
 0x20e   :  { %2561 = vmatmul.mubr.bf16.gmra.mxu0 %v8264_v29  ;;  %2645 = vmatpush1.bf16.msra.mxu1 %v7232_v8  ;;  %v8934_v42 = vpop.f32.mrf.mxu0  ;;  %v7252_v8 = vld [vmem:[%s10942_s3 + $0xec] ss:$48 sps:$4 sm:$0xff]  }
 0x20f   :  { %v2883_v39 = vmul.f32 %v2823_v54, %v8920_v21  ;;  %2570 = vmatprep.mubr.bf16.mxu0 %v8274_v35  ;;  %2706 = vmatpush1.bf16.msra.mxu0 %v7235_v16  ;;  %v8944_v43 = vpop.f32.mrf.mxu1  ;;  %v8949_v32 = vadd.f32 %v2131_v46, %v2071_v25  ;;  %v7250_v46 = vld [vmem:[%s10942_s3 + $0xe8] ss:$48 sps:$4 sm:$0xff]   ;;  %v7258_v54 = vld [vmem:[%s10942_s3 + $0x8c] ss:$48 sps:$4 sm:$0xff]  }
 0x210   :  { %v8951_v56 = vpop.f32.mrf.mxu0  ;;  %2646 = vmatprep.subr.bf16.mxu1 %v7240_v20  ;;  %2707 = vmatprep.subr.bf16.mxu0 %v7243_v0 }
 0x211   :  { %v8956_v53 = vpop.f32.mrf.mxu1  ;;  %2631 = vmatprep.mubr.bf16.mxu1 %v10949_v49  ;;  %v2835_v55 = vmul.f32 0.044715, %v8949_v32  ;;  %v2943_v2 = vmul.f32 %v2883_v39, %v8920_v21 }
 0x212   :  { %2647 = vmatpush1.bf16.msra.mxu1 %v7238_v24  ;;  %v8960_v63 = vpop.f32.mrf.mxu0  ;;  %v7253_v24 = vld [vmem:[%s10942_s3 + $0x6e8] ss:$48 sps:$4 sm:$0xff]  }
 0x213   :  { %2708 = vmatpush1.bf16.msra.mxu0 %v7241_v36  ;;  %v8962_v61 = vpop.f32.mrf.mxu1  ;;  %2648 = vmatprep.subr.bf16.mxu1 %v7246_v48  ;;  %v2895_v7 = vmul.f32 %v2835_v55, %v8949_v32  ;;  %v3003_v25 = vadd.f32 %v2943_v2, %v8920_v21  ;;  %v7259_v55 = vld [vmem:[%s10942_s3 + $0x688] ss:$48 sps:$4 sm:$0xff]  }
 0x214   :  { %v8969_v41 = vpop.f32.mrf.mxu0  ;;  %2709 = vmatprep.subr.bf16.mxu0 %v7249_v47  ;;  %v7256_v47 = vld [vmem:[%s10942_s3 + $0x88] ss:$48 sps:$4 sm:$0xff]  }
 0x215   :  { %2632 = vmatmul.mubr.bf16.gmra.mxu1 %v8296_v50  ;;  %v8978_v16 = vpop.f32.mrf.mxu1  ;;  %v2955_v0 = vmul.f32 %v2895_v7, %v8949_v32  ;;  %v7264_v7 = vld [vmem:[%s10942_s3 + $0x2c] ss:$48 sps:$4 sm:$0xff]  }
 0x216   :  { %2571 = vmatmul.mubr.bf16.gmra.mxu0 %v8301_v51  ;;  %2649 = vmatpush1.bf16.msra.mxu1 %v7244_v59  ;;  %v8981_v20 = vpop.f32.mrf.mxu0 }
 0x217   :  { %2672 = vmatprep.mubr.bf16.mxu1 %v8208_v33  ;;  %2710 = vmatpush1.bf16.msra.mxu0 %v7247_v45  ;;  %v8988_v44 = vpop.f32.mrf.mxu1  ;;  %v7261_v33 = vld [vmem:[%s10942_s3 + $0x68c] ss:$48 sps:$4 sm:$0xff]   ;;  %v3015_v48 = vadd.f32 %v2955_v0, %v8949_v32  ;;  %v7262_v0 = vld [vmem:[%s10942_s3 + $0x28] ss:$48 sps:$4 sm:$0xff]  }
 0x218   :  { %v8997_v36 = vpop.f32.mrf.mxu0  ;;  %2650 = vmatprep.subr.bf16.mxu1 %v7252_v8  ;;  %2711 = vmatprep.subr.bf16.mxu0 %v7255_v9  ;;  %v3063_v8 = vmul.f32 0.7978846, %v3003_v25  ;;  %v7273_v25 = vld [vmem:[%s10945_s5 + $0xac] ss:$12 sps:$4 sm:$0xff]  }
 0x219   :  { %v2149_v39 = vpop.f32.mrf.mxu1  ;;  %2733 = vmatprep.mubr.bf16.mxu0 %v10949_v49  ;;  %v3075_v45 = vmul.f32 0.7978846, %v3015_v48  ;;  %v7268_v48 = vld [vmem:[%s10942_s3 + $0x5c8] ss:$48 sps:$4 sm:$0xff]  }
 0x21a   :  { %2651 = vmatpush1.bf16.msra.mxu1 %v7250_v46  ;;  %v2088_v59 = vpop.f32.mrf.mxu0  ;;  %v7267_v46 = vld [vmem:[%s10942_s3 + $0x62c] ss:$48 sps:$4 sm:$0xff]   ;;  %v7271_v39 = vld [vmem:[%s10945_s5 + $0xa8] ss:$12 sps:$4 sm:$0xff]  }
 0x21b   :  { %2712 = vmatpush1.bf16.msra.mxu0 %v7253_v24  ;;  %v2150_v2 = vpop.f32.mrf.mxu1  ;;  %2652 = vmatprep.subr.bf16.mxu1 %v7258_v54  ;;  %7686 = vtanh.f32 %v3075_v45  ;;  %v7265_v24 = vld [vmem:[%s10942_s3 + $0x628] ss:$48 sps:$4 sm:$0xff]   ;;  %v7270_v54 = vld [vmem:[%s10942_s3 + $0x5cc] ss:$48 sps:$4 sm:$0xff]  }
 0x21c   :  { %v2089_v9 = vpop.f32.mrf.mxu0  ;;  %2713 = vmatprep.subr.bf16.mxu0 %v7261_v33  ;;  %7688 = vtanh.f32 %v3063_v8  ;;  %v9030_v33 = vrot.slane %v8874_v1, %v8161_v40  ;;  %v7274_v59 = vld [vmem:[%s10942_s3 + $0x568] ss:$48 sps:$4 sm:$0xff]   ;;  %v7277_v45 = vld [vmem:[%s10945_s5 + $0x90] ss:$12 sps:$4 sm:$0xff]  }
 0x21d   :  { %v7282_v2 = vld [vmem:[%s10942_s3 + $0x50c] ss:$48 sps:$4 sm:$0xff]  }
 0x21e   :  { %2653 = vmatpush1.bf16.msra.mxu1 %v7256_v47  ;;  %v7276_v47 = vld [vmem:[%s10942_s3 + $0x56c] ss:$48 sps:$4 sm:$0xff]  }
 0x21f   :  { %2714 = vmatpush1.bf16.msra.mxu0 %v7259_v55  ;;  %2654 = vmatprep.subr.bf16.mxu1 %v7264_v7  ;;  %v7279_v55 = vld [vmem:[%s10945_s5 + $0x94] ss:$12 sps:$4 sm:$0xff]   ;;  %v2065_v7 = vadd.f32 %v8896_v62, %v9030_v33  ;;  %v7285_v9 = vld [vmem:[%s10945_s5 + $0x7c] ss:$12 sps:$4 sm:$0xff]  }
 0x220   :  { %2715 = vmatprep.subr.bf16.mxu0 %v7267_v46  ;;  %v2069_v46 = vadd.f32 %v8912_v15, %v9030_v33  ;;  %v7280_v62 = vld [vmem:[%s10942_s3 + $0x508] ss:$48 sps:$4 sm:$0xff]   ;;  %v7288_v15 = vld [vmem:[%s10942_s3 + $0x4ac] ss:$48 sps:$4 sm:$0xff]  }
 0x222   :  { %2655 = vmatpush1.bf16.msra.mxu1 %v7262_v0  ;;  %v2077_v0 = vadd.f32 %v8951_v56, %v8890_v58  ;;  %v9078_v56 = vadd.f32 %v8886_v57, %v2065_v7  ;;  %v7286_v57 = vld [vmem:[%s10942_s3 + $0x4a8] ss:$48 sps:$4 sm:$0xff]  }
 0x223   :  { %2716 = vmatpush1.bf16.msra.mxu0 %v7265_v24  ;;  %2656 = vmatprep.subr.bf16.mxu1 %v7270_v54 }
 0x224   :  { %5275 = vmatprep.subr.bf16.mxu0 %v7273_v25 }
 0x226   :  { %v9055_v8 = vpop.f32.mrf.mxu0  ;;  %2657 = vmatpush2.bf16.msra.mxu1 %v7268_v48  ;;  %2734 = vmatmul.mubr.bf16.vlgmr.msra.gmra.mxu0 %v8210_v31  ;;  %v7283_v31 = vld [vmem:[%s10945_s5 + $0x78] ss:$12 sps:$4 sm:$0xff]  }
 0x227   :  { %5276 = vmatpush1.bf16.msra.mxu0 %v7271_v39  ;;  %2658 = vmatprep.subr.bf16.mxu1 %v7276_v47  ;;  %v7291_v48 = vld [vmem:[%s10945_s5 + $0x64] ss:$12 sps:$4 sm:$0xff]   ;;  %v9086_v39 = vadd.f32 %v8909_v14, %v2069_v46  ;;  %v7289_v14 = vld [vmem:[%s10945_s5 + $0x60] ss:$12 sps:$4 sm:$0xff]  }
 0x228   :  { %v9065_v24 = vpop.f32.mrf.mxu0  ;;  %5277 = vmatprep.subr.bf16.mxu0 %v7279_v55  ;;  %2743 = vmatprep.mubr.bf16.mxu0 %v10949_v49  ;;  %v7687_v54 = vpop.eup %7686  ;;  %v9089_v55 = vadd.f32 %v8944_v43, %v2077_v0  ;;  %v2775_v0 = vmul.f32 0.5, %v8949_v32  ;;  %v7295_v32 = vld [vmem:[%s10945_s5 + $0x48] ss:$12 sps:$4 sm:$0xff]  }
 0x229   :  { %v7689_v47 = vpop.eup %7688  ;;  %v3195_v43 = vadd.f32 1.0, %v7687_v54  ;;  %v2834_v46 = vmul.f32 0.044715, %v9086_v39 }
 0x22a   :  { %v9080_v25 = vpop.f32.mrf.mxu0  ;;  %2659 = vmatpush2.bf16.msra.mxu1 %v7274_v59  ;;  %v2081_v59 = vadd.f32 %v8969_v41, %v8890_v58  ;;  %v7297_v41 = vld [vmem:[%s10945_s5 + $0x4c] ss:$12 sps:$4 sm:$0xff]   ;;  %v3183_v54 = vadd.f32 1.0, %v7689_v47  ;;  %v2847_v27 = vmul.f32 0.044715, %v9089_v55 }
 0x22b   :  { %5278 = vmatpush1.bf16.msra.mxu0 %v7277_v45  ;;  %2660 = vmatprep.subr.bf16.mxu1 %v7282_v2  ;;  %v7294_v45 = vld [vmem:[%s10942_s3 + $0x44c] ss:$48 sps:$4 sm:$0xff]   ;;  %v2822_v2 = vmul.f32 0.044715, %v9078_v56  ;;  %v3255_v11 = vmul.f32 %v3195_v43, %v2775_v0 }
 0x22c   :  { %v9091_v49 = vpop.f32.mrf.mxu0  ;;  %5279 = vmatprep.subr.bf16.mxu0 %v7285_v9  ;;  %v2763_v9 = vmul.f32 0.5, %v8920_v21  ;;  %v7292_v21 = vld [vmem:[%s10942_s3 + $0x448] ss:$48 sps:$4 sm:$0xff]  }
 0x22e   :  { %v9105_v7 = vpop.f32.mrf.mxu0  ;;  %2661 = vmatpush2.bf16.msra.mxu1 %v7280_v62  ;;  %2744 = vmatmul.mubr.bf16.gmra.mxu0 %v8258_v28  ;;  %v10983_v62 = vmov 0   ;;  %v9119_v28 = vadd.f32 %v8962_v61, %v2081_v59  ;;  %v7300_v61 = vld [vmem:[%s10942_s3 + $0x3ec] ss:$48 sps:$4 sm:$0xff]   ;;  %v7303_v59 = vld [vmem:[%s10945_s5 + $0x34] ss:$12 sps:$4 sm:$0xff]  }
 0x22f   :  { %5280 = vmatpush1.bf16.msra.mxu0 %v7283_v31  ;;  %2662 = vmatprep.subr.bf16.mxu1 %v7288_v15  ;;  %v3243_v31 = vmul.f32 %v3183_v54, %v2763_v9  ;;  %v2882_v15 = vmul.f32 %v2822_v2, %v9078_v56 }
 0x230   :  { %v9115_v22 = vpop.f32.mrf.mxu0  ;;  %5281 = vmatprep.subr.bf16.mxu0 %v7291_v48  ;;  %2753 = vmatprep.mubr.bf16.mxu0 %v10983_v62  ;;  %v2894_v48 = vmul.f32 %v2834_v46, %v9086_v39  ;;  %v2859_v43 = vmul.f32 0.044715, %v9119_v28  ;;  %v2087_v46 = vadd.f32 %v8997_v36, %v8890_v58  ;;  %v7309_v58 = vld [vmem:[%s10945_s5 + $0x1c] ss:$12 sps:$4 sm:$0xff]   ;;  %v2085_v62 = vadd.f32 %v8981_v20, %v9030_v33 }
 0x231   :  { %v9146_v2 = vpack.c.bf16 %v3255_v11, %v3243_v31  ;;  %v7306_v11 = vld [vmem:[%s10942_s3 + $0x38c] ss:$48 sps:$4 sm:$0xff]  }
 0x232   :  { %v9121_v17 = vpop.f32.mrf.mxu0  ;;  %2663 = vmatpush2.bf16.msra.mxu1 %v7286_v57  ;;  %v7298_v57 = vld [vmem:[%s10942_s3 + $0x3e8] ss:$48 sps:$4 sm:$0xff]   ;;  %v2919_v54 = vmul.f32 %v2859_v43, %v9119_v28  ;;  %v7312_v20 = vld [vmem:[%s10942_s3 + $0x32c] ss:$48 sps:$4 sm:$0xff]  }
 0x233   :  { %5282 = vmatpush1.bf16.msra.mxu0 %v7289_v14  ;;  %2664 = vmatprep.subr.bf16.mxu1 %v7294_v45  ;;  %v2907_v14 = vmul.f32 %v2847_v27, %v9089_v55  ;;  %v2079_v45 = vadd.f32 %v8960_v63, %v9030_v33  ;;  %v7301_v27 = vld [vmem:[%s10945_s5 + $0x30] ss:$12 sps:$4 sm:$0xff]   ;;  %v2954_v63 = vmul.f32 %v2894_v48, %v9086_v39  ;;  %v7310_v43 = vld [vmem:[%s10942_s3 + $0x328] ss:$48 sps:$4 sm:$0xff]  }
 0x234   :  { %v9134_v47 = vpop.f32.mrf.mxu0  ;;  %5283 = vmatprep.subr.bf16.mxu0 %v7297_v41  ;;  %v2075_v41 = vadd.f32 %v8934_v42, %v9030_v33  ;;  %v2942_v42 = vmul.f32 %v2882_v15, %v9078_v56 }
 0x235   :  { %v9173_v36 = vadd.f32 %v8956_v53, %v2079_v45  ;;  %v7307_v53 = vld [vmem:[%s10945_s5 + $0x18] ss:$12 sps:$4 sm:$0xff]  }
 0x236   :  { %v9150_v9 = vpop.f32.mrf.mxu0  ;;  %2665 = vmatpush2.bf16.msra.mxu1 %v7292_v21  ;;  %2754 = vmatmul.mubr.bf16.gmra.mxu0 %v8296_v50  ;;  %v7304_v50 = vld [vmem:[%s10942_s3 + $0x388] ss:$48 sps:$4 sm:$0xff]   ;;  %v2967_v21 = vmul.f32 %v2907_v14, %v9089_v55  ;;  %v3002_v33 = vadd.f32 %v2942_v42, %v9078_v56 }
 0x237   :  { %5284 = vmatpush1.bf16.msra.mxu0 %v7295_v32  ;;  %5307 = vmatprep.mubr.bf16.mxu0 %v9146_v2  ;;  %v9180_v32 = vadd.f32 %v8931_v34, %v2075_v41  ;;  %v3014_v34 = vadd.f32 %v2954_v63, %v9086_v39  ;;  %v2858_v48 = vmul.f32 0.044715, %v9173_v36  ;;  %v7313_v41 = vld [vmem:[%s10945_s5] ss:$12 sps:$4 sm:$0xff]   ;;  %v7316_v63 = vld [vmem:[%s10945_s5 + $0x228] ss:$12 sps:$4 sm:$0xff]  }
 0x238   :  { %v9164_v0 = vpop.f32.mrf.mxu0  ;;  %2666 = vmatprep.subr.bf16.mxu1 %v7300_v61  ;;  %5285 = vmatprep.subr.bf16.mxu0 %v7303_v59  ;;  %v9183_v61 = vadd.f32 %v8988_v44, %v2087_v46  ;;  %v7315_v44 = vld [vmem:[%s10945_s5 + $0x4] ss:$12 sps:$4 sm:$0xff]   ;;  %v2979_v59 = vmul.f32 %v2919_v54, %v9119_v28  ;;  %v3027_v14 = vadd.f32 %v2967_v21, %v9089_v55  ;;  %v7324_v21 = vld [vmem:[%s10945_s5 + $0x214] ss:$12 sps:$4 sm:$0xff]  }
 0x239   :  { %v2846_v45 = vmul.f32 0.044715, %v9180_v32  ;;  %v3074_v42 = vmul.f32 0.7978846, %v3014_v34 }
 0x23a   :  { %v2271_v31 = vpop.f32.mrf.mxu0  ;;  %2667 = vmatpush2.bf16.msra.mxu1 %v7298_v57  ;;  %v9198_v57 = vadd.f32 %v8978_v16, %v2085_v62  ;;  %v2871_v46 = vmul.f32 0.044715, %v9183_v61  ;;  %v7318_v16 = vld [vmem:[%s10945_s5 + $0x22c] ss:$12 sps:$4 sm:$0xff]   ;;  %v7319_v62 = vld [vmem:[%s10945_s5 + $0x168] ss:$12 sps:$4 sm:$0xff]  }
 0x23b   :  { %5286 = vmatpush1.bf16.msra.mxu0 %v7301_v27  ;;  %2668 = vmatprep.subr.bf16.mxu1 %v7306_v11  ;;  %v7321_v27 = vld [vmem:[%s10945_s5 + $0x16c] ss:$12 sps:$4 sm:$0xff]   ;;  %v3062_v11 = vmul.f32 0.7978846, %v3002_v33  ;;  %v3039_v31 = vadd.f32 %v2979_v59, %v9119_v28  ;;  %v7327_v33 = vld [vmem:[%s10945_s5 + $0x154] ss:$12 sps:$4 sm:$0xff]  }
 0x23c   :  { %v2272_v15 = vpop.f32.mrf.mxu0  ;;  %5287 = vmatprep.subr.bf16.mxu0 %v7309_v58  ;;  %v2918_v58 = vmul.f32 %v2858_v48, %v9173_v36  ;;  %v2870_v54 = vmul.f32 0.044715, %v9198_v57  ;;  %v2931_v34 = vmul.f32 %v2871_v46, %v9183_v61  ;;  %v9244_v48 = vrot.slane %v8874_v1, %v8155_v38 }
 0x23d   :  { %7690 = vtanh.f32 %v3062_v11 }
 0x23e   :  { %2669 = vmatpush2.bf16.msra.mxu1 %v7304_v50  ;;  %v10954_v50 = vsub.s32 3, %v8149_v30  ;;  %7692 = vtanh.f32 %v3074_v42 }
 0x23f   :  { %5288 = vmatpush1.bf16.msra.mxu0 %v7307_v53  ;;  %2670 = vmatprep.subr.bf16.mxu1 %v7312_v20  ;;  %v3087_v53 = vmul.f32 0.7978846, %v3027_v14  ;;  %v2906_v20 = vmul.f32 %v2846_v45, %v9180_v32  ;;  %v7325_v14 = vld [vmem:[%s10945_s5 + $0x150] ss:$12 sps:$4 sm:$0xff]  }
 0x240   :  { %5289 = vmatprep.subr.bf16.mxu0 %v7315_v44  ;;  %v9237_v15 = vrot.slane %v8874_v1, %v10954_v50  ;;  %v7322_v44 = vld [vmem:[%s10945_s5 + $0x210] ss:$12 sps:$4 sm:$0xff]  }
 0x241   :  { %v7330_v45 = vld [vmem:[%s10945_s5 + $0x1fc] ss:$12 sps:$4 sm:$0xff]   ;;  %7694 = vtanh.f32 %v3087_v53 }
 0x242   :  { %2671 = vmatpush2.bf16.msra.mxu1 %v7310_v43  ;;  %v3099_v43 = vmul.f32 0.7978846, %v3039_v31  ;;  %v7333_v1 = vld [vmem:[%s10945_s5 + $0x13c] ss:$12 sps:$4 sm:$0xff]   ;;  %v7331_v31 = vld [vmem:[%s10945_s5 + $0x138] ss:$12 sps:$4 sm:$0xff]  }
 0x243   :  { %5290 = vmatpush1.bf16.msra.mxu0 %v7313_v41  ;;  %5336 = vmatprep.subr.bf16.mxu1 %v7318_v16  ;;  %v2978_v41 = vmul.f32 %v2918_v58, %v9173_v36  ;;  %v2991_v16 = vmul.f32 %v2931_v34, %v9183_v61  ;;  %v7328_v58 = vld [vmem:[%s10945_s5 + $0x1f8] ss:$12 sps:$4 sm:$0xff]  }
 0x244   :  { %5291 = vmatprep.subr.bf16.mxu0 %v7321_v27  ;;  %7696 = vtanh.f32 %v3099_v43 }
 0x245   :  { %v2186_v59 = vpop.f32.mrf.mxu1  ;;  %2673 = vmatmul.mubr.bf16.vlgmr.msra.gmra.mxu1 %v8215_v52  ;;  %v2966_v52 = vmul.f32 %v2906_v20, %v9180_v32  ;;  %v3038_v20 = vadd.f32 %v2978_v41, %v9173_v36 }
 0x246   :  { %2682 = vmatprep.mubr.bf16.mxu1 %v8234_v60  ;;  %5337 = vmatpush1.bf16.msra.mxu1 %v7316_v63  ;;  %v2187_v60 = vadd.f32 %v2186_v59, %v9244_v48  ;;  %v2930_v59 = vmul.f32 %v2870_v54, %v9198_v57 }
 0x247   :  { %v2188_v46 = vpop.f32.mrf.mxu1  ;;  %5292 = vmatpush2.bf16.msra.mxu0 %v7319_v62  ;;  %5338 = vmatprep.subr.bf16.mxu1 %v7324_v21  ;;  %v7336_v21 = vld [vmem:[%s10945_s5 + $0x1e4] ss:$12 sps:$4 sm:$0xff]   ;;  %v3026_v34 = vadd.f32 %v2966_v52, %v9180_v32 }
 0x248   :  { %v2189_v27 = vadd.f32 %v2188_v46, %v9237_v15  ;;  %5293 = vmatprep.subr.bf16.mxu0 %v7327_v33  ;;  %v7339_v33 = vld [vmem:[%s10945_s5 + $0x124] ss:$12 sps:$4 sm:$0xff]   ;;  %v9288_v54 = vadd.f32 %v9055_v8, %v2187_v60  ;;  %v2990_v53 = vmul.f32 %v2930_v59, %v9198_v57  ;;  %v7343_v59 = vld [vmem:[%s10945_s5 + $0x108] ss:$12 sps:$4 sm:$0xff]  }
 0x249   :  { %v2190_v63 = vpop.f32.mrf.mxu1  ;;  %v3086_v52 = vmul.f32 0.7978846, %v3026_v34 }
 0x24a   :  { %v9270_v62 = vadd.f32 %v9065_v24, %v2189_v27  ;;  %5339 = vmatpush1.bf16.msra.mxu1 %v7322_v44  ;;  %v3051_v24 = vadd.f32 %v2991_v16, %v9183_v61  ;;  %v2191_v44 = vadd.f32 %v2190_v63, %v9244_v48  ;;  %v7334_v27 = vld [vmem:[%s10945_s5 + $0x1e0] ss:$12 sps:$4 sm:$0xff]  }
 0x24b   :  { %v2192_v46 = vpop.f32.mrf.mxu1  ;;  %5294 = vmatpush2.bf16.msra.mxu0 %v7325_v14  ;;  %5340 = vmatprep.subr.bf16.mxu1 %v7330_v45  ;;  %v3098_v14 = vmul.f32 0.7978846, %v3038_v20 }
 0x24c   :  { %v2825_v11 = vmul.f32 0.044715, %v9270_v62  ;;  %v2193_v41 = vadd.f32 %v2192_v46, %v9237_v15  ;;  %5295 = vmatprep.subr.bf16.mxu0 %v7333_v1  ;;  %v7337_v1 = vld [vmem:[%s10945_s5 + $0x120] ss:$12 sps:$4 sm:$0xff]   ;;  %v3111_v43 = vmul.f32 0.7978846, %v3051_v24 }
 0x24d   :  { %v2196_v42 = vpop.f32.mrf.mxu1  ;;  %2683 = vmatmul.mubr.bf16.gmra.mxu1 %v8264_v29  ;;  %v7342_v29 = vld [vmem:[%s10945_s5 + $0x1cc] ss:$12 sps:$4 sm:$0xff]   ;;  %7698 = vtanh.f32 %v3098_v14  ;;  %v7348_v46 = vld [vmem:[%s10945_s5 + $0x1b4] ss:$12 sps:$4 sm:$0xff]  }
 0x24e   :  { %v2885_v45 = vmul.f32 %v2825_v11, %v9270_v62  ;;  %2692 = vmatprep.mubr.bf16.mxu1 %v8274_v35  ;;  %5341 = vmatpush1.bf16.msra.mxu1 %v7328_v58  ;;  %v9298_v8 = vadd.f32 %v9091_v49, %v2193_v41  ;;  %v9304_v35 = vadd.f32 %v9080_v25, %v2191_v44  ;;  %v7345_v58 = vld [vmem:[%s10945_s5 + $0x10c] ss:$12 sps:$4 sm:$0xff]   ;;  %v2824_v49 = vmul.f32 0.044715, %v9288_v54  ;;  %v7340_v25 = vld [vmem:[%s10945_s5 + $0x1c8] ss:$12 sps:$4 sm:$0xff]  }
 0x24f   :  { %v2198_v16 = vpop.f32.mrf.mxu1  ;;  %5296 = vmatpush2.bf16.msra.mxu0 %v7331_v31  ;;  %5342 = vmatprep.subr.bf16.mxu1 %v7336_v21  ;;  %7700 = vtanh.f32 %v3086_v52  ;;  %v3050_v21 = vadd.f32 %v2990_v53, %v9198_v57  ;;  %v7351_v24 = vld [vmem:[%s10945_s5 + $0xf4] ss:$12 sps:$4 sm:$0xff]   ;;  %v9329_v44 = vmul.f32 0.5, %v9078_v56  ;;  %v7349_v56 = vld [vmem:[%s10945_s5 + $0xf0] ss:$12 sps:$4 sm:$0xff]  }
 0x250   :  { %5297 = vmatprep.subr.bf16.mxu0 %v7339_v33  ;;  %v2945_v60 = vmul.f32 %v2885_v45, %v9270_v62  ;;  %v2837_v63 = vmul.f32 0.044715, %v9298_v8  ;;  %v2199_v20 = vadd.f32 %v2198_v16, %v9237_v15  ;;  %7702 = vtanh.f32 %v3111_v43 }
 0x251   :  { %v2200_v31 = vpop.f32.mrf.mxu1  ;;  %v2836_v41 = vmul.f32 0.044715, %v9304_v35  ;;  %v552_v45 = vsub.s32 5, %v8149_v30  ;;  %v2197_v43 = vadd.f32 %v2196_v42, %v9244_v48 }
 0x252   :  { %5343 = vmatpush1.bf16.msra.mxu1 %v7334_v27  ;;  %v2897_v33 = vmul.f32 %v2837_v63, %v9298_v8  ;;  %v3005_v11 = vadd.f32 %v2945_v60, %v9270_v62  ;;  %v7346_v27 = vld [vmem:[%s10945_s5 + $0x1b0] ss:$12 sps:$4 sm:$0xff]   ;;  %v2201_v60 = vadd.f32 %v2200_v31, %v9244_v48  ;;  %v7691_v63 = vpop.eup %7690 }
 0x253   :  { %v2202_v34 = vpop.f32.mrf.mxu1  ;;  %5298 = vmatpush2.bf16.msra.mxu0 %v7337_v1  ;;  %5344 = vmatprep.subr.bf16.mxu1 %v7342_v29  ;;  %v2884_v1 = vmul.f32 %v2824_v49, %v9288_v54  ;;  %v7354_v49 = vld [vmem:[%s10945_s5 + $0x19c] ss:$12 sps:$4 sm:$0xff]   ;;  %v7693_v31 = vpop.eup %7692 }
 0x254   :  { %5299 = vmatprep.subr.bf16.mxu0 %v7345_v58  ;;  %v2203_v52 = vadd.f32 %v2202_v34, %v9237_v15  ;;  %v2957_v16 = vmul.f32 %v2897_v33, %v9298_v8  ;;  %v3065_v29 = vmul.f32 0.7978846, %v3005_v11  ;;  %v9346_v58 = vadd.f32 %v9115_v22, %v2199_v20  ;;  %v7357_v22 = vld [vmem:[%s10945_s5 + $0xdc] ss:$12 sps:$4 sm:$0xff]  }
 0x255   :  { %v2206_v53 = vpop.f32.mrf.mxu1  ;;  %2693 = vmatmul.mubr.bf16.gmra.mxu1 %v8301_v51  ;;  %v3110_v51 = vmul.f32 0.7978846, %v3050_v21  ;;  %v9353_v34 = vmul.f32 0.5, %v9086_v39  ;;  %v2896_v20 = vmul.f32 %v2836_v41, %v9304_v35  ;;  %v7352_v39 = vld [vmem:[%s10945_s5 + $0x198] ss:$12 sps:$4 sm:$0xff]   ;;  %v9371_v21 = vmul.f32 0.5, %v9180_v32 }
 0x256   :  { %5345 = vmatpush1.bf16.msra.mxu1 %v7340_v25  ;;  %v9356_v33 = vadd.f32 %v9134_v47, %v2203_v52  ;;  %v3017_v42 = vadd.f32 %v2957_v16, %v9298_v8  ;;  %7704 = vtanh.f32 %v3065_v29  ;;  %v9368_v47 = vmul.f32 0.5, %v9089_v55  ;;  %v7355_v32 = vld [vmem:[%s10945_s5 + $0xd8] ss:$12 sps:$4 sm:$0xff]  }
 0x257   :  { %v2208_v11 = vpop.f32.mrf.mxu1  ;;  %5300 = vmatpush2.bf16.msra.mxu0 %v7343_v59  ;;  %5346 = vmatprep.subr.bf16.mxu1 %v7348_v46  ;;  %v7695_v59 = vpop.eup %7694  ;;  %v2944_v46 = vmul.f32 %v2884_v1, %v9288_v54  ;;  %v2799_v41 = vmul.f32 0.5, %v9119_v28  ;;  %v9377_v29 = vadd.f32 %v9105_v7, %v2197_v43  ;;  %v9381_v55 = vadd.f32 %v9121_v17, %v2201_v60  ;;  %v7360_v1 = vld [vmem:[%s10945_s5 + $0x184] ss:$12 sps:$4 sm:$0xff]   ;;  %v7358_v60 = vld [vmem:[%s10945_s5 + $0x180] ss:$12 sps:$4 sm:$0xff]  }
 0x258   :  { %v2209_v25 = vadd.f32 %v2208_v11, %v9237_v15  ;;  %5301 = vmatprep.subr.bf16.mxu0 %v7351_v24  ;;  %v2861_v52 = vmul.f32 0.044715, %v9356_v33  ;;  %v3077_v15 = vmul.f32 0.7978846, %v3017_v42  ;;  %v7697_v24 = vpop.eup %7696  ;;  %v2849_v11 = vmul.f32 0.044715, %v9346_v58 }
 0x259   :  { %v2210_v16 = vpop.f32.mrf.mxu1  ;;  %7706 = vtanh.f32 %v3110_v51  ;;  %v9394_v17 = vmul.f32 0.5, %v9173_v36  ;;  %v7363_v51 = vld [vmem:[%s10945_s5 + $0xc4] ss:$12 sps:$4 sm:$0xff]   ;;  %v3194_v42 = vadd.f32 1.0, %v7693_v31  ;;  %v3004_v36 = vadd.f32 %v2944_v46, %v9288_v54 }
 0x25a   :  { %5347 = vmatpush1.bf16.msra.mxu1 %v7346_v27  ;;  %v2921_v28 = vmul.f32 %v2861_v52, %v9356_v33  ;;  %v9391_v7 = vadd.f32 %v9164_v0, %v2209_v25  ;;  %7708 = vtanh.f32 %v3077_v15  ;;  %v2956_v27 = vmul.f32 %v2896_v20, %v9304_v35  ;;  %v7366_v20 = vld [vmem:[%s10945_s5 + $0x2ec] ss:$12 sps:$4 sm:$0xff]   ;;  %v7699_v16 = vpop.eup %7698 }
 0x25b   :  { %v2211_v43 = vpop.f32.mrf.mxu1  ;;  %5302 = vmatpush2.bf16.msra.mxu0 %v7349_v56  ;;  %5348 = vmatprep.subr.bf16.mxu1 %v7354_v49  ;;  %v3182_v0 = vadd.f32 1.0, %v7691_v63  ;;  %v9404_v56 = vmul.f32 0.5, %v9183_v61  ;;  %v2207_v49 = vadd.f32 %v2206_v53, %v9244_v48  ;;  %v3207_v25 = vadd.f32 1.0, %v7695_v59  ;;  %v7369_v48 = vld [vmem:[%s10945_s5 + $0x3ac] ss:$12 sps:$4 sm:$0xff]  }
 0x25c   :  { %5303 = vmatprep.subr.bf16.mxu0 %v7357_v22  ;;  %v7361_v22 = vld [vmem:[%s10945_s5 + $0xc0] ss:$12 sps:$4 sm:$0xff]   ;;  %v3219_v52 = vadd.f32 1.0, %v7697_v24  ;;  %v2848_v63 = vmul.f32 0.044715, %v9377_v29  ;;  %v2909_v61 = vmul.f32 %v2849_v11, %v9346_v58  ;;  %v2981_v53 = vmul.f32 %v2921_v28, %v9356_v33  ;;  %v7701_v46 = vpop.eup %7700 }
 0x25d   :  { %v2860_v31 = vmul.f32 0.044715, %v9381_v55  ;;  %v2873_v15 = vmul.f32 0.044715, %v9391_v7  ;;  %v7703_v59 = vpop.eup %7702  ;;  %v3016_v24 = vadd.f32 %v2956_v27, %v9304_v35  ;;  %v7364_v11 = vld [vmem:[%s10945_s5 + $0x2e8] ss:$12 sps:$4 sm:$0xff]   ;;  %v3254_v43 = vmul.f32 %v3194_v42, %v9353_v34 }
 0x25e   :  { %5349 = vmatpush1.bf16.msra.mxu1 %v7352_v39  ;;  %v3242_v39 = vmul.f32 %v3182_v0, %v9329_v44  ;;  %v3064_v50 = vmul.f32 0.7978846, %v3004_v36  ;;  %v9429_v28 = vadd.f32 %v9150_v9, %v2207_v49  ;;  %v3218_v14 = vadd.f32 1.0, %v7699_v16  ;;  %v7375_v44 = vld [vmem:[%s10945_s5 + $0x394] ss:$12 sps:$4 sm:$0xff]  }
 0x25f   :  { %5304 = vmatpush2.bf16.msra.mxu0 %v7355_v32  ;;  %5350 = vmatprep.subr.bf16.mxu1 %v7360_v1  ;;  %v7367_v32 = vld [vmem:[%s10945_s5 + $0x3a8] ss:$12 sps:$4 sm:$0xff]   ;;  %v3279_v1 = vmul.f32 %v3219_v52, %v2799_v41  ;;  %v2920_v27 = vmul.f32 %v2860_v31, %v9381_v55  ;;  %v3206_v34 = vadd.f32 1.0, %v7701_v46  ;;  %v2969_v9 = vmul.f32 %v2909_v61, %v9346_v58  ;;  %v9451_v61 = vld [vmem:[%s10946_s4] sm:$0xff]  ;;  %v7373_v31 = vld [vmem:[%s10945_s5 + $0x390] ss:$12 sps:$4 sm:$0xff]  }
 0x260   :  { %5305 = vmatprep.subr.bf16.mxu0 %v7363_v51  ;;  %v7372_v51 = vld [vmem:[%s10945_s5 + $0x2d4] ss:$12 sps:$4 sm:$0xff]   ;;  %v3041_v0 = vadd.f32 %v2981_v53, %v9356_v33  ;;  %v2908_v42 = vmul.f32 %v2848_v63, %v9377_v29  ;;  %v3267_v41 = vmul.f32 %v3207_v25, %v9368_v47  ;;  %v2933_v36 = vmul.f32 %v2873_v15, %v9391_v7  ;;  %v7370_v47 = vld [vmem:[%s10945_s5 + $0x2d0] ss:$12 sps:$4 sm:$0xff]  }
 0x261   :  { %v3076_v52 = vmul.f32 0.7978846, %v3016_v24  ;;  %v9446_v16 = vpack.c.bf16 %v3254_v43, %v3242_v39  ;;  %7710 = vtanh.f32 %v3064_v50  ;;  %v7381_v46 = vld [vmem:[%s10945_s5 + $0x37c] ss:$12 sps:$4 sm:$0xff]   ;;  %v3029_v15 = vadd.f32 %v2969_v9, %v9346_v58 }
 0x262   :  { %5351 = vmatpush1.bf16.msra.mxu1 %v7358_v60  ;;  %v3231_v60 = vadd.f32 1.0, %v7703_v59  ;;  %v9464_v63 = vpack.c.bf16 %v3279_v1, %v3267_v41  ;;  %v3101_v59 = vmul.f32 0.7978846, %v3041_v0  ;;  %v2980_v24 = vmul.f32 %v2920_v27, %v9381_v55  ;;  %v7376_v27 = vld [vmem:[%s10945_s5 + $0x2b8] ss:$12 sps:$4 sm:$0xff]  }
 0x263   :  { %5306 = vmatpush2.bf16.msra.mxu0 %v7361_v22  ;;  %5352 = vmatprep.subr.bf16.mxu1 %v7366_v20  ;;  %v7705_v49 = vpop.eup %7704  ;;  %v9456_v22 = vrot.slane %v9451_v61, %v552_v45  ;;  %v2872_v20 = vmul.f32 0.044715, %v9429_v28  ;;  %v7378_v45 = vld [vmem:[%s10945_s5 + $0x2bc] ss:$12 sps:$4 sm:$0xff]   ;;  %7712 = vtanh.f32 %v3076_v52  ;;  %v3089_v52 = vmul.f32 0.7978846, %v3029_v15 }
 0x264   :  { %5397 = vmatprep.subr.bf16.mxu0 %v7369_v48  ;;  %v3278_v48 = vmul.f32 %v3218_v14, %v9394_v17  ;;  %v3185_v50 = vadd.f32 1.0, %v7705_v49  ;;  %v3266_v14 = vmul.f32 %v3206_v34, %v9371_v21  ;;  %v2968_v17 = vmul.f32 %v2908_v42, %v9377_v29  ;;  %v7379_v34 = vld [vmem:[%s10945_s5 + $0x378] ss:$12 sps:$4 sm:$0xff]  }
 0x265   :  { %v9462_v25 = vpop.f32.mrf.mxu1  ;;  %v3291_v42 = vmul.f32 %v3231_v60, %v9404_v56  ;;  %v7384_v49 = vld [vmem:[%s10945_s5 + $0x2a4] ss:$12 sps:$4 sm:$0xff]   ;;  %7714 = vtanh.f32 %v3101_v59 }
 0x266   :  { %v9473_v53 = vpop.f32.mrf.mxu0  ;;  %5308 = vmatmul.mubr.bf16.vlgmr.msra.gmra.mxu0 %v9446_v16  ;;  %5353 = vmatpush2.bf16.msra.mxu1 %v7364_v11  ;;  %v7707_v39 = vpop.eup %7706  ;;  %v2993_v11 = vmul.f32 %v2933_v36, %v9391_v7  ;;  %v7387_v56 = vld [vmem:[%s10945_s5 + $0x364] ss:$12 sps:$4 sm:$0xff]   ;;  %7716 = vtanh.f32 %v3089_v52 }
 0x267   :  { %v2371_v43 = vpop.f32.mrf.mxu1  ;;  %5317 = vmatprep.mubr.bf16.mxu0 %v9464_v63  ;;  %5398 = vmatpush1.bf16.msra.mxu0 %v7367_v32  ;;  %v7709_v1 = vpop.eup %7708  ;;  %v9491_v32 = vpack.c.bf16 %v3278_v48, %v3266_v14  ;;  %v3040_v48 = vadd.f32 %v2980_v24, %v9381_v55  ;;  %v3230_v60 = vadd.f32 1.0, %v7707_v39 }
 0x268   :  { %v2310_v41 = vpop.f32.mrf.mxu0  ;;  %5354 = vmatprep.subr.bf16.mxu1 %v7372_v51  ;;  %5399 = vmatprep.subr.bf16.mxu0 %v7375_v44  ;;  %v3197_v21 = vadd.f32 1.0, %v7709_v1  ;;  %v2765_v51 = vmul.f32 0.5, %v9270_v62  ;;  %v2777_v44 = vmul.f32 0.5, %v9298_v8  ;;  %v3053_v62 = vadd.f32 %v2993_v11, %v9391_v7 }
 0x269   :  { %v2311_v9 = vadd.f32 %v2310_v41, %v9456_v22  ;;  %v9489_v0 = vpop.f32.mrf.mxu1  ;;  %v2932_v8 = vmul.f32 %v2872_v20, %v9429_v28  ;;  %v9522_v20 = vpack.c.bf16 %v3291_v42, %v3291_v42  ;;  %v2810_v11 = vmul.f32 0.5, %v9198_v57 }
 0x26a   :  { %v2312_v36 = vpop.f32.mrf.mxu0  ;;  %5355 = vmatpush2.bf16.msra.mxu1 %v7370_v47  ;;  %v3028_v47 = vadd.f32 %v2968_v17, %v9377_v29  ;;  %v3245_v15 = vmul.f32 %v3185_v50, %v2765_v51  ;;  %v3257_v5 = vmul.f32 %v3197_v21, %v2777_v44  ;;  %v7385_v50 = vld [vmem:[%s10945_s5 + $0x360] ss:$12 sps:$4 sm:$0xff]   ;;  %v3113_v51 = vmul.f32 0.7978846, %v3053_v62 }
 0x26b   :  { %v2375_v14 = vpop.f32.mrf.mxu1  ;;  %5400 = vmatpush1.bf16.msra.mxu0 %v7373_v31  ;;  %5356 = vmatprep.subr.bf16.mxu1 %v7378_v45  ;;  %v9509_v1 = vadd.f32 %v2371_v43, %v2311_v9  ;;  %v7382_v31 = vld [vmem:[%s10945_s5 + $0x2a0] ss:$12 sps:$4 sm:$0xff]   ;;  %v10984_v45 = vsub.s32 4, %v8149_v30  ;;  %v3100_v9 = vmul.f32 0.7978846, %v3040_v48  ;;  %v2992_v44 = vmul.f32 %v2932_v8, %v9429_v28 }
 0x26c   :  { %v2314_v41 = vpop.f32.mrf.mxu0  ;;  %5401 = vmatprep.subr.bf16.mxu0 %v7381_v46  ;;  %v9530_v59 = vpack.c.bf16 %v3257_v5, %v3245_v15  ;;  %v7390_v43 = vld [vmem:[%s10945_s5 + $0x28c] ss:$12 sps:$4 sm:$0xff]   ;;  %v3088_v5 = vmul.f32 0.7978846, %v3028_v47 }
 0x26d   :  { %v9517_v24 = vrot.slane %v9451_v61, %v10984_v45  ;;  %v2315_v39 = vadd.f32 %v2314_v41, %v9456_v22  ;;  %v9520_v17 = vpop.f32.mrf.mxu1  ;;  %v2827_v41 = vmul.f32 0.044715, %v9509_v1  ;;  %7718 = vtanh.f32 %v3100_v9 }
 0x26e   :  { %v9527_v46 = vpop.f32.mrf.mxu0  ;;  %5318 = vmatmul.mubr.bf16.gmra.mxu0 %v9491_v32  ;;  %5357 = vmatpush2.bf16.msra.mxu1 %v7376_v27  ;;  %v7393_v27 = vld [vmem:[%s10945_s5 + $0x34c] ss:$12 sps:$4 sm:$0xff]   ;;  %v7711_v47 = vpop.eup %7710  ;;  %7720 = vtanh.f32 %v3088_v5  ;;  %v2776_v9 = vmul.f32 0.5, %v9304_v35 }
 0x26f   :  { %v2313_v21 = vadd.f32 %v2312_v36, %v9517_v24  ;;  %v2381_v42 = vpop.f32.mrf.mxu1  ;;  %5327 = vmatprep.mubr.bf16.mxu0 %v9522_v20  ;;  %5402 = vmatpush1.bf16.msra.mxu0 %v7379_v34  ;;  %v9543_v15 = vadd.f32 %v2375_v14, %v2315_v39  ;;  %v7388_v34 = vld [vmem:[%s10945_s5 + $0x288] ss:$12 sps:$4 sm:$0xff]   ;;  %v3290_v36 = vmul.f32 %v3230_v60, %v2810_v11  ;;  %7722 = vtanh.f32 %v3113_v51 }
 0x270   :  { %5368 = vmatprep.mubr.bf16.mxu1 %v9530_v59  ;;  %v2320_v57 = vpop.f32.mrf.mxu0  ;;  %5358 = vmatprep.subr.bf16.mxu1 %v7384_v49  ;;  %v2309_v52 = vadd.f32 %v9473_v53, %v9517_v24  ;;  %v7391_v14 = vld [vmem:[%s10945_s5 + $0x348] ss:$12 sps:$4 sm:$0xff]   ;;  %v2887_v39 = vmul.f32 %v2827_v41, %v9509_v1  ;;  %v3184_v35 = vadd.f32 1.0, %v7711_v47  ;;  %v2319_v47 = vadd.f32 %v9527_v46, %v9517_v24 }
 0x271   :  { %v9551_v48 = vpop.f32.mrf.mxu1  ;;  %5403 = vmatprep.subr.bf16.mxu0 %v7387_v56  ;;  %v2839_v62 = vmul.f32 0.044715, %v9543_v15  ;;  %v9558_v49 = vadd.f32 %v9489_v0, %v2313_v21  ;;  %v2321_v60 = vadd.f32 %v2320_v57, %v9456_v22  ;;  %v7396_v53 = vld [vmem:[%s10945_s5 + $0x274] ss:$12 sps:$4 sm:$0xff]   ;;  %v3052_v56 = vadd.f32 %v2992_v44, %v9429_v28 }
 0x272   :  { %v2322_v8 = vpop.f32.mrf.mxu0  ;;  %5359 = vmatpush2.bf16.msra.mxu1 %v7382_v31  ;;  %v9566_v31 = vpack.c.bf16 %v3290_v36, %v3290_v36  ;;  %v7399_v0 = vld [vmem:[%s10945_s5 + $0x334] ss:$12 sps:$4 sm:$0xff]   ;;  %v9576_v21 = vadd.f32 %v9462_v25, %v2309_v52  ;;  %v9590_v25 = vmul.f32 0.5, %v9346_v58 }
 0x273   :  { %v2385_v45 = vpop.f32.mrf.mxu1  ;;  %5404 = vmatpush1.bf16.msra.mxu0 %v7385_v50  ;;  %5360 = vmatprep.subr.bf16.mxu1 %v7390_v43  ;;  %v7713_v50 = vpop.eup %7712  ;;  %v9572_v43 = vmul.f32 0.5, %v9288_v54  ;;  %v2899_v44 = vmul.f32 %v2839_v62, %v9543_v15  ;;  %v7397_v54 = vld [vmem:[%s10945_s5 + $0x330] ss:$12 sps:$4 sm:$0xff]   ;;  %v2838_v57 = vmul.f32 0.044715, %v9558_v49  ;;  %v9593_v36 = vadd.f32 %v2381_v42, %v2321_v60 }
 0x274   :  { %v2324_v11 = vpop.f32.mrf.mxu0  ;;  %5405 = vmatprep.subr.bf16.mxu0 %v7393_v27  ;;  %v7394_v27 = vld [vmem:[%s10945_s5 + $0x270] ss:$12 sps:$4 sm:$0xff]   ;;  %v2323_v52 = vadd.f32 %v2322_v8, %v9517_v24  ;;  %v7400_v42 = vld [vmem:[%s10945_s5 + $0x258] ss:$12 sps:$4 sm:$0xff]   ;;  %v3196_v8 = vadd.f32 1.0, %v7713_v50  ;;  %v2947_v60 = vmul.f32 %v2887_v39, %v9509_v1 }
 0x275   :  { %v9578_v5 = vpop.f32.mrf.mxu1  ;;  %v2325_v41 = vadd.f32 %v2324_v11, %v9456_v22  ;;  %v3112_v11 = vmul.f32 0.7978846, %v3052_v56  ;;  %v2826_v56 = vmul.f32 0.044715, %v9576_v21  ;;  %v2959_v23 = vmul.f32 %v2899_v44, %v9543_v15 }
 0x276   :  { %v2328_v51 = vpop.f32.mrf.mxu0  ;;  %5328 = vmatmul.mubr.bf16.gmra.mxu0 %v9566_v31  ;;  %5361 = vmatpush2.bf16.msra.mxu1 %v7388_v34  ;;  %v7402_v34 = vld [vmem:[%s10945_s5 + $0x25c] ss:$12 sps:$4 sm:$0xff]   ;;  %v3007_v19 = vadd.f32 %v2947_v60, %v9509_v1  ;;  %v2898_v10 = vmul.f32 %v2838_v57, %v9558_v49  ;;  %v2851_v50 = vmul.f32 0.044715, %v9593_v36  ;;  %v9618_v39 = vadd.f32 %v9551_v48, %v2323_v52  ;;  %v7409_v60 = vld [vmem:[%s10945_s5 + $0x300] ss:$12 sps:$4 sm:$0xff]  }
 0x277   :  { %v2391_v62 = vpop.f32.mrf.mxu1  ;;  %5406 = vmatpush1.bf16.msra.mxu0 %v7391_v14  ;;  %5362 = vmatprep.subr.bf16.mxu1 %v7396_v53  ;;  %v9601_v26 = vadd.f32 %v2385_v45, %v2325_v41  ;;  %v7405_v14 = vld [vmem:[%s10945_s5 + $0x31c] ss:$12 sps:$4 sm:$0xff]   ;;  %v7715_v53 = vpop.eup %7714  ;;  %7724 = vtanh.f32 %v3112_v11  ;;  %v9627_v44 = vadd.f32 %v9520_v17, %v2319_v47  ;;  %v7406_v11 = vld [vmem:[%s10945_s5 + $0x240] ss:$12 sps:$4 sm:$0xff]   ;;  %v3256_v17 = vmul.f32 %v3196_v8, %v2776_v9 }
 0x278   :  { %v2330_v58 = vpop.f32.mrf.mxu0  ;;  %5407 = vmatprep.subr.bf16.mxu0 %v7399_v0  ;;  %v7717_v18 = vpop.eup %7716  ;;  %v3221_v48 = vadd.f32 1.0, %v7715_v53  ;;  %v3067_v52 = vmul.f32 0.7978846, %v3007_v19  ;;  %v2801_v47 = vmul.f32 0.5, %v9356_v33  ;;  %v3244_v33 = vmul.f32 %v3184_v35, %v9572_v43  ;;  %v7414_v9 = vld [vmem:[%s10945_s5 + $0x46c] ss:$12 sps:$4 sm:$0xff]  }
 0x279   :  { %v2331_v46 = vadd.f32 %v2330_v58, %v9456_v22  ;;  %v2393_v45 = vpop.f32.mrf.mxu1  ;;  %v2863_v41 = vmul.f32 0.044715, %v9601_v26  ;;  %v7403_v22 = vld [vmem:[%s10945_s5 + $0x318] ss:$12 sps:$4 sm:$0xff]   ;;  %v2958_v8 = vmul.f32 %v2898_v10, %v9558_v49  ;;  %v2800_v35 = vmul.f32 0.5, %v9381_v55 }
 0x27a   :  { %v2332_v0 = vpop.f32.mrf.mxu0  ;;  %5363 = vmatpush2.bf16.msra.mxu1 %v7394_v27  ;;  %v7408_v27 = vld [vmem:[%s10945_s5 + $0x244] ss:$12 sps:$4 sm:$0xff]   ;;  %7726 = vtanh.f32 %v3067_v52  ;;  %v7719_v53 = vpop.eup %7718  ;;  %v2329_v45 = vadd.f32 %v2328_v51, %v9517_v24  ;;  %v7421_v24 = vld [vmem:[%s10945_s5 + $0x528] ss:$12 sps:$4 sm:$0xff]   ;;  %v9663_v10 = vpack.c.bf16 %v3256_v17, %v3244_v33 }
 0x27b   :  { %v2394_v6 = vpop.f32.mrf.mxu1  ;;  %5408 = vmatpush1.bf16.msra.mxu0 %v7397_v54  ;;  %5364 = vmatprep.subr.bf16.mxu1 %v7402_v34  ;;  %v3019_v54 = vadd.f32 %v2959_v23, %v9543_v15  ;;  %v2923_v34 = vmul.f32 %v2863_v41, %v9601_v26  ;;  %v9634_v58 = vadd.f32 %v2391_v62, %v2331_v46  ;;  %v3209_v23 = vadd.f32 1.0, %v7717_v18  ;;  %v7423_v18 = vld [vmem:[%s10945_s5 + $0x52c] ss:$12 sps:$4 sm:$0xff]   ;;  %v7412_v55 = vld [vmem:[%s10945_s5 + $0x468] ss:$12 sps:$4 sm:$0xff]  }
 0x27c   :  { %v2333_v57 = vpop.f32.mrf.mxu0  ;;  %5409 = vmatprep.subr.bf16.mxu0 %v7405_v14  ;;  %v7411_v6 = vld [vmem:[%s10945_s5 + $0x304] ss:$12 sps:$4 sm:$0xff]   ;;  %v2886_v14 = vmul.f32 %v2826_v56, %v9576_v21  ;;  %v2911_v62 = vmul.f32 %v2851_v50, %v9593_v36  ;;  %v2862_v46 = vmul.f32 0.044715, %v9618_v39  ;;  %v2850_v56 = vmul.f32 0.044715, %v9627_v44 }
 0x27d   :  { %v3079_v19 = vmul.f32 0.7978846, %v3019_v54  ;;  %v3281_v41 = vmul.f32 %v3221_v48, %v2801_v47  ;;  %v2875_v51 = vmul.f32 0.044715, %v9634_v58  ;;  %v2983_v0 = vmul.f32 %v2923_v34, %v9601_v26  ;;  %v7429_v54 = vld [vmem:[%s10945_s5 + $0x514] ss:$12 sps:$4 sm:$0xff]  }
 0x27e   :  { %5365 = vmatpush2.bf16.msra.mxu1 %v7400_v42  ;;  %v7721_v42 = vpop.eup %7720  ;;  %v2946_v50 = vmul.f32 %v2886_v14, %v9576_v21  ;;  %v2922_v57 = vmul.f32 %v2862_v46, %v9618_v39  ;;  %v2971_v52 = vmul.f32 %v2911_v62, %v9593_v36  ;;  %v2910_v34 = vmul.f32 %v2850_v56, %v9627_v44  ;;  %v7427_v46 = vld [vmem:[%s10945_s5 + $0x510] ss:$12 sps:$4 sm:$0xff]  }
 0x27f   :  { %5410 = vmatpush1.bf16.msra.mxu0 %v7403_v22  ;;  %5366 = vmatprep.subr.bf16.mxu1 %v7408_v27  ;;  %7728 = vtanh.f32 %v3079_v19  ;;  %v7723_v43 = vpop.eup %7722  ;;  %v3269_v22 = vmul.f32 %v3209_v23, %v9590_v25  ;;  %v3220_v27 = vadd.f32 1.0, %v7719_v53  ;;  %v3208_v48 = vadd.f32 1.0, %v7721_v42  ;;  %v7415_v33 = vld [vmem:[%s10945_s5 + $0x450] ss:$12 sps:$4 sm:$0xff]  }
 0x280   :  { %5411 = vmatprep.subr.bf16.mxu0 %v7411_v6  ;;  %v9668_v6 = vadd.f32 %v9578_v5, %v2329_v45  ;;  %v3018_v25 = vadd.f32 %v2958_v8, %v9558_v49  ;;  %v7417_v5 = vld [vmem:[%s10945_s5 + $0x454] ss:$12 sps:$4 sm:$0xff]   ;;  %v3233_v17 = vadd.f32 1.0, %v7723_v43  ;;  %v3043_v47 = vadd.f32 %v2983_v0, %v9601_v26 }
 0x281   :  { %v2935_v14 = vmul.f32 %v2875_v51, %v9634_v58  ;;  %v2788_v19 = vmul.f32 0.5, %v9377_v29  ;;  %v3280_v53 = vmul.f32 %v3220_v27, %v2800_v35  ;;  %v2813_v62 = vmul.f32 0.5, %v9391_v7  ;;  %v7435_v29 = vld [vmem:[%s10945_s5 + $0x4fc] ss:$12 sps:$4 sm:$0xff]   ;;  %v7418_v27 = vld [vmem:[%s10945_s5 + $0x438] ss:$12 sps:$4 sm:$0xff]  }
 0x282   :  { %5367 = vmatpush2.bf16.msra.mxu1 %v7406_v11  ;;  %v9679_v11 = vpack.c.bf16 %v3281_v41, %v3269_v22  ;;  %v2874_v45 = vmul.f32 0.044715, %v9668_v6  ;;  %v2982_v7 = vmul.f32 %v2922_v57, %v9618_v39  ;;  %v3078_v42 = vmul.f32 0.7978846, %v3018_v25  ;;  %v7433_v57 = vld [vmem:[%s10945_s5 + $0x4f8] ss:$12 sps:$4 sm:$0xff]  }
 0x283   :  { %5412 = vmatpush1.bf16.msra.mxu0 %v7409_v60  ;;  %5458 = vmatprep.subr.bf16.mxu1 %v7423_v18  ;;  %v3006_v60 = vadd.f32 %v2946_v50, %v9576_v21  ;;  %v3268_v56 = vmul.f32 %v3208_v48, %v2788_v19  ;;  %v3293_v41 = vmul.f32 %v3233_v17, %v2813_v62  ;;  %v3103_v51 = vmul.f32 0.7978846, %v3043_v47 }
 0x284   :  { %5413 = vmatprep.subr.bf16.mxu0 %v7414_v9  ;;  %v3031_v9 = vadd.f32 %v2971_v52, %v9593_v36  ;;  %v7725_v18 = vpop.eup %7724  ;;  %v2970_v43 = vmul.f32 %v2910_v34, %v9627_v44  ;;  %v2995_v35 = vmul.f32 %v2935_v14, %v9634_v58  ;;  %v3042_v25 = vadd.f32 %v2982_v7, %v9618_v39  ;;  %v7426_v14 = vld [vmem:[%s10945_s5 + $0x424] ss:$12 sps:$4 sm:$0xff]  }
 0x285   :  { %5369 = vmatmul.mubr.bf16.vlgmr.msra.gmra.mxu1 %v9663_v10  ;;  %v3066_v0 = vmul.f32 0.7978846, %v3006_v60  ;;  %v9714_v22 = vpack.c.bf16 %v3280_v53, %v3268_v56  ;;  %v3232_v48 = vadd.f32 1.0, %v7725_v18  ;;  %v2934_v34 = vmul.f32 %v2874_v45, %v9668_v6  ;;  %v7447_v18 = vld [vmem:[%s10945_s5 + $0x4cc] ss:$12 sps:$4 sm:$0xff]  }
 0x286   :  { %v9688_v23 = vpop.f32.mrf.mxu0  ;;  %5378 = vmatprep.mubr.bf16.mxu1 %v9679_v11  ;;  %5459 = vmatpush1.bf16.msra.mxu1 %v7421_v24  ;;  %v7420_v24 = vld [vmem:[%s10945_s5 + $0x43c] ss:$12 sps:$4 sm:$0xff]   ;;  %v3091_v52 = vmul.f32 0.7978846, %v3031_v9  ;;  %7730 = vtanh.f32 %v3078_v42  ;;  %v9729_v17 = vpack.c.bf16 %v3293_v41, %v3293_v41  ;;  %v3030_v60 = vadd.f32 %v2970_v43, %v9627_v44  ;;  %v7439_v9 = vld [vmem:[%s10945_s5 + $0x4e0] ss:$12 sps:$4 sm:$0xff]  }
 0x287   :  { %5414 = vmatpush2.bf16.msra.mxu0 %v7412_v55  ;;  %5460 = vmatprep.subr.bf16.mxu1 %v7429_v54  ;;  %v7727_v55 = vpop.eup %7726  ;;  %v7441_v54 = vld [vmem:[%s10945_s5 + $0x4e4] ss:$12 sps:$4 sm:$0xff]   ;;  %v2812_v53 = vmul.f32 0.5, %v9429_v28  ;;  %7732 = vtanh.f32 %v3103_v51  ;;  %v3055_v62 = vadd.f32 %v2995_v35, %v9634_v58  ;;  %v2767_v45 = vmul.f32 0.5, %v9509_v1  ;;  %v7424_v28 = vld [vmem:[%s10945_s5 + $0x420] ss:$12 sps:$4 sm:$0xff]  }
 0x288   :  { %v9705_v8 = vpop.f32.mrf.mxu0  ;;  %5415 = vmatprep.subr.bf16.mxu0 %v7417_v5  ;;  %v3187_v47 = vadd.f32 1.0, %v7727_v55  ;;  %7734 = vtanh.f32 %v3066_v0  ;;  %v3102_v1 = vmul.f32 0.7978846, %v3042_v25  ;;  %v3090_v43 = vmul.f32 0.7978846, %v3030_v60 }
 0x289   :  { %v3292_v7 = vmul.f32 %v3232_v48, %v2812_v53  ;;  %7736 = vtanh.f32 %v3091_v52  ;;  %v3115_v51 = vmul.f32 0.7978846, %v3055_v62  ;;  %v7430_v55 = vld [vmem:[%s10945_s5 + $0x408] ss:$12 sps:$4 sm:$0xff]  }
 0x28a   :  { %v9712_v50 = vpop.f32.mrf.mxu0  ;;  %5461 = vmatpush1.bf16.msra.mxu1 %v7427_v46  ;;  %v3247_v42 = vmul.f32 %v3187_v47, %v2767_v45  ;;  %v7453_v48 = vld [vmem:[%s10945_s5 + $0x4b4] ss:$12 sps:$4 sm:$0xff]   ;;  %7738 = vtanh.f32 %v3102_v1  ;;  %v7451_v47 = vld [vmem:[%s10945_s5 + $0x4b0] ss:$12 sps:$4 sm:$0xff]  }
 0x28b   :  { %5416 = vmatpush2.bf16.msra.mxu0 %v7415_v33  ;;  %5462 = vmatprep.subr.bf16.mxu1 %v7435_v29  ;;  %v2779_v33 = vmul.f32 0.5, %v9543_v15  ;;  %v2994_v15 = vmul.f32 %v2934_v34, %v9668_v6  ;;  %v7438_v25 = vld [vmem:[%s10945_s5 + $0x3f4] ss:$12 sps:$4 sm:$0xff]   ;;  %7740 = vtanh.f32 %v3090_v43  ;;  %v7456_v60 = vld [vmem:[%s10945_s5 + $0x49c] ss:$12 sps:$4 sm:$0xff]   ;;  %v2778_v43 = vmul.f32 0.5, %v9558_v49 }
 0x28c   :  { %v9727_v5 = vpop.f32.mrf.mxu0  ;;  %5417 = vmatprep.subr.bf16.mxu0 %v7420_v24  ;;  %v7729_v19 = vpop.eup %7728  ;;  %v7432_v24 = vld [vmem:[%s10945_s5 + $0x40c] ss:$12 sps:$4 sm:$0xff]   ;;  %7742 = vtanh.f32 %v3115_v51  ;;  %v7444_v62 = vld [vmem:[%s10945_s5 + $0x3dc] ss:$12 sps:$4 sm:$0xff]   ;;  %v556_v51 = vsub.s32 6, %v8149_v30 }
 0x28d   :  { %5379 = vmatmul.mubr.bf16.gmra.mxu1 %v9714_v22  ;;  %v3199_v29 = vadd.f32 1.0, %v7729_v19  ;;  %v7462_v49 = vld [vmem:[%s10945_s5 + $0x5ec] ss:$12 sps:$4 sm:$0xff]  }
 0x28e   :  { %v9738_v46 = vpop.f32.mrf.mxu0  ;;  %5388 = vmatprep.mubr.bf16.mxu1 %v9729_v17  ;;  %5463 = vmatpush1.bf16.msra.mxu1 %v7433_v57  ;;  %v9765_v57 = vpack.c.bf16 %v3292_v7, %v3292_v7  ;;  %v7442_v7 = vld [vmem:[%s10945_s5 + $0x3d8] ss:$12 sps:$4 sm:$0xff]  }
 0x28f   :  { %5418 = vmatpush2.bf16.msra.mxu0 %v7418_v27  ;;  %5464 = vmatprep.subr.bf16.mxu1 %v7441_v54  ;;  %v3259_v56 = vmul.f32 %v3199_v29, %v2779_v33  ;;  %v7445_v27 = vld [vmem:[%s10945_s5 + $0x4c8] ss:$12 sps:$4 sm:$0xff]   ;;  %v3054_v54 = vadd.f32 %v2994_v15, %v9668_v6 }
 0x290   :  { %v9753_v41 = vpop.f32.mrf.mxu0  ;;  %5419 = vmatprep.subr.bf16.mxu0 %v7426_v14  ;;  %v7436_v14 = vld [vmem:[%s10945_s5 + $0x3f0] ss:$12 sps:$4 sm:$0xff]  }
 0x291   :  { %v9758_v35 = vpack.c.bf16 %v3259_v56, %v3247_v42  ;;  %v3114_v19 = vmul.f32 0.7978846, %v3054_v54  ;;  %v7450_v42 = vld [vmem:[%s10945_s5 + $0x3c4] ss:$12 sps:$4 sm:$0xff]   ;;  %v2803_v54 = vmul.f32 0.5, %v9601_v26  ;;  %v2791_v26 = vmul.f32 0.5, %v9593_v36 }
 0x292   :  { %v9760_v0 = vpop.f32.mrf.mxu0  ;;  %5465 = vmatpush1.bf16.msra.mxu1 %v7439_v9  ;;  %v7454_v9 = vld [vmem:[%s10945_s5 + $0x498] ss:$12 sps:$4 sm:$0xff]  }
 0x293   :  { %5420 = vmatpush2.bf16.msra.mxu0 %v7424_v28  ;;  %5466 = vmatprep.subr.bf16.mxu1 %v7447_v18  ;;  %v7731_v45 = vpop.eup %7730  ;;  %v7459_v18 = vld [vmem:[%s10945_s5 + $0x484] ss:$12 sps:$4 sm:$0xff]   ;;  %7744 = vtanh.f32 %v3114_v19  ;;  %v560_v19 = vsub.s32 7, %v8149_v30 }
 0x294   :  { %5429 = vmatprep.mubr.bf16.mxu0 %v9758_v35  ;;  %v9775_v52 = vpop.f32.mrf.mxu0  ;;  %5421 = vmatprep.subr.bf16.mxu0 %v7432_v24  ;;  %v7733_v33 = vpop.eup %7732  ;;  %v3198_v56 = vadd.f32 1.0, %v7731_v45 }
 0x295   :  { %5389 = vmatmul.mubr.bf16.gmra.mxu1 %v9765_v57  ;;  %v7735_v28 = vpop.eup %7734  ;;  %v3223_v24 = vadd.f32 1.0, %v7733_v33 }
 0x296   :  { %v9781_v34 = vpop.f32.mrf.mxu0  ;;  %5467 = vmatpush1.bf16.msra.mxu1 %v7445_v27  ;;  %v7737_v1 = vpop.eup %7736  ;;  %v3186_v27 = vadd.f32 1.0, %v7735_v28 }
 0x297   :  { %5422 = vmatpush2.bf16.msra.mxu0 %v7430_v55  ;;  %5468 = vmatprep.subr.bf16.mxu1 %v7453_v48  ;;  %v7457_v55 = vld [vmem:[%s10945_s5 + $0x480] ss:$12 sps:$4 sm:$0xff]   ;;  %v3283_v33 = vmul.f32 %v3223_v24, %v2803_v54 }
 0x298   :  { %v9792_v53 = vpop.f32.mrf.mxu0  ;;  %5423 = vmatprep.subr.bf16.mxu0 %v7438_v25  ;;  %v7448_v48 = vld [vmem:[%s10945_s5 + $0x3c0] ss:$12 sps:$4 sm:$0xff]   ;;  %v3211_v25 = vadd.f32 1.0, %v7737_v1  ;;  %v7463_v1 = vld [vmem:[%s10945_s5 + $0x6a8] ss:$12 sps:$4 sm:$0xff]  }
 0x29a   :  { %v2515_v29 = vpop.f32.mrf.mxu0  ;;  %5469 = vmatpush1.bf16.msra.mxu1 %v7451_v47  ;;  %v7739_v47 = vpop.eup %7738 }
 0x29b   :  { %5424 = vmatpush2.bf16.msra.mxu0 %v7436_v14  ;;  %5470 = vmatprep.subr.bf16.mxu1 %v7456_v60  ;;  %v2766_v14 = vmul.f32 0.5, %v9576_v21  ;;  %v3258_v60 = vmul.f32 %v3198_v56, %v2778_v43  ;;  %v7741_v45 = vpop.eup %7740  ;;  %v7460_v21 = vld [vmem:[%s10945_s5 + $0x5e8] ss:$12 sps:$4 sm:$0xff]  }
 0x29c   :  { %v2516_v15 = vpop.f32.mrf.mxu0  ;;  %5425 = vmatprep.subr.bf16.mxu0 %v7444_v62  ;;  %v7465_v62 = vld [vmem:[%s10945_s5 + $0x6ac] ss:$12 sps:$4 sm:$0xff]   ;;  %v7743_v29 = vpop.eup %7742  ;;  %v7471_v56 = vld [vmem:[%s10945_s5 + $0x694] ss:$12 sps:$4 sm:$0xff]  }
 0x29d   :  { %v3246_v28 = vmul.f32 %v3186_v27, %v2766_v14  ;;  %v9839_v15 = vrot.slane %v9451_v61, %v560_v19  ;;  %v3210_v27 = vadd.f32 1.0, %v7741_v45  ;;  %v7474_v14 = vld [vmem:[%s10945_s5 + $0x5bc] ss:$12 sps:$4 sm:$0xff]  }
 0x29e   :  { %5471 = vmatpush1.bf16.msra.mxu1 %v7454_v9  ;;  %v9828_v9 = vrot.slane %v9451_v61, %v556_v51  ;;  %v2802_v51 = vmul.f32 0.5, %v9618_v39  ;;  %v7466_v61 = vld [vmem:[%s10945_s5 + $0x5d0] ss:$12 sps:$4 sm:$0xff]  }
 0x29f   :  { %5426 = vmatpush2.bf16.msra.mxu0 %v7442_v7  ;;  %5472 = vmatprep.subr.bf16.mxu1 %v7459_v18  ;;  %v3271_v7 = vmul.f32 %v3211_v25, %v2791_v26  ;;  %v3222_v18 = vadd.f32 1.0, %v7739_v47  ;;  %v9836_v36 = vpack.c.bf16 %v3258_v60, %v3246_v28  ;;  %v2790_v25 = vmul.f32 0.5, %v9627_v44  ;;  %v7469_v39 = vld [vmem:[%s10945_s5 + $0x690] ss:$12 sps:$4 sm:$0xff]  }
 0x2a0   :  { %5427 = vmatprep.subr.bf16.mxu0 %v7450_v42  ;;  %v7468_v42 = vld [vmem:[%s10945_s5 + $0x5d4] ss:$12 sps:$4 sm:$0xff]   ;;  %v2815_v47 = vmul.f32 0.5, %v9634_v58  ;;  %v7745_v60 = vpop.eup %7744  ;;  %v7477_v44 = vld [vmem:[%s10945_s5 + $0x67c] ss:$12 sps:$4 sm:$0xff]  }
 0x2a1   :  { %v9847_v43 = vpack.c.bf16 %v3283_v33, %v3271_v7  ;;  %v3270_v45 = vmul.f32 %v3210_v27, %v2790_v25  ;;  %v7483_v27 = vld [vmem:[%s10945_s5 + $0x664] ss:$12 sps:$4 sm:$0xff]  }
 0x2a2   :  { %5473 = vmatpush1.bf16.msra.mxu1 %v7457_v55  ;;  %v3235_v55 = vadd.f32 1.0, %v7743_v29 }
 0x2a3   :  { %5428 = vmatpush2.bf16.msra.mxu0 %v7448_v48  ;;  %5474 = vmatprep.subr.bf16.mxu1 %v7462_v49  ;;  %v3282_v49 = vmul.f32 %v3222_v18, %v2802_v51  ;;  %v3234_v18 = vadd.f32 1.0, %v7745_v60  ;;  %v7480_v51 = vld [vmem:[%s10945_s5 + $0x5a4] ss:$12 sps:$4 sm:$0xff]   ;;  %v7481_v60 = vld [vmem:[%s10945_s5 + $0x660] ss:$12 sps:$4 sm:$0xff]  }
 0x2a4   :  { %5519 = vmatprep.subr.bf16.mxu0 %v7465_v62  ;;  %v3295_v26 = vmul.f32 %v3235_v55, %v2815_v47 }
 0x2a5   :  { %v2430_v24 = vpop.f32.mrf.mxu1  ;;  %v9879_v7 = vpack.c.bf16 %v3282_v49, %v3270_v45  ;;  %v7478_v49 = vld [vmem:[%s10945_s5 + $0x5a0] ss:$12 sps:$4 sm:$0xff]  }
 0x2a6   :  { %v2431_v48 = vadd.f32 %v2430_v24, %v9828_v9  ;;  %5430 = vmatmul.mubr.bf16.vlgmr.msra.gmra.mxu0 %v9836_v36  ;;  %5475 = vmatpush2.bf16.msra.mxu1 %v7460_v21  ;;  %v7489_v45 = vld [vmem:[%s10945_s5 + $0x64c] ss:$12 sps:$4 sm:$0xff]  }
 0x2a7   :  { %v2432_v54 = vpop.f32.mrf.mxu1  ;;  %5439 = vmatprep.mubr.bf16.mxu0 %v9847_v43  ;;  %5520 = vmatpush1.bf16.msra.mxu0 %v7463_v1  ;;  %v7475_v1 = vld [vmem:[%s10945_s5 + $0x678] ss:$12 sps:$4 sm:$0xff]  }
 0x2a8   :  { %v9865_v19 = vadd.f32 %v9688_v23, %v2431_v48  ;;  %v2433_v62 = vadd.f32 %v2432_v54, %v9839_v15  ;;  %5476 = vmatprep.subr.bf16.mxu1 %v7468_v42  ;;  %5521 = vmatprep.subr.bf16.mxu0 %v7471_v56  ;;  %v7472_v23 = vld [vmem:[%s10945_s5 + $0x5b8] ss:$12 sps:$4 sm:$0xff]   ;;  %v9896_v48 = vpack.c.bf16 %v3295_v26, %v3295_v26 }
 0x2a9   :  { %v2434_v58 = vpop.f32.mrf.mxu1 }
 0x2aa   :  { %v2828_v33 = vmul.f32 0.044715, %v9865_v19  ;;  %v9873_v29 = vadd.f32 %v9705_v8, %v2433_v62  ;;  %v2435_v28 = vadd.f32 %v2434_v58, %v9828_v9  ;;  %5477 = vmatpush2.bf16.msra.mxu1 %v7466_v61  ;;  %v2814_v61 = vmul.f32 0.5, %v9668_v6  ;;  %v7486_v62 = vld [vmem:[%s10945_s5 + $0x58c] ss:$12 sps:$4 sm:$0xff]  }
 0x2ab   :  { %v2436_v21 = vpop.f32.mrf.mxu1  ;;  %5522 = vmatpush1.bf16.msra.mxu0 %v7469_v39  ;;  %5478 = vmatprep.subr.bf16.mxu1 %v7474_v14 }
 0x2ac   :  { %v2888_v8 = vmul.f32 %v2828_v33, %v9865_v19  ;;  %v2829_v42 = vmul.f32 0.044715, %v9873_v29  ;;  %v9887_v56 = vadd.f32 %v9712_v50, %v2435_v28  ;;  %v2437_v24 = vadd.f32 %v2436_v21, %v9839_v15  ;;  %5523 = vmatprep.subr.bf16.mxu0 %v7477_v44 }
 0x2ad   :  { %v2440_v55 = vpop.f32.mrf.mxu1  ;;  %v3294_v6 = vmul.f32 %v3234_v18, %v2814_v61 }
 0x2ae   :  { %v2948_v54 = vmul.f32 %v2888_v8, %v9865_v19  ;;  %v2889_v50 = vmul.f32 %v2829_v42, %v9873_v29  ;;  %v2840_v25 = vmul.f32 0.044715, %v9887_v56  ;;  %5440 = vmatmul.mubr.bf16.gmra.mxu0 %v9879_v7  ;;  %5479 = vmatpush2.bf16.msra.mxu1 %v7472_v23  ;;  %v9907_v47 = vadd.f32 %v9727_v5, %v2437_v24  ;;  %v7484_v42 = vld [vmem:[%s10945_s5 + $0x588] ss:$12 sps:$4 sm:$0xff]  }
 0x2af   :  { %v2441_v39 = vadd.f32 %v2440_v55, %v9828_v9  ;;  %v2442_v14 = vpop.f32.mrf.mxu1  ;;  %5449 = vmatprep.mubr.bf16.mxu0 %v9896_v48  ;;  %5524 = vmatpush1.bf16.msra.mxu0 %v7475_v1  ;;  %v7492_v55 = vld [vmem:[%s10945_s5 + $0x574] ss:$12 sps:$4 sm:$0xff]  }
 0x2b0   :  { %v3008_v44 = vadd.f32 %v2948_v54, %v9865_v19  ;;  %v2900_v5 = vmul.f32 %v2840_v25, %v9887_v56  ;;  %v2443_v58 = vadd.f32 %v2442_v14, %v9839_v15  ;;  %5480 = vmatprep.subr.bf16.mxu1 %v7480_v51  ;;  %5525 = vmatprep.subr.bf16.mxu0 %v7483_v27  ;;  %v2841_v26 = vmul.f32 0.044715, %v9907_v47 }
 0x2b1   :  { %v9925_v33 = vadd.f32 %v9738_v46, %v2441_v39  ;;  %v2444_v28 = vpop.f32.mrf.mxu1  ;;  %v2949_v23 = vmul.f32 %v2889_v50, %v9873_v29  ;;  %v9938_v27 = vpack.c.bf16 %v3294_v6, %v3294_v6 }
 0x2b2   :  { %v3068_v21 = vmul.f32 0.7978846, %v3008_v44  ;;  %v2960_v18 = vmul.f32 %v2900_v5, %v9887_v56  ;;  %v9930_v1 = vadd.f32 %v9753_v41, %v2443_v58  ;;  %v2445_v8 = vadd.f32 %v2444_v28, %v9828_v9  ;;  %5481 = vmatpush2.bf16.msra.mxu1 %v7478_v49  ;;  %v7487_v41 = vld [vmem:[%s10945_s5 + $0x648] ss:$12 sps:$4 sm:$0xff]  }
 0x2b3   :  { %v2901_v24 = vmul.f32 %v2841_v26, %v9907_v47  ;;  %v2852_v46 = vmul.f32 0.044715, %v9925_v33  ;;  %v2446_v51 = vpop.f32.mrf.mxu1  ;;  %5526 = vmatpush1.bf16.msra.mxu0 %v7481_v60  ;;  %5482 = vmatprep.subr.bf16.mxu1 %v7486_v62  ;;  %v3009_v61 = vadd.f32 %v2949_v23, %v9873_v29  ;;  %v7495_v49 = vld [vmem:[%s10945_s5 + $0x634] ss:$12 sps:$4 sm:$0xff]   ;;  %v7493_v23 = vld [vmem:[%s10945_s5 + $0x630] ss:$12 sps:$4 sm:$0xff]  }
 0x2b4   :  { %7746 = vtanh.f32 %v3068_v21  ;;  %v3020_v54 = vadd.f32 %v2960_v18, %v9887_v56  ;;  %v2853_v50 = vmul.f32 0.044715, %v9930_v1  ;;  %v9950_v25 = vadd.f32 %v9760_v0, %v2445_v8  ;;  %5527 = vmatprep.subr.bf16.mxu0 %v7489_v45  ;;  %v7490_v45 = vld [vmem:[%s10945_s5 + $0x570] ss:$12 sps:$4 sm:$0xff]  }
 0x2b5   :  { %v2912_v39 = vmul.f32 %v2852_v46, %v9925_v33  ;;  %v2447_v14 = vadd.f32 %v2446_v51, %v9839_v15  ;;  %v2450_v6 = vpop.f32.mrf.mxu1  ;;  %v2961_v60 = vmul.f32 %v2901_v24, %v9907_v47  ;;  %v3069_v62 = vmul.f32 0.7978846, %v3009_v61 }
 0x2b6   :  { %v3080_v44 = vmul.f32 0.7978846, %v3020_v54  ;;  %v2913_v5 = vmul.f32 %v2853_v50, %v9930_v1  ;;  %v2864_v58 = vmul.f32 0.044715, %v9950_v25  ;;  %v2451_v0 = vadd.f32 %v2450_v6, %v9828_v9  ;;  %5450 = vmatmul.mubr.bf16.gmra.mxu0 %v9938_v27  ;;  %5483 = vmatpush2.bf16.msra.mxu1 %v7484_v42  ;;  %v7498_v9 = vld [vmem:[%s10945_s5 + $0x55c] ss:$12 sps:$4 sm:$0xff]  }
 0x2b7   :  { %v9966_v26 = vadd.f32 %v9775_v52, %v2447_v14  ;;  %v2452_v28 = vpop.f32.mrf.mxu1  ;;  %5528 = vmatpush1.bf16.msra.mxu0 %v7487_v41  ;;  %5484 = vmatprep.subr.bf16.mxu1 %v7492_v55  ;;  %v3021_v21 = vadd.f32 %v2961_v60, %v9907_v47  ;;  %7748 = vtanh.f32 %v3069_v62  ;;  %v7501_v42 = vld [vmem:[%s10945_s5 + $0x61c] ss:$12 sps:$4 sm:$0xff]   ;;  %v7507_v60 = vld [vmem:[%s10945_s5 + $0x604] ss:$12 sps:$4 sm:$0xff]  }
 0x2b8   :  { %7750 = vtanh.f32 %v3080_v44  ;;  %v2924_v18 = vmul.f32 %v2864_v58, %v9950_v25  ;;  %v9977_v52 = vadd.f32 %v9781_v34, %v2451_v0  ;;  %v2453_v8 = vadd.f32 %v2452_v28, %v9839_v15  ;;  %5529 = vmatprep.subr.bf16.mxu0 %v7495_v49  ;;  %v7496_v34 = vld [vmem:[%s10945_s5 + $0x558] ss:$12 sps:$4 sm:$0xff]  }
 0x2b9   :  { %v2865_v24 = vmul.f32 0.044715, %v9966_v26  ;;  %v2454_v46 = vpop.f32.mrf.mxu1  ;;  %v3081_v51 = vmul.f32 0.7978846, %v3021_v21  ;;  %v2973_v41 = vmul.f32 %v2913_v5, %v9930_v1  ;;  %v2972_v15 = vmul.f32 %v2912_v39, %v9925_v33  ;;  %v7499_v49 = vld [vmem:[%s10945_s5 + $0x618] ss:$12 sps:$4 sm:$0xff]  }
 0x2ba   :  { %v2876_v55 = vmul.f32 0.044715, %v9977_v52  ;;  %v9987_v61 = vadd.f32 %v9792_v53, %v2453_v8  ;;  %5485 = vmatpush2.bf16.msra.mxu1 %v7490_v45  ;;  %v7504_v53 = vld [vmem:[%s10945_s5 + $0x544] ss:$12 sps:$4 sm:$0xff]   ;;  %v2984_v6 = vmul.f32 %v2924_v18, %v9950_v25  ;;  %v7502_v45 = vld [vmem:[%s10945_s5 + $0x540] ss:$12 sps:$4 sm:$0xff]  }
 0x2bb   :  { %v2925_v54 = vmul.f32 %v2865_v24, %v9966_v26  ;;  %v2455_v50 = vpop.f32.mrf.mxu1  ;;  %5530 = vmatpush1.bf16.msra.mxu0 %v7493_v23  ;;  %5486 = vmatprep.subr.bf16.mxu1 %v7498_v9  ;;  %7752 = vtanh.f32 %v3081_v51  ;;  %v3033_v14 = vadd.f32 %v2973_v41, %v9930_v1  ;;  %v3032_v62 = vadd.f32 %v2972_v15, %v9925_v33  ;;  %v7505_v9 = vld [vmem:[%s10945_s5 + $0x600] ss:$12 sps:$4 sm:$0xff]   ;;  %v10025_v24 = vld [vmem:[%s10946_s4 + $0x8] sm:$0xf] }
 0x2bc   :  { %v2877_v39 = vmul.f32 0.044715, %v9987_v61  ;;  %5531 = vmatprep.subr.bf16.mxu0 %v7501_v42  ;;  %v3044_v58 = vadd.f32 %v2984_v6, %v9950_v25  ;;  %v2936_v0 = vmul.f32 %v2876_v55, %v9977_v52  ;;  %v7534_v42 = vld [vmem:[%s10945_s5 + $0x82c] ss:$12 sps:$4 sm:$0xff]   ;;  %v7508_v50 = vld [vmem:[%s10945_s5 + $0x768] ss:$12 sps:$4 sm:$0xff]  }
 0x2bd   :  { %v2985_v44 = vmul.f32 %v2925_v54, %v9966_v26  ;;  %v3093_v5 = vmul.f32 0.7978846, %v3033_v14  ;;  %v3092_v28 = vmul.f32 0.7978846, %v3032_v62  ;;  %v7510_v46 = vld [vmem:[%s10945_s5 + $0x76c] ss:$12 sps:$4 sm:$0xff]   ;;  %v10035_v54 = vrot.slane %v10025_v24, %v8161_v40 }
 0x2be   :  { %5487 = vmatpush2.bf16.msra.mxu1 %v7496_v34  ;;  %v2937_v23 = vmul.f32 %v2877_v39, %v9987_v61  ;;  %v3104_v18 = vmul.f32 0.7978846, %v3044_v58  ;;  %v2996_v8 = vmul.f32 %v2936_v0, %v9977_v52  ;;  %v10045_v62 = vrot.slane %v10025_v24, %v8152_v37 }
 0x2bf   :  { %5532 = vmatpush1.bf16.msra.mxu0 %v7499_v49  ;;  %5488 = vmatprep.subr.bf16.mxu1 %v7504_v53  ;;  %v3045_v21 = vadd.f32 %v2985_v44, %v9966_v26  ;;  %7754 = vtanh.f32 %v3093_v5  ;;  %v7513_v53 = vld [vmem:[%s10945_s5 + $0x754] ss:$12 sps:$4 sm:$0xff]  }
 0x2c0   :  { %5533 = vmatprep.subr.bf16.mxu0 %v7507_v60  ;;  %7756 = vtanh.f32 %v3092_v28  ;;  %v2997_v51 = vmul.f32 %v2937_v23, %v9987_v61  ;;  %v3056_v34 = vadd.f32 %v2996_v8, %v9977_v52  ;;  %v2780_v23 = vmul.f32 0.5, %v9887_v56  ;;  %v7516_v8 = vld [vmem:[%s10945_s5 + $0x73c] ss:$12 sps:$4 sm:$0xff]  }
 0x2c1   :  { %v7747_v41 = vpop.eup %7746  ;;  %v3105_v55 = vmul.f32 0.7978846, %v3045_v21  ;;  %7758 = vtanh.f32 %v3104_v18  ;;  %v2769_v56 = vmul.f32 0.5, %v9873_v29 }
 0x2c2   :  { %5489 = vmatpush2.bf16.msra.mxu1 %v7502_v45  ;;  %v3057_v15 = vadd.f32 %v2997_v51, %v9987_v61  ;;  %v3116_v6 = vmul.f32 0.7978846, %v3056_v34  ;;  %v7511_v45 = vld [vmem:[%s10945_s5 + $0x750] ss:$12 sps:$4 sm:$0xff]   ;;  %v3188_v18 = vadd.f32 1.0, %v7747_v41  ;;  %v2768_v34 = vmul.f32 0.5, %v9865_v19 }
 0x2c3   :  { %5534 = vmatpush1.bf16.msra.mxu0 %v7505_v9  ;;  %7760 = vtanh.f32 %v3105_v55  ;;  %5580 = vmatprep.subr.bf16.mxu1 %v7534_v42 }
 0x2c4   :  { %v7749_v49 = vpop.eup %7748  ;;  %5535 = vmatprep.subr.bf16.mxu0 %v7510_v46  ;;  %v3117_v14 = vmul.f32 0.7978846, %v3057_v15  ;;  %v3248_v29 = vmul.f32 %v3188_v18, %v2768_v34  ;;  %v2805_v34 = vmul.f32 0.5, %v9966_v26 }
 0x2c5   :  { %v7751_v39 = vpop.eup %7750  ;;  %v2613_v60 = vpop.f32.mrf.mxu1  ;;  %v3189_v21 = vadd.f32 1.0, %v7749_v49 }
 0x2c6   :  { %v2552_v44 = vpop.f32.mrf.mxu0  ;;  %v3200_v5 = vadd.f32 1.0, %v7751_v39  ;;  %7762 = vtanh.f32 %v3117_v14  ;;  %v7514_v39 = vld [vmem:[%s10945_s5 + $0x738] ss:$12 sps:$4 sm:$0xff]  }
 0x2c7   :  { %v2553_v58 = vadd.f32 %v2552_v44, %v10035_v54  ;;  %v2615_v0 = vpop.f32.mrf.mxu1  ;;  %5536 = vmatpush2.bf16.msra.mxu0 %v7508_v50  ;;  %7764 = vtanh.f32 %v3116_v6  ;;  %v2781_v50 = vmul.f32 0.5, %v9907_v47  ;;  %v3249_v44 = vmul.f32 %v3189_v21, %v2769_v56  ;;  %v7517_v21 = vld [vmem:[%s10945_s5 + $0x720] ss:$12 sps:$4 sm:$0xff]  }
 0x2c8   :  { %v7753_v28 = vpop.eup %7752  ;;  %v2554_v9 = vpop.f32.mrf.mxu0  ;;  %5537 = vmatprep.subr.bf16.mxu0 %v7513_v53  ;;  %v3260_v41 = vmul.f32 %v3200_v5, %v2780_v23  ;;  %v2792_v47 = vmul.f32 0.5, %v9925_v33  ;;  %v7519_v5 = vld [vmem:[%s10945_s5 + $0x724] ss:$12 sps:$4 sm:$0xff]  }
 0x2c9   :  { %v10055_v42 = vadd.f32 %v2613_v60, %v2553_v58  ;;  %v2555_v46 = vadd.f32 %v2554_v9, %v10045_v62  ;;  %v2617_v51 = vpop.f32.mrf.mxu1  ;;  %v3201_v55 = vadd.f32 1.0, %v7753_v28 }
 0x2ca   :  { %v2556_v15 = vpop.f32.mrf.mxu0 }
 0x2cb   :  { %v2830_v49 = vmul.f32 0.044715, %v10055_v42  ;;  %v10062_v53 = vadd.f32 %v2615_v0, %v2555_v46  ;;  %v2557_v14 = vadd.f32 %v2556_v15, %v10035_v54  ;;  %v2619_v6 = vpop.f32.mrf.mxu1  ;;  %5538 = vmatpush2.bf16.msra.mxu0 %v7511_v45  ;;  %v3261_v58 = vmul.f32 %v3201_v55, %v2781_v50  ;;  %v7532_v15 = vld [vmem:[%s10945_s5 + $0x828] ss:$12 sps:$4 sm:$0xff]  }
 0x2cc   :  { %v7755_v60 = vpop.eup %7754  ;;  %v2558_v19 = vpop.f32.mrf.mxu0  ;;  %5539 = vmatprep.subr.bf16.mxu0 %v7516_v8  ;;  %v2793_v46 = vmul.f32 0.5, %v9930_v1  ;;  %v10082_v55 = vpack.c.bf16 %v3260_v41, %v3248_v29  ;;  %v7539_v1 = vld [vmem:[%s10945_s5 + $0x814] ss:$12 sps:$4 sm:$0xff]  }
 0x2cd   :  { %v7757_v0 = vpop.eup %7756  ;;  %v2890_v28 = vmul.f32 %v2830_v49, %v10055_v42  ;;  %v10073_v45 = vadd.f32 %v2617_v51, %v2557_v14  ;;  %v2559_v23 = vadd.f32 %v2558_v19, %v10045_v62  ;;  %v2623_v9 = vpop.f32.mrf.mxu1  ;;  %v10080_v8 = vpack.c.bf16 %v3261_v58, %v3249_v44 }
 0x2ce   :  { %v7759_v33 = vpop.eup %7758  ;;  %v2562_v18 = vpop.f32.mrf.mxu0  ;;  %10986 = vst [vmem:[#allocation18_spill] sm:$0xff] %v10082_v55  ;;  %v2804_v51 = vmul.f32 0.5, %v9950_v25  ;;  %v2831_v50 = vmul.f32 0.044715, %v10062_v53  ;;  %v3213_v14 = vadd.f32 1.0, %v7755_v60  ;;  %v3212_v58 = vadd.f32 1.0, %v7757_v0 }
 0x2cf   :  { %10985 = vst [vmem:[#allocation17_spill] sm:$0xff] %v10080_v8  ;;  %v2950_v56 = vmul.f32 %v2890_v28, %v10055_v42  ;;  %v2842_v49 = vmul.f32 0.044715, %v10073_v45  ;;  %v2625_v41 = vpop.f32.mrf.mxu1  ;;  %5540 = vmatpush2.bf16.msra.mxu0 %v7514_v39  ;;  %v10095_v19 = vadd.f32 %v2619_v6, %v2559_v23  ;;  %v2563_v25 = vadd.f32 %v2562_v18, %v10035_v54  ;;  %v7522_v28 = vld [vmem:[%s10945_s5 + $0x70c] ss:$12 sps:$4 sm:$0xff]  }
 0x2d0   :  { %v7761_v26 = vpop.eup %7760  ;;  %5490 = vmatprep.mubr.bf16.mxu1 %v10080_v8  ;;  %v2564_v44 = vpop.f32.mrf.mxu0  ;;  %v3224_v29 = vadd.f32 1.0, %v7759_v33  ;;  %5541 = vmatprep.subr.bf16.mxu0 %v7519_v5  ;;  %v2817_v23 = vmul.f32 0.5, %v9987_v61  ;;  %v10110_v33 = vmul.f32 0.5, %v9977_v52  ;;  %v7520_v52 = vld [vmem:[%s10945_s5 + $0x708] ss:$12 sps:$4 sm:$0xff]  }
 0x2d1   :  { %v2902_v13 = vmul.f32 %v2842_v49, %v10073_v45  ;;  %5491 = vmatmul.mubr.bf16.vlgmr.msra.gmra.mxu1 %v10082_v55  ;;  %v2565_v39 = vadd.f32 %v2564_v44, %v10045_v62  ;;  %v2627_v6 = vpop.f32.mrf.mxu1  ;;  %v3225_v60 = vadd.f32 1.0, %v7761_v26  ;;  %v3010_v18 = vadd.f32 %v2950_v56, %v10055_v42  ;;  %v7537_v49 = vld [vmem:[%s10945_s5 + $0x810] ss:$12 sps:$4 sm:$0xff]  }
 0x2d2   :  { %v10107_v12 = vadd.f32 %v2623_v9, %v2563_v25  ;;  %v2566_v0 = vpop.f32.mrf.mxu0  ;;  %v3284_v5 = vmul.f32 %v3224_v29, %v2804_v51  ;;  %5581 = vmatpush1.bf16.msra.mxu1 %v7532_v15  ;;  %v2843_v26 = vmul.f32 0.044715, %v10095_v19  ;;  %v7544_v51 = vld [vmem:[%s10945_s5 + $0x7fc] ss:$12 sps:$4 sm:$0xff]   ;;  %v2891_v15 = vmul.f32 %v2831_v50, %v10062_v53 }
 0x2d3   :  { %v7763_v4 = vpop.eup %7762  ;;  %v2962_v44 = vmul.f32 %v2902_v13, %v10073_v45  ;;  %v10117_v61 = vadd.f32 %v2625_v41, %v2565_v39  ;;  %v2567_v9 = vadd.f32 %v2566_v0, %v10035_v54  ;;  %v2629_v56 = vpop.f32.mrf.mxu1  ;;  %5542 = vmatpush2.bf16.msra.mxu0 %v7517_v21  ;;  %5582 = vmatprep.subr.bf16.mxu1 %v7539_v1  ;;  %v7525_v21 = vld [vmem:[%s10945_s5 + $0x6f4] ss:$12 sps:$4 sm:$0xff]   ;;  %v3070_v50 = vmul.f32 0.7978846, %v3010_v18  ;;  %v7523_v18 = vld [vmem:[%s10945_s5 + $0x6f0] ss:$12 sps:$4 sm:$0xff]  }
 0x2d4   :  { %v2568_v13 = vpop.f32.mrf.mxu0  ;;  %v3273_v25 = vmul.f32 %v3213_v14, %v2793_v46  ;;  %v3285_v29 = vmul.f32 %v3225_v60, %v2805_v34  ;;  %v3272_v41 = vmul.f32 %v3212_v58, %v2792_v47  ;;  %5543 = vmatprep.subr.bf16.mxu0 %v7522_v28  ;;  %v7765_v39 = vpop.eup %7764  ;;  %v2854_v1 = vmul.f32 0.044715, %v10107_v12  ;;  %v7542_v58 = vld [vmem:[%s10945_s5 + $0x7f8] ss:$12 sps:$4 sm:$0xff]  }
 0x2d5   :  { %v3022_v0 = vadd.f32 %v2962_v44, %v10073_v45  ;;  %v2855_v3 = vmul.f32 0.044715, %v10117_v61  ;;  %v10133_v55 = vadd.f32 %v2627_v6, %v2567_v9  ;;  %v2633_v8 = vpop.f32.mrf.mxu1  ;;  %v2569_v46 = vadd.f32 %v2568_v13, %v10045_v62 }
 0x2d6   :  { %v2572_v34 = vpop.f32.mrf.mxu0  ;;  %v10136_v47 = vpack.c.bf16 %v3285_v29, %v3273_v25  ;;  %v3237_v14 = vadd.f32 1.0, %v7763_v4  ;;  %5583 = vmatpush1.bf16.msra.mxu1 %v7537_v49  ;;  %v2903_v28 = vmul.f32 %v2843_v26, %v10095_v19  ;;  %v10144_v9 = vpack.c.bf16 %v3284_v5, %v3272_v41  ;;  %v7549_v4 = vld [vmem:[%s10945_s5 + $0x7e4] ss:$12 sps:$4 sm:$0xff]   ;;  %v7528_v5 = vld [vmem:[%s10945_s5 + $0x6dc] ss:$12 sps:$4 sm:$0xff]  }
 0x2d7   :  { %v2866_v60 = vmul.f32 0.044715, %v10133_v55  ;;  %v2573_v6 = vadd.f32 %v2572_v34, %v10035_v54  ;;  %v2635_v44 = vpop.f32.mrf.mxu1  ;;  %5544 = vmatpush2.bf16.msra.mxu0 %v7520_v52  ;;  %5584 = vmatprep.subr.bf16.mxu1 %v7544_v51  ;;  %v3082_v49 = vmul.f32 0.7978846, %v3022_v0  ;;  %v10152_v13 = vadd.f32 %v2629_v56, %v2569_v46 }
 0x2d8   :  { %5500 = vmatprep.mubr.bf16.mxu1 %v10136_v47  ;;  %v2574_v26 = vpop.f32.mrf.mxu0  ;;  %v3297_v54 = vmul.f32 %v3237_v14, %v2817_v23  ;;  %v3236_v25 = vadd.f32 1.0, %v7765_v39  ;;  %5545 = vmatprep.subr.bf16.mxu0 %v7525_v21  ;;  %v2914_v52 = vmul.f32 %v2854_v1, %v10107_v12  ;;  %v2915_v51 = vmul.f32 %v2855_v3, %v10117_v61  ;;  %v7547_v3 = vld [vmem:[%s10945_s5 + $0x7e0] ss:$12 sps:$4 sm:$0xff]  }
 0x2d9   :  { %v2926_v29 = vmul.f32 %v2866_v60, %v10133_v55  ;;  %5501 = vmatmul.mubr.bf16.gmra.mxu1 %v10144_v9  ;;  %v2575_v56 = vadd.f32 %v2574_v26, %v10045_v62  ;;  %v2637_v41 = vpop.f32.mrf.mxu1  ;;  %v2867_v0 = vmul.f32 0.044715, %v10152_v13  ;;  %v10164_v23 = vadd.f32 %v2633_v8, %v2573_v6  ;;  %v7526_v8 = vld [vmem:[%s10945_s5 + $0x6d8] ss:$12 sps:$4 sm:$0xff]  }
 0x2da   :  { %v2576_v21 = vpop.f32.mrf.mxu0  ;;  %v10166_v39 = vpack.c.bf16 %v3297_v54, %v3297_v54  ;;  %v2951_v46 = vmul.f32 %v2891_v15, %v10062_v53  ;;  %5585 = vmatpush1.bf16.msra.mxu1 %v7542_v58  ;;  %v3296_v62 = vmul.f32 %v3236_v25, %v10110_v33  ;;  %v2963_v14 = vmul.f32 %v2903_v28, %v10095_v19  ;;  %v7554_v15 = vld [vmem:[%s10945_s5 + $0x7cc] ss:$12 sps:$4 sm:$0xff]   ;;  %v7531_v33 = vld [vmem:[%s10945_s5 + $0x6c4] ss:$12 sps:$4 sm:$0xff]   ;;  %v7552_v25 = vld [vmem:[%s10945_s5 + $0x7c8] ss:$12 sps:$4 sm:$0xff]  }
 0x2db   :  { %v10172_v1 = vadd.f32 %v2635_v44, %v2575_v56  ;;  %v2638_v34 = vpop.f32.mrf.mxu1  ;;  %5546 = vmatpush2.bf16.msra.mxu0 %v7523_v18  ;;  %5586 = vmatprep.subr.bf16.mxu1 %v7549_v4  ;;  %7766 = vtanh.f32 %v3082_v49  ;;  %v2927_v58 = vmul.f32 %v2867_v0, %v10152_v13  ;;  %v2975_v18 = vmul.f32 %v2915_v51, %v10117_v61  ;;  %v7535_v0 = vld [vmem:[%s10945_s5 + $0x170] ss:$12 sps:$4 sm:$0xff]  }
 0x2dc   :  { %5510 = vmatprep.mubr.bf16.mxu1 %v10166_v39  ;;  %v2577_v60 = vpop.f32.mrf.mxu0  ;;  %5547 = vmatprep.subr.bf16.mxu0 %v7528_v5  ;;  %v3011_v6 = vadd.f32 %v2951_v46, %v10062_v53  ;;  %7768 = vtanh.f32 %v3070_v50  ;;  %v3023_v44 = vadd.f32 %v2963_v14, %v10095_v19  ;;  %v2878_v4 = vmul.f32 0.044715, %v10164_v23  ;;  %v7529_v50 = vld [vmem:[%s10945_s5 + $0x6c0] ss:$12 sps:$4 sm:$0xff]  }
 0x2dd   :  { %v2879_v28 = vmul.f32 0.044715, %v10172_v1  ;;  %v2987_v26 = vmul.f32 %v2927_v58, %v10152_v13  ;;  %v2974_v54 = vmul.f32 %v2914_v52, %v10107_v12  ;;  %v10197_v5 = vpack.c.bf16 %v3296_v62, %v3296_v62  ;;  %v7559_v52 = vld [vmem:[%s10945_s5 + $0x7b4] ss:$12 sps:$4 sm:$0xff]   ;;  %v7557_v58 = vld [vmem:[%s10945_s5 + $0x7b0] ss:$12 sps:$4 sm:$0xff]  }
 0x2de   :  { %v3071_v49 = vmul.f32 0.7978846, %v3011_v6  ;;  %5587 = vmatpush1.bf16.msra.mxu1 %v7547_v3  ;;  %v3083_v51 = vmul.f32 0.7978846, %v3023_v44  ;;  %v3035_v56 = vadd.f32 %v2975_v18, %v10117_v61  ;;  %v2986_v41 = vmul.f32 %v2926_v29, %v10133_v55 }
 0x2df   :  { %5548 = vmatpush2.bf16.msra.mxu0 %v7526_v8  ;;  %5588 = vmatprep.subr.bf16.mxu1 %v7554_v15  ;;  %v3047_v21 = vadd.f32 %v2987_v26, %v10152_v13  ;;  %v3034_v46 = vadd.f32 %v2974_v54, %v10107_v12  ;;  %v2939_v3 = vmul.f32 %v2879_v28, %v10172_v1  ;;  %v7569_v26 = vld [vmem:[%s10945_s5 + $0x784] ss:$12 sps:$4 sm:$0xff]  }
 0x2e0   :  { %5549 = vmatprep.subr.bf16.mxu0 %v7531_v33  ;;  %7770 = vtanh.f32 %v3071_v49  ;;  %v3095_v29 = vmul.f32 0.7978846, %v3035_v56  ;;  %v3046_v34 = vadd.f32 %v2986_v41, %v10133_v55  ;;  %v2938_v15 = vmul.f32 %v2878_v4, %v10164_v23  ;;  %v7564_v33 = vld [vmem:[%s10945_s5 + $0x79c] ss:$12 sps:$4 sm:$0xff]   ;;  %v7562_v49 = vld [vmem:[%s10945_s5 + $0x798] ss:$12 sps:$4 sm:$0xff]  }
 0x2e1   :  { %5511 = vmatmul.mubr.bf16.gmra.mxu1 %v10197_v5  ;;  %7772 = vtanh.f32 %v3083_v51  ;;  %v3107_v62 = vmul.f32 0.7978846, %v3047_v21  ;;  %v3094_v8 = vmul.f32 0.7978846, %v3034_v46  ;;  %v2999_v14 = vmul.f32 %v2939_v3, %v10172_v1  ;;  %v7567_v41 = vld [vmem:[%s10945_s5 + $0x780] ss:$12 sps:$4 sm:$0xff]  }
 0x2e2   :  { %5589 = vmatpush1.bf16.msra.mxu1 %v7552_v25  ;;  %7774 = vtanh.f32 %v3095_v29  ;;  %v3106_v60 = vmul.f32 0.7978846, %v3046_v34  ;;  %v2998_v28 = vmul.f32 %v2938_v15, %v10164_v23  ;;  %v2782_v29 = vmul.f32 0.5, %v10073_v45 }
 0x2e3   :  { %5550 = vmatpush2.bf16.msra.mxu0 %v7529_v50  ;;  %5590 = vmatprep.subr.bf16.mxu1 %v7559_v52  ;;  %7776 = vtanh.f32 %v3107_v62  ;;  %v3059_v6 = vadd.f32 %v2999_v14, %v10172_v1  ;;  %v7574_v52 = vld [vmem:[%s10945_s5 + $0x8ec] ss:$12 sps:$4 sm:$0xff]   ;;  %v7572_v14 = vld [vmem:[%s10945_s5 + $0x8e8] ss:$12 sps:$4 sm:$0xff]   ;;  %v2771_v15 = vmul.f32 0.5, %v10062_v53 }
 0x2e4   :  { %6655 = vmatprep.subr.bf16.mxu0 %v7535_v0  ;;  %7778 = vtanh.f32 %v3094_v8  ;;  %v3058_v4 = vadd.f32 %v2998_v28, %v10164_v23 }
 0x2e5   :  { %7780 = vtanh.f32 %v3106_v60  ;;  %v3119_v18 = vmul.f32 0.7978846, %v3059_v6  ;;  %v2770_v6 = vmul.f32 0.5, %v10055_v42  ;;  %v7577_v42 = vld [vmem:[%s10945_s5 + $0x8d0] ss:$12 sps:$4 sm:$0xff]  }
 0x2e6   :  { %v10225_v44 = vpop.f32.mrf.mxu0  ;;  %5591 = vmatpush1.bf16.msra.mxu1 %v7557_v58  ;;  %v3118_v25 = vmul.f32 0.7978846, %v3058_v4  ;;  %v2783_v58 = vmul.f32 0.5, %v10095_v19  ;;  %v2795_v19 = vmul.f32 0.5, %v10117_v61  ;;  %v7584_v61 = vld [vmem:[%s10945_s5 + $0x8bc] ss:$12 sps:$4 sm:$0xff]  }
 0x2e7   :  { %5592 = vmatprep.subr.bf16.mxu1 %v7564_v33  ;;  %7782 = vtanh.f32 %v3119_v18  ;;  %v7579_v33 = vld [vmem:[%s10945_s5 + $0x8d4] ss:$12 sps:$4 sm:$0xff]  }
 0x2e8   :  { %v10234_v54 = vpop.f32.mrf.mxu0  ;;  %v7767_v50 = vpop.eup %7766  ;;  %7784 = vtanh.f32 %v3118_v25 }
 0x2e9   :  { %v7769_v51 = vpop.eup %7768  ;;  %v3202_v21 = vadd.f32 1.0, %v7767_v50 }
 0x2ea   :  { %v10236_v56 = vpop.f32.mrf.mxu0  ;;  %5593 = vmatpush1.bf16.msra.mxu1 %v7562_v49  ;;  %v3190_v8 = vadd.f32 1.0, %v7769_v51 }
 0x2eb   :  { %5594 = vmatprep.subr.bf16.mxu1 %v7569_v26  ;;  %v3262_v18 = vmul.f32 %v3202_v21, %v2782_v29 }
 0x2ec   :  { %v10244_v0 = vpop.f32.mrf.mxu0  ;;  %v3250_v53 = vmul.f32 %v3190_v8, %v2770_v6 }
 0x2ed   :  { %v7771_v46 = vpop.eup %7770 }
 0x2ee   :  { %v7773_v3 = vpop.eup %7772  ;;  %v10247_v34 = vpop.f32.mrf.mxu0  ;;  %v3191_v62 = vadd.f32 1.0, %v7771_v46  ;;  %5595 = vmatpush1.bf16.msra.mxu1 %v7567_v41  ;;  %v2807_v41 = vmul.f32 0.5, %v10152_v13  ;;  %v10275_v29 = vpack.c.bf16 %v3262_v18, %v3250_v53  ;;  %v7540_v13 = vld [vmem:[%s10945_s5 + $0x158] ss:$12 sps:$4 sm:$0xff]   ;;  %v2819_v18 = vmul.f32 0.5, %v10172_v1 }
 0x2ef   :  { %v3203_v60 = vadd.f32 1.0, %v7773_v3  ;;  %5596 = vmatprep.subr.bf16.mxu1 %v7574_v52  ;;  %v7775_v45 = vpop.eup %7774  ;;  %v7536_v3 = vld [vmem:[%s10945_s5 + $0xb0] ss:$12 sps:$4 sm:$0xff]   ;;  %v7545_v1 = vld [vmem:[%s10945_s5 + $0x140] ss:$12 sps:$4 sm:$0xff]  }
 0x2f0   :  { %v10258_v28 = vpop.f32.mrf.mxu0  ;;  %v7777_v4 = vpop.eup %7776  ;;  %v3251_v49 = vmul.f32 %v3191_v62, %v2771_v15  ;;  %v3215_v25 = vadd.f32 1.0, %v7775_v45 }
 0x2f1   :  { %v3263_v26 = vmul.f32 %v3203_v60, %v2783_v58  ;;  %v7779_v50 = vpop.eup %7778  ;;  %v3227_v52 = vadd.f32 1.0, %v7777_v4  ;;  %v2806_v60 = vmul.f32 0.5, %v10133_v55  ;;  %v7541_v55 = vld [vmem:[%s10945_s5 + $0x98] ss:$12 sps:$4 sm:$0xff]  }
 0x2f2   :  { %v10260_v51 = vpop.f32.mrf.mxu0  ;;  %5597 = vmatpush2.bf16.msra.mxu1 %v7572_v14  ;;  %v7781_v46 = vpop.eup %7780  ;;  %v3275_v8 = vmul.f32 %v3215_v25, %v2795_v19  ;;  %v3214_v6 = vadd.f32 1.0, %v7779_v50  ;;  %v2794_v50 = vmul.f32 0.5, %v10107_v12 }
 0x2f3   :  { %v10267_v21 = vpack.c.bf16 %v3263_v26, %v3251_v49  ;;  %5598 = vmatprep.subr.bf16.mxu1 %v7579_v33  ;;  %v3287_v14 = vmul.f32 %v3227_v52, %v2807_v41  ;;  %v3226_v15 = vadd.f32 1.0, %v7781_v46  ;;  %v7582_v49 = vld [vmem:[%s10945_s5 + $0x8b8] ss:$12 sps:$4 sm:$0xff]   ;;  %v7587_v46 = vld [vmem:[%s10945_s5 + $0x8a0] ss:$12 sps:$4 sm:$0xff]  }
 0x2f4   :  { %v10280_v62 = vpop.f32.mrf.mxu0  ;;  %v7783_v58 = vpop.eup %7782  ;;  %v7589_v26 = vld [vmem:[%s10945_s5 + $0x8a4] ss:$12 sps:$4 sm:$0xff]   ;;  %v3274_v52 = vmul.f32 %v3214_v6, %v2794_v50  ;;  %v7551_v6 = vld [vmem:[%s10945_s5 + $0x68] ss:$12 sps:$4 sm:$0xff]  }
 0x2f5   :  { %5551 = vmatprep.mubr.bf16.mxu0 %v10267_v21  ;;  %v10287_v45 = vpack.c.bf16 %v3287_v14, %v3275_v8  ;;  %v3239_v4 = vadd.f32 1.0, %v7783_v58  ;;  %v3286_v53 = vmul.f32 %v3226_v15, %v2806_v60  ;;  %v7785_v41 = vpop.eup %7784  ;;  %v7594_v15 = vld [vmem:[%s10945_s5 + $0x88c] ss:$12 sps:$4 sm:$0xff]   ;;  %v2818_v58 = vmul.f32 0.5, %v10164_v23  ;;  %v7592_v60 = vld [vmem:[%s10945_s5 + $0x888] ss:$12 sps:$4 sm:$0xff]  }
 0x2f6   :  { %5552 = vmatmul.mubr.bf16.vlgmr.msra.gmra.mxu0 %v10275_v29  ;;  %v10285_v33 = vpop.f32.mrf.mxu0  ;;  %5599 = vmatpush2.bf16.msra.mxu1 %v7577_v42  ;;  %v3238_v14 = vadd.f32 1.0, %v7785_v41  ;;  %v7555_v23 = vld [vmem:[%s10945_s5 + $0x110] ss:$12 sps:$4 sm:$0xff]   ;;  %v7560_v50 = vld [vmem:[%s10945_s5 + $0xf8] ss:$12 sps:$4 sm:$0xff]  }
 0x2f7   :  { %6656 = vmatpush3.bf16.msra.mxu0 %v7536_v3  ;;  %5600 = vmatprep.subr.bf16.mxu1 %v7584_v61  ;;  %v3299_v19 = vmul.f32 %v3239_v4, %v2819_v18  ;;  %v7546_v3 = vld [vmem:[%s10945_s5 + $0x80] ss:$12 sps:$4 sm:$0xff]   ;;  %v10314_v12 = vpack.c.bf16 %v3286_v53, %v3274_v52  ;;  %v10987_v53 = vsub.s32 3, %v8149_v30  ;;  %v7604_v41 = vld [vmem:[%s10945_s5 + $0x85c] ss:$12 sps:$4 sm:$0xff]  }
 0x2f8   :  { %6657 = vmatprep.subr.bf16.mxu0 %v7540_v13  ;;  %5561 = vmatprep.mubr.bf16.mxu0 %v10287_v45  ;;  %v10303_v25 = vpop.f32.mrf.mxu0  ;;  %v7550_v13 = vld [vmem:[%s10945_s5 + $0x128] ss:$12 sps:$4 sm:$0xff]   ;;  %v3298_v4 = vmul.f32 %v3238_v14, %v2818_v58  ;;  %v7561_v30 = vld [vmem:[%s10945_s5 + $0x38] ss:$12 sps:$4 sm:$0xff]   ;;  %v7565_v14 = vld [vmem:[%s10945_s5 + $0xe0] ss:$12 sps:$4 sm:$0xff]  }
 0x2f9   :  { %v10312_v61 = vpack.c.bf16 %v3299_v19, %v3299_v19  ;;  %v7599_v18 = vld [vmem:[%s10945_s5 + $0x874] ss:$12 sps:$4 sm:$0xff]   ;;  %v10355_v19 = vrot.slane %v10025_v24, %v10987_v53 }
 0x2fa   :  { %v2759_v42 = vpop.f32.mrf.mxu0  ;;  %5601 = vmatpush2.bf16.msra.mxu1 %v7582_v49  ;;  %v10339_v49 = vrot.slane %v10025_v24, %v8155_v38 }
 0x2fb   :  { %6658 = vmatpush3.bf16.msra.mxu0 %v7541_v55  ;;  %5602 = vmatprep.subr.bf16.mxu1 %v7589_v26  ;;  %v7597_v55 = vld [vmem:[%s10945_s5 + $0x870] ss:$12 sps:$4 sm:$0xff]  }
 0x2fc   :  { %6659 = vmatprep.subr.bf16.mxu0 %v7545_v1  ;;  %v2760_v8 = vpop.f32.mrf.mxu0  ;;  %v7556_v26 = vld [vmem:[%s10945_s5 + $0x50] ss:$12 sps:$4 sm:$0xff]   ;;  %v10347_v1 = vpack.c.bf16 %v3298_v4, %v3298_v4 }
 0x2fe   :  { %5562 = vmatmul.mubr.bf16.gmra.mxu0 %v10314_v12  ;;  %5603 = vmatpush2.bf16.msra.mxu1 %v7587_v46  ;;  %v7602_v46 = vld [vmem:[%s10945_s5 + $0x858] ss:$12 sps:$4 sm:$0xff]  }
 0x2ff   :  { %6660 = vmatpush3.bf16.msra.mxu0 %v7546_v3  ;;  %5571 = vmatprep.mubr.bf16.mxu0 %v10312_v61  ;;  %v7609_v3 = vld [vmem:[%s10945_s5 + $0x844] ss:$12 sps:$4 sm:$0xff]  }
 0x300   :  { %6661 = vmatprep.subr.bf16.mxu0 %v7550_v13  ;;  %5604 = vmatprep.subr.bf16.mxu1 %v7594_v15 }
 0x302   :  { %5605 = vmatpush2.bf16.msra.mxu1 %v7592_v60 }
 0x303   :  { %6662 = vmatpush3.bf16.msra.mxu0 %v7551_v6  ;;  %5606 = vmatprep.subr.bf16.mxu1 %v7599_v18  ;;  %v7566_v6 = vld [vmem:[%s10945_s5 + $0x20] ss:$12 sps:$4 sm:$0xff]  }
 0x304   :  { %6663 = vmatprep.subr.bf16.mxu0 %v7555_v23  ;;  %v7612_v23 = vld [vmem:[%s10945_s5 + $0x2f0] ss:$12 sps:$4 sm:$0xff]  }
 0x305   :  { %v2674_v52 = vpop.f32.mrf.mxu1 }
 0x306   :  { %5572 = vmatmul.mubr.bf16.gmra.mxu0 %v10347_v1  ;;  %v2675_v42 = vadd.f32 %v2674_v52, %v10339_v49  ;;  %5607 = vmatpush2.bf16.msra.mxu1 %v7597_v55 }
 0x307   :  { %6664 = vmatpush3.bf16.msra.mxu0 %v7556_v26  ;;  %5673 = vmatprep.mubr.bf16.mxu0 %v9146_v2  ;;  %v2676_v24 = vpop.f32.mrf.mxu1 }
 0x308   :  { %6665 = vmatprep.subr.bf16.mxu0 %v7560_v50  ;;  %v10373_v13 = vadd.f32 %v10225_v44, %v2675_v42  ;;  %v2677_v8 = vadd.f32 %v2676_v24, %v10355_v19  ;;  %5608 = vmatprep.subr.bf16.mxu1 %v7604_v41  ;;  %v7607_v44 = vld [vmem:[%s10945_s5 + $0x840] ss:$12 sps:$4 sm:$0xff]   ;;  %v7570_v50 = vld [vmem:[%s10945_s5 + $0xc8] ss:$12 sps:$4 sm:$0xff]  }
 0x309   :  { %v2678_v2 = vpop.f32.mrf.mxu1 }
 0x30a   :  { %v2832_v15 = vmul.f32 0.044715, %v10373_v13  ;;  %v10381_v58 = vadd.f32 %v10234_v54, %v2677_v8  ;;  %v2679_v60 = vadd.f32 %v2678_v2, %v10339_v49  ;;  %5609 = vmatpush2.bf16.msra.mxu1 %v7602_v46 }
 0x30b   :  { %6666 = vmatpush3.bf16.msra.mxu0 %v7561_v30  ;;  %v2680_v18 = vpop.f32.mrf.mxu1  ;;  %5610 = vmatprep.subr.bf16.mxu1 %v7609_v3 }
 0x30c   :  { %v2892_v54 = vmul.f32 %v2832_v15, %v10373_v13  ;;  %v2833_v4 = vmul.f32 0.044715, %v10381_v58  ;;  %6667 = vmatprep.subr.bf16.mxu0 %v7565_v14  ;;  %v10396_v55 = vadd.f32 %v10236_v56, %v2679_v60  ;;  %v2681_v26 = vadd.f32 %v2680_v18, %v10355_v19  ;;  %v7571_v56 = vld [vmem:[%s10945_s5 + $0x8] ss:$12 sps:$4 sm:$0xff]  }
 0x30d   :  { %v2684_v53 = vpop.f32.mrf.mxu1 }
 0x30e   :  { %v2952_v41 = vmul.f32 %v2892_v54, %v10373_v13  ;;  %v2893_v52 = vmul.f32 %v2833_v4, %v10381_v58  ;;  %v2844_v42 = vmul.f32 0.044715, %v10396_v55  ;;  %5611 = vmatpush2.bf16.msra.mxu1 %v7607_v44  ;;  %v10406_v46 = vadd.f32 %v10244_v0, %v2681_v26  ;;  %v7575_v0 = vld [vmem:[%s10945_s5 + $0x470] ss:$12 sps:$4 sm:$0xff]  }
 0x30f   :  { %6668 = vmatpush3.bf16.msra.mxu0 %v7566_v6  ;;  %v2685_v30 = vadd.f32 %v2684_v53, %v10339_v49  ;;  %v2686_v24 = vpop.f32.mrf.mxu1  ;;  %6689 = vmatprep.subr.bf16.mxu1 %v7612_v23 }
 0x310   :  { %v3012_v3 = vadd.f32 %v2952_v41, %v10373_v13  ;;  %v2904_v8 = vmul.f32 %v2844_v42, %v10396_v55  ;;  %6669 = vmatprep.subr.bf16.mxu0 %v7570_v50  ;;  %v2687_v14 = vadd.f32 %v2686_v24, %v10355_v19  ;;  %v2953_v2 = vmul.f32 %v2893_v52, %v10381_v58  ;;  %v7576_v50 = vld [vmem:[%s10945_s5 + $0x3b0] ss:$12 sps:$4 sm:$0xff]   ;;  %v7580_v42 = vld [vmem:[%s10945_s5 + $0x458] ss:$12 sps:$4 sm:$0xff]  }
 0x311   :  { %v2845_v15 = vmul.f32 0.044715, %v10406_v46  ;;  %v10421_v60 = vadd.f32 %v10247_v34, %v2685_v30  ;;  %v2688_v44 = vpop.f32.mrf.mxu1 }
 0x312   :  { %v3072_v6 = vmul.f32 0.7978846, %v3012_v3  ;;  %v2964_v18 = vmul.f32 %v2904_v8, %v10396_v55  ;;  %v10425_v23 = vadd.f32 %v10258_v28, %v2687_v14  ;;  %v2689_v54 = vadd.f32 %v2688_v44, %v10339_v49  ;;  %v7581_v44 = vld [vmem:[%s10945_s5 + $0x398] ss:$12 sps:$4 sm:$0xff]  }
 0x313   :  { %v2905_v4 = vmul.f32 %v2845_v15, %v10406_v46  ;;  %6670 = vmatpush3.bf16.msra.mxu0 %v7571_v56  ;;  %v2856_v26 = vmul.f32 0.044715, %v10421_v60  ;;  %v2690_v34 = vpop.f32.mrf.mxu1  ;;  %v3013_v53 = vadd.f32 %v2953_v2, %v10381_v58 }
 0x314   :  { %7786 = vtanh.f32 %v3072_v6  ;;  %v3024_v41 = vadd.f32 %v2964_v18, %v10396_v55  ;;  %v2857_v28 = vmul.f32 0.044715, %v10425_v23  ;;  %6723 = vmatprep.subr.bf16.mxu0 %v7575_v0  ;;  %v10437_v52 = vadd.f32 %v10260_v51, %v2689_v54 }
 0x315   :  { %v2916_v56 = vmul.f32 %v2856_v26, %v10421_v60  ;;  %v2691_v30 = vadd.f32 %v2690_v34, %v10355_v19  ;;  %v2694_v24 = vpop.f32.mrf.mxu1  ;;  %v2965_v3 = vmul.f32 %v2905_v4, %v10406_v46  ;;  %v3073_v8 = vmul.f32 0.7978846, %v3013_v53 }
 0x316   :  { %v3084_v14 = vmul.f32 0.7978846, %v3024_v41  ;;  %v2917_v2 = vmul.f32 %v2857_v28, %v10425_v23  ;;  %5674 = vmatmul.mubr.bf16.vlgmr.msra.gmra.mxu0 %v9446_v16  ;;  %v2868_v51 = vmul.f32 0.044715, %v10437_v52  ;;  %v2695_v0 = vadd.f32 %v2694_v24, %v10339_v49 }
 0x317   :  { %5681 = vmatprep.mubr.bf16.mxu0 %v9464_v63  ;;  %6724 = vmatpush3.bf16.msra.mxu0 %v7576_v50  ;;  %v10451_v15 = vadd.f32 %v10280_v62, %v2691_v30  ;;  %v2696_v6 = vpop.f32.mrf.mxu1  ;;  %v3025_v18 = vadd.f32 %v2965_v3, %v10406_v46  ;;  %7788 = vtanh.f32 %v3073_v8  ;;  %v7585_v62 = vld [vmem:[%s10945_s5 + $0x440] ss:$12 sps:$4 sm:$0xff]  }
 0x318   :  { %7790 = vtanh.f32 %v3084_v14  ;;  %v2928_v16 = vmul.f32 %v2868_v51, %v10437_v52  ;;  %6725 = vmatprep.subr.bf16.mxu0 %v7580_v42  ;;  %v10459_v49 = vadd.f32 %v10285_v33, %v2695_v0  ;;  %v2697_v63 = vadd.f32 %v2696_v6, %v10355_v19  ;;  %v7586_v19 = vld [vmem:[%s10945_s5 + $0x380] ss:$12 sps:$4 sm:$0xff]  }
 0x319   :  { %v2869_v54 = vmul.f32 0.044715, %v10451_v15  ;;  %v2698_v4 = vpop.f32.mrf.mxu1  ;;  %v3085_v26 = vmul.f32 0.7978846, %v3025_v18  ;;  %v2977_v50 = vmul.f32 %v2917_v2, %v10425_v23  ;;  %v2976_v33 = vmul.f32 %v2916_v56, %v10421_v60 }
 0x31a   :  { %v2880_v34 = vmul.f32 0.044715, %v10459_v49  ;;  %v10469_v53 = vadd.f32 %v10303_v25, %v2697_v63  ;;  %v2988_v30 = vmul.f32 %v2928_v16, %v10437_v52  ;;  %v7590_v25 = vld [vmem:[%s10945_s5 + $0x428] ss:$12 sps:$4 sm:$0xff]  }
 0x31b   :  { %v2929_v41 = vmul.f32 %v2869_v54, %v10451_v15  ;;  %6726 = vmatpush3.bf16.msra.mxu0 %v7581_v44  ;;  %v2699_v28 = vpop.f32.mrf.mxu1  ;;  %7792 = vtanh.f32 %v3085_v26  ;;  %v3037_v42 = vadd.f32 %v2977_v50, %v10425_v23  ;;  %v3036_v56 = vadd.f32 %v2976_v33, %v10421_v60  ;;  %v7591_v44 = vld [vmem:[%s10945_s5 + $0x368] ss:$12 sps:$4 sm:$0xff]   ;;  %v7596_v26 = vld [vmem:[%s10945_s5 + $0x350] ss:$12 sps:$4 sm:$0xff]   ;;  %v7600_v33 = vld [vmem:[%s10945_s5 + $0x3f8] ss:$12 sps:$4 sm:$0xff]  }
 0x31c   :  { %v2881_v24 = vmul.f32 0.044715, %v10469_v53  ;;  %6727 = vmatprep.subr.bf16.mxu0 %v7585_v62  ;;  %v3048_v14 = vadd.f32 %v2988_v30, %v10437_v52  ;;  %v2940_v2 = vmul.f32 %v2880_v34, %v10459_v49  ;;  %v7601_v30 = vld [vmem:[%s10945_s5 + $0x338] ss:$12 sps:$4 sm:$0xff]  }
 0x31d   :  { %v2989_v3 = vmul.f32 %v2929_v41, %v10451_v15  ;;  %v3097_v8 = vmul.f32 0.7978846, %v3037_v42  ;;  %v3096_v51 = vmul.f32 0.7978846, %v3036_v56  ;;  %v2784_v56 = vmul.f32 0.5, %v10396_v55 }
 0x31e   :  { %5682 = vmatmul.mubr.bf16.gmra.mxu0 %v9491_v32  ;;  %v2941_v0 = vmul.f32 %v2881_v24, %v10469_v53  ;;  %v3108_v18 = vmul.f32 0.7978846, %v3048_v14  ;;  %v3000_v16 = vmul.f32 %v2940_v2, %v10459_v49  ;;  %v7595_v32 = vld [vmem:[%s10945_s5 + $0x410] ss:$12 sps:$4 sm:$0xff]   ;;  %v2773_v14 = vmul.f32 0.5, %v10381_v58 }
 0x31f   :  { %5689 = vmatprep.mubr.bf16.mxu0 %v9522_v20  ;;  %6728 = vmatpush3.bf16.msra.mxu0 %v7586_v19  ;;  %v3049_v6 = vadd.f32 %v2989_v3, %v10451_v15  ;;  %7794 = vtanh.f32 %v3097_v8  ;;  %v7606_v55 = vld [vmem:[%s10945_s5 + $0x320] ss:$12 sps:$4 sm:$0xff]   ;;  %v7610_v58 = vld [vmem:[%s10945_s5 + $0x3c8] ss:$12 sps:$4 sm:$0xff]  }
 0x320   :  { %6729 = vmatprep.subr.bf16.mxu0 %v7590_v25  ;;  %7796 = vtanh.f32 %v3096_v51  ;;  %v3001_v63 = vmul.f32 %v2941_v0, %v10469_v53  ;;  %v3060_v54 = vadd.f32 %v3000_v16, %v10459_v49  ;;  %v2772_v51 = vmul.f32 0.5, %v10373_v13 }
 0x321   :  { %v7787_v20 = vpop.eup %7786  ;;  %v3109_v62 = vmul.f32 0.7978846, %v3049_v6  ;;  %7798 = vtanh.f32 %v3108_v18 }
 0x322   :  { %v3061_v4 = vadd.f32 %v3001_v63, %v10469_v53  ;;  %v3120_v50 = vmul.f32 0.7978846, %v3060_v54  ;;  %v3192_v8 = vadd.f32 1.0, %v7787_v20  ;;  %v7613_v20 = vld [vmem:[%s10945_s5 + $0x230] ss:$12 sps:$4 sm:$0xff]  }
 0x323   :  { %6730 = vmatpush3.bf16.msra.mxu0 %v7591_v44  ;;  %7800 = vtanh.f32 %v3109_v62 }
 0x324   :  { %v7789_v34 = vpop.eup %7788  ;;  %6731 = vmatprep.subr.bf16.mxu0 %v7595_v32  ;;  %v3121_v41 = vmul.f32 0.7978846, %v3061_v4  ;;  %v3252_v32 = vmul.f32 %v3192_v8, %v2772_v51 }
 0x325   :  { %v7791_v19 = vpop.eup %7790  ;;  %v3193_v24 = vadd.f32 1.0, %v7789_v34 }
 0x326   :  { %5690 = vmatmul.mubr.bf16.gmra.mxu0 %v9566_v31  ;;  %v10507_v28 = vpop.f32.mrf.mxu0  ;;  %v3204_v42 = vadd.f32 1.0, %v7791_v19  ;;  %7802 = vtanh.f32 %v3121_v41  ;;  %v7605_v31 = vld [vmem:[%s10945_s5 + $0x3e0] ss:$12 sps:$4 sm:$0xff]   ;;  %v7614_v19 = vld [vmem:[%s10945_s5 + $0x770] ss:$12 sps:$4 sm:$0xff]  }
 0x327   :  { %6732 = vmatpush3.bf16.msra.mxu0 %v7596_v26  ;;  %5785 = vmatprep.mubr.bf16.mxu0 %v9758_v35  ;;  %7804 = vtanh.f32 %v3120_v50  ;;  %v2785_v35 = vmul.f32 0.5, %v10406_v46  ;;  %v3253_v6 = vmul.f32 %v3193_v24, %v2773_v14  ;;  %v7616_v26 = vld [vmem:[%s10945_s5 + $0x2d8] ss:$12 sps:$4 sm:$0xff]   ;;  %v7611_v50 = vld [vmem:[%s10945_s5 + $0x308] ss:$12 sps:$4 sm:$0xff]  }
 0x328   :  { %v7793_v25 = vpop.eup %7792  ;;  %6733 = vmatprep.subr.bf16.mxu0 %v7600_v33  ;;  %v10517_v3 = vpop.f32.mrf.mxu0  ;;  %v3264_v44 = vmul.f32 %v3204_v42, %v2784_v56  ;;  %v7617_v24 = vld [vmem:[%s10945_s5 + $0x218] ss:$12 sps:$4 sm:$0xff]  }
 0x329   :  { %v3205_v2 = vadd.f32 1.0, %v7793_v25  ;;  %v2809_v25 = vmul.f32 0.5, %v10451_v15  ;;  %v2796_v15 = vmul.f32 0.5, %v10421_v60  ;;  %v7621_v60 = vld [vmem:[%s10945_s5 + $0x200] ss:$12 sps:$4 sm:$0xff]  }
 0x32a   :  { %v10522_v0 = vpop.f32.mrf.mxu0  ;;  %v10539_v4 = vpack.c.bf16 %v3264_v44, %v3252_v32 }
 0x32b   :  { %6734 = vmatpush3.bf16.msra.mxu0 %v7601_v30  ;;  %v3265_v18 = vmul.f32 %v3205_v2, %v2785_v35  ;;  %v2797_v30 = vmul.f32 0.5, %v10425_v23  ;;  %v7620_v35 = vld [vmem:[%s10945_s5 + $0x2c0] ss:$12 sps:$4 sm:$0xff]   ;;  %v7615_v23 = vld [vmem:[%s10945_s5 + $0x6b0] ss:$12 sps:$4 sm:$0xff]  }
 0x32c   :  { %v7795_v16 = vpop.eup %7794  ;;  %6735 = vmatprep.subr.bf16.mxu0 %v7605_v31  ;;  %v10530_v46 = vpop.f32.mrf.mxu0  ;;  %v2808_v31 = vmul.f32 0.5, %v10437_v52 }
 0x32d   :  { %v7797_v13 = vpop.eup %7796  ;;  %v10532_v63 = vpack.c.bf16 %v3265_v18, %v3253_v6  ;;  %v3217_v34 = vadd.f32 1.0, %v7795_v16  ;;  %v7618_v6 = vld [vmem:[%s10945_s5 + $0x758] ss:$12 sps:$4 sm:$0xff]   ;;  %v2821_v16 = vmul.f32 0.5, %v10469_v53 }
 0x32e   :  { %v7799_v62 = vpop.eup %7798  ;;  %v10537_v54 = vpop.f32.mrf.mxu0  ;;  %v3216_v8 = vadd.f32 1.0, %v7797_v13  ;;  %v7619_v53 = vld [vmem:[%s10945_s5 + $0x698] ss:$12 sps:$4 sm:$0xff]  }
 0x32f   :  { %6736 = vmatpush3.bf16.msra.mxu0 %v7606_v55  ;;  %5612 = vmatprep.mubr.bf16.mxu1 %v10532_v63  ;;  %v3228_v33 = vadd.f32 1.0, %v7799_v62  ;;  %v3277_v51 = vmul.f32 %v3217_v34, %v2797_v30  ;;  %v7622_v34 = vld [vmem:[%s10945_s5 + $0x740] ss:$12 sps:$4 sm:$0xff]   ;;  %v7625_v30 = vld [vmem:[%s10945_s5 + $0x1e8] ss:$12 sps:$4 sm:$0xff]  }
 0x330   :  { %v7801_v41 = vpop.eup %7800  ;;  %6737 = vmatprep.subr.bf16.mxu0 %v7610_v58  ;;  %5613 = vmatmul.mubr.bf16.vlgmr.msra.gmra.mxu1 %v10539_v4  ;;  %v10552_v42 = vpop.f32.mrf.mxu0  ;;  %v3276_v13 = vmul.f32 %v3216_v8, %v2796_v15  ;;  %v10618_v8 = vld [vmem:[%s10947_s6] sm:$0x7]  ;;  %v7631_v15 = vld [vmem:[%s10945_s5 + $0x650] ss:$12 sps:$4 sm:$0xff]  }
 0x331   :  { %6690 = vmatpush3.bf16.msra.mxu1 %v7613_v20  ;;  %v3229_v56 = vadd.f32 1.0, %v7801_v41  ;;  %v3288_v55 = vmul.f32 %v3228_v33, %v2808_v31  ;;  %v2820_v41 = vmul.f32 0.5, %v10459_v49  ;;  %v7626_v49 = vld [vmem:[%s10945_s5 + $0x728] ss:$12 sps:$4 sm:$0xff]   ;;  %v7628_v31 = vld [vmem:[%s10945_s5 + $0x290] ss:$12 sps:$4 sm:$0xff]  }
 0x332   :  { %v10560_v14 = vpop.f32.mrf.mxu0  ;;  %6691 = vmatprep.subr.bf16.mxu1 %v7616_v26 }
 0x333   :  { %v7803_v2 = vpop.eup %7802  ;;  %6738 = vmatpush3.bf16.msra.mxu0 %v7611_v50  ;;  %v3289_v44 = vmul.f32 %v3229_v56, %v2809_v25  ;;  %v10587_v26 = vpack.c.bf16 %v3288_v55, %v3276_v13 }
 0x334   :  { %v7805_v52 = vpop.eup %7804  ;;  %6791 = vmatprep.subr.bf16.mxu0 %v7614_v19  ;;  %v10572_v18 = vpop.f32.mrf.mxu0  ;;  %v3241_v58 = vadd.f32 1.0, %v7803_v2  ;;  %v7627_v2 = vld [vmem:[%s10945_s5 + $0x668] ss:$12 sps:$4 sm:$0xff]  }
 0x335   :  { %6692 = vmatpush3.bf16.msra.mxu1 %v7617_v24  ;;  %v10575_v32 = vpack.c.bf16 %v3289_v44, %v3277_v51  ;;  %v3240_v50 = vadd.f32 1.0, %v7805_v52  ;;  %v7623_v24 = vld [vmem:[%s10945_s5 + $0x680] ss:$12 sps:$4 sm:$0xff]   ;;  %v7632_v51 = vld [vmem:[%s10945_s5 + $0x278] ss:$12 sps:$4 sm:$0xff]   ;;  %v10643_v44 = vrot.slane %v10618_v8, %v8152_v37 }
 0x336   :  { %5786 = vmatmul.mubr.bf16.vlgmr.msra.gmra.mxu0 %v9836_v36  ;;  %v10578_v20 = vpop.f32.mrf.mxu0  ;;  %6693 = vmatprep.subr.bf16.mxu1 %v7620_v35  ;;  %v3301_v62 = vmul.f32 %v3241_v58, %v2821_v16  ;;  %v7624_v36 = vld [vmem:[%s10945_s5 + $0x2a8] ss:$12 sps:$4 sm:$0xff]   ;;  %v7629_v35 = vld [vmem:[%s10945_s5 + $0x1d0] ss:$12 sps:$4 sm:$0xff]   ;;  %v7634_v37 = vld [vmem:[%s10945_s5 + $0x6f8] ss:$12 sps:$4 sm:$0xff]  }
 0x337   :  { %5793 = vmatprep.mubr.bf16.mxu0 %v9847_v43  ;;  %6792 = vmatpush3.bf16.msra.mxu0 %v7615_v23  ;;  %v3300_v25 = vmul.f32 %v3240_v50, %v2820_v41  ;;  %v7635_v58 = vld [vmem:[%s10945_s5 + $0x638] ss:$12 sps:$4 sm:$0xff]   ;;  %v7641_v50 = vld [vmem:[%s10945_s5 + $0x188] ss:$12 sps:$4 sm:$0xff]   ;;  %v7644_v41 = vld [vmem:[%s10945_s5 + $0x5f0] ss:$12 sps:$4 sm:$0xff]  }
 0x338   :  { %6793 = vmatprep.subr.bf16.mxu0 %v7618_v6  ;;  %5622 = vmatprep.mubr.bf16.mxu1 %v10575_v32  ;;  %v10596_v43 = vpop.f32.mrf.mxu0  ;;  %v10598_v33 = vpack.c.bf16 %v3301_v62, %v3301_v62  ;;  %v5312_v6 = vadd.f32 %v10517_v3, %v10643_v44  ;;  %v7640_v3 = vld [vmem:[%s10945_s5 + $0x248] ss:$12 sps:$4 sm:$0xff]  }
 0x339   :  { %5623 = vmatmul.mubr.bf16.gmra.mxu1 %v10587_v26  ;;  %v10628_v23 = vpack.c.bf16 %v3300_v25, %v3300_v25  ;;  %v5322_v25 = vadd.f32 %v10552_v42, %v10643_v44 }
 0x33a   :  { %6694 = vmatpush3.bf16.msra.mxu1 %v7621_v60  ;;  %v5333_v19 = vpop.f32.mrf.mxu0  ;;  %5632 = vmatprep.mubr.bf16.mxu1 %v10598_v33 }
 0x33b   :  { %6794 = vmatpush3.bf16.msra.mxu0 %v7619_v53  ;;  %6695 = vmatprep.subr.bf16.mxu1 %v7624_v36  ;;  %v5316_v53 = vadd.f32 %v10530_v46, %v10643_v44 }
 0x33c   :  { %6795 = vmatprep.subr.bf16.mxu0 %v7622_v34  ;;  %v5334_v56 = vpop.f32.mrf.mxu0 }
 0x33d   :  { %v7645_v56 = vld [vmem:[%s10945_s5 + $0x530] ss:$12 sps:$4 sm:$0xff]  }
 0x33e   :  { %5794 = vmatmul.mubr.bf16.gmra.mxu0 %v9879_v7  ;;  %6696 = vmatpush3.bf16.msra.mxu1 %v7625_v30  ;;  %v10635_v7 = vrot.slane %v10618_v8, %v8161_v40  ;;  %v7633_v40 = vld [vmem:[%s10945_s5 + $0x1b8] ss:$12 sps:$4 sm:$0xff]   ;;  %v7642_v30 = vld [vmem:[%s10945_s5 + $0x6c8] ss:$12 sps:$4 sm:$0xff]  }
 0x33f   :  { %5801 = vmatprep.mubr.bf16.mxu0 %v9896_v48  ;;  %6796 = vmatpush3.bf16.msra.mxu0 %v7623_v24  ;;  %v7630_v48 = vld [vmem:[%s10945_s5 + $0x710] ss:$12 sps:$4 sm:$0xff]  }
 0x340   :  { %6797 = vmatprep.subr.bf16.mxu0 %v7626_v49  ;;  %6697 = vmatprep.subr.bf16.mxu1 %v7628_v31  ;;  %v5310_v55 = vadd.f32 %v10507_v28, %v10635_v7  ;;  %v7637_v28 = vld [vmem:[%s10945_s5 + $0x1a0] ss:$12 sps:$4 sm:$0xff]   ;;  %v5320_v46 = vadd.f32 %v10537_v54, %v10635_v7  ;;  %v7643_v54 = vld [vmem:[%s10945_s5 + $0x608] ss:$12 sps:$4 sm:$0xff]   ;;  %v5324_v42 = vadd.f32 %v10560_v14, %v10635_v7 }
 0x341   :  { %5633 = vmatmul.mubr.bf16.gmra.mxu1 %v10628_v23 }
 0x342   :  { %6698 = vmatpush3.bf16.msra.mxu1 %v7629_v35  ;;  %5729 = vmatprep.mubr.bf16.mxu1 %v9530_v59  ;;  %v7636_v59 = vld [vmem:[%s10945_s5 + $0x260] ss:$12 sps:$4 sm:$0xff]   ;;  %v7646_v35 = vld [vmem:[%s10945_s5 + $0x5d8] ss:$12 sps:$4 sm:$0xff]  }
 0x343   :  { %6798 = vmatpush3.bf16.msra.mxu0 %v7627_v2  ;;  %6699 = vmatprep.subr.bf16.mxu1 %v7632_v51 }
 0x344   :  { %6799 = vmatprep.subr.bf16.mxu0 %v7630_v48  ;;  %v5326_v48 = vadd.f32 %v10572_v18, %v10643_v44 }
 0x345   :  { %v5370_v52 = vpop.f32.mrf.mxu1 }
 0x346   :  { %5802 = vmatmul.mubr.bf16.gmra.mxu0 %v9938_v27  ;;  %6700 = vmatpush3.bf16.msra.mxu1 %v7633_v40  ;;  %v10663_v16 = vadd.f32 %v5370_v52, %v5310_v55  ;;  %v5314_v27 = vadd.f32 %v10522_v0, %v10635_v7  ;;  %v7639_v0 = vld [vmem:[%s10945_s5 + $0x620] ss:$12 sps:$4 sm:$0xff]   ;;  %v5330_v55 = vadd.f32 %v10578_v20, %v10635_v7  ;;  %v7650_v20 = vld [vmem:[%s10945_s5 + $0x5a8] ss:$12 sps:$4 sm:$0xff]  }
 0x347   :  { %6800 = vmatpush3.bf16.msra.mxu0 %v7631_v15  ;;  %5897 = vmatprep.mubr.bf16.mxu0 %v10267_v21  ;;  %v5372_v13 = vpop.f32.mrf.mxu1  ;;  %v7638_v21 = vld [vmem:[%s10945_s5 + $0x6e0] ss:$12 sps:$4 sm:$0xff]   ;;  %v7647_v15 = vld [vmem:[%s10945_s5 + $0x518] ss:$12 sps:$4 sm:$0xff]  }
 0x348   :  { %6801 = vmatprep.subr.bf16.mxu0 %v7634_v37  ;;  %6701 = vmatprep.subr.bf16.mxu1 %v7636_v59  ;;  %v10677_v60 = vadd.f32 %v5372_v13, %v5312_v6  ;;  %v5332_v37 = vadd.f32 %v10596_v43, %v10643_v44  ;;  %v7649_v52 = vld [vmem:[%s10945_s5 + $0x500] ss:$12 sps:$4 sm:$0xff]   ;;  %v7651_v43 = vld [vmem:[%s10945_s5 + $0x4e8] ss:$12 sps:$4 sm:$0xff]   ;;  %v7652_v44 = vld [vmem:[%s10945_s5 + $0x590] ss:$12 sps:$4 sm:$0xff]  }
 0x349   :  { %v5374_v62 = vpop.f32.mrf.mxu1 }
 0x34a   :  { %6702 = vmatpush3.bf16.msra.mxu1 %v7637_v28  ;;  %v10684_v36 = vadd.f32 %v5374_v62, %v5314_v27  ;;  %v10988_v28 = vld [vmem:[#allocation17_spill] sm:$0xff]  ;;  %v7659_v62 = vld [vmem:[%s10945_s5 + $0x488] ss:$12 sps:$4 sm:$0xff]  }
 0x34b   :  { %6802 = vmatpush3.bf16.msra.mxu0 %v7635_v58  ;;  %6703 = vmatprep.subr.bf16.mxu1 %v7640_v3  ;;  %v5376_v34 = vpop.f32.mrf.mxu1  ;;  %v7656_v58 = vld [vmem:[%s10945_s5 + $0x560] ss:$12 sps:$4 sm:$0xff]   ;;  %v7658_v3 = vld [vmem:[%s10945_s5 + $0x548] ss:$12 sps:$4 sm:$0xff]  }
 0x34c   :  { %6803 = vmatprep.subr.bf16.mxu0 %v7638_v21  ;;  %v10697_v19 = vadd.f32 %v5376_v34, %v5316_v53  ;;  %v7661_v34 = vld [vmem:[%s10945_s5 + $0x830] ss:$12 sps:$4 sm:$0xff]  }
 0x34d   :  { %v5380_v24 = vpop.f32.mrf.mxu1 }
 0x34e   :  { %6704 = vmatpush3.bf16.msra.mxu1 %v7641_v50  ;;  %v10704_v49 = vadd.f32 %v5380_v24, %v5320_v46 }
 0x34f   :  { %6804 = vmatpush3.bf16.msra.mxu0 %v7639_v0  ;;  %6757 = vmatprep.subr.bf16.mxu1 %v7644_v41  ;;  %v5382_v31 = vpop.f32.mrf.mxu1 }
 0x350   :  { %6805 = vmatprep.subr.bf16.mxu0 %v7642_v30  ;;  %v10717_v2 = vadd.f32 %v5382_v31, %v5322_v25  ;;  %v10989_v30 = vld [vmem:[#allocation18_spill] sm:$0xff] }
 0x351   :  { %5730 = vmatmul.mubr.bf16.vlgmr.msra.gmra.mxu1 %v9663_v10  ;;  %v5384_v51 = vpop.f32.mrf.mxu1  ;;  %v7648_v10 = vld [vmem:[%s10945_s5 + $0x5c0] ss:$12 sps:$4 sm:$0xff]   ;;  %v7663_v25 = vld [vmem:[%s10945_s5 + $0x818] ss:$12 sps:$4 sm:$0xff]  }
 0x352   :  { %5737 = vmatprep.mubr.bf16.mxu1 %v9679_v11  ;;  %6758 = vmatpush3.bf16.msra.mxu1 %v7645_v56  ;;  %v10723_v40 = vadd.f32 %v5384_v51, %v5324_v42  ;;  %v7664_v56 = vld [vmem:[%s10945_s5 + $0x8c0] ss:$12 sps:$4 sm:$0xff]  }
 0x353   :  { %6806 = vmatpush3.bf16.msra.mxu0 %v7643_v54  ;;  %6759 = vmatprep.subr.bf16.mxu1 %v7646_v35  ;;  %v5386_v14 = vpop.f32.mrf.mxu1 }
 0x354   :  { %v10733_v18 = vadd.f32 %v5386_v14, %v5326_v48  ;;  %v7668_v14 = vld [vmem:[%s10945_s5 + $0x890] ss:$12 sps:$4 sm:$0xff]  }
 0x355   :  { %v5390_v11 = vpop.f32.mrf.mxu1 }
 0x356   :  { %5898 = vmatmul.mubr.bf16.vlgmr.msra.gmra.mxu0 %v10275_v29  ;;  %6760 = vmatpush3.bf16.msra.mxu1 %v7647_v15  ;;  %v10738_v59 = vadd.f32 %v5390_v11, %v5330_v55  ;;  %v7667_v15 = vld [vmem:[%s10945_s5 + $0x7e8] ss:$12 sps:$4 sm:$0xff]   ;;  %v7671_v55 = vld [vmem:[%s10945_s5 + $0x7b8] ss:$12 sps:$4 sm:$0xff]   ;;  %v7673_v11 = vld [vmem:[%s10945_s5 + $0x7a0] ss:$12 sps:$4 sm:$0xff]  }
 0x357   :  { %5905 = vmatprep.mubr.bf16.mxu0 %v10287_v45  ;;  %6761 = vmatprep.subr.bf16.mxu1 %v7648_v10  ;;  %v5392_v6 = vpop.f32.mrf.mxu1 }
 0x358   :  { %v10747_v7 = vadd.f32 %v5392_v6, %v5332_v37 }
 0x359   :  { %5738 = vmatmul.mubr.bf16.gmra.mxu1 %v9714_v22  ;;  %v5394_v29 = vpop.f32.mrf.mxu1  ;;  %v7653_v22 = vld [vmem:[%s10945_s5 + $0x4d0] ss:$12 sps:$4 sm:$0xff]  }
 0x35a   :  { %5745 = vmatprep.mubr.bf16.mxu1 %v9729_v17  ;;  %6762 = vmatpush3.bf16.msra.mxu1 %v7649_v52  ;;  %v7654_v17 = vld [vmem:[%s10945_s5 + $0x578] ss:$12 sps:$4 sm:$0xff]  }
 0x35b   :  { %6763 = vmatprep.subr.bf16.mxu1 %v7650_v20  ;;  %v5395_v45 = vpop.f32.mrf.mxu1 }
 0x35e   :  { %5906 = vmatmul.mubr.bf16.gmra.mxu0 %v10314_v12  ;;  %6764 = vmatpush3.bf16.msra.mxu1 %v7651_v43  ;;  %v7655_v12 = vld [vmem:[%s10945_s5 + $0x4b8] ss:$12 sps:$4 sm:$0xff]  }
 0x35f   :  { %5913 = vmatprep.mubr.bf16.mxu0 %v10312_v61  ;;  %6765 = vmatprep.subr.bf16.mxu1 %v7652_v44 }
 0x361   :  { %5746 = vmatmul.mubr.bf16.gmra.mxu1 %v9765_v57  ;;  %v7657_v57 = vld [vmem:[%s10945_s5 + $0x4a0] ss:$12 sps:$4 sm:$0xff]  }
 0x362   :  { %6766 = vmatpush3.bf16.msra.mxu1 %v7653_v22  ;;  %5841 = vmatprep.mubr.bf16.mxu1 %v10988_v28 }
 0x363   :  { %6767 = vmatprep.subr.bf16.mxu1 %v7654_v17 }
 0x366   :  { %5914 = vmatmul.mubr.bf16.gmra.mxu0 %v10347_v1  ;;  %6768 = vmatpush3.bf16.msra.mxu1 %v7655_v12  ;;  %v5431_v61 = vpop.f32.mrf.mxu0 }
 0x367   :  { %v10778_v13 = vadd.f32 %v5431_v61, %v10663_v16  ;;  %6769 = vmatprep.subr.bf16.mxu1 %v7656_v58  ;;  %v7660_v16 = vld [vmem:[%s10945_s5 + $0x8f0] ss:$12 sps:$4 sm:$0xff]  }
 0x368   :  { %v5433_v27 = vpop.f32.mrf.mxu0 }
 0x369   :  { %v10784_v21 = vadd.f32 %v5433_v27, %v10677_v60 }
 0x36a   :  { %6770 = vmatpush3.bf16.msra.mxu1 %v7657_v57  ;;  %v5435_v1 = vpop.f32.mrf.mxu0 }
 0x36b   :  { %v10790_v53 = vadd.f32 %v5435_v1, %v10684_v36  ;;  %6771 = vmatprep.subr.bf16.mxu1 %v7658_v3  ;;  %v7662_v36 = vld [vmem:[%s10945_s5 + $0x8d8] ss:$12 sps:$4 sm:$0xff]  }
 0x36c   :  { %v5437_v50 = vpop.f32.mrf.mxu0 }
 0x36d   :  { %v5438_v0 = vadd.f32 %v5437_v50, %v10697_v19 }
 0x36e   :  { %6772 = vmatpush3.bf16.msra.mxu1 %v7659_v62  ;;  %v5441_v60 = vpop.f32.mrf.mxu0 }
 0x36f   :  { %v5442_v41 = vadd.f32 %v5441_v60, %v10704_v49  ;;  %6825 = vmatprep.subr.bf16.mxu1 %v7660_v16 }
 0x370   :  { %v5443_v46 = vpop.f32.mrf.mxu0 }
 0x371   :  { %5842 = vmatmul.mubr.bf16.vlgmr.msra.gmra.mxu1 %v10989_v30  ;;  %v5444_v24 = vadd.f32 %v5443_v46, %v10717_v2  ;;  %v7666_v2 = vld [vmem:[%s10945_s5 + $0x8a8] ss:$12 sps:$4 sm:$0xff]  }
 0x372   :  { %5849 = vmatprep.mubr.bf16.mxu1 %v10136_v47  ;;  %6826 = vmatpush3.bf16.msra.mxu1 %v7661_v34  ;;  %v5445_v19 = vpop.f32.mrf.mxu0  ;;  %v7665_v47 = vld [vmem:[%s10945_s5 + $0x800] ss:$12 sps:$4 sm:$0xff]  }
 0x373   :  { %v5446_v49 = vadd.f32 %v5445_v19, %v10723_v40  ;;  %6827 = vmatprep.subr.bf16.mxu1 %v7662_v36 }
 0x374   :  { %v5447_v54 = vpop.f32.mrf.mxu0 }
 0x375   :  { %v5448_v31 = vadd.f32 %v5447_v54, %v10733_v18  ;;  %v7672_v18 = vld [vmem:[%s10945_s5 + $0x860] ss:$12 sps:$4 sm:$0xff]  }
 0x376   :  { %6828 = vmatpush3.bf16.msra.mxu1 %v7663_v25  ;;  %v5451_v35 = vpop.f32.mrf.mxu0 }
 0x377   :  { %v5452_v42 = vadd.f32 %v5451_v35, %v10738_v59  ;;  %6829 = vmatprep.subr.bf16.mxu1 %v7664_v56 }
 0x378   :  { %v5453_v51 = vpop.f32.mrf.mxu0 }
 0x379   :  { %5850 = vmatmul.mubr.bf16.gmra.mxu1 %v10144_v9  ;;  %v5454_v48 = vadd.f32 %v5453_v51, %v10747_v7  ;;  %v7669_v9 = vld [vmem:[%s10945_s5 + $0x7d0] ss:$12 sps:$4 sm:$0xff]  }
 0x37a   :  { %5857 = vmatprep.mubr.bf16.mxu1 %v10166_v39  ;;  %6830 = vmatpush3.bf16.msra.mxu1 %v7665_v47  ;;  %v5455_v40 = vpop.f32.mrf.mxu0  ;;  %v7670_v39 = vld [vmem:[%s10945_s5 + $0x878] ss:$12 sps:$4 sm:$0xff]  }
 0x37b   :  { %6831 = vmatprep.subr.bf16.mxu1 %v7666_v2 }
 0x37c   :  { %v5456_v10 = vpop.f32.mrf.mxu0 }
 0x37e   :  { %6832 = vmatpush3.bf16.msra.mxu1 %v7667_v15 }
 0x37f   :  { %6833 = vmatprep.subr.bf16.mxu1 %v7668_v14 }
 0x381   :  { %5858 = vmatmul.mubr.bf16.gmra.mxu1 %v10197_v5  ;;  %v7674_v5 = vld [vmem:[%s10945_s5 + $0x848] ss:$12 sps:$4 sm:$0xff]  }
 0x382   :  { %6834 = vmatpush3.bf16.msra.mxu1 %v7669_v9  ;;  %5953 = vmatprep.mubr.bf16.mxu1 %v10532_v63  ;;  %v7675_v63 = vld [vmem:[%s10945_s5 + $0x788] ss:$12 sps:$4 sm:$0xff]  }
 0x383   :  { %6835 = vmatprep.subr.bf16.mxu1 %v7670_v39 }
 0x386   :  { %6836 = vmatpush3.bf16.msra.mxu1 %v7671_v55 }
 0x387   :  { %6837 = vmatprep.subr.bf16.mxu1 %v7672_v18 }
 0x38a   :  { %6838 = vmatpush3.bf16.msra.mxu1 %v7673_v11 }
 0x38b   :  { %6839 = vmatprep.subr.bf16.mxu1 %v7674_v5  ;;  %v10990_v5 = vld [vmem:[#allocation2_spill] sm:$0xff] }
 0x38e   :  { %6840 = vmatpush3.bf16.msra.mxu1 %v7675_v63 }
 0x391   :  { %5954 = vmatmul.mubr.bf16.vlgmr.msra.gmra.mxu1 %v10539_v4  ;;  %v5492_v37 = vpop.f32.mrf.mxu1 }
 0x392   :  { %v5493_v59 = vadd.f32 %v5492_v37, %v10778_v13  ;;  %5961 = vmatprep.mubr.bf16.mxu1 %v10575_v32  ;;  %v10991_v37 = vld [vmem:[#allocation3_spill] sm:$0xff] }
 0x393   :  { %v5494_v52 = vpop.f32.mrf.mxu1 }
 0x394   :  { %v5495_v6 = vadd.f32 %v5494_v52, %v10784_v21 }
 0x395   :  { %v5496_v20 = vpop.f32.mrf.mxu1 }
 0x396   :  { %v5497_v7 = vadd.f32 %v5496_v20, %v10790_v53 }
 0x397   :  { %v5498_v29 = vpop.f32.mrf.mxu1 }
 0x398   :  { %v5499_v43 = vadd.f32 %v5498_v29, %v5438_v0 }
 0x399   :  { %5962 = vmatmul.mubr.bf16.gmra.mxu1 %v10587_v26  ;;  %v5502_v45 = vpop.f32.mrf.mxu1 }
 0x39a   :  { %v5503_v44 = vadd.f32 %v5502_v45, %v5442_v41  ;;  %5969 = vmatprep.mubr.bf16.mxu1 %v10598_v33 }
 0x39b   :  { %v5504_v4 = vpop.f32.mrf.mxu1 }
 0x39c   :  { %v10860_v22 = vadd.f32 %v5504_v4, %v5444_v24 }
 0x39d   :  { %v5506_v17 = vpop.f32.mrf.mxu1 }
 0x39e   :  { %v10862_v28 = vadd.f32 %v5506_v17, %v5446_v49 }
 0x39f   :  { %v5508_v32 = vpop.f32.mrf.mxu1 }
 0x3a0   :  { %v10864_v12 = vadd.f32 %v5508_v32, %v5448_v31 }
 0x3a1   :  { %5970 = vmatmul.mubr.bf16.gmra.mxu1 %v10628_v23  ;;  %v5512_v58 = vpop.f32.mrf.mxu1 }
 0x3a2   :  { %v10867_v61 = vadd.f32 %v5512_v58, %v5452_v42 }
 0x3a3   :  { %v5514_v57 = vpop.f32.mrf.mxu1 }
 0x3a4   :  { %v10869_v26 = vadd.f32 %v5514_v57, %v5454_v48  ;;  %v10993_v57 = vld [vmem:[#allocation9_spill] sm:$0xff] }
 0x3a5   :  { %v5516_v13 = vpop.f32.mrf.mxu1 }
 0x3a7   :  { %v5517_v3 = vpop.f32.mrf.mxu1 }
 0x3b6   :  { %v5553_v33 = vpop.f32.mrf.mxu0 }
 0x3b7   :  { %v5554_v40 = vadd.f32 %v5553_v33, %v5493_v59 }
 0x3b8   :  { %v5555_v27 = vpop.f32.mrf.mxu0 }
 0x3b9   :  { %v5556_v14 = vadd.f32 %v5555_v27, %v5495_v6  ;;  %v10992_v6 = vld [vmem:[#allocation8_spill] sm:$0xff] }
 0x3ba   :  { %v5557_v21 = vpop.f32.mrf.mxu0 }
 0x3bb   :  { %v5558_v39 = vadd.f32 %v5557_v21, %v5497_v7 }
 0x3bc   :  { %v5559_v1 = vpop.f32.mrf.mxu0 }
 0x3bd   :  { %v5560_v11 = vadd.f32 %v5559_v1, %v5499_v43 }
 0x3be   :  { %v5563_v62 = vpop.f32.mrf.mxu0 }
 0x3bf   :  { %v5564_v32 = vadd.f32 %v5563_v62, %v5503_v44 }
 0x3c0   :  { %v5565_v53 = vpop.f32.mrf.mxu0 }
 0x3c1   :  { %v5566_v3 = vadd.f32 %v5565_v53, %v10860_v22  ;;  %v10995_v22 = vld [vmem:[#allocation6_spill] sm:$0xff] }
 0x3c2   :  { %v5567_v16 = vpop.f32.mrf.mxu0 }
 0x3c4   :  { %v5569_v50 = vpop.f32.mrf.mxu0 }
 0x3c6   :  { %v5573_v0 = vpop.f32.mrf.mxu0 }
 0x3c8   :  { %v10871_v60 = vpop.f32.mrf.mxu0 }
 0x3ca   :  { %v5577_v23 = vpop.f32.mrf.mxu0 }
 0x3cb   :  { %v5568_v23 = vadd.f32 %v5567_v16, %v10862_v28 }
 0x3cc   :  { %v5578_v34 = vpop.f32.mrf.mxu0 }
 0x3d6   :  { %v6671_v41 = vpop.f32.mrf.mxu0 }
 0x3d8   :  { %v6672_v36 = vpop.f32.mrf.mxu0 }
 0x3d9   :  { %v10873_v46 = vadd.f32 %v6672_v36, %v6671_v41  ;;  %v5570_v36 = vadd.f32 %v5569_v50, %v10864_v12  ;;  %v10996_v12 = vld [vmem:[#allocation11_spill] sm:$0xff] }
 0x3da   :  { %v6674_v30 = vpop.f32.mrf.mxu0 }
 0x3dc   :  { %v6675_v24 = vpop.f32.mrf.mxu0 }
 0x3dd   :  { %v10875_v19 = vadd.f32 %v6675_v24, %v6674_v30  ;;  %v10994_v30 = vld [vmem:[#allocation5_spill] sm:$0xff] }
 0x3de   :  { %v6677_v25 = vpop.f32.mrf.mxu0 }
 0x3e0   :  { %v6678_v49 = vpop.f32.mrf.mxu0 }
 0x3e1   :  { %v10877_v56 = vadd.f32 %v6678_v49, %v6677_v25 }
 0x3e2   :  { %v6680_v54 = vpop.f32.mrf.mxu0 }
 0x3e4   :  { %v6681_v31 = vpop.f32.mrf.mxu0 }
 0x3e5   :  { %v10879_v35 = vadd.f32 %v6681_v31, %v6680_v54  ;;  %v5574_v31 = vadd.f32 %v5573_v0, %v10867_v61 }
 0x3e6   :  { %v6683_v47 = vpop.f32.mrf.mxu0 }
 0x3e8   :  { %v6684_v42 = vpop.f32.mrf.mxu0 }
 0x3e9   :  { %v10881_v2 = vadd.f32 %v6684_v42, %v6683_v47 }
 0x3ea   :  { %v6686_v51 = vpop.f32.mrf.mxu0 }
 0x3ec   :  { %v6687_v48 = vpop.f32.mrf.mxu0 }
 0x3ed   :  { %v5576_v48 = vadd.f32 %v10871_v60, %v10869_v26  ;;  %v10998_v26 = vld [vmem:[#allocation14_spill] sm:$0xff] }
 0x3f0   :  { %v5614_v15 = vpop.f32.mrf.mxu1 }
 0x3f1   :  { %v5615_v10 = vadd.f32 %v5614_v15, %v5554_v40  ;;  %v10997_v15 = vld [vmem:[#allocation12_spill] sm:$0xff] }
 0x3f2   :  { %v5616_v9 = vpop.f32.mrf.mxu1 }
 0x3f3   :  { %v5617_v55 = vadd.f32 %v5616_v9, %v5556_v14  ;;  %v5977_v63 = vadd.f32 %v5615_v10, %v10990_v5  ;;  %v10999_v5 = vld [vmem:[#allocation15_spill] sm:$0xff] }
 0x3f4   :  { %v5618_v18 = vpop.f32.mrf.mxu1 }
 0x3f5   :  { %v5978_v52 = vadd.f32 %v5617_v55, %v10991_v37  ;;  %v5619_v20 = vadd.f32 %v5618_v18, %v5558_v39 }
 0x3f6   :  { %v6739_v29 = vpop.f32.mrf.mxu0  ;;  %v5620_v45 = vpop.f32.mrf.mxu1 }
 0x3f7   :  { %v6645_v4 = vpack.c.bf16 %v5978_v52, %v5977_v63  ;;  %v5621_v17 = vadd.f32 %v5620_v45, %v5560_v11  ;;  %v5980_v7 = vadd.f32 %v5619_v20, %v10992_v6 }
 0x3f8   :  { %v6740_v58 = vpop.f32.mrf.mxu0 }
 0x3f9   :  { %6045 = vst [vmem:[%s10948_s7] sm:$0xff] %v6645_v4  ;;  %v6741_v59 = vadd.f32 %v6740_v58, %v6739_v29  ;;  %v5981_v43 = vadd.f32 %v5621_v17, %v10993_v57  ;;  %v5624_v13 = vpop.f32.mrf.mxu1  ;;  %v3735_v17 = vrot.slane %v10618_v8, %v8155_v38 }
 0x3fa   :  { %v6742_v33 = vpop.f32.mrf.mxu0  ;;  %v5625_v27 = vadd.f32 %v5624_v13, %v5564_v32 }
 0x3fb   :  { %v6647_v21 = vpack.c.bf16 %v5981_v43, %v5980_v7  ;;  %v5626_v1 = vpop.f32.mrf.mxu1  ;;  %v5676_v6 = vadd.f32 %v10873_v46, %v3735_v17  ;;  %v5684_v38 = vadd.f32 %v10877_v56, %v3735_v17 }
 0x3fc   :  { %v6743_v44 = vpop.f32.mrf.mxu0  ;;  %v5627_v62 = vadd.f32 %v5626_v1, %v5566_v3  ;;  %v5983_v24 = vadd.f32 %v5625_v27, %v10994_v30 }
 0x3fd   :  { %6047 = vst [vmem:[%s10948_s7 + $0xc] sm:$0xff] %v6647_v21  ;;  %v6744_v34 = vadd.f32 %v6743_v44, %v6742_v33  ;;  %v5628_v41 = vpop.f32.mrf.mxu1  ;;  %v5679_v33 = vadd.f32 %v10875_v19, %v3735_v17 }
 0x3fe   :  { %v6745_v25 = vpop.f32.mrf.mxu0  ;;  %v5984_v53 = vadd.f32 %v5627_v62, %v10995_v22  ;;  %v5629_v49 = vadd.f32 %v5628_v41, %v5568_v23 }
 0x3ff   :  { %v5630_v54 = vpop.f32.mrf.mxu1 }
 0x400   :  { %v6649_v28 = vpack.c.bf16 %v5984_v53, %v5983_v24  ;;  %v6746_v16 = vpop.f32.mrf.mxu0  ;;  %v5631_v47 = vadd.f32 %v5630_v54, %v5570_v36  ;;  %v5986_v50 = vadd.f32 %v5629_v49, %v10996_v12  ;;  %v5687_v53 = vadd.f32 %v10879_v35, %v3735_v17 }
 0x401   :  { %v6747_v42 = vadd.f32 %v6746_v16, %v6745_v25  ;;  %v5634_v51 = vpop.f32.mrf.mxu1 }
 0x402   :  { %6049 = vst [vmem:[%s10948_s7 + $0x18] sm:$0xff] %v6649_v28  ;;  %v6748_v40 = vpop.f32.mrf.mxu0  ;;  %v5987_v14 = vadd.f32 %v5631_v47, %v10997_v15  ;;  %v5635_v10 = vadd.f32 %v5634_v51, %v5574_v31  ;;  %v5692_v47 = vadd.f32 %v10881_v2, %v3735_v17 }
 0x403   :  { %v5636_v9 = vpop.f32.mrf.mxu1 }
 0x404   :  { %v6651_v61 = vpack.c.bf16 %v5987_v14, %v5986_v50  ;;  %v6749_v0 = vpop.f32.mrf.mxu0  ;;  %v5637_v39 = vadd.f32 %v5636_v9, %v5576_v48  ;;  %v5989_v60 = vadd.f32 %v5635_v10, %v10998_v26 }
 0x405   :  { %v6750_v55 = vadd.f32 %v6749_v0, %v6748_v40  ;;  %v5638_v18 = vpop.f32.mrf.mxu1 }
 0x406   :  { %6051 = vst [vmem:[%s10948_s7 + $0x24] sm:$0xff] %v6651_v61  ;;  %v6751_v11 = vpop.f32.mrf.mxu0  ;;  %v5990_v63 = vadd.f32 %v5637_v39, %v10999_v5 }
 0x407   :  { %v5639_v37 = vpop.f32.mrf.mxu1 }
 0x408   :  { %v6653_v52 = vpack.c.bf16 %v5990_v63, %v5989_v60  ;;  %v6752_v20 = vpop.f32.mrf.mxu0 }
 0x409   :  { %v6753_v29 = vadd.f32 %v6752_v20, %v6751_v11 }
 0x40a   :  { %6053 = vst [vmem:[%s10948_s7 + $0x30] sm:$0x11] %v6653_v52  ;;  %v6754_v45 = vpop.f32.mrf.mxu0 }
 0x40c   :  { %v6755_v4 = vpop.f32.mrf.mxu0 }
 0x411   :  { %v6705_v32 = vpop.f32.mrf.mxu1 }
 0x413   :  { %v6706_v58 = vpop.f32.mrf.mxu1 }
 0x414   :  { %v6707_v7 = vadd.f32 %v6706_v58, %v6705_v32 }
 0x415   :  { %v6708_v57 = vpop.f32.mrf.mxu1 }
 0x416   :  { %v6807_v43 = vpop.f32.mrf.mxu0  ;;  %v5732_v13 = vadd.f32 %v6707_v7, %v5676_v6 }
 0x417   :  { %v6709_v3 = vpop.f32.mrf.mxu1 }
 0x418   :  { %v6808_v27 = vpop.f32.mrf.mxu0  ;;  %v6710_v21 = vadd.f32 %v6709_v3, %v6708_v57  ;;  %v5788_v1 = vadd.f32 %v6741_v59, %v5732_v13 }
 0x419   :  { %v6711_v23 = vpop.f32.mrf.mxu1  ;;  %v6809_v45 = vadd.f32 %v6808_v27, %v6807_v43 }
 0x41a   :  { %v6810_v44 = vpop.f32.mrf.mxu0  ;;  %v5735_v62 = vadd.f32 %v6710_v21, %v5679_v33  ;;  %v11000_v21 = vld [vmem:[#allocation4_spill] sm:$0xff] }
 0x41b   :  { %v6712_v41 = vpop.f32.mrf.mxu1 }
 0x41c   :  { %v6811_v8 = vpop.f32.mrf.mxu0  ;;  %v6713_v36 = vadd.f32 %v6712_v41, %v6711_v23  ;;  %v5791_v30 = vadd.f32 %v6744_v34, %v5735_v62 }
 0x41d   :  { %v6714_v46 = vpop.f32.mrf.mxu1  ;;  %v6812_v7 = vadd.f32 %v6811_v8, %v6810_v44  ;;  %v11001_v44 = vld [vmem:[#allocation10_spill] sm:$0xff] }
 0x41e   :  { %v6813_v24 = vpop.f32.mrf.mxu0  ;;  %v5740_v25 = vadd.f32 %v6713_v36, %v5684_v38 }
 0x41f   :  { %v6715_v22 = vpop.f32.mrf.mxu1 }
 0x420   :  { %v6814_v49 = vpop.f32.mrf.mxu0  ;;  %v6716_v19 = vadd.f32 %v6715_v22, %v6714_v46  ;;  %v5796_v54 = vadd.f32 %v6747_v42, %v5740_v25 }
 0x421   :  { %v6717_v31 = vpop.f32.mrf.mxu1  ;;  %v6815_v38 = vadd.f32 %v6814_v49, %v6813_v24  ;;  %v11002_v49 = vld [vmem:[#allocation7_spill] sm:$0xff] }
 0x422   :  { %v6816_v59 = vpop.f32.mrf.mxu0  ;;  %v5743_v28 = vadd.f32 %v6716_v19, %v5687_v53 }
 0x423   :  { %v6718_v16 = vpop.f32.mrf.mxu1 }
 0x424   :  { %v6817_v51 = vpop.f32.mrf.mxu0  ;;  %v6719_v56 = vadd.f32 %v6718_v16, %v6717_v31  ;;  %v5799_v48 = vadd.f32 %v6750_v55, %v5743_v28 }
 0x425   :  { %v6720_v12 = vpop.f32.mrf.mxu1  ;;  %v6818_v19 = vadd.f32 %v6817_v51, %v6816_v59  ;;  %v11003_v59 = vld [vmem:[#allocation13_spill] sm:$0xff] }
 0x426   :  { %v6819_v34 = vpop.f32.mrf.mxu0  ;;  %v5748_v50 = vadd.f32 %v6719_v56, %v5692_v47 }
 0x427   :  { %v6721_v40 = vpop.f32.mrf.mxu1 }
 0x428   :  { %v6820_v15 = vpop.f32.mrf.mxu0  ;;  %v5804_v14 = vadd.f32 %v6753_v29, %v5748_v50 }
 0x429   :  { %v6821_v12 = vadd.f32 %v6820_v15, %v6819_v34  ;;  %v11004_v34 = vld [vmem:[#allocation16_spill] sm:$0xff] }
 0x42a   :  { %v6822_v10 = vpop.f32.mrf.mxu0 }
 0x42c   :  { %v6823_v35 = vpop.f32.mrf.mxu0 }
 0x431   :  { %v6773_v9 = vpop.f32.mrf.mxu1 }
 0x433   :  { %v6774_v61 = vpop.f32.mrf.mxu1 }
 0x434   :  { %v6775_v63 = vadd.f32 %v6774_v61, %v6773_v9 }
 0x435   :  { %v6776_v42 = vpop.f32.mrf.mxu1 }
 0x436   :  { %v5844_v37 = vadd.f32 %v6775_v63, %v5788_v1 }
 0x437   :  { %v6777_v0 = vpop.f32.mrf.mxu1 }
 0x438   :  { %v6778_v52 = vadd.f32 %v6777_v0, %v6776_v42  ;;  %v5900_v32 = vadd.f32 %v6809_v45, %v5844_v37 }
 0x439   :  { %v6779_v39 = vpop.f32.mrf.mxu1 }
 0x43a   :  { %v5847_v17 = vadd.f32 %v6778_v52, %v5791_v30 }
 0x43b   :  { %v6780_v18 = vpop.f32.mrf.mxu1 }
 0x43c   :  { %v6781_v29 = vadd.f32 %v6780_v18, %v6779_v39  ;;  %v5903_v62 = vadd.f32 %v6812_v7, %v5847_v17 }
 0x43d   :  { %v6782_v26 = vpop.f32.mrf.mxu1 }
 0x43e   :  { %v5852_v13 = vadd.f32 %v6781_v29, %v5796_v54 }
 0x43f   :  { %v6783_v60 = vpop.f32.mrf.mxu1 }
 0x440   :  { %v6784_v33 = vadd.f32 %v6783_v60, %v6782_v26  ;;  %v5908_v43 = vadd.f32 %v6815_v38, %v5852_v13 }
 0x441   :  { %v6785_v2 = vpop.f32.mrf.mxu1 }
 0x442   :  { %v5855_v25 = vadd.f32 %v6784_v33, %v5799_v48 }
 0x443   :  { %v6786_v11 = vpop.f32.mrf.mxu1 }
 0x444   :  { %v6787_v30 = vadd.f32 %v6786_v11, %v6785_v2  ;;  %v5911_v47 = vadd.f32 %v6818_v19, %v5855_v25 }
 0x445   :  { %v6788_v5 = vpop.f32.mrf.mxu1 }
 0x446   :  { %v5860_v24 = vadd.f32 %v6787_v30, %v5804_v14 }
 0x447   :  { %v6789_v55 = vpop.f32.mrf.mxu1 }
 0x448   :  { %v5916_v14 = vadd.f32 %v6821_v12, %v5860_v24 }
 0x451   :  { %v6841_v20 = vpop.f32.mrf.mxu1 }
 0x453   :  { %v6842_v4 = vpop.f32.mrf.mxu1 }
 0x454   :  { %v6843_v58 = vadd.f32 %v6842_v4, %v6841_v20 }
 0x455   :  { %v6844_v6 = vpop.f32.mrf.mxu1 }
 0x456   :  { %v5956_v57 = vadd.f32 %v6843_v58, %v5900_v32 }
 0x457   :  { %v6845_v3 = vpop.f32.mrf.mxu1 }
 0x458   :  { %v5979_v23 = vadd.f32 %v5956_v57, %v11000_v21  ;;  %v6846_v41 = vadd.f32 %v6845_v3, %v6844_v6 }
 0x459   :  { %v6847_v1 = vpop.f32.mrf.mxu1 }
 0x45a   :  { %v6646_v36 = vpack.c.bf16 %v5979_v23, %v5979_v23  ;;  %v5959_v46 = vadd.f32 %v6846_v41, %v5903_v62 }
 0x45b   :  { %v6848_v27 = vpop.f32.mrf.mxu1 }
 0x45c   :  { %6046 = vst [vmem:[%s10948_s7 + $0x8] sm:$0xf] %v6646_v36  ;;  %v5982_v8 = vadd.f32 %v5959_v46, %v11001_v44  ;;  %v6849_v22 = vadd.f32 %v6848_v27, %v6847_v1 }
 0x45d   :  { %v6850_v53 = vpop.f32.mrf.mxu1 }
 0x45e   :  { %v6648_v54 = vpack.c.bf16 %v5982_v8, %v5982_v8  ;;  %v5964_v31 = vadd.f32 %v6849_v22, %v5908_v43 }
 0x45f   :  { %v6851_v28 = vpop.f32.mrf.mxu1 }
 0x460   :  { %6048 = vst [vmem:[%s10948_s7 + $0x14] sm:$0xf] %v6648_v54  ;;  %v5985_v16 = vadd.f32 %v5964_v31, %v11002_v49  ;;  %v6852_v56 = vadd.f32 %v6851_v28, %v6850_v53 }
 0x461   :  { %v6853_v48 = vpop.f32.mrf.mxu1 }
 0x462   :  { %v6650_v50 = vpack.c.bf16 %v5985_v16, %v5985_v16  ;;  %v5967_v40 = vadd.f32 %v6852_v56, %v5911_v47 }
 0x463   :  { %v6854_v10 = vpop.f32.mrf.mxu1 }
 0x464   :  { %6050 = vst [vmem:[%s10948_s7 + $0x20] sm:$0xf] %v6650_v50  ;;  %v5988_v51 = vadd.f32 %v5967_v40, %v11003_v59  ;;  %v6855_v35 = vadd.f32 %v6854_v10, %v6853_v48 }
 0x465   :  { %v6856_v9 = vpop.f32.mrf.mxu1 }
 0x466   :  { %v6652_v61 = vpack.c.bf16 %v5988_v51, %v5988_v51  ;;  %v5972_v42 = vadd.f32 %v6855_v35, %v5916_v14 }
 0x467   :  { %v6857_v0 = vpop.f32.mrf.mxu1 }
 0x468   :  { %6052 = vst [vmem:[%s10948_s7 + $0x2c] sm:$0xf] %v6652_v61  ;;  %v5991_v15 = vadd.f32 %v5972_v42, %v11004_v34 }
 0x46a   :  { %v6654_v39 = vpack.c.bf16 %v5991_v15, %v5991_v15 }
 0x46c   :  { %6054 = vst [vmem:[%s10948_s7 + $0x38] sm:$0x1] %v6654_v39 }

</bundles_post_ra>
